<compile_context>
chip_gen: v7x
topology: tpu7x:2x2x1
jax: 0.10.0
libtpu: 0.0.40
codegen_flags: <defaults>
</compile_context>

<pallas_src>
import math

import jax
import jax.numpy as jnp
from jax.experimental import pallas as pl
from jax.experimental.pallas import tpu as pltpu

VIS_CHANNELS = 512                     # ResNet18 conv-trunk output channels
TEXT_HIDDEN = 768                      # roberta-base hidden size (pooler_output width)
CLS_IN = VIS_CHANNELS + TEXT_HIDDEN    # 1280 = classifier input width
TILE_N = 2816                          # answer tile: 5632 = 2 * 2816 -> 2 grid steps


# ------------------------------- Pallas kernel -------------------------------

def _concat_classifier_kernel(img_ref, txt_ref, w_ref, b_ref, o_ref):
    """One answer-tile of Linear(cat([img_feats, txt_feats])) for the whole batch.

    img_ref : (B, 512)          bf16  pooled image features
    txt_ref : (B, 768)          bf16  RoBERTa pooler_output
    w_ref   : (1280, TILE_N)    bf16  merged classifier weight tile (tile-contiguous HBM)
    b_ref   : (1, TILE_N)       f32
    o_ref   : (B, TILE_N)       f32
    """
    # torch.cat((img_features, text_features), dim=1) — built in VMEM, never in HBM.
    feats = jnp.concatenate([img_ref[...], txt_ref[...]], axis=-1)      # (B, 1280) bf16
    acc = jnp.dot(feats, w_ref[...], preferred_element_type=jnp.float32)
    o_ref[...] = acc + b_ref[...]


# ------------------------------- forward (glue) -------------------------------

def _baseline_forward(params, img_feature_map, text_pooled, *, n_answers):
    """img_feature_map: (B, 512, H, W) NCHW conv-trunk output; text_pooled: (B, 768)."""
    # AdaptiveAvgPool2d((1,1)) + squeeze of the FROZEN backbone output, hoisted out of the
    # per-tile kernel body (computed once; 4 KiB result; removes the old transpose kernel).
    pooled = jnp.mean(img_feature_map, axis=(2, 3)).astype(jnp.bfloat16)   # (B, 512)
    txt = text_pooled.astype(jnp.bfloat16)                                  # (B, 768)

    w = params["cls_w"]                 # (n_tiles, 1280, TILE_N) bf16, tile-contiguous
    bias = params["cls_b"]              # (1, n_pad) f32
    n_tiles, _, tile_n = w.shape
    n_pad = n_tiles * tile_n
    B = pooled.shape[0]

    cost = pl.CostEstimate(
        flops=2 * B * CLS_IN * n_pad,
        transcendentals=0,
        bytes_accessed=(CLS_IN * n_pad * 2          # bf16 weights (dominant)
                        + B * CLS_IN * 2            # bf16 activations
                        + n_pad * 4                 # f32 bias
                        + B * n_pad * 4),           # f32 logits
    )

    logits_padded = pl.pallas_call(
        _concat_classifier_kernel,
        out_shape=jax.ShapeDtypeStruct((B, n_pad), jnp.float32),
        grid=(n_tiles,),
        in_specs=[
            pl.BlockSpec((B, VIS_CHANNELS), lambda j: (0, 0)),
            pl.BlockSpec((B, TEXT_HIDDEN), lambda j: (0, 0)),
            # Leading (tile) dim squeezed: each step DMAs one contiguous (1280, TILE_N) slab.
            pl.BlockSpec((None, CLS_IN, tile_n), lambda j: (j, 0, 0)),
            pl.BlockSpec((1, tile_n), lambda j: (0, j)),
        ],
        out_specs=pl.BlockSpec((B, tile_n), lambda j: (0, j)),
        compiler_params=pltpu.CompilerParams(
            dimension_semantics=("parallel",),
            # ~7 MiB weight tile double-buffered (~14.5 MiB total) — raise v5e's 16 MiB
            # scoped default; equals the v6e/v7x defaults.
            vmem_limit_bytes=32 * 1024 * 1024,
        ),
        cost_estimate=cost,
    )(pooled, txt, w, bias)

    # Drop the zero-weighted padding columns.
    return logits_padded[:, :n_answers]


baseline_forward = jax.jit(_baseline_forward, static_argnames="n_answers")


# ------------------------------ parameter init -------------------------------

def init_params(key, n_answers, tile_n=TILE_N):
    """nn.Linear(1280, n_answers) init, stored padded / tile-contiguous / bf16."""
    n_pad = ((n_answers + tile_n - 1) // tile_n) * tile_n
    n_tiles = n_pad // tile_n
    kw, kb = jax.random.split(key)
    bound = 1.0 / math.sqrt(CLS_IN)
    w = jax.random.uniform(kw, (CLS_IN, n_answers), jnp.float32, -bound, bound)
    b = jax.random.uniform(kb, (n_answers,), jnp.float32, -bound, bound)
    w_pad = jnp.zeros((CLS_IN, n_pad), jnp.float32).at[:, :n_answers].set(w)
    b_pad = jnp.zeros((1, n_pad), jnp.float32).at[:, :n_answers].set(b)
    # Tile-contiguous HBM layout: answer-tile j is one contiguous (1280, tile_n) slab,
    # so each grid step is a single large contiguous DMA instead of a strided one.
    w_tiled = (w_pad.reshape(CLS_IN, n_tiles, tile_n)
                    .transpose(1, 0, 2)
                    .astype(jnp.bfloat16))
    return dict(cls_w=w_tiled, cls_b=b_pad)


# ------------------------------------ main -----------------------------------

if __name__ == "__main__":
    key = jax.random.PRNGKey(0)
    k_img, k_txt, k_par = jax.random.split(key, 3)

    B = 2
    Dsp = 7                 # ResNet18 spatial dim for a 224x224 input
    n_answers = 5217        # BaselineNet default

    # TODO(synk): the frozen RoBERTa tokenizer/text-encoder (pooler_output) and the frozen
    # ResNet18 conv trunk are pretrained backbones and are not re-implemented; synthetic
    # backbone outputs of the correct shapes stand in for them.
    img_feature_map = jax.random.normal(k_img, (B, VIS_CHANNELS, Dsp, Dsp), jnp.float32)
    text_pooled = jax.random.normal(k_txt, (B, TEXT_HIDDEN), jnp.float32)

    params = init_params(k_par, n_answers)
    logits = baseline_forward(params, img_feature_map, text_pooled, n_answers=n_answers)
    jax.block_until_ready(logits)
    assert logits.shape == (B, n_answers)

    # Reference check (pure JAX, fp32 accumulation over the same bf16-cast operands).
    n_tiles = params["cls_w"].shape[0]
    w_full = (params["cls_w"].transpose(1, 0, 2)
              .reshape(CLS_IN, n_tiles * TILE_N)[:, :n_answers].astype(jnp.float32))
    b_full = params["cls_b"][0, :n_answers]
    feats_ref = jnp.concatenate(
        [jnp.mean(img_feature_map, axis=(2, 3)).astype(jnp.bfloat16).astype(jnp.float32),
         text_pooled.astype(jnp.bfloat16).astype(jnp.float32)], axis=1)
    ref = feats_ref @ w_full + b_full
    max_err = float(jnp.max(jnp.abs(logits - ref)))
    assert max_err < 5e-3, f"mismatch vs reference: {max_err}"

    print("KERNEL_OK")
</pallas_src>

<mosaic_0001>
module attributes {stable_mosaic.version = 11 : i64} {
  func.func @_concat_classifier_kernel(%arg0: i32, %arg1: memref<2x512xbf16, #tpu.memory_space<vmem>>, %arg2: memref<2x768xbf16, #tpu.memory_space<vmem>>, %arg3: memref<1x1280x2816xbf16, #tpu.memory_space<vmem>>, %arg4: memref<1x2816xf32, #tpu.memory_space<vmem>>, %arg5: memref<2x2816xf32, #tpu.memory_space<vmem>>) attributes {dimension_semantics = [#tpu.dimension_semantics<parallel>], iteration_bounds = array<i64: 2>, scalar_prefetch = 0 : i64, scratch_operands = 0 : i64, tpu.core_type = #tpu.core_type<tc>, window_params = [{pipeline_mode = #tpu.pipeline_mode<synchronous>, transform_indices = @transform_0, window_bounds = array<i64: 2, 512>}, {pipeline_mode = #tpu.pipeline_mode<synchronous>, transform_indices = @transform_1, window_bounds = array<i64: 2, 768>}, {transform_indices = @transform_2, window_bounds = array<i64: 1, 1280, 2816>}, {transform_indices = @transform_3, window_bounds = array<i64: 1, 2816>}, {transform_indices = @transform_4, window_bounds = array<i64: 2, 2816>}]} {
    %c0 = arith.constant 0 : index
    %c0_0 = arith.constant 0 : index
    %0 = vector.load %arg1[%c0, %c0_0] : memref<2x512xbf16, #tpu.memory_space<vmem>>, vector<2x512xbf16>
    %c0_1 = arith.constant 0 : index
    %c0_2 = arith.constant 0 : index
    %1 = vector.load %arg2[%c0_1, %c0_2] : memref<2x768xbf16, #tpu.memory_space<vmem>>, vector<2x768xbf16>
    %2 = tpu.concatenate %0, %1 in 1 : vector<2x512xbf16>, vector<2x768xbf16> -> vector<2x1280xbf16>
    %c0_3 = arith.constant 0 : index
    %c0_4 = arith.constant 0 : index
    %c0_5 = arith.constant 0 : index
    %3 = vector.load %arg3[%c0_3, %c0_4, %c0_5] : memref<1x1280x2816xbf16, #tpu.memory_space<vmem>>, vector<1x1280x2816xbf16>
    %4 = vector.shape_cast %3 : vector<1x1280x2816xbf16> to vector<1280x2816xbf16>
    %cst = arith.constant dense<0.000000e+00> : vector<2x2816xf32>
    %5 = tpu.matmul %2, %4, %cst {dimension_numbers = #tpu.dot_dimension_numbers<[1], [0], [0], [1], [0, 0, 1, 1], [], []>} : vector<2x1280xbf16>, vector<1280x2816xbf16>, vector<2x2816xf32> -> vector<2x2816xf32>
    %c0_6 = arith.constant 0 : index
    %c0_7 = arith.constant 0 : index
    %6 = vector.load %arg4[%c0_6, %c0_7] : memref<1x2816xf32, #tpu.memory_space<vmem>>, vector<1x2816xf32>
    %7 = vector.broadcast %6 : vector<1x2816xf32> to vector<2x2816xf32>
    %8 = arith.addf %5, %7 : vector<2x2816xf32>
    %c0_8 = arith.constant 0 : index
    %c0_9 = arith.constant 0 : index
    %9 = vector.load %arg5[%c0_8, %c0_9] : memref<2x2816xf32, #tpu.memory_space<vmem>>, vector<2x2816xf32>
    tpu.vector_store %arg5[%c0_8, %c0_9], %8 {strides = array<i32>} : memref<2x2816xf32, #tpu.memory_space<vmem>>, vector<2x2816xf32>,
    return
  }
  func.func @transform_0(%arg0: i32) -> (i32, i32) {
    %c0_i32 = arith.constant 0 : i32
    %c0_i32_0 = arith.constant 0 : i32
    %c0_i32_1 = arith.constant 0 : i32
    return %c0_i32, %c0_i32_0 : i32, i32
  }
  func.func @transform_1(%arg0: i32) -> (i32, i32) {
    %c0_i32 = arith.constant 0 : i32
    %c0_i32_0 = arith.constant 0 : i32
    %c0_i32_1 = arith.constant 0 : i32
    return %c0_i32, %c0_i32_0 : i32, i32
  }
  func.func @transform_2(%arg0: i32) -> (i32, i32, i32) {
    %c0_i32 = arith.constant 0 : i32
    %c0_i32_0 = arith.constant 0 : i32
    %c0_i32_1 = arith.constant 0 : i32
    return %arg0, %c0_i32, %c0_i32_0 : i32, i32, i32
  }
  func.func @transform_3(%arg0: i32) -> (i32, i32) {
    %c0_i32 = arith.constant 0 : i32
    %c0_i32_0 = arith.constant 0 : i32
    return %c0_i32, %arg0 : i32, i32
  }
  func.func @transform_4(%arg0: i32) -> (i32, i32) {
    %c0_i32 = arith.constant 0 : i32
    %c0_i32_0 = arith.constant 0 : i32
    return %c0_i32, %arg0 : i32, i32
  }
}

</mosaic_0001>

<bundles_post_ra>
// kernel: _baseline_forward.1
= control target key start
LH: loop header
LB: loop body
LE: loop exit
PB: predicated region body
PF: predicated region fallthrough
CT: control target
= control target key end

     0   :  { %9 = vsyncpa [#allocation3], 0  ;;  %s20493_s0 = inlined_call_operand.vmem [shape: bf16[2,512], index: 0, kind: input, shape index: {}]   ;;  %s20494_s1 = inlined_call_operand.vmem [shape: bf16[2,768], index: 1, kind: input, shape index: {}]   ;;  %s20495_s2 = inlined_call_operand.hbm [shape: bf16[2,1280,2816], index: 2, kind: input, shape index: {}]   ;;  %s20496_s3 = inlined_call_operand.hbm [shape: f32[1,5632], index: 3, kind: input, shape index: {}]   ;;  %s20497_s4 = inlined_call_operand.vmem [shape: f32[2,5632], index: 4, kind: output, shape index: {}]  }
   0x1   :  { %11 = vsyncpa [#allocation3 + $0x1], 0 }
   0x2   :  { %12 = vsyncpa [#allocation5], 0 }
   0x3   :  { %14 = vsyncpa [#allocation5 + $0x1], 0  ;;  %s18289_s15 = smov 0   ;;  %s18291_s16 = smov 0  }
   0x4   :  { %s18293_s17 = smov 0   ;;  %s18295_s18 = smov 0  }
   0x5 LB: > { %s13491_s19 = sadd.s32 4294967295, %s18256_s18   ;;  %s18309_s20 = sadd.s32 1, %s18256_s18   ;;  %s18256_s18 = sphi %s18295_s18, %s20508_s18   ;;  %s18252_s17 = sphi %s18293_s17, %s20507_s17   ;;  %s18248_s16 = sphi %s18291_s16, %s20506_s16   ;;  %s18244_s15 = sphi %s18289_s15, %s20505_s15  }
   0x6   : > { %s66_s21 = ssub.s32 %s18256_s18, %s18309_s20  ;;  %s69_s22 = sadd.s32 1, %s18252_s17 }
   0x7   : > { %p67_p0 = scmp.eq.s32.totalorder %s66_s21, 0  ;;  %p76_p1 = scmp.ne.s32.totalorder %s18252_s17, %s18248_s16 }
   0x8   : > { %p77_p2 = scmp.eq.s32.totalorder %s18256_s18, 0  ;;  %p82_p3 = scmp.ne.s32.totalorder %s18248_s16, %s18244_s15 }
   0x9   : > { %s18319_s23 = scalar_select %p67_p0, %s18252_s17, %s69_s22  }
   0xa   : > { %p78_p4 = por %p77_p2, %p76_p1  ;;  %p83_p5 = scmp.eq.s32.totalorder %s13491_s19, 0 }
   0xb   : > { %p15476_p6 = scmp.lt.s32.totalorder %s18256_s18, 2  ;;  %s18329_s25 = sand.u32 1, %s18252_s17  }
   0xc   : > { %p18324_p7 = por %p83_p5, %p82_p3  ;;  %s15460_s26 = smul.u32 14080, %s18329_s25 }
   0xd   : > { %s15461_s27 = smul.u32 225280, %s18256_s18  ;;  %p18333_p8 = pnand %p15476_p6, %p78_p4 }
   0xe   : > { %s20499_s24 = scalar_select %p18324_p7, 1, 0 }
   0xf   : > { %s18340_s5 = scalar_lea.hbm %s20495_s2, %s15461_s27  ;;  %s168_s6 = scalar_lea.vmem [#allocation2], %s15460_s26 }
  0x10   : > { %s175_s7 = sshll.u32 %s168_s6, 4  ;;  %s165_s8 = scalar_lea.sflag [#allocation3], %s18329_s25  ;;  %s18342_s7 = int_to_ptr.vmem [resolvable:$true] %s175_s7 }
  0x11   : > { %s18158_s9 = scalar_lea.hbm %s18340_s5, 225280  ;;  %p18160_p11 = pneg %p18333_p8 }
  0x12   : > { %p18159_p10 = scmp.ne.s32.totalorder %s18340_s5, %s18158_s9  ;;  %s18163_s12 = scalar_lea.hbm %s20495_s2, 450560 }
  0x13   : > { %p18164_p0 = scmp.lt.u32.totalorder %s18340_s5, %s20495_s2  ;;  %p18165_p1 = scmp.lt.u32.totalorder %s18163_s12, %s18158_s9 }
  0x14   : > { %p18161_p12 = pnand %p18160_p11, %p18159_p10  ;;  %p18167_p3 = scmp.lt.u32.totalorder %s18158_s9, %s18340_s5 }
  0x15   : > { %p18166_p2 = por %p18165_p1, %p18164_p0 }
  0x16   : > { %p18162_p13 = pneg %p18161_p12 }
  0x17   : > { %p18168_p4 = por %p18167_p3, %p18166_p2 }
  0x19   : > { %p18169_p5 = pnand %p18168_p4, %p18162_p13 }
  0x1b   : > { %18172 = shalt.err (!%p18169_p5)
}
  0x1c   : > { %s18173_s15 = scalar_lea.vmem %s18342_s7, 225280  ;;  %s18258_s21 = smov [#allocation2]  }
  0x1d   : > { %p18174_p6 = scmp.ne.s32.totalorder %s18342_s7, %s18173_s15  ;;  %s18178_s22 = sshll.u32 %s18258_s21, 4  ;;  %s18179_s22 = int_to_ptr.vmem [resolvable:$false] %s18178_s22 }
  0x1e   : > { %s18180_s26 = scalar_lea.vmem %s18179_s22, 450560  ;;  %p18181_p9 = scmp.lt.s32.totalorder %s18342_s7, %s18179_s22 }
  0x1f   : > { %p18176_p10 = pnand %p18174_p6, %p18160_p11  ;;  %p18182_p0 = scmp.lt.s32.totalorder %s18180_s26, %s18173_s15 }
  0x21   : > { %p18177_p12 = pneg %p18176_p10  ;;  %p18183_p1 = por %p18182_p0, %p18181_p9 }
  0x23   : > { %p18184_p2 = pnand %p18183_p1, %p18177_p12 }
  0x25   : > { %18187 = shalt.err (!%p18184_p2)
}
  0x26   : > { %s18259_s27 = smov 1408   ;;  %s18260_s29 = smov 88  }
  0x27   : > { %15472 = dma.hbm_to_vmem [thread:$0]  (!%p18333_p8), %s18340_s5, 225280, %s18342_s7, %s165_s8, %s18259_s27, %s18259_s27, %s18260_s29  }
  0x28   : > { %p202_p13 = scmp.lt.s32.totalorder %s18256_s18, 3  ;;  %s15462_s30 = smul.u32 22, %s18329_s25 }
  0x29   : > { %p20501_p9 = scmp.ge.s32.totalorder %s18256_s18, 1  ;;  %s15263_s9 = smul.u32 352, %s18256_s18 }
  0x2a   : > { %s189_s13 = scalar_lea.vmem [#allocation4], %s15462_s30  ;;  %s186_s5 = scalar_lea.sflag [#allocation5], %s18329_s25 }
  0x2b   : > { %p18377_p3 = pnand %p20501_p9, %p202_p13  ;;  %s18385_s12 = scalar_lea.hbm %s20496_s3, %s15263_s9 }
  0x2c   : > { %s197_s14 = sshll.u32 %s189_s13, 4  ;;  %s18188_s7 = scalar_lea.hbm %s18385_s12, 352  ;;  %s198_s14 = int_to_ptr.vmem [resolvable:$true] %s197_s14 }
  0x2d   : > { %s20502_s6 = scalar_select %p18377_p3, 1, 0 }
  0x2e   : > { %p18189_p4 = scmp.ne.s32.totalorder %s18385_s12, %s18188_s7  ;;  %s18193_s21 = scalar_lea.hbm %s20496_s3, 704 }
  0x2f   : > { %p18194_p10 = scmp.lt.u32.totalorder %s18385_s12, %s20496_s3  ;;  %p18195_p12 = scmp.lt.u32.totalorder %s18193_s21, %s18188_s7 }
  0x30   : > { %p18191_p5 = pnand %p18189_p4, %p18160_p11  ;;  %p18197_p1 = scmp.lt.u32.totalorder %s18188_s7, %s18385_s12 }
  0x31   : > { %p18196_p0 = por %p18195_p12, %p18194_p10 }
  0x32   : > { %p18192_p6 = pneg %p18191_p5 }
  0x33   : > { %p18198_p2 = por %p18197_p1, %p18196_p0 }
  0x35   : > { %p18199_p13 = pnand %p18198_p2, %p18192_p6 }
  0x37   : > { %18202 = shalt.err (!%p18199_p13)
}
  0x38   : > { %s18203_s25 = scalar_lea.vmem %s198_s14, 352  ;;  %s18261_s27 = smov [#allocation4]  }
  0x39   : > { %p18204_p9 = scmp.ne.s32.totalorder %s198_s14, %s18203_s25  ;;  %s18208_s29 = sshll.u32 %s18261_s27, 4  ;;  %s18209_s29 = int_to_ptr.vmem [resolvable:$false] %s18208_s29 }
  0x3a   : > { %s18210_s30 = scalar_lea.vmem %s18209_s29, 704  ;;  %p18211_p7 = scmp.lt.s32.totalorder %s198_s14, %s18209_s29 }
  0x3b   : > { %p18206_p4 = pnand %p18204_p9, %p18160_p11  ;;  %p18212_p3 = scmp.lt.s32.totalorder %s18210_s30, %s18203_s25 }
  0x3d   : > { %p18207_p5 = pneg %p18206_p4  ;;  %p18213_p10 = por %p18212_p3, %p18211_p7 }
  0x3f   : > { %p18214_p12 = pnand %p18213_p10, %p18207_p5 }
  0x41   : > { %18217 = shalt.err (!%p18214_p12)
}
  0x42   : > { %15475 = dma.hbm_to_vmem [thread:$0]  (!%p18333_p8), %s18385_s12, 352, %s198_s14, %s186_s5  }
  0x43   : > { %p20503_p6 = scmp.ne.s32.totalorder %s20502_s6, 0 }
  0x44   : > { %s208_s9 = sand.u32 (!%p20503_p6), 1, %s18248_s16   ;;  %p20504_p11 = scmp.ne.s32.totalorder (!%p20503_p6), %s20499_s24, 0 }
  0x45   : > { %206 = sbr.rel (%p20503_p6) target bundleno = 2093 (0x82d), region = 36  ;;  %s209_s11 = scalar_lea.sflag (!%p20503_p6), [#allocation3], %s208_s9 }
  0x46   : > { %s15463_s10 = smul.u32 (!%p20503_p6), 14080, %s208_s9 }
  0x48   : > { %s18410_s13 = scalar_lea.vmem (!%p20503_p6), [#allocation2], %s15463_s10 }
  0x4c   : > { %18235 = dma.done.wait (%p20504_p11), %s209_s11, 225280  }
  0x4d   : > { %18237 = vsyncadd (%p20504_p11), %s209_s11, 4294742016  ;;  %s15464_s7 = smul.u32 22, %s208_s9  ;;  %s218_s28 = scalar_lea.sflag [#allocation5], %s208_s9 }
  0x4f   : > { %s18416_s8 = scalar_lea.vmem [#allocation4], %s15464_s7 }
  0x50   : > { %18239 = dma.done.wait (%p20504_p11), %s218_s28, 352  }
  0x51   : > { %18241 = vsyncadd (%p20504_p11), %s218_s28, 4294966944  ;;  %v15513_v0 = vld [vmem:[%s18410_s13 + $0x4] ss:$88 sps:$4 sm:$0xff]   ;;  %v15517_v2 = vld [vmem:[%s18410_s13] ss:$88 sps:$4 sm:$0xff]   ;;  %v272_v40 = vlaneseq  ;;  %s252_s5 = smul.u32 22, %s13491_s19 }
  0x52   : > { %v15515_v1 = vld [vmem:[%s18410_s13 + $0x1604] ss:$88 sps:$4 sm:$0xff]   ;;  %11019 = vmatprep.subr.bf16.mxu1 %v15513_v0  ;;  %v15518_v3 = vld [vmem:[%s18410_s13 + $0x1600] ss:$88 sps:$4 sm:$0xff]   ;;  %v15519_v4 = vld [vmem:[%s18410_s13 + $0xb4] ss:$88 sps:$4 sm:$0xff]  }
  0x53   : > { %11101 = vmatprep.subr.bf16.mxu0 %v15515_v1  ;;  %11020 = vmatpush1.bf16.msra.mxu1 %v15517_v2  ;;  %v15521_v5 = vld [vmem:[%s18410_s13 + $0x16b4] ss:$88 sps:$4 sm:$0xff]   ;;  %v15523_v6 = vld [vmem:[%s18410_s13 + $0xb0] ss:$88 sps:$4 sm:$0xff]   ;;  %v15525_v8 = vld [vmem:[%s18410_s13 + $0x164] ss:$88 sps:$4 sm:$0xff]  }
  0x54   : > { %11102 = vmatpush1.bf16.msra.mxu0 %v15518_v3  ;;  %11021 = vmatprep.subr.bf16.mxu1 %v15519_v4  ;;  %v15524_v7 = vld [vmem:[%s18410_s13 + $0x16b0] ss:$88 sps:$4 sm:$0xff]   ;;  %v15527_v9 = vld [vmem:[%s18410_s13 + $0x1764] ss:$88 sps:$4 sm:$0xff]   ;;  %v15529_v10 = vld [vmem:[%s18410_s13 + $0x160] ss:$88 sps:$4 sm:$0xff]  }
  0x55   : > { %11103 = vmatprep.subr.bf16.mxu0 %v15521_v5  ;;  %v15530_v11 = vld [vmem:[%s18410_s13 + $0x1760] ss:$88 sps:$4 sm:$0xff]   ;;  %v15531_v12 = vld [vmem:[%s18410_s13 + $0x214] ss:$88 sps:$4 sm:$0xff]   ;;  %v15535_v14 = vld [vmem:[%s18410_s13 + $0x210] ss:$88 sps:$4 sm:$0xff]  }
  0x56   : > { %v15533_v13 = vld [vmem:[%s18410_s13 + $0x1814] ss:$88 sps:$4 sm:$0xff]   ;;  %v15536_v15 = vld [vmem:[%s18410_s13 + $0x1810] ss:$88 sps:$4 sm:$0xff]   ;;  %v15537_v16 = vld [vmem:[%s18410_s13 + $0x2c4] ss:$88 sps:$4 sm:$0xff]  }
  0x57   : > { %11022 = vmatpush1.bf16.msra.mxu1 %v15523_v6  ;;  %v15539_v17 = vld [vmem:[%s18410_s13 + $0x18c4] ss:$88 sps:$4 sm:$0xff]   ;;  %v15541_v18 = vld [vmem:[%s18410_s13 + $0x2c0] ss:$88 sps:$4 sm:$0xff]   ;;  %v15543_v20 = vld [vmem:[%s18410_s13 + $0x374] ss:$88 sps:$4 sm:$0xff]  }
  0x58   : > { %11104 = vmatpush1.bf16.msra.mxu0 %v15524_v7  ;;  %11023 = vmatprep.subr.bf16.mxu1 %v15525_v8  ;;  %v15542_v19 = vld [vmem:[%s18410_s13 + $0x18c0] ss:$88 sps:$4 sm:$0xff]   ;;  %v15545_v21 = vld [vmem:[%s18410_s13 + $0x1974] ss:$88 sps:$4 sm:$0xff]   ;;  %v15547_v22 = vld [vmem:[%s18410_s13 + $0x370] ss:$88 sps:$4 sm:$0xff]  }
  0x59   : > { %11105 = vmatprep.subr.bf16.mxu0 %v15527_v9  ;;  %v15548_v23 = vld [vmem:[%s18410_s13 + $0x1970] ss:$88 sps:$4 sm:$0xff]   ;;  %v15549_v24 = vld [vmem:[%s18410_s13 + $0x424] ss:$88 sps:$4 sm:$0xff]   ;;  %v15553_v26 = vld [vmem:[%s18410_s13 + $0x420] ss:$88 sps:$4 sm:$0xff]  }
  0x5a   : > { %v15551_v25 = vld [vmem:[%s18410_s13 + $0x1a24] ss:$88 sps:$4 sm:$0xff]   ;;  %v15554_v27 = vld [vmem:[%s18410_s13 + $0x1a20] ss:$88 sps:$4 sm:$0xff]   ;;  %v15555_v28 = vld [vmem:[%s18410_s13 + $0x4d4] ss:$88 sps:$4 sm:$0xff]  }
  0x5b   : > { %11024 = vmatpush1.bf16.msra.mxu1 %v15529_v10  ;;  %v15557_v29 = vld [vmem:[%s18410_s13 + $0x1ad4] ss:$88 sps:$4 sm:$0xff]   ;;  %v15559_v30 = vld [vmem:[%s18410_s13 + $0x4d0] ss:$88 sps:$4 sm:$0xff]   ;;  %v15561_v32 = vld [vmem:[%s18410_s13 + $0x584] ss:$88 sps:$4 sm:$0xff]  }
  0x5c   : > { %11106 = vmatpush1.bf16.msra.mxu0 %v15530_v11  ;;  %11025 = vmatprep.subr.bf16.mxu1 %v15531_v12  ;;  %v15560_v31 = vld [vmem:[%s18410_s13 + $0x1ad0] ss:$88 sps:$4 sm:$0xff]   ;;  %v15563_v33 = vld [vmem:[%s18410_s13 + $0x1b84] ss:$88 sps:$4 sm:$0xff]   ;;  %v15565_v34 = vld [vmem:[%s18410_s13 + $0x580] ss:$88 sps:$4 sm:$0xff]  }
  0x5d   : > { %11107 = vmatprep.subr.bf16.mxu0 %v15533_v13  ;;  %v15566_v35 = vld [vmem:[%s18410_s13 + $0x1b80] ss:$88 sps:$4 sm:$0xff]   ;;  %v15567_v36 = vld [vmem:[%s18410_s13 + $0x634] ss:$88 sps:$4 sm:$0xff]   ;;  %v18262_v38 = vmov 1966171168  }
  0x5e   : > { %v15569_v37 = vld [vmem:[%s18410_s13 + $0x1c34] ss:$88 sps:$4 sm:$0xff]   ;;  %v270_v39 = vunpack.c.l.s4 %v18262_v38  ;;  %v15571_v41 = vld [vmem:[%s18410_s13 + $0x630] ss:$88 sps:$4 sm:$0xff]   ;;  %v15573_v43 = vld [vmem:[%s18410_s13 + $0x6e4] ss:$88 sps:$4 sm:$0xff]  }
  0x5f   : > { %11026 = vmatpush1.bf16.msra.mxu1 %v15535_v14  ;;  %v15572_v42 = vld [vmem:[%s18410_s13 + $0x1c30] ss:$88 sps:$4 sm:$0xff]   ;;  %v15575_v44 = vld [vmem:[%s18410_s13 + $0x1ce4] ss:$88 sps:$4 sm:$0xff]   ;;  %v18464_v46 = vshrl.u32 %v272_v40, 7  ;;  %p253_p7 = scmp.lt.s32.totalorder %s252_s5, 43 }
  0x60   : > { %11108 = vmatpush1.bf16.msra.mxu0 %v15536_v15  ;;  %11027 = vmatprep.subr.bf16.mxu1 %v15537_v16  ;;  %v271_v45 = vunpack.c.0.s8 %v270_v39  ;;  %v15577_v47 = vld [vmem:[%s18410_s13 + $0x6e0] ss:$88 sps:$4 sm:$0xff]   ;;  %v15579_v49 = vld [vmem:[%s18410_s13 + $0x794] ss:$88 sps:$4 sm:$0xff]   ;;  %v15583_v53 = vld [vmem:[%s18410_s13 + $0x790] ss:$88 sps:$4 sm:$0xff]  }
  0x61   : > { %11109 = vmatprep.subr.bf16.mxu0 %v15539_v17  ;;  %v15578_v48 = vld [vmem:[%s18410_s13 + $0x1ce0] ss:$88 sps:$4 sm:$0xff]   ;;  %v15581_v50 = vld [vmem:[%s18410_s13 + $0x1d94] ss:$88 sps:$4 sm:$0xff]   ;;  %v15584_v54 = vld [vmem:[%s18410_s13 + $0x1d90] ss:$88 sps:$4 sm:$0xff]  }
  0x62   : > { %v274_v51 = vsub.s32 %v271_v45, %v18464_v46  ;;  %v13499_v52 = vld.sshfl [vmem:[%s20493_s0] sm:$0x33 pattern:$0x75316420]  ;;  %v15585_v57 = vld [vmem:[%s18410_s13 + $0x844] ss:$88 sps:$4 sm:$0xff]  }
  0x63   : > { %11028 = vmatpush1.bf16.msra.mxu1 %v15541_v18  ;;  %v268_v55 = vcombine.high %v13499_v52, %v13499_v52  ;;  %v259_v56 = vld [vmem:[%s20494_s1] sm:$0x3f]  ;;  %v15591_v0 = vld [vmem:[%s18410_s13 + $0x8f4] ss:$88 sps:$4 sm:$0xff]   ;;  %v15595_v3 = vld [vmem:[%s18410_s13 + $0x8f0] ss:$88 sps:$4 sm:$0xff]  }
  0x64   : > { %11110 = vmatpush1.bf16.msra.mxu0 %v15542_v19  ;;  %11029 = vmatprep.subr.bf16.mxu1 %v15543_v20  ;;  %v15587_v58 = vld [vmem:[%s18410_s13 + $0x1e44] ss:$88 sps:$4 sm:$0xff]   ;;  %v297_v59 = vrot.slane %v259_v56, %v274_v51  ;;  %v15589_v62 = vld [vmem:[%s18410_s13 + $0x840] ss:$88 sps:$4 sm:$0xff]   ;;  %v15593_v1 = vld [vmem:[%s18410_s13 + $0x1ef4] ss:$88 sps:$4 sm:$0xff]   ;;  %v290_v11 = vcombine.high %v259_v56, %v259_v56  ;;  %v18503_v18 = vrot.slane %v13499_v52, %v274_v51 }
  0x65   : > { %11111 = vmatprep.subr.bf16.mxu0 %v15545_v21  ;;  %v18481_v60 = vrot.slane %v268_v55, %v274_v51  ;;  %v15590_v63 = vld [vmem:[%s18410_s13 + $0x1e40] ss:$88 sps:$4 sm:$0xff]   ;;  %v15596_v4 = vld [vmem:[%s18410_s13 + $0x1ef0] ss:$88 sps:$4 sm:$0xff]   ;;  %v15597_v5 = vld [vmem:[%s18410_s13 + $0x9a4] ss:$88 sps:$4 sm:$0xff]  }
  0x66   : > { %v305_v61 = vcombine.high %v297_v59, %v297_v59  ;;  %v15599_v6 = vld [vmem:[%s18410_s13 + $0x1fa4] ss:$88 sps:$4 sm:$0xff]   ;;  %v15601_v7 = vld [vmem:[%s18410_s13 + $0x9a0] ss:$88 sps:$4 sm:$0xff]   ;;  %v15603_v9 = vld [vmem:[%s18410_s13 + $0xa54] ss:$88 sps:$4 sm:$0xff]   ;;  %v304_v14 = vrot.slane %v290_v11, %v274_v51  ;;  %v18505_v19 = vrot.slane %v297_v59, %v274_v51 }
  0x67   : > { %11030 = vmatpush1.bf16.msra.mxu1 %v15547_v22  ;;  %11051 = vmatprep.mubr.bf16.mxu1 %v18481_v60  ;;  %v15602_v8 = vld [vmem:[%s18410_s13 + $0x1fa0] ss:$88 sps:$4 sm:$0xff]   ;;  %v15605_v10 = vld [vmem:[%s18410_s13 + $0x2054] ss:$88 sps:$4 sm:$0xff]   ;;  %v15607_v12 = vld [vmem:[%s18410_s13 + $0xa50] ss:$88 sps:$4 sm:$0xff]  }
  0x68   : > { %11112 = vmatpush1.bf16.msra.mxu0 %v15548_v23  ;;  %11031 = vmatprep.subr.bf16.mxu1 %v15549_v24  ;;  %v18487_v2 = vrot.slane %v305_v61, %v274_v51  ;;  %v15608_v13 = vld [vmem:[%s18410_s13 + $0x2050] ss:$88 sps:$4 sm:$0xff]   ;;  %v15611_v15 = vld [vmem:[%s18410_s13 + $0xb04] ss:$88 sps:$4 sm:$0xff]   ;;  %v306_v17 = vcombine.high %v304_v14, %v304_v14  ;;  %v15609_v20 = vld [vmem:[%s18410_s13 + $0xb00] ss:$88 sps:$4 sm:$0xff]   ;;  %v18511_v23 = vrot.slane %v304_v14, %v274_v51 }
  0x69   : > { %11113 = vmatprep.subr.bf16.mxu0 %v15551_v25  ;;  %v15614_v16 = vld [vmem:[%s18410_s13 + $0x2104] ss:$88 sps:$4 sm:$0xff]   ;;  %v15612_v21 = vld [vmem:[%s18410_s13 + $0x2100] ss:$88 sps:$4 sm:$0xff]   ;;  %v15617_v24 = vld [vmem:[%s18410_s13 + $0xbb4] ss:$88 sps:$4 sm:$0xff]  }
  0x6a   : > { %11133 = vmatprep.mubr.bf16.mxu0 %v18487_v2  ;;  %v18509_v22 = vrot.slane %v306_v17, %v274_v51  ;;  %v15620_v25 = vld [vmem:[%s18410_s13 + $0x21b4] ss:$88 sps:$4 sm:$0xff]   ;;  %v15635_v38 = vld [vmem:[%s18410_s13 + $0xdc4] ss:$88 sps:$4 sm:$0xff]   ;;  %v15633_v40 = vld [vmem:[%s18410_s13 + $0xdc0] ss:$88 sps:$4 sm:$0xff]  }
  0x6b   : > { %11032 = vmatpush1.bf16.msra.mxu1 %v15553_v26  ;;  %v18517_v26 = vcombine.high %v18481_v60, %v18481_v60  ;;  %v15638_v39 = vld [vmem:[%s18410_s13 + $0x23c4] ss:$88 sps:$4 sm:$0xff]   ;;  %v15642_v45 = vld [vmem:[%s18410_s13 + $0x2470] ss:$88 sps:$4 sm:$0xff]   ;;  %v15653_v51 = vld [vmem:[%s18410_s13 + $0xfd4] ss:$88 sps:$4 sm:$0xff]  }
  0x6c   : > { %11114 = vmatpush1.bf16.msra.mxu0 %v15554_v27  ;;  %11033 = vmatprep.subr.bf16.mxu1 %v15555_v28  ;;  %v18521_v27 = vcombine.high %v18487_v2, %v18487_v2  ;;  %v15615_v28 = vld [vmem:[%s18410_s13 + $0xbb0] ss:$88 sps:$4 sm:$0xff]   ;;  %v15656_v52 = vld [vmem:[%s18410_s13 + $0x25d4] ss:$88 sps:$4 sm:$0xff]   ;;  %v15659_v55 = vld [vmem:[%s18410_s13 + $0x1084] ss:$88 sps:$4 sm:$0xff]  }
  0x6d   : > { %11115 = vmatprep.subr.bf16.mxu0 %v15557_v29  ;;  %v15618_v29 = vld [vmem:[%s18410_s13 + $0x21b0] ss:$88 sps:$4 sm:$0xff]   ;;  %v15662_v56 = vld [vmem:[%s18410_s13 + $0x2684] ss:$88 sps:$4 sm:$0xff]   ;;  %v15665_v59 = vld [vmem:[%s18410_s13 + $0x1134] ss:$88 sps:$4 sm:$0xff]  }
  0x6e   : > { %v15668_v61 = vld [vmem:[%s18410_s13 + $0x2734] ss:$88 sps:$4 sm:$0xff]   ;;  %v15681_v11 = vld [vmem:[%s18410_s13 + $0x1340] ss:$88 sps:$4 sm:$0xff]   ;;  %v15695_v17 = vld [vmem:[%s18410_s13 + $0x14a4] ss:$88 sps:$4 sm:$0xff]  }
  0x6f   : > { %11034 = vmatpush1.bf16.msra.mxu1 %v15559_v30  ;;  %v15623_v30 = vld [vmem:[%s18410_s13 + $0xc64] ss:$88 sps:$4 sm:$0xff]   ;;  %v15692_v14 = vld [vmem:[%s18410_s13 + $0x29f4] ss:$88 sps:$4 sm:$0xff]   ;;  %s20510_s5 = smov (!%p253_p7, %s252_s5), 43 }
  0x70   : > { %11116 = vmatpush1.bf16.msra.mxu0 %v15560_v31  ;;  %11035 = vmatprep.subr.bf16.mxu1 %v15561_v32  ;;  %v15626_v31 = vld [vmem:[%s18410_s13 + $0x2264] ss:$88 sps:$4 sm:$0xff]   ;;  %v15621_v32 = vld [vmem:[%s18410_s13 + $0xc60] ss:$88 sps:$4 sm:$0xff]   ;;  %s13498_s18 = sshll.u32 %s20510_s5, 1 }
  0x71   : > { %11117 = vmatprep.subr.bf16.mxu0 %v15563_v33  ;;  %v15624_v33 = vld [vmem:[%s18410_s13 + $0x2260] ss:$88 sps:$4 sm:$0xff]   ;;  %s19221_s21 = scalar_lea.vmem %s20497_s4, %s13498_s18 }
  0x73   : > { %11036 = vmatpush1.bf16.msra.mxu1 %v15565_v34  ;;  %v15629_v34 = vld [vmem:[%s18410_s13 + $0xd14] ss:$88 sps:$4 sm:$0xff]  }
  0x74   : > { %11118 = vmatpush1.bf16.msra.mxu0 %v15566_v35  ;;  %11037 = vmatprep.subr.bf16.mxu1 %v15567_v36  ;;  %v15632_v35 = vld [vmem:[%s18410_s13 + $0x2314] ss:$88 sps:$4 sm:$0xff]   ;;  %v15627_v36 = vld [vmem:[%s18410_s13 + $0xd10] ss:$88 sps:$4 sm:$0xff]  }
  0x75   : > { %11119 = vmatprep.subr.bf16.mxu0 %v15569_v37  ;;  %v15630_v37 = vld [vmem:[%s18410_s13 + $0x2310] ss:$88 sps:$4 sm:$0xff]  }
  0x77   : > { %11038 = vmatpush1.bf16.msra.mxu1 %v15571_v41  ;;  %v15636_v41 = vld [vmem:[%s18410_s13 + $0x23c0] ss:$88 sps:$4 sm:$0xff]  }
  0x78   : > { %11120 = vmatpush1.bf16.msra.mxu0 %v15572_v42  ;;  %11039 = vmatprep.subr.bf16.mxu1 %v15573_v43  ;;  %v15641_v42 = vld [vmem:[%s18410_s13 + $0xe74] ss:$88 sps:$4 sm:$0xff]  }
  0x79   : > { %11121 = vmatprep.subr.bf16.mxu0 %v15575_v44  ;;  %v15644_v43 = vld [vmem:[%s18410_s13 + $0x2474] ss:$88 sps:$4 sm:$0xff]   ;;  %v15639_v44 = vld [vmem:[%s18410_s13 + $0xe70] ss:$88 sps:$4 sm:$0xff]  }
  0x7b   : > { %11040 = vmatpush1.bf16.msra.mxu1 %v15577_v47  ;;  %v15647_v47 = vld [vmem:[%s18410_s13 + $0xf24] ss:$88 sps:$4 sm:$0xff]  }
  0x7c   : > { %11122 = vmatpush1.bf16.msra.mxu0 %v15578_v48  ;;  %11041 = vmatprep.subr.bf16.mxu1 %v15579_v49  ;;  %v15650_v48 = vld [vmem:[%s18410_s13 + $0x2524] ss:$88 sps:$4 sm:$0xff]   ;;  %v15645_v49 = vld [vmem:[%s18410_s13 + $0xf20] ss:$88 sps:$4 sm:$0xff]  }
  0x7d   : > { %11123 = vmatprep.subr.bf16.mxu0 %v15581_v50  ;;  %v15648_v50 = vld [vmem:[%s18410_s13 + $0x2520] ss:$88 sps:$4 sm:$0xff]  }
  0x7f   : > { %11042 = vmatpush1.bf16.msra.mxu1 %v15583_v53  ;;  %v15651_v53 = vld [vmem:[%s18410_s13 + $0xfd0] ss:$88 sps:$4 sm:$0xff]  }
  0x80   : > { %11124 = vmatpush1.bf16.msra.mxu0 %v15584_v54  ;;  %11043 = vmatprep.subr.bf16.mxu1 %v15585_v57  ;;  %v15654_v54 = vld [vmem:[%s18410_s13 + $0x25d0] ss:$88 sps:$4 sm:$0xff]   ;;  %v15657_v57 = vld [vmem:[%s18410_s13 + $0x1080] ss:$88 sps:$4 sm:$0xff]  }
  0x81   : > { %11125 = vmatprep.subr.bf16.mxu0 %v15587_v58  ;;  %v15660_v58 = vld [vmem:[%s18410_s13 + $0x2680] ss:$88 sps:$4 sm:$0xff]  }
  0x83   : > { %11044 = vmatpush1.bf16.msra.mxu1 %v15589_v62  ;;  %v15663_v62 = vld [vmem:[%s18410_s13 + $0x1130] ss:$88 sps:$4 sm:$0xff]  }
  0x84   : > { %11126 = vmatpush1.bf16.msra.mxu0 %v15590_v63  ;;  %11045 = vmatprep.subr.bf16.mxu1 %v15591_v0  ;;  %v15666_v63 = vld [vmem:[%s18410_s13 + $0x2730] ss:$88 sps:$4 sm:$0xff]   ;;  %v15671_v0 = vld [vmem:[%s18410_s13 + $0x11e4] ss:$88 sps:$4 sm:$0xff]  }
  0x85   : > { %11127 = vmatprep.subr.bf16.mxu0 %v15593_v1  ;;  %v15674_v1 = vld [vmem:[%s18410_s13 + $0x27e4] ss:$88 sps:$4 sm:$0xff]  }
  0x87   : > { %11046 = vmatpush1.bf16.msra.mxu1 %v15595_v3  ;;  %v15669_v3 = vld [vmem:[%s18410_s13 + $0x11e0] ss:$88 sps:$4 sm:$0xff]  }
  0x88   : > { %11128 = vmatpush1.bf16.msra.mxu0 %v15596_v4  ;;  %11047 = vmatprep.subr.bf16.mxu1 %v15597_v5  ;;  %v15672_v4 = vld [vmem:[%s18410_s13 + $0x27e0] ss:$88 sps:$4 sm:$0xff]   ;;  %v15677_v5 = vld [vmem:[%s18410_s13 + $0x1294] ss:$88 sps:$4 sm:$0xff]  }
  0x89   : > { %11129 = vmatprep.subr.bf16.mxu0 %v15599_v6  ;;  %v15680_v6 = vld [vmem:[%s18410_s13 + $0x2894] ss:$88 sps:$4 sm:$0xff]  }
  0x8b   : > { %11048 = vmatpush1.bf16.msra.mxu1 %v15601_v7  ;;  %v15675_v7 = vld [vmem:[%s18410_s13 + $0x1290] ss:$88 sps:$4 sm:$0xff]  }
  0x8c   : > { %11130 = vmatpush1.bf16.msra.mxu0 %v15602_v8  ;;  %11049 = vmatprep.subr.bf16.mxu1 %v15603_v9  ;;  %v15678_v8 = vld [vmem:[%s18410_s13 + $0x2890] ss:$88 sps:$4 sm:$0xff]   ;;  %v15683_v9 = vld [vmem:[%s18410_s13 + $0x1344] ss:$88 sps:$4 sm:$0xff]  }
  0x8d   : > { %11131 = vmatprep.subr.bf16.mxu0 %v15605_v10  ;;  %v15686_v10 = vld [vmem:[%s18410_s13 + $0x2944] ss:$88 sps:$4 sm:$0xff]  }
  0x8f   : > { %11050 = vmatpush1.bf16.msra.mxu1 %v15607_v12  ;;  %v15684_v12 = vld [vmem:[%s18410_s13 + $0x2940] ss:$88 sps:$4 sm:$0xff]  }
  0x90   : > { %11132 = vmatpush1.bf16.msra.mxu0 %v15608_v13  ;;  %11060 = vmatprep.subr.bf16.mxu1 %v15611_v15  ;;  %v15689_v13 = vld [vmem:[%s18410_s13 + $0x13f4] ss:$88 sps:$4 sm:$0xff]   ;;  %v15687_v15 = vld [vmem:[%s18410_s13 + $0x13f0] ss:$88 sps:$4 sm:$0xff]  }
  0x91   : > { %11142 = vmatprep.subr.bf16.mxu0 %v15614_v16  ;;  %v15690_v16 = vld [vmem:[%s18410_s13 + $0x29f0] ss:$88 sps:$4 sm:$0xff]  }
  0x92   : > { %11052 = vmatmul.mubr.bf16.vlgmr.msra.gmra.mrb[0].mxu1 %v18503_v18 }
  0x93   : > { %11134 = vmatmul.mubr.bf16.vlgmr.msra.gmra.mrb[0].mxu0 %v18505_v19  ;;  %11061 = vmatpush1.bf16.msra.mxu1 %v15609_v20  ;;  %v15698_v20 = vld [vmem:[%s18410_s13 + $0x2aa4] ss:$88 sps:$4 sm:$0xff]  }
  0x94   : > { %11143 = vmatpush1.bf16.msra.mxu0 %v15612_v21  ;;  %11062 = vmatprep.subr.bf16.mxu1 %v15617_v24  ;;  %v15693_v21 = vld [vmem:[%s18410_s13 + $0x14a0] ss:$88 sps:$4 sm:$0xff]  }
  0x95   : > { %11144 = vmatprep.subr.bf16.mxu0 %v15620_v25  ;;  %11092 = vmatprep.mubr.bf16.mxu1 %v18517_v26  ;;  %v15696_v24 = vld [vmem:[%s18410_s13 + $0x2aa0] ss:$88 sps:$4 sm:$0xff]   ;;  %v15701_v25 = vld [vmem:[%s18410_s13 + $0x1554] ss:$88 sps:$4 sm:$0xff]  }
  0x96   : > { %11174 = vmatprep.mubr.bf16.mxu0 %v18521_v27 }
  0x97   : > { %11063 = vmatpush1.bf16.msra.mxu1 %v15615_v28  ;;  %v15704_v28 = vld [vmem:[%s18410_s13 + $0x2b54] ss:$88 sps:$4 sm:$0xff]  }
  0x98   : > { %11145 = vmatpush1.bf16.msra.mxu0 %v15618_v29  ;;  %11064 = vmatprep.subr.bf16.mxu1 %v15623_v30  ;;  %v15699_v29 = vld [vmem:[%s18410_s13 + $0x1550] ss:$88 sps:$4 sm:$0xff]  }
  0x99   : > { %11146 = vmatprep.subr.bf16.mxu0 %v15626_v31  ;;  %v15702_v30 = vld [vmem:[%s18410_s13 + $0x2b50] ss:$88 sps:$4 sm:$0xff]   ;;  %v15707_v31 = vld [vmem:[%s18410_s13 + $0x2c04] ss:$88 sps:$4 sm:$0xff]  }
  0x9b   : > { %11065 = vmatpush1.bf16.msra.mxu1 %v15621_v32  ;;  %v15710_v32 = vld [vmem:[%s18410_s13 + $0xc] ss:$88 sps:$4 sm:$0xff]  }
  0x9c   : > { %11147 = vmatpush1.bf16.msra.mxu0 %v15624_v33  ;;  %11066 = vmatprep.subr.bf16.mxu1 %v15629_v34  ;;  %v18589_v33 = vcombine.high %v18503_v18, %v18503_v18  ;;  %v18593_v34 = vcombine.high %v18505_v19, %v18505_v19 }
  0x9d   : > { %11148 = vmatprep.subr.bf16.mxu0 %v15632_v35  ;;  %v15705_v35 = vld [vmem:[%s18410_s13 + $0x2c00] ss:$88 sps:$4 sm:$0xff]  }
  0x9f   : > { %11067 = vmatpush1.bf16.msra.mxu1 %v15627_v36  ;;  %v15708_v36 = vld [vmem:[%s18410_s13 + $0x8] ss:$88 sps:$4 sm:$0xff]  }
  0xa0   : > { %11149 = vmatpush1.bf16.msra.mxu0 %v15630_v37  ;;  %11068 = vmatprep.subr.bf16.mxu1 %v15635_v38  ;;  %v15713_v37 = vld [vmem:[%s18410_s13 + $0x2cb4] ss:$88 sps:$4 sm:$0xff]  }
  0xa1   : > { %11150 = vmatprep.subr.bf16.mxu0 %v15638_v39  ;;  %v15716_v38 = vld [vmem:[%s18410_s13 + $0xbc] ss:$88 sps:$4 sm:$0xff]   ;;  %v15711_v39 = vld [vmem:[%s18410_s13 + $0x2cb0] ss:$88 sps:$4 sm:$0xff]  }
  0xa3   : > { %11069 = vmatpush1.bf16.msra.mxu1 %v15633_v40  ;;  %v15714_v40 = vld [vmem:[%s18410_s13 + $0xb8] ss:$88 sps:$4 sm:$0xff]  }
  0xa4   : > { %11151 = vmatpush1.bf16.msra.mxu0 %v15636_v41  ;;  %11070 = vmatprep.subr.bf16.mxu1 %v15641_v42  ;;  %v15719_v41 = vld [vmem:[%s18410_s13 + $0x2d64] ss:$88 sps:$4 sm:$0xff]  }
  0xa5   : > { %11152 = vmatprep.subr.bf16.mxu0 %v15644_v43  ;;  %v15722_v42 = vld [vmem:[%s18410_s13 + $0x16c] ss:$88 sps:$4 sm:$0xff]   ;;  %v15717_v43 = vld [vmem:[%s18410_s13 + $0x2d60] ss:$88 sps:$4 sm:$0xff]  }
  0xa7   : > { %11071 = vmatpush1.bf16.msra.mxu1 %v15639_v44  ;;  %v15720_v44 = vld [vmem:[%s18410_s13 + $0x168] ss:$88 sps:$4 sm:$0xff]  }
  0xa8   : > { %11153 = vmatpush1.bf16.msra.mxu0 %v15642_v45  ;;  %11072 = vmatprep.subr.bf16.mxu1 %v15647_v47  ;;  %v15725_v45 = vld [vmem:[%s18410_s13 + $0x2e14] ss:$88 sps:$4 sm:$0xff]  }
  0xa9   : > { %11154 = vmatprep.subr.bf16.mxu0 %v15650_v48  ;;  %v15728_v47 = vld [vmem:[%s18410_s13 + $0x21c] ss:$88 sps:$4 sm:$0xff]   ;;  %v15723_v48 = vld [vmem:[%s18410_s13 + $0x2e10] ss:$88 sps:$4 sm:$0xff]  }
  0xab   : > { %11073 = vmatpush1.bf16.msra.mxu1 %v15645_v49  ;;  %v15726_v49 = vld [vmem:[%s18410_s13 + $0x218] ss:$88 sps:$4 sm:$0xff]  }
  0xac   : > { %11155 = vmatpush1.bf16.msra.mxu0 %v15648_v50  ;;  %11074 = vmatprep.subr.bf16.mxu1 %v15653_v51  ;;  %v15731_v50 = vld [vmem:[%s18410_s13 + $0x2ec4] ss:$88 sps:$4 sm:$0xff]  }
  0xad   : > { %11156 = vmatprep.subr.bf16.mxu0 %v15656_v52  ;;  %v15734_v51 = vld [vmem:[%s18410_s13 + $0x2cc] ss:$88 sps:$4 sm:$0xff]   ;;  %v15729_v52 = vld [vmem:[%s18410_s13 + $0x2ec0] ss:$88 sps:$4 sm:$0xff]  }
  0xaf   : > { %11075 = vmatpush1.bf16.msra.mxu1 %v15651_v53  ;;  %v15732_v53 = vld [vmem:[%s18410_s13 + $0x2c8] ss:$88 sps:$4 sm:$0xff]  }
  0xb0   : > { %11157 = vmatpush1.bf16.msra.mxu0 %v15654_v54  ;;  %11076 = vmatprep.subr.bf16.mxu1 %v15659_v55  ;;  %v15737_v54 = vld [vmem:[%s18410_s13 + $0x2f74] ss:$88 sps:$4 sm:$0xff]  }
  0xb1   : > { %11158 = vmatprep.subr.bf16.mxu0 %v15662_v56  ;;  %v15740_v55 = vld [vmem:[%s18410_s13 + $0x37c] ss:$88 sps:$4 sm:$0xff]   ;;  %v15735_v56 = vld [vmem:[%s18410_s13 + $0x2f70] ss:$88 sps:$4 sm:$0xff]  }
  0xb3   : > { %11077 = vmatpush1.bf16.msra.mxu1 %v15657_v57  ;;  %v15738_v57 = vld [vmem:[%s18410_s13 + $0x378] ss:$88 sps:$4 sm:$0xff]  }
  0xb4   : > { %11159 = vmatpush1.bf16.msra.mxu0 %v15660_v58  ;;  %11078 = vmatprep.subr.bf16.mxu1 %v15665_v59  ;;  %v15743_v58 = vld [vmem:[%s18410_s13 + $0x3024] ss:$88 sps:$4 sm:$0xff]  }
  0xb5   : > { %11160 = vmatprep.subr.bf16.mxu0 %v15668_v61  ;;  %v15746_v59 = vld [vmem:[%s18410_s13 + $0x42c] ss:$88 sps:$4 sm:$0xff]   ;;  %v15741_v61 = vld [vmem:[%s18410_s13 + $0x3020] ss:$88 sps:$4 sm:$0xff]  }
  0xb7   : > { %11079 = vmatpush1.bf16.msra.mxu1 %v15663_v62  ;;  %v15744_v62 = vld [vmem:[%s18410_s13 + $0x428] ss:$88 sps:$4 sm:$0xff]  }
  0xb8   : > { %11161 = vmatpush1.bf16.msra.mxu0 %v15666_v63  ;;  %11080 = vmatprep.subr.bf16.mxu1 %v15671_v0  ;;  %v15749_v63 = vld [vmem:[%s18410_s13 + $0x30d4] ss:$88 sps:$4 sm:$0xff]  }
  0xb9   : > { %11162 = vmatprep.subr.bf16.mxu0 %v15674_v1  ;;  %v15752_v0 = vld [vmem:[%s18410_s13 + $0x4dc] ss:$88 sps:$4 sm:$0xff]   ;;  %v15747_v1 = vld [vmem:[%s18410_s13 + $0x30d0] ss:$88 sps:$4 sm:$0xff]  }
  0xbb   : > { %11081 = vmatpush1.bf16.msra.mxu1 %v15669_v3  ;;  %v15750_v3 = vld [vmem:[%s18410_s13 + $0x4d8] ss:$88 sps:$4 sm:$0xff]  }
  0xbc   : > { %11163 = vmatpush1.bf16.msra.mxu0 %v15672_v4  ;;  %11082 = vmatprep.subr.bf16.mxu1 %v15677_v5  ;;  %v15755_v4 = vld [vmem:[%s18410_s13 + $0x3184] ss:$88 sps:$4 sm:$0xff]  }
  0xbd   : > { %11164 = vmatprep.subr.bf16.mxu0 %v15680_v6  ;;  %v15758_v5 = vld [vmem:[%s18410_s13 + $0x58c] ss:$88 sps:$4 sm:$0xff]   ;;  %v15753_v6 = vld [vmem:[%s18410_s13 + $0x3180] ss:$88 sps:$4 sm:$0xff]  }
  0xbf   : > { %11083 = vmatpush1.bf16.msra.mxu1 %v15675_v7  ;;  %v15756_v7 = vld [vmem:[%s18410_s13 + $0x588] ss:$88 sps:$4 sm:$0xff]  }
  0xc0   : > { %11165 = vmatpush1.bf16.msra.mxu0 %v15678_v8  ;;  %11084 = vmatprep.subr.bf16.mxu1 %v15683_v9  ;;  %v15761_v8 = vld [vmem:[%s18410_s13 + $0x3234] ss:$88 sps:$4 sm:$0xff]  }
  0xc1   : > { %11166 = vmatprep.subr.bf16.mxu0 %v15686_v10  ;;  %v15764_v9 = vld [vmem:[%s18410_s13 + $0x63c] ss:$88 sps:$4 sm:$0xff]   ;;  %v15759_v10 = vld [vmem:[%s18410_s13 + $0x3230] ss:$88 sps:$4 sm:$0xff]  }
  0xc3   : > { %11085 = vmatpush1.bf16.msra.mxu1 %v15681_v11  ;;  %v15762_v11 = vld [vmem:[%s18410_s13 + $0x638] ss:$88 sps:$4 sm:$0xff]  }
  0xc4   : > { %11167 = vmatpush1.bf16.msra.mxu0 %v15684_v12  ;;  %11086 = vmatprep.subr.bf16.mxu1 %v15689_v13  ;;  %v15767_v12 = vld [vmem:[%s18410_s13 + $0x32e4] ss:$88 sps:$4 sm:$0xff]  }
  0xc5   : > { %11168 = vmatprep.subr.bf16.mxu0 %v15692_v14  ;;  %v15770_v13 = vld [vmem:[%s18410_s13 + $0x6ec] ss:$88 sps:$4 sm:$0xff]   ;;  %v15765_v14 = vld [vmem:[%s18410_s13 + $0x32e0] ss:$88 sps:$4 sm:$0xff]  }
  0xc7   : > { %11087 = vmatpush1.bf16.msra.mxu1 %v15687_v15  ;;  %v15768_v15 = vld [vmem:[%s18410_s13 + $0x6e8] ss:$88 sps:$4 sm:$0xff]  }
  0xc8   : > { %11169 = vmatpush1.bf16.msra.mxu0 %v15690_v16  ;;  %11088 = vmatprep.subr.bf16.mxu1 %v15695_v17  ;;  %v15773_v16 = vld [vmem:[%s18410_s13 + $0x3394] ss:$88 sps:$4 sm:$0xff]  }
  0xc9   : > { %11170 = vmatprep.subr.bf16.mxu0 %v15698_v20  ;;  %v15776_v17 = vld [vmem:[%s18410_s13 + $0x79c] ss:$88 sps:$4 sm:$0xff]   ;;  %v15771_v20 = vld [vmem:[%s18410_s13 + $0x3390] ss:$88 sps:$4 sm:$0xff]  }
  0xcb   : > { %11089 = vmatpush1.bf16.msra.mxu1 %v15693_v21  ;;  %v15774_v21 = vld [vmem:[%s18410_s13 + $0x798] ss:$88 sps:$4 sm:$0xff]  }
  0xcc   : > { %11171 = vmatpush1.bf16.msra.mxu0 %v15696_v24  ;;  %11090 = vmatprep.subr.bf16.mxu1 %v15701_v25  ;;  %v15779_v24 = vld [vmem:[%s18410_s13 + $0x3444] ss:$88 sps:$4 sm:$0xff]  }
  0xcd   : > { %11172 = vmatprep.subr.bf16.mxu0 %v15704_v28  ;;  %v15782_v25 = vld [vmem:[%s18410_s13 + $0x84c] ss:$88 sps:$4 sm:$0xff]   ;;  %v15777_v28 = vld [vmem:[%s18410_s13 + $0x3440] ss:$88 sps:$4 sm:$0xff]  }
  0xcf   : > { %11091 = vmatpush1.bf16.msra.mxu1 %v15699_v29  ;;  %v15780_v29 = vld [vmem:[%s18410_s13 + $0x848] ss:$88 sps:$4 sm:$0xff]  }
  0xd0   : > { %11173 = vmatpush1.bf16.msra.mxu0 %v15702_v30  ;;  %11224 = vmatprep.subr.bf16.mxu1 %v15710_v32  ;;  %v15785_v30 = vld [vmem:[%s18410_s13 + $0x34f4] ss:$88 sps:$4 sm:$0xff]   ;;  %v15783_v32 = vld [vmem:[%s18410_s13 + $0x34f0] ss:$88 sps:$4 sm:$0xff]  }
  0xd1   : > { %11183 = vmatprep.subr.bf16.mxu0 %v15707_v31  ;;  %v15788_v31 = vld [vmem:[%s18410_s13 + $0x8fc] ss:$88 sps:$4 sm:$0xff]  }
  0xd2   : > { %11093 = vmatmul.mubr.bf16.vlgmr.msra.gmra.mrb[0].mxu1 %v18589_v33 }
  0xd3   : > { %11175 = vmatmul.mubr.bf16.vlgmr.msra.gmra.mrb[0].mxu0 %v18593_v34  ;;  %11225 = vmatpush1.bf16.msra.mxu1 %v15708_v36  ;;  %v15791_v36 = vld [vmem:[%s18410_s13 + $0x35a4] ss:$88 sps:$4 sm:$0xff]  }
  0xd4   : > { %11184 = vmatpush1.bf16.msra.mxu0 %v15705_v35  ;;  %11226 = vmatprep.subr.bf16.mxu1 %v15716_v38  ;;  %v15786_v35 = vld [vmem:[%s18410_s13 + $0x8f8] ss:$88 sps:$4 sm:$0xff]  }
  0xd5   : > { %11185 = vmatprep.subr.bf16.mxu0 %v15713_v37  ;;  %11215 = vmatprep.mubr.bf16.mxu0 %v18509_v22  ;;  %v15794_v37 = vld [vmem:[%s18410_s13 + $0x9ac] ss:$88 sps:$4 sm:$0xff]   ;;  %v15789_v38 = vld [vmem:[%s18410_s13 + $0x35a0] ss:$88 sps:$4 sm:$0xff]  }
  0xd6   : > { %11256 = vmatprep.mubr.bf16.mxu1 %v18481_v60 }
  0xd7   : > { %11227 = vmatpush1.bf16.msra.mxu1 %v15714_v40  ;;  %v15797_v40 = vld [vmem:[%s18410_s13 + $0x3654] ss:$88 sps:$4 sm:$0xff]  }
  0xd8   : > { %11186 = vmatpush1.bf16.msra.mxu0 %v15711_v39  ;;  %11228 = vmatprep.subr.bf16.mxu1 %v15722_v42  ;;  %v15792_v39 = vld [vmem:[%s18410_s13 + $0x9a8] ss:$88 sps:$4 sm:$0xff]  }
  0xd9   : > { %11187 = vmatprep.subr.bf16.mxu0 %v15719_v41  ;;  %v15800_v41 = vld [vmem:[%s18410_s13 + $0xa5c] ss:$88 sps:$4 sm:$0xff]   ;;  %v15795_v42 = vld [vmem:[%s18410_s13 + $0x3650] ss:$88 sps:$4 sm:$0xff]  }
  0xdb   : > { %11229 = vmatpush1.bf16.msra.mxu1 %v15720_v44  ;;  %v15804_v44 = vld [vmem:[%s18410_s13 + $0xb0c] ss:$88 sps:$4 sm:$0xff]  }
  0xdc   : > { %11188 = vmatpush1.bf16.msra.mxu0 %v15717_v43  ;;  %11230 = vmatprep.subr.bf16.mxu1 %v15728_v47  ;;  %v15798_v43 = vld [vmem:[%s18410_s13 + $0xa58] ss:$88 sps:$4 sm:$0xff]   ;;  %v15802_v47 = vld [vmem:[%s18410_s13 + $0xb08] ss:$88 sps:$4 sm:$0xff]  }
  0xdd   : > { %11189 = vmatprep.subr.bf16.mxu0 %v15725_v45  ;;  %v15807_v45 = vld [vmem:[%s18410_s13 + $0x14] ss:$88 sps:$4 sm:$0xff]  }
  0xdf   : > { %11231 = vmatpush1.bf16.msra.mxu1 %v15726_v49  ;;  %v15810_v49 = vld [vmem:[%s18410_s13 + $0xbbc] ss:$88 sps:$4 sm:$0xff]  }
  0xe0   : > { %11190 = vmatpush1.bf16.msra.mxu0 %v15723_v48  ;;  %11232 = vmatprep.subr.bf16.mxu1 %v15734_v51  ;;  %v15805_v48 = vld [vmem:[%s18410_s13 + $0x10] ss:$88 sps:$4 sm:$0xff]  }
  0xe1   : > { %11191 = vmatprep.subr.bf16.mxu0 %v15731_v50  ;;  %v15813_v50 = vld [vmem:[%s18410_s13 + $0xc4] ss:$88 sps:$4 sm:$0xff]   ;;  %v15808_v51 = vld [vmem:[%s18410_s13 + $0xbb8] ss:$88 sps:$4 sm:$0xff]  }
  0xe3   : > { %11233 = vmatpush1.bf16.msra.mxu1 %v15732_v53  ;;  %v15816_v53 = vld [vmem:[%s18410_s13 + $0xc6c] ss:$88 sps:$4 sm:$0xff]  }
  0xe4   : > { %11192 = vmatpush1.bf16.msra.mxu0 %v15729_v52  ;;  %11234 = vmatprep.subr.bf16.mxu1 %v15740_v55  ;;  %v15811_v52 = vld [vmem:[%s18410_s13 + $0xc0] ss:$88 sps:$4 sm:$0xff]  }
  0xe5   : > { %11193 = vmatprep.subr.bf16.mxu0 %v15737_v54  ;;  %v15819_v54 = vld [vmem:[%s18410_s13 + $0x174] ss:$88 sps:$4 sm:$0xff]   ;;  %v15814_v55 = vld [vmem:[%s18410_s13 + $0xc68] ss:$88 sps:$4 sm:$0xff]  }
  0xe7   : > { %11235 = vmatpush1.bf16.msra.mxu1 %v15738_v57  ;;  %v15822_v57 = vld [vmem:[%s18410_s13 + $0xd1c] ss:$88 sps:$4 sm:$0xff]  }
  0xe8   : > { %11194 = vmatpush1.bf16.msra.mxu0 %v15735_v56  ;;  %11236 = vmatprep.subr.bf16.mxu1 %v15746_v59  ;;  %v15817_v56 = vld [vmem:[%s18410_s13 + $0x170] ss:$88 sps:$4 sm:$0xff]  }
  0xe9   : > { %11195 = vmatprep.subr.bf16.mxu0 %v15743_v58  ;;  %v15825_v58 = vld [vmem:[%s18410_s13 + $0x224] ss:$88 sps:$4 sm:$0xff]   ;;  %v15820_v59 = vld [vmem:[%s18410_s13 + $0xd18] ss:$88 sps:$4 sm:$0xff]  }
  0xeb   : > { %11237 = vmatpush1.bf16.msra.mxu1 %v15744_v62  ;;  %v15828_v62 = vld [vmem:[%s18410_s13 + $0xdcc] ss:$88 sps:$4 sm:$0xff]  }
  0xec   : > { %11196 = vmatpush1.bf16.msra.mxu0 %v15741_v61  ;;  %11238 = vmatprep.subr.bf16.mxu1 %v15752_v0  ;;  %v15823_v61 = vld [vmem:[%s18410_s13 + $0x220] ss:$88 sps:$4 sm:$0xff]  }
  0xed   : > { %11197 = vmatprep.subr.bf16.mxu0 %v15749_v63  ;;  %v15831_v63 = vld [vmem:[%s18410_s13 + $0x2d4] ss:$88 sps:$4 sm:$0xff]   ;;  %v15826_v0 = vld [vmem:[%s18410_s13 + $0xdc8] ss:$88 sps:$4 sm:$0xff]  }
  0xef   : > { %11239 = vmatpush1.bf16.msra.mxu1 %v15750_v3  ;;  %v15834_v3 = vld [vmem:[%s18410_s13 + $0xe7c] ss:$88 sps:$4 sm:$0xff]  }
  0xf0   : > { %11198 = vmatpush1.bf16.msra.mxu0 %v15747_v1  ;;  %11240 = vmatprep.subr.bf16.mxu1 %v15758_v5  ;;  %v15829_v1 = vld [vmem:[%s18410_s13 + $0x2d0] ss:$88 sps:$4 sm:$0xff]  }
  0xf1   : > { %11199 = vmatprep.subr.bf16.mxu0 %v15755_v4  ;;  %v15837_v4 = vld [vmem:[%s18410_s13 + $0x384] ss:$88 sps:$4 sm:$0xff]   ;;  %v15832_v5 = vld [vmem:[%s18410_s13 + $0xe78] ss:$88 sps:$4 sm:$0xff]  }
  0xf3   : > { %11241 = vmatpush1.bf16.msra.mxu1 %v15756_v7  ;;  %v15840_v7 = vld [vmem:[%s18410_s13 + $0xf2c] ss:$88 sps:$4 sm:$0xff]  }
  0xf4   : > { %11200 = vmatpush1.bf16.msra.mxu0 %v15753_v6  ;;  %11242 = vmatprep.subr.bf16.mxu1 %v15764_v9  ;;  %v15835_v6 = vld [vmem:[%s18410_s13 + $0x380] ss:$88 sps:$4 sm:$0xff]  }
  0xf5   : > { %11201 = vmatprep.subr.bf16.mxu0 %v15761_v8  ;;  %v15843_v8 = vld [vmem:[%s18410_s13 + $0x434] ss:$88 sps:$4 sm:$0xff]   ;;  %v15838_v9 = vld [vmem:[%s18410_s13 + $0xf28] ss:$88 sps:$4 sm:$0xff]  }
  0xf7   : > { %11243 = vmatpush1.bf16.msra.mxu1 %v15762_v11  ;;  %v15846_v11 = vld [vmem:[%s18410_s13 + $0xfdc] ss:$88 sps:$4 sm:$0xff]  }
  0xf8   : > { %11202 = vmatpush1.bf16.msra.mxu0 %v15759_v10  ;;  %11244 = vmatprep.subr.bf16.mxu1 %v15770_v13  ;;  %v15841_v10 = vld [vmem:[%s18410_s13 + $0x430] ss:$88 sps:$4 sm:$0xff]  }
  0xf9   : > { %11203 = vmatprep.subr.bf16.mxu0 %v15767_v12  ;;  %v15849_v12 = vld [vmem:[%s18410_s13 + $0x4e4] ss:$88 sps:$4 sm:$0xff]   ;;  %v15844_v13 = vld [vmem:[%s18410_s13 + $0xfd8] ss:$88 sps:$4 sm:$0xff]  }
  0xfb   : > { %11245 = vmatpush1.bf16.msra.mxu1 %v15768_v15  ;;  %v15852_v15 = vld [vmem:[%s18410_s13 + $0x108c] ss:$88 sps:$4 sm:$0xff]  }
  0xfc   : > { %11204 = vmatpush1.bf16.msra.mxu0 %v15765_v14  ;;  %11246 = vmatprep.subr.bf16.mxu1 %v15776_v17  ;;  %v15847_v14 = vld [vmem:[%s18410_s13 + $0x4e0] ss:$88 sps:$4 sm:$0xff]  }
  0xfd   : > { %11205 = vmatprep.subr.bf16.mxu0 %v15773_v16  ;;  %v15855_v16 = vld [vmem:[%s18410_s13 + $0x594] ss:$88 sps:$4 sm:$0xff]   ;;  %v15850_v17 = vld [vmem:[%s18410_s13 + $0x1088] ss:$88 sps:$4 sm:$0xff]  }
  0xff   : > { %11247 = vmatpush1.bf16.msra.mxu1 %v15774_v21  ;;  %v15858_v21 = vld [vmem:[%s18410_s13 + $0x113c] ss:$88 sps:$4 sm:$0xff]  }
 0x100   : > { %11206 = vmatpush1.bf16.msra.mxu0 %v15771_v20  ;;  %11248 = vmatprep.subr.bf16.mxu1 %v15782_v25  ;;  %v15853_v20 = vld [vmem:[%s18410_s13 + $0x590] ss:$88 sps:$4 sm:$0xff]  }
 0x101   : > { %11207 = vmatprep.subr.bf16.mxu0 %v15779_v24  ;;  %v15861_v24 = vld [vmem:[%s18410_s13 + $0x644] ss:$88 sps:$4 sm:$0xff]   ;;  %v15856_v25 = vld [vmem:[%s18410_s13 + $0x1138] ss:$88 sps:$4 sm:$0xff]  }
 0x103   : > { %11249 = vmatpush1.bf16.msra.mxu1 %v15780_v29  ;;  %v15864_v29 = vld [vmem:[%s18410_s13 + $0x11ec] ss:$88 sps:$4 sm:$0xff]  }
 0x104   : > { %11208 = vmatpush1.bf16.msra.mxu0 %v15777_v28  ;;  %11250 = vmatprep.subr.bf16.mxu1 %v15788_v31  ;;  %v15859_v28 = vld [vmem:[%s18410_s13 + $0x640] ss:$88 sps:$4 sm:$0xff]  }
 0x105   : > { %11209 = vmatprep.subr.bf16.mxu0 %v15785_v30  ;;  %v15867_v30 = vld [vmem:[%s18410_s13 + $0x6f4] ss:$88 sps:$4 sm:$0xff]   ;;  %v15862_v31 = vld [vmem:[%s18410_s13 + $0x11e8] ss:$88 sps:$4 sm:$0xff]  }
 0x107   : > { %11251 = vmatpush1.bf16.msra.mxu1 %v15786_v35  ;;  %v15870_v35 = vld [vmem:[%s18410_s13 + $0x129c] ss:$88 sps:$4 sm:$0xff]  }
 0x108   : > { %11210 = vmatpush1.bf16.msra.mxu0 %v15783_v32  ;;  %11252 = vmatprep.subr.bf16.mxu1 %v15794_v37  ;;  %v15865_v32 = vld [vmem:[%s18410_s13 + $0x6f0] ss:$88 sps:$4 sm:$0xff]  }
 0x109   : > { %11211 = vmatprep.subr.bf16.mxu0 %v15791_v36  ;;  %v15873_v36 = vld [vmem:[%s18410_s13 + $0x7a4] ss:$88 sps:$4 sm:$0xff]   ;;  %v15868_v37 = vld [vmem:[%s18410_s13 + $0x1298] ss:$88 sps:$4 sm:$0xff]  }
 0x10b   : > { %11253 = vmatpush1.bf16.msra.mxu1 %v15792_v39  ;;  %v15876_v39 = vld [vmem:[%s18410_s13 + $0x134c] ss:$88 sps:$4 sm:$0xff]  }
 0x10c   : > { %11212 = vmatpush1.bf16.msra.mxu0 %v15789_v38  ;;  %11254 = vmatprep.subr.bf16.mxu1 %v15800_v41  ;;  %v15871_v38 = vld [vmem:[%s18410_s13 + $0x7a0] ss:$88 sps:$4 sm:$0xff]  }
 0x10d   : > { %11213 = vmatprep.subr.bf16.mxu0 %v15797_v40  ;;  %v15879_v40 = vld [vmem:[%s18410_s13 + $0x854] ss:$88 sps:$4 sm:$0xff]   ;;  %v15874_v41 = vld [vmem:[%s18410_s13 + $0x1348] ss:$88 sps:$4 sm:$0xff]  }
 0x10f   : > { %11255 = vmatpush1.bf16.msra.mxu1 %v15798_v43  ;;  %v15882_v43 = vld [vmem:[%s18410_s13 + $0x13fc] ss:$88 sps:$4 sm:$0xff]  }
 0x110   : > { %11214 = vmatpush1.bf16.msra.mxu0 %v15795_v42  ;;  %11265 = vmatprep.subr.bf16.mxu1 %v15804_v44  ;;  %v15877_v42 = vld [vmem:[%s18410_s13 + $0x850] ss:$88 sps:$4 sm:$0xff]   ;;  %v15885_v44 = vld [vmem:[%s18410_s13 + $0x904] ss:$88 sps:$4 sm:$0xff]  }
 0x111   : > { %11429 = vmatprep.subr.bf16.mxu0 %v15807_v45  ;;  %v15880_v45 = vld [vmem:[%s18410_s13 + $0x13f8] ss:$88 sps:$4 sm:$0xff]  }
 0x112   : > { %11257 = vmatmul.mubr.bf16.vlgmr.msra.gmra.mrb[4].mxu1 %v18503_v18 }
 0x113   : > { %11216 = vmatmul.mubr.bf16.vlgmr.msra.gmra.mrb[0].mxu0 %v18511_v23  ;;  %11266 = vmatpush1.bf16.msra.mxu1 %v15802_v47  ;;  %v15883_v47 = vld [vmem:[%s18410_s13 + $0x900] ss:$88 sps:$4 sm:$0xff]  }
 0x114   : > { %11430 = vmatpush1.bf16.msra.mxu0 %v15805_v48  ;;  %11267 = vmatprep.subr.bf16.mxu1 %v15810_v49  ;;  %v15888_v48 = vld [vmem:[%s18410_s13 + $0x14ac] ss:$88 sps:$4 sm:$0xff]  }
 0x115   : > { %11431 = vmatprep.subr.bf16.mxu0 %v15813_v50  ;;  %11297 = vmatprep.mubr.bf16.mxu1 %v18517_v26  ;;  %v15891_v49 = vld [vmem:[%s18410_s13 + $0x9b4] ss:$88 sps:$4 sm:$0xff]   ;;  %v15886_v50 = vld [vmem:[%s18410_s13 + $0x14a8] ss:$88 sps:$4 sm:$0xff]  }
 0x116   : > { %11461 = vmatprep.mubr.bf16.mxu0 %v18481_v60 }
 0x117   : > { %11268 = vmatpush1.bf16.msra.mxu1 %v15808_v51  ;;  %v15889_v51 = vld [vmem:[%s18410_s13 + $0x9b0] ss:$88 sps:$4 sm:$0xff]  }
 0x118   : > { %11432 = vmatpush1.bf16.msra.mxu0 %v15811_v52  ;;  %11269 = vmatprep.subr.bf16.mxu1 %v15816_v53  ;;  %v15894_v52 = vld [vmem:[%s18410_s13 + $0x155c] ss:$88 sps:$4 sm:$0xff]  }
 0x119   : > { %11433 = vmatprep.subr.bf16.mxu0 %v15819_v54  ;;  %v15897_v53 = vld [vmem:[%s18410_s13 + $0xa64] ss:$88 sps:$4 sm:$0xff]   ;;  %v15892_v54 = vld [vmem:[%s18410_s13 + $0x1558] ss:$88 sps:$4 sm:$0xff]  }
 0x11b   : > { %11270 = vmatpush1.bf16.msra.mxu1 %v15814_v55  ;;  %v15895_v55 = vld [vmem:[%s18410_s13 + $0xa60] ss:$88 sps:$4 sm:$0xff]  }
 0x11c   : > { %11434 = vmatpush1.bf16.msra.mxu0 %v15817_v56  ;;  %11271 = vmatprep.subr.bf16.mxu1 %v15822_v57  ;;  %v15900_v56 = vld [vmem:[%s18410_s13 + $0x160c] ss:$88 sps:$4 sm:$0xff]  }
 0x11d   : > { %11435 = vmatprep.subr.bf16.mxu0 %v15825_v58  ;;  %v15903_v57 = vld [vmem:[%s18410_s13 + $0xb14] ss:$88 sps:$4 sm:$0xff]   ;;  %v15898_v58 = vld [vmem:[%s18410_s13 + $0x1608] ss:$88 sps:$4 sm:$0xff]  }
 0x11f   : > { %11272 = vmatpush1.bf16.msra.mxu1 %v15820_v59  ;;  %v15901_v59 = vld [vmem:[%s18410_s13 + $0xb10] ss:$88 sps:$4 sm:$0xff]  }
 0x120   : > { %11436 = vmatpush1.bf16.msra.mxu0 %v15823_v61  ;;  %11273 = vmatprep.subr.bf16.mxu1 %v15828_v62  ;;  %v15906_v61 = vld [vmem:[%s18410_s13 + $0x16bc] ss:$88 sps:$4 sm:$0xff]  }
 0x121   : > { %11437 = vmatprep.subr.bf16.mxu0 %v15831_v63  ;;  %v15909_v62 = vld [vmem:[%s18410_s13 + $0xbc4] ss:$88 sps:$4 sm:$0xff]   ;;  %v15904_v63 = vld [vmem:[%s18410_s13 + $0x16b8] ss:$88 sps:$4 sm:$0xff]  }
 0x123   : > { %11274 = vmatpush1.bf16.msra.mxu1 %v15826_v0  ;;  %v15907_v0 = vld [vmem:[%s18410_s13 + $0xbc0] ss:$88 sps:$4 sm:$0xff]  }
 0x124   : > { %11438 = vmatpush1.bf16.msra.mxu0 %v15829_v1  ;;  %11275 = vmatprep.subr.bf16.mxu1 %v15834_v3  ;;  %v15912_v1 = vld [vmem:[%s18410_s13 + $0x176c] ss:$88 sps:$4 sm:$0xff]  }
 0x125   : > { %11439 = vmatprep.subr.bf16.mxu0 %v15837_v4  ;;  %v15915_v3 = vld [vmem:[%s18410_s13 + $0xc74] ss:$88 sps:$4 sm:$0xff]   ;;  %v15910_v4 = vld [vmem:[%s18410_s13 + $0x1768] ss:$88 sps:$4 sm:$0xff]  }
 0x127   : > { %11276 = vmatpush1.bf16.msra.mxu1 %v15832_v5  ;;  %v15913_v5 = vld [vmem:[%s18410_s13 + $0xc70] ss:$88 sps:$4 sm:$0xff]  }
 0x128   : > { %11440 = vmatpush1.bf16.msra.mxu0 %v15835_v6  ;;  %11277 = vmatprep.subr.bf16.mxu1 %v15840_v7  ;;  %v15918_v6 = vld [vmem:[%s18410_s13 + $0x181c] ss:$88 sps:$4 sm:$0xff]  }
 0x129   : > { %11441 = vmatprep.subr.bf16.mxu0 %v15843_v8  ;;  %v15921_v7 = vld [vmem:[%s18410_s13 + $0xd24] ss:$88 sps:$4 sm:$0xff]   ;;  %v15916_v8 = vld [vmem:[%s18410_s13 + $0x1818] ss:$88 sps:$4 sm:$0xff]  }
 0x12b   : > { %11278 = vmatpush1.bf16.msra.mxu1 %v15838_v9  ;;  %v15919_v9 = vld [vmem:[%s18410_s13 + $0xd20] ss:$88 sps:$4 sm:$0xff]  }
 0x12c   : > { %11442 = vmatpush1.bf16.msra.mxu0 %v15841_v10  ;;  %11279 = vmatprep.subr.bf16.mxu1 %v15846_v11  ;;  %v15924_v10 = vld [vmem:[%s18410_s13 + $0x18cc] ss:$88 sps:$4 sm:$0xff]  }
 0x12d   : > { %11443 = vmatprep.subr.bf16.mxu0 %v15849_v12  ;;  %v15927_v11 = vld [vmem:[%s18410_s13 + $0xdd4] ss:$88 sps:$4 sm:$0xff]   ;;  %v15922_v12 = vld [vmem:[%s18410_s13 + $0x18c8] ss:$88 sps:$4 sm:$0xff]  }
 0x12f   : > { %11280 = vmatpush1.bf16.msra.mxu1 %v15844_v13  ;;  %v15925_v13 = vld [vmem:[%s18410_s13 + $0xdd0] ss:$88 sps:$4 sm:$0xff]  }
 0x130   : > { %11444 = vmatpush1.bf16.msra.mxu0 %v15847_v14  ;;  %11281 = vmatprep.subr.bf16.mxu1 %v15852_v15  ;;  %v15930_v14 = vld [vmem:[%s18410_s13 + $0x197c] ss:$88 sps:$4 sm:$0xff]  }
 0x131   : > { %11445 = vmatprep.subr.bf16.mxu0 %v15855_v16  ;;  %v15933_v15 = vld [vmem:[%s18410_s13 + $0xe84] ss:$88 sps:$4 sm:$0xff]   ;;  %v15928_v16 = vld [vmem:[%s18410_s13 + $0x1978] ss:$88 sps:$4 sm:$0xff]  }
 0x133   : > { %11282 = vmatpush1.bf16.msra.mxu1 %v15850_v17  ;;  %v15931_v17 = vld [vmem:[%s18410_s13 + $0xe80] ss:$88 sps:$4 sm:$0xff]  }
 0x134   : > { %11446 = vmatpush1.bf16.msra.mxu0 %v15853_v20  ;;  %11283 = vmatprep.subr.bf16.mxu1 %v15858_v21  ;;  %v15936_v20 = vld [vmem:[%s18410_s13 + $0x1a2c] ss:$88 sps:$4 sm:$0xff]  }
 0x135   : > { %11447 = vmatprep.subr.bf16.mxu0 %v15861_v24  ;;  %v15939_v21 = vld [vmem:[%s18410_s13 + $0xf34] ss:$88 sps:$4 sm:$0xff]   ;;  %v15934_v24 = vld [vmem:[%s18410_s13 + $0x1a28] ss:$88 sps:$4 sm:$0xff]  }
 0x137   : > { %11284 = vmatpush1.bf16.msra.mxu1 %v15856_v25  ;;  %v15937_v25 = vld [vmem:[%s18410_s13 + $0xf30] ss:$88 sps:$4 sm:$0xff]  }
 0x138   : > { %11448 = vmatpush1.bf16.msra.mxu0 %v15859_v28  ;;  %11285 = vmatprep.subr.bf16.mxu1 %v15864_v29  ;;  %v15942_v28 = vld [vmem:[%s18410_s13 + $0x1adc] ss:$88 sps:$4 sm:$0xff]  }
 0x139   : > { %11449 = vmatprep.subr.bf16.mxu0 %v15867_v30  ;;  %v15945_v29 = vld [vmem:[%s18410_s13 + $0xfe4] ss:$88 sps:$4 sm:$0xff]   ;;  %v15940_v30 = vld [vmem:[%s18410_s13 + $0x1ad8] ss:$88 sps:$4 sm:$0xff]  }
 0x13b   : > { %11286 = vmatpush1.bf16.msra.mxu1 %v15862_v31  ;;  %v15943_v31 = vld [vmem:[%s18410_s13 + $0xfe0] ss:$88 sps:$4 sm:$0xff]  }
 0x13c   : > { %11450 = vmatpush1.bf16.msra.mxu0 %v15865_v32  ;;  %11287 = vmatprep.subr.bf16.mxu1 %v15870_v35  ;;  %v15948_v32 = vld [vmem:[%s18410_s13 + $0x1b8c] ss:$88 sps:$4 sm:$0xff]  }
 0x13d   : > { %11451 = vmatprep.subr.bf16.mxu0 %v15873_v36  ;;  %v15951_v35 = vld [vmem:[%s18410_s13 + $0x1094] ss:$88 sps:$4 sm:$0xff]   ;;  %v15946_v36 = vld [vmem:[%s18410_s13 + $0x1b88] ss:$88 sps:$4 sm:$0xff]  }
 0x13f   : > { %11288 = vmatpush1.bf16.msra.mxu1 %v15868_v37  ;;  %v15949_v37 = vld [vmem:[%s18410_s13 + $0x1090] ss:$88 sps:$4 sm:$0xff]  }
 0x140   : > { %11452 = vmatpush1.bf16.msra.mxu0 %v15871_v38  ;;  %11289 = vmatprep.subr.bf16.mxu1 %v15876_v39  ;;  %v15954_v38 = vld [vmem:[%s18410_s13 + $0x1c3c] ss:$88 sps:$4 sm:$0xff]  }
 0x141   : > { %11453 = vmatprep.subr.bf16.mxu0 %v15879_v40  ;;  %v15957_v39 = vld [vmem:[%s18410_s13 + $0x1144] ss:$88 sps:$4 sm:$0xff]   ;;  %v15952_v40 = vld [vmem:[%s18410_s13 + $0x1c38] ss:$88 sps:$4 sm:$0xff]  }
 0x143   : > { %11290 = vmatpush1.bf16.msra.mxu1 %v15874_v41  ;;  %v15955_v41 = vld [vmem:[%s18410_s13 + $0x1140] ss:$88 sps:$4 sm:$0xff]  }
 0x144   : > { %11454 = vmatpush1.bf16.msra.mxu0 %v15877_v42  ;;  %11291 = vmatprep.subr.bf16.mxu1 %v15882_v43  ;;  %v15960_v42 = vld [vmem:[%s18410_s13 + $0x1cec] ss:$88 sps:$4 sm:$0xff]  }
 0x145   : > { %11455 = vmatprep.subr.bf16.mxu0 %v15885_v44  ;;  %v15963_v43 = vld [vmem:[%s18410_s13 + $0x11f4] ss:$88 sps:$4 sm:$0xff]   ;;  %v15958_v44 = vld [vmem:[%s18410_s13 + $0x1ce8] ss:$88 sps:$4 sm:$0xff]  }
 0x147   : > { %11292 = vmatpush1.bf16.msra.mxu1 %v15880_v45  ;;  %v15961_v45 = vld [vmem:[%s18410_s13 + $0x11f0] ss:$88 sps:$4 sm:$0xff]  }
 0x148   : > { %11456 = vmatpush1.bf16.msra.mxu0 %v15883_v47  ;;  %11293 = vmatprep.subr.bf16.mxu1 %v15888_v48  ;;  %v15966_v47 = vld [vmem:[%s18410_s13 + $0x1d9c] ss:$88 sps:$4 sm:$0xff]  }
 0x149   : > { %11457 = vmatprep.subr.bf16.mxu0 %v15891_v49  ;;  %v15969_v48 = vld [vmem:[%s18410_s13 + $0x12a4] ss:$88 sps:$4 sm:$0xff]   ;;  %v15964_v49 = vld [vmem:[%s18410_s13 + $0x1d98] ss:$88 sps:$4 sm:$0xff]  }
 0x14b   : > { %11294 = vmatpush1.bf16.msra.mxu1 %v15886_v50  ;;  %v15967_v50 = vld [vmem:[%s18410_s13 + $0x12a0] ss:$88 sps:$4 sm:$0xff]  }
 0x14c   : > { %11458 = vmatpush1.bf16.msra.mxu0 %v15889_v51  ;;  %11295 = vmatprep.subr.bf16.mxu1 %v15894_v52  ;;  %v15972_v51 = vld [vmem:[%s18410_s13 + $0x1e4c] ss:$88 sps:$4 sm:$0xff]  }
 0x14d   : > { %11459 = vmatprep.subr.bf16.mxu0 %v15897_v53  ;;  %v15975_v52 = vld [vmem:[%s18410_s13 + $0x1354] ss:$88 sps:$4 sm:$0xff]   ;;  %v15970_v53 = vld [vmem:[%s18410_s13 + $0x1e48] ss:$88 sps:$4 sm:$0xff]  }
 0x14f   : > { %11296 = vmatpush1.bf16.msra.mxu1 %v15892_v54  ;;  %v15973_v54 = vld [vmem:[%s18410_s13 + $0x1350] ss:$88 sps:$4 sm:$0xff]  }
 0x150   : > { %11460 = vmatpush1.bf16.msra.mxu0 %v15895_v55  ;;  %11306 = vmatprep.subr.bf16.mxu1 %v15900_v56  ;;  %v15978_v55 = vld [vmem:[%s18410_s13 + $0x1efc] ss:$88 sps:$4 sm:$0xff]  }
 0x151   : > { %11470 = vmatprep.subr.bf16.mxu0 %v15903_v57  ;;  %v15981_v56 = vld [vmem:[%s18410_s13 + $0x1404] ss:$88 sps:$4 sm:$0xff]   ;;  %v15976_v57 = vld [vmem:[%s18410_s13 + $0x1ef8] ss:$88 sps:$4 sm:$0xff]  }
 0x152   : > { %11298 = vmatmul.mubr.bf16.vlgmr.msra.gmra.mrb[4].mxu1 %v18589_v33 }
 0x153   : > { %11462 = vmatmul.mubr.bf16.vlgmr.msra.gmra.mrb[4].mxu0 %v18503_v18  ;;  %11307 = vmatpush1.bf16.msra.mxu1 %v15898_v58  ;;  %v15979_v58 = vld [vmem:[%s18410_s13 + $0x1400] ss:$88 sps:$4 sm:$0xff]  }
 0x154   : > { %11471 = vmatpush1.bf16.msra.mxu0 %v15901_v59  ;;  %11308 = vmatprep.subr.bf16.mxu1 %v15906_v61  ;;  %v15984_v59 = vld [vmem:[%s18410_s13 + $0x1fac] ss:$88 sps:$4 sm:$0xff]  }
 0x155   : > { %11472 = vmatprep.subr.bf16.mxu0 %v15909_v62  ;;  %11338 = vmatprep.mubr.bf16.mxu1 %v18487_v2  ;;  %v15987_v61 = vld [vmem:[%s18410_s13 + $0x14b4] ss:$88 sps:$4 sm:$0xff]   ;;  %v15982_v62 = vld [vmem:[%s18410_s13 + $0x1fa8] ss:$88 sps:$4 sm:$0xff]  }
 0x156   : > { %11502 = vmatprep.mubr.bf16.mxu0 %v18517_v26 }
 0x157   : > { %11309 = vmatpush1.bf16.msra.mxu1 %v15904_v63  ;;  %v15985_v63 = vld [vmem:[%s18410_s13 + $0x14b0] ss:$88 sps:$4 sm:$0xff]  }
 0x158   : > { %11473 = vmatpush1.bf16.msra.mxu0 %v15907_v0  ;;  %11310 = vmatprep.subr.bf16.mxu1 %v15912_v1  ;;  %v15990_v0 = vld [vmem:[%s18410_s13 + $0x205c] ss:$88 sps:$4 sm:$0xff]  }
 0x159   : > { %11474 = vmatprep.subr.bf16.mxu0 %v15915_v3  ;;  %v15993_v1 = vld [vmem:[%s18410_s13 + $0x1564] ss:$88 sps:$4 sm:$0xff]   ;;  %v15988_v3 = vld [vmem:[%s18410_s13 + $0x2058] ss:$88 sps:$4 sm:$0xff]  }
 0x15b   : > { %11311 = vmatpush1.bf16.msra.mxu1 %v15910_v4  ;;  %v15991_v4 = vld [vmem:[%s18410_s13 + $0x1560] ss:$88 sps:$4 sm:$0xff]  }
 0x15c   : > { %11475 = vmatpush1.bf16.msra.mxu0 %v15913_v5  ;;  %11312 = vmatprep.subr.bf16.mxu1 %v15918_v6  ;;  %v15996_v5 = vld [vmem:[%s18410_s13 + $0x210c] ss:$88 sps:$4 sm:$0xff]  }
 0x15d   : > { %11476 = vmatprep.subr.bf16.mxu0 %v15921_v7  ;;  %v15999_v6 = vld [vmem:[%s18410_s13 + $0x1614] ss:$88 sps:$4 sm:$0xff]   ;;  %v15994_v7 = vld [vmem:[%s18410_s13 + $0x2108] ss:$88 sps:$4 sm:$0xff]  }
 0x15f   : > { %11313 = vmatpush1.bf16.msra.mxu1 %v15916_v8  ;;  %v15997_v8 = vld [vmem:[%s18410_s13 + $0x1610] ss:$88 sps:$4 sm:$0xff]  }
 0x160   : > { %11477 = vmatpush1.bf16.msra.mxu0 %v15919_v9  ;;  %11314 = vmatprep.subr.bf16.mxu1 %v15924_v10  ;;  %v16002_v9 = vld [vmem:[%s18410_s13 + $0x21bc] ss:$88 sps:$4 sm:$0xff]  }
 0x161   : > { %11478 = vmatprep.subr.bf16.mxu0 %v15927_v11  ;;  %v16005_v10 = vld [vmem:[%s18410_s13 + $0x16c4] ss:$88 sps:$4 sm:$0xff]   ;;  %v16000_v11 = vld [vmem:[%s18410_s13 + $0x21b8] ss:$88 sps:$4 sm:$0xff]  }
 0x163   : > { %11315 = vmatpush1.bf16.msra.mxu1 %v15922_v12  ;;  %v16003_v12 = vld [vmem:[%s18410_s13 + $0x16c0] ss:$88 sps:$4 sm:$0xff]  }
 0x164   : > { %11479 = vmatpush1.bf16.msra.mxu0 %v15925_v13  ;;  %11316 = vmatprep.subr.bf16.mxu1 %v15930_v14  ;;  %v16008_v13 = vld [vmem:[%s18410_s13 + $0x226c] ss:$88 sps:$4 sm:$0xff]  }
 0x165   : > { %11480 = vmatprep.subr.bf16.mxu0 %v15933_v15  ;;  %v16011_v14 = vld [vmem:[%s18410_s13 + $0x1774] ss:$88 sps:$4 sm:$0xff]   ;;  %v16006_v15 = vld [vmem:[%s18410_s13 + $0x2268] ss:$88 sps:$4 sm:$0xff]  }
 0x167   : > { %11317 = vmatpush1.bf16.msra.mxu1 %v15928_v16  ;;  %v16009_v16 = vld [vmem:[%s18410_s13 + $0x1770] ss:$88 sps:$4 sm:$0xff]  }
 0x168   : > { %11481 = vmatpush1.bf16.msra.mxu0 %v15931_v17  ;;  %11318 = vmatprep.subr.bf16.mxu1 %v15936_v20  ;;  %v16014_v17 = vld [vmem:[%s18410_s13 + $0x231c] ss:$88 sps:$4 sm:$0xff]  }
 0x169   : > { %11482 = vmatprep.subr.bf16.mxu0 %v15939_v21  ;;  %v16017_v20 = vld [vmem:[%s18410_s13 + $0x1824] ss:$88 sps:$4 sm:$0xff]   ;;  %v16012_v21 = vld [vmem:[%s18410_s13 + $0x2318] ss:$88 sps:$4 sm:$0xff]  }
 0x16b   : > { %11319 = vmatpush1.bf16.msra.mxu1 %v15934_v24  ;;  %v16015_v24 = vld [vmem:[%s18410_s13 + $0x1820] ss:$88 sps:$4 sm:$0xff]  }
 0x16c   : > { %11483 = vmatpush1.bf16.msra.mxu0 %v15937_v25  ;;  %11320 = vmatprep.subr.bf16.mxu1 %v15942_v28  ;;  %v16020_v25 = vld [vmem:[%s18410_s13 + $0x23cc] ss:$88 sps:$4 sm:$0xff]  }
 0x16d   : > { %11484 = vmatprep.subr.bf16.mxu0 %v15945_v29  ;;  %v16023_v28 = vld [vmem:[%s18410_s13 + $0x18d4] ss:$88 sps:$4 sm:$0xff]   ;;  %v16018_v29 = vld [vmem:[%s18410_s13 + $0x23c8] ss:$88 sps:$4 sm:$0xff]  }
 0x16f   : > { %11321 = vmatpush1.bf16.msra.mxu1 %v15940_v30  ;;  %v16021_v30 = vld [vmem:[%s18410_s13 + $0x18d0] ss:$88 sps:$4 sm:$0xff]  }
 0x170   : > { %11485 = vmatpush1.bf16.msra.mxu0 %v15943_v31  ;;  %11322 = vmatprep.subr.bf16.mxu1 %v15948_v32  ;;  %v16026_v31 = vld [vmem:[%s18410_s13 + $0x247c] ss:$88 sps:$4 sm:$0xff]  }
 0x171   : > { %11486 = vmatprep.subr.bf16.mxu0 %v15951_v35  ;;  %v16029_v32 = vld [vmem:[%s18410_s13 + $0x1984] ss:$88 sps:$4 sm:$0xff]   ;;  %v16024_v35 = vld [vmem:[%s18410_s13 + $0x2478] ss:$88 sps:$4 sm:$0xff]  }
 0x173   : > { %11323 = vmatpush1.bf16.msra.mxu1 %v15946_v36  ;;  %v16027_v36 = vld [vmem:[%s18410_s13 + $0x1980] ss:$88 sps:$4 sm:$0xff]  }
 0x174   : > { %11487 = vmatpush1.bf16.msra.mxu0 %v15949_v37  ;;  %11324 = vmatprep.subr.bf16.mxu1 %v15954_v38  ;;  %v16032_v37 = vld [vmem:[%s18410_s13 + $0x252c] ss:$88 sps:$4 sm:$0xff]  }
 0x175   : > { %11488 = vmatprep.subr.bf16.mxu0 %v15957_v39  ;;  %v16035_v38 = vld [vmem:[%s18410_s13 + $0x1a34] ss:$88 sps:$4 sm:$0xff]  }
 0x177   : > { %11325 = vmatpush1.bf16.msra.mxu1 %v15952_v40 }
 0x178   : > { %11489 = vmatpush1.bf16.msra.mxu0 %v15955_v41  ;;  %11326 = vmatprep.subr.bf16.mxu1 %v15960_v42  ;;  %v16030_v42 = vld [vmem:[%s18410_s13 + $0x2528] ss:$88 sps:$4 sm:$0xff]  }
 0x179   : > { %11490 = vmatprep.subr.bf16.mxu0 %v15963_v43  ;;  %v16033_v43 = vld [vmem:[%s18410_s13 + $0x1a30] ss:$88 sps:$4 sm:$0xff]  }
 0x17b   : > { %11327 = vmatpush1.bf16.msra.mxu1 %v15958_v44 }
 0x17c   : > { %11491 = vmatpush1.bf16.msra.mxu0 %v15961_v45  ;;  %11328 = vmatprep.subr.bf16.mxu1 %v15966_v47  ;;  %v16038_v45 = vld [vmem:[%s18410_s13 + $0x25dc] ss:$88 sps:$4 sm:$0xff]  }
 0x17d   : > { %11492 = vmatprep.subr.bf16.mxu0 %v15969_v48  ;;  %v16041_v47 = vld [vmem:[%s18410_s13 + $0x1ae4] ss:$88 sps:$4 sm:$0xff]   ;;  %v16036_v48 = vld [vmem:[%s18410_s13 + $0x25d8] ss:$88 sps:$4 sm:$0xff]  }
 0x17f   : > { %11329 = vmatpush1.bf16.msra.mxu1 %v15964_v49  ;;  %v16039_v49 = vld [vmem:[%s18410_s13 + $0x1ae0] ss:$88 sps:$4 sm:$0xff]  }
 0x180   : > { %11493 = vmatpush1.bf16.msra.mxu0 %v15967_v50  ;;  %11330 = vmatprep.subr.bf16.mxu1 %v15972_v51  ;;  %v16044_v50 = vld [vmem:[%s18410_s13 + $0x268c] ss:$88 sps:$4 sm:$0xff]  }
 0x181   : > { %11494 = vmatprep.subr.bf16.mxu0 %v15975_v52  ;;  %v16047_v51 = vld [vmem:[%s18410_s13 + $0x1b94] ss:$88 sps:$4 sm:$0xff]   ;;  %v16042_v52 = vld [vmem:[%s18410_s13 + $0x2688] ss:$88 sps:$4 sm:$0xff]  }
 0x183   : > { %11331 = vmatpush1.bf16.msra.mxu1 %v15970_v53  ;;  %v16045_v53 = vld [vmem:[%s18410_s13 + $0x1b90] ss:$88 sps:$4 sm:$0xff]  }
 0x184   : > { %11495 = vmatpush1.bf16.msra.mxu0 %v15973_v54  ;;  %11332 = vmatprep.subr.bf16.mxu1 %v15978_v55  ;;  %v16050_v54 = vld [vmem:[%s18410_s13 + $0x273c] ss:$88 sps:$4 sm:$0xff]  }
 0x185   : > { %11496 = vmatprep.subr.bf16.mxu0 %v15981_v56  ;;  %v16053_v55 = vld [vmem:[%s18410_s13 + $0x1c44] ss:$88 sps:$4 sm:$0xff]   ;;  %v16048_v56 = vld [vmem:[%s18410_s13 + $0x2738] ss:$88 sps:$4 sm:$0xff]  }
 0x187   : > { %11333 = vmatpush1.bf16.msra.mxu1 %v15976_v57  ;;  %v16051_v57 = vld [vmem:[%s18410_s13 + $0x1c40] ss:$88 sps:$4 sm:$0xff]  }
 0x188   : > { %11497 = vmatpush1.bf16.msra.mxu0 %v15979_v58  ;;  %11334 = vmatprep.subr.bf16.mxu1 %v15984_v59  ;;  %v16056_v58 = vld [vmem:[%s18410_s13 + $0x27ec] ss:$88 sps:$4 sm:$0xff]  }
 0x189   : > { %11498 = vmatprep.subr.bf16.mxu0 %v15987_v61  ;;  %v16059_v59 = vld [vmem:[%s18410_s13 + $0x1cf4] ss:$88 sps:$4 sm:$0xff]   ;;  %v16054_v61 = vld [vmem:[%s18410_s13 + $0x27e8] ss:$88 sps:$4 sm:$0xff]  }
 0x18b   : > { %11335 = vmatpush1.bf16.msra.mxu1 %v15982_v62  ;;  %v16057_v62 = vld [vmem:[%s18410_s13 + $0x1cf0] ss:$88 sps:$4 sm:$0xff]  }
 0x18c   : > { %11499 = vmatpush1.bf16.msra.mxu0 %v15985_v63  ;;  %11336 = vmatprep.subr.bf16.mxu1 %v15990_v0  ;;  %v16062_v63 = vld [vmem:[%s18410_s13 + $0x289c] ss:$88 sps:$4 sm:$0xff]  }
 0x18d   : > { %11500 = vmatprep.subr.bf16.mxu0 %v15993_v1  ;;  %v16065_v0 = vld [vmem:[%s18410_s13 + $0x1da4] ss:$88 sps:$4 sm:$0xff]   ;;  %v16060_v1 = vld [vmem:[%s18410_s13 + $0x2898] ss:$88 sps:$4 sm:$0xff]  }
 0x18f   : > { %11337 = vmatpush1.bf16.msra.mxu1 %v15988_v3  ;;  %v16063_v3 = vld [vmem:[%s18410_s13 + $0x1da0] ss:$88 sps:$4 sm:$0xff]  }
 0x190   : > { %11501 = vmatpush1.bf16.msra.mxu0 %v15991_v4  ;;  %11347 = vmatprep.subr.bf16.mxu1 %v15996_v5  ;;  %v16068_v4 = vld [vmem:[%s18410_s13 + $0x294c] ss:$88 sps:$4 sm:$0xff]  }
 0x191   : > { %11511 = vmatprep.subr.bf16.mxu0 %v15999_v6  ;;  %v16071_v5 = vld [vmem:[%s18410_s13 + $0x1e54] ss:$88 sps:$4 sm:$0xff]   ;;  %v16066_v6 = vld [vmem:[%s18410_s13 + $0x2948] ss:$88 sps:$4 sm:$0xff]  }
 0x192   : > { %11339 = vmatmul.mubr.bf16.vlgmr.msra.gmra.mrb[4].mxu1 %v18505_v19 }
 0x193   : > { %11503 = vmatmul.mubr.bf16.vlgmr.msra.gmra.mrb[4].mxu0 %v18589_v33  ;;  %11348 = vmatpush1.bf16.msra.mxu1 %v15994_v7  ;;  %v16069_v7 = vld [vmem:[%s18410_s13 + $0x1e50] ss:$88 sps:$4 sm:$0xff]  }
 0x194   : > { %11512 = vmatpush1.bf16.msra.mxu0 %v15997_v8  ;;  %11349 = vmatprep.subr.bf16.mxu1 %v16002_v9  ;;  %v16074_v8 = vld [vmem:[%s18410_s13 + $0x29fc] ss:$88 sps:$4 sm:$0xff]  }
 0x195   : > { %11513 = vmatprep.subr.bf16.mxu0 %v16005_v10  ;;  %11379 = vmatprep.mubr.bf16.mxu1 %v18521_v27  ;;  %v16077_v9 = vld [vmem:[%s18410_s13 + $0x1f04] ss:$88 sps:$4 sm:$0xff]   ;;  %v16072_v10 = vld [vmem:[%s18410_s13 + $0x29f8] ss:$88 sps:$4 sm:$0xff]  }
 0x196   : > { %11543 = vmatprep.mubr.bf16.mxu0 %v18487_v2 }
 0x197   : > { %11350 = vmatpush1.bf16.msra.mxu1 %v16000_v11  ;;  %v16075_v11 = vld [vmem:[%s18410_s13 + $0x1f00] ss:$88 sps:$4 sm:$0xff]  }
 0x198   : > { %11514 = vmatpush1.bf16.msra.mxu0 %v16003_v12  ;;  %11351 = vmatprep.subr.bf16.mxu1 %v16008_v13  ;;  %v16080_v12 = vld [vmem:[%s18410_s13 + $0x2aac] ss:$88 sps:$4 sm:$0xff]  }
 0x199   : > { %11515 = vmatprep.subr.bf16.mxu0 %v16011_v14  ;;  %v16083_v13 = vld [vmem:[%s18410_s13 + $0x1fb4] ss:$88 sps:$4 sm:$0xff]   ;;  %v16078_v14 = vld [vmem:[%s18410_s13 + $0x2aa8] ss:$88 sps:$4 sm:$0xff]  }
 0x19b   : > { %11352 = vmatpush1.bf16.msra.mxu1 %v16006_v15  ;;  %v16081_v15 = vld [vmem:[%s18410_s13 + $0x1fb0] ss:$88 sps:$4 sm:$0xff]  }
 0x19c   : > { %11516 = vmatpush1.bf16.msra.mxu0 %v16009_v16  ;;  %11353 = vmatprep.subr.bf16.mxu1 %v16014_v17  ;;  %v16086_v16 = vld [vmem:[%s18410_s13 + $0x2b5c] ss:$88 sps:$4 sm:$0xff]  }
 0x19d   : > { %11517 = vmatprep.subr.bf16.mxu0 %v16017_v20  ;;  %v16089_v17 = vld [vmem:[%s18410_s13 + $0x2064] ss:$88 sps:$4 sm:$0xff]   ;;  %v16084_v20 = vld [vmem:[%s18410_s13 + $0x2b58] ss:$88 sps:$4 sm:$0xff]  }
 0x19f   : > { %11354 = vmatpush1.bf16.msra.mxu1 %v16012_v21  ;;  %v16087_v21 = vld [vmem:[%s18410_s13 + $0x2060] ss:$88 sps:$4 sm:$0xff]  }
 0x1a0   : > { %11518 = vmatpush1.bf16.msra.mxu0 %v16015_v24  ;;  %11355 = vmatprep.subr.bf16.mxu1 %v16020_v25  ;;  %v16092_v24 = vld [vmem:[%s18410_s13 + $0x2c0c] ss:$88 sps:$4 sm:$0xff]  }
 0x1a1   : > { %11519 = vmatprep.subr.bf16.mxu0 %v16023_v28  ;;  %v16095_v25 = vld [vmem:[%s18410_s13 + $0x2114] ss:$88 sps:$4 sm:$0xff]   ;;  %v16090_v28 = vld [vmem:[%s18410_s13 + $0x2c08] ss:$88 sps:$4 sm:$0xff]  }
 0x1a3   : > { %11356 = vmatpush1.bf16.msra.mxu1 %v16018_v29  ;;  %v16093_v29 = vld [vmem:[%s18410_s13 + $0x2110] ss:$88 sps:$4 sm:$0xff]  }
 0x1a4   : > { %11520 = vmatpush1.bf16.msra.mxu0 %v16021_v30  ;;  %11357 = vmatprep.subr.bf16.mxu1 %v16026_v31  ;;  %v16098_v30 = vld [vmem:[%s18410_s13 + $0x2cbc] ss:$88 sps:$4 sm:$0xff]  }
 0x1a5   : > { %11521 = vmatprep.subr.bf16.mxu0 %v16029_v32  ;;  %v18827_v39 = vpop.f32.mrb[0].mxu1  ;;  %v16101_v31 = vld [vmem:[%s18410_s13 + $0x21c4] ss:$88 sps:$4 sm:$0xff]   ;;  %v16096_v32 = vld [vmem:[%s18410_s13 + $0x2cb8] ss:$88 sps:$4 sm:$0xff]  }
 0x1a6   : > { %v18829_v40 = vpop.f32.mrb[1].mxu1 }
 0x1a7   : > { %v11098_v41 = vpop.f32.mrb[2].mxu1  ;;  %11358 = vmatpush1.bf16.msra.mxu1 %v16024_v35  ;;  %v16099_v35 = vld [vmem:[%s18410_s13 + $0x21c0] ss:$88 sps:$4 sm:$0xff]  }
 0x1a8   : > { %11522 = vmatpush1.bf16.msra.mxu0 %v16027_v36  ;;  %v11099_v44 = vpop.f32.mrb[3].mxu1  ;;  %11359 = vmatprep.subr.bf16.mxu1 %v16032_v37  ;;  %v16104_v36 = vld [vmem:[%s18410_s13 + $0x2d6c] ss:$88 sps:$4 sm:$0xff]   ;;  %v16105_v41 = vld [vmem:[%s18410_s13 + $0x2270] ss:$88 sps:$4 sm:$0xff]  }
 0x1a9   : > { %11523 = vmatprep.subr.bf16.mxu0 %v16035_v38  ;;  %v16107_v37 = vld [vmem:[%s18410_s13 + $0x2274] ss:$88 sps:$4 sm:$0xff]   ;;  %v16102_v38 = vld [vmem:[%s18410_s13 + $0x2d68] ss:$88 sps:$4 sm:$0xff]  }
 0x1aa   : > { %v2103_v44 = vld [vmem:[%s18416_s8] sm:$0xff] }
 0x1ab   : > { %11360 = vmatpush1.bf16.msra.mxu1 %v16030_v42  ;;  %v16110_v42 = vld [vmem:[%s18410_s13 + $0x2e1c] ss:$88 sps:$4 sm:$0xff]  }
 0x1ac   : > { %11524 = vmatpush1.bf16.msra.mxu0 %v16033_v43  ;;  %11361 = vmatprep.subr.bf16.mxu1 %v16038_v45  ;;  %v16113_v43 = vld [vmem:[%s18410_s13 + $0x2324] ss:$88 sps:$4 sm:$0xff]   ;;  %v16108_v45 = vld [vmem:[%s18410_s13 + $0x2e18] ss:$88 sps:$4 sm:$0xff]  }
 0x1ad   : > { %11525 = vmatprep.subr.bf16.mxu0 %v16041_v47  ;;  %v16111_v47 = vld [vmem:[%s18410_s13 + $0x2320] ss:$88 sps:$4 sm:$0xff]  }
 0x1af   : > { %11362 = vmatpush1.bf16.msra.mxu1 %v16036_v48  ;;  %v18891_v48 = vsub.s32 0, %v18464_v46 }
 0x1b0   : > { %11526 = vmatpush1.bf16.msra.mxu0 %v16039_v49  ;;  %11363 = vmatprep.subr.bf16.mxu1 %v16044_v50  ;;  %v16116_v49 = vld [vmem:[%s18410_s13 + $0x2ecc] ss:$88 sps:$4 sm:$0xff]  }
 0x1b1   : > { %11527 = vmatprep.subr.bf16.mxu0 %v16047_v51  ;;  %v16119_v50 = vld [vmem:[%s18410_s13 + $0x23d4] ss:$88 sps:$4 sm:$0xff]   ;;  %v18896_v51 = vsub.s32 1, %v18464_v46 }
 0x1b3   : > { %11364 = vmatpush1.bf16.msra.mxu1 %v16042_v52  ;;  %v16114_v52 = vld [vmem:[%s18410_s13 + $0x2ec8] ss:$88 sps:$4 sm:$0xff]  }
 0x1b4   : > { %11528 = vmatpush1.bf16.msra.mxu0 %v16045_v53  ;;  %11365 = vmatprep.subr.bf16.mxu1 %v16050_v54  ;;  %v16117_v53 = vld [vmem:[%s18410_s13 + $0x23d0] ss:$88 sps:$4 sm:$0xff]   ;;  %v2112_v54 = vrot.slane %v2103_v44, %v18891_v48 }
 0x1b5   : > { %11529 = vmatprep.subr.bf16.mxu0 %v16053_v55  ;;  %v16122_v55 = vld [vmem:[%s18410_s13 + $0x2f7c] ss:$88 sps:$4 sm:$0xff]  }
 0x1b7   : > { %11366 = vmatpush1.bf16.msra.mxu1 %v16048_v56  ;;  %v16125_v56 = vld [vmem:[%s18410_s13 + $0x2484] ss:$88 sps:$4 sm:$0xff]  }
 0x1b8   : > { %11530 = vmatpush1.bf16.msra.mxu0 %v16051_v57  ;;  %11367 = vmatprep.subr.bf16.mxu1 %v16056_v58  ;;  %v2116_v57 = vrot.slane %v2103_v44, %v18896_v51  ;;  %v16120_v58 = vld [vmem:[%s18410_s13 + $0x2f78] ss:$88 sps:$4 sm:$0xff]   ;;  %v16173_v44 = vld [vmem:[%s18410_s13 + $0x2a04] ss:$88 sps:$4 sm:$0xff]  }
 0x1b9   : > { %11531 = vmatprep.subr.bf16.mxu0 %v16059_v59  ;;  %v16123_v59 = vld [vmem:[%s18410_s13 + $0x2480] ss:$88 sps:$4 sm:$0xff]  }
 0x1bb   : > { %11368 = vmatpush1.bf16.msra.mxu1 %v16054_v61  ;;  %v15264_v61 = vadd.f32 %v18827_v39, %v2112_v54  ;;  %v16126_v39 = vld [vmem:[%s18410_s13 + $0x3028] ss:$88 sps:$4 sm:$0xff]   ;;  %v16182_v54 = vld [vmem:[%s18410_s13 + $0x365c] ss:$88 sps:$4 sm:$0xff]  }
 0x1bc   : > { %11532 = vmatpush1.bf16.msra.mxu0 %v16057_v62  ;;  %11369 = vmatprep.subr.bf16.mxu1 %v16062_v63  ;;  %v16128_v62 = vld [vmem:[%s18410_s13 + $0x302c] ss:$88 sps:$4 sm:$0xff]  }
 0x1bd   : > { %11533 = vmatprep.subr.bf16.mxu0 %v16065_v0  ;;  %v16131_v63 = vld [vmem:[%s18410_s13 + $0x2534] ss:$88 sps:$4 sm:$0xff]   ;;  %v15266_v0 = vadd.f32 %v18829_v40, %v2116_v57  ;;  %v16183_v57 = vld [vmem:[%s18410_s13 + $0x2b60] ss:$88 sps:$4 sm:$0xff]  }
 0x1be   : > { %v16134_v40 = vld [vmem:[%s18410_s13 + $0x30dc] ss:$88 sps:$4 sm:$0xff]  }
 0x1bf   : > { %11370 = vmatpush1.bf16.msra.mxu1 %v16060_v1 }
 0x1c0   : > { %11534 = vmatpush1.bf16.msra.mxu0 %v16063_v3  ;;  %11371 = vmatprep.subr.bf16.mxu1 %v16068_v4 }
 0x1c1   : > { %11535 = vmatprep.subr.bf16.mxu0 %v16071_v5 }
 0x1c3   : > { %11372 = vmatpush1.bf16.msra.mxu1 %v16066_v6 }
 0x1c4   : > { %11536 = vmatpush1.bf16.msra.mxu0 %v16069_v7  ;;  %11373 = vmatprep.subr.bf16.mxu1 %v16074_v8  ;;  %v16129_v7 = vld [vmem:[%s18410_s13 + $0x2530] ss:$88 sps:$4 sm:$0xff]  }
 0x1c5   : > { %11537 = vmatprep.subr.bf16.mxu0 %v16077_v9  ;;  %v16137_v9 = vld [vmem:[%s18410_s13 + $0x25e4] ss:$88 sps:$4 sm:$0xff]  }
 0x1c7   : > { %11374 = vmatpush1.bf16.msra.mxu1 %v16072_v10 }
 0x1c8   : > { %11538 = vmatpush1.bf16.msra.mxu0 %v16075_v11  ;;  %11375 = vmatprep.subr.bf16.mxu1 %v16080_v12  ;;  %v16132_v11 = vld [vmem:[%s18410_s13 + $0x30d8] ss:$88 sps:$4 sm:$0xff]  }
 0x1c9   : > { %11539 = vmatprep.subr.bf16.mxu0 %v16083_v13  ;;  %v16135_v12 = vld [vmem:[%s18410_s13 + $0x25e0] ss:$88 sps:$4 sm:$0xff]   ;;  %v16140_v13 = vld [vmem:[%s18410_s13 + $0x318c] ss:$88 sps:$4 sm:$0xff]  }
 0x1cb   : > { %11376 = vmatpush1.bf16.msra.mxu1 %v16078_v14  ;;  %v16143_v14 = vld [vmem:[%s18410_s13 + $0x2694] ss:$88 sps:$4 sm:$0xff]  }
 0x1cc   : > { %11540 = vmatpush1.bf16.msra.mxu0 %v16081_v15  ;;  %11377 = vmatprep.subr.bf16.mxu1 %v16086_v16  ;;  %v16138_v15 = vld [vmem:[%s18410_s13 + $0x3188] ss:$88 sps:$4 sm:$0xff]  }
 0x1cd   : > { %11541 = vmatprep.subr.bf16.mxu0 %v16089_v17  ;;  %v16141_v16 = vld [vmem:[%s18410_s13 + $0x2690] ss:$88 sps:$4 sm:$0xff]   ;;  %v16146_v17 = vld [vmem:[%s18410_s13 + $0x323c] ss:$88 sps:$4 sm:$0xff]  }
 0x1cf   : > { %11378 = vmatpush1.bf16.msra.mxu1 %v16084_v20  ;;  %v16149_v20 = vld [vmem:[%s18410_s13 + $0x2744] ss:$88 sps:$4 sm:$0xff]  }
 0x1d0   : > { %11542 = vmatpush1.bf16.msra.mxu0 %v16087_v21  ;;  %11388 = vmatprep.subr.bf16.mxu1 %v16092_v24  ;;  %v16144_v21 = vld [vmem:[%s18410_s13 + $0x3238] ss:$88 sps:$4 sm:$0xff]  }
 0x1d1   : > { %11552 = vmatprep.subr.bf16.mxu0 %v16095_v25  ;;  %v16147_v24 = vld [vmem:[%s18410_s13 + $0x2740] ss:$88 sps:$4 sm:$0xff]   ;;  %v16152_v25 = vld [vmem:[%s18410_s13 + $0x32ec] ss:$88 sps:$4 sm:$0xff]  }
 0x1d2   : > { %11380 = vmatmul.mubr.bf16.vlgmr.msra.gmra.mrb[4].mxu1 %v18593_v34 }
 0x1d3   : > { %11544 = vmatmul.mubr.bf16.vlgmr.msra.gmra.mrb[4].mxu0 %v18505_v19  ;;  %11389 = vmatpush1.bf16.msra.mxu1 %v16090_v28  ;;  %v16155_v28 = vld [vmem:[%s18410_s13 + $0x27f4] ss:$88 sps:$4 sm:$0xff]  }
 0x1d4   : > { %11553 = vmatpush1.bf16.msra.mxu0 %v16093_v29  ;;  %11390 = vmatprep.subr.bf16.mxu1 %v16098_v30  ;;  %v16150_v29 = vld [vmem:[%s18410_s13 + $0x32e8] ss:$88 sps:$4 sm:$0xff]  }
 0x1d5   : > { %11554 = vmatprep.subr.bf16.mxu0 %v16101_v31  ;;  %11420 = vmatprep.mubr.bf16.mxu1 %v18509_v22  ;;  %v16153_v30 = vld [vmem:[%s18410_s13 + $0x27f0] ss:$88 sps:$4 sm:$0xff]   ;;  %v16158_v31 = vld [vmem:[%s18410_s13 + $0x339c] ss:$88 sps:$4 sm:$0xff]  }
 0x1d6   : > { %11584 = vmatprep.mubr.bf16.mxu0 %v18521_v27 }
 0x1d7   : > { %11391 = vmatpush1.bf16.msra.mxu1 %v16096_v32  ;;  %v16161_v32 = vld [vmem:[%s18410_s13 + $0x28a4] ss:$88 sps:$4 sm:$0xff]  }
 0x1d8   : > { %11555 = vmatpush1.bf16.msra.mxu0 %v16099_v35  ;;  %11392 = vmatprep.subr.bf16.mxu1 %v16104_v36  ;;  %v16156_v35 = vld [vmem:[%s18410_s13 + $0x3398] ss:$88 sps:$4 sm:$0xff]  }
 0x1d9   : > { %11556 = vmatprep.subr.bf16.mxu0 %v16107_v37  ;;  %v16159_v36 = vld [vmem:[%s18410_s13 + $0x28a0] ss:$88 sps:$4 sm:$0xff]   ;;  %v16164_v37 = vld [vmem:[%s18410_s13 + $0x344c] ss:$88 sps:$4 sm:$0xff]  }
 0x1db   : > { %11393 = vmatpush1.bf16.msra.mxu1 %v16102_v38  ;;  %v16167_v38 = vld [vmem:[%s18410_s13 + $0x2954] ss:$88 sps:$4 sm:$0xff]  }
 0x1dc   : > { %11557 = vmatpush1.bf16.msra.mxu0 %v16105_v41  ;;  %11394 = vmatprep.subr.bf16.mxu1 %v16110_v42  ;;  %v16162_v41 = vld [vmem:[%s18410_s13 + $0x3448] ss:$88 sps:$4 sm:$0xff]  }
 0x1dd   : > { %11558 = vmatprep.subr.bf16.mxu0 %v16113_v43  ;;  %v16165_v42 = vld [vmem:[%s18410_s13 + $0x2950] ss:$88 sps:$4 sm:$0xff]   ;;  %v16170_v43 = vld [vmem:[%s18410_s13 + $0x34fc] ss:$88 sps:$4 sm:$0xff]  }
 0x1df   : > { %11395 = vmatpush1.bf16.msra.mxu1 %v16108_v45  ;;  %v16168_v45 = vld [vmem:[%s18410_s13 + $0x34f8] ss:$88 sps:$4 sm:$0xff]  }
 0x1e0   : > { %11559 = vmatpush1.bf16.msra.mxu0 %v16111_v47  ;;  %11396 = vmatprep.subr.bf16.mxu1 %v16116_v49  ;;  %v16171_v47 = vld [vmem:[%s18410_s13 + $0x2a00] ss:$88 sps:$4 sm:$0xff]   ;;  %v16176_v49 = vld [vmem:[%s18410_s13 + $0x35ac] ss:$88 sps:$4 sm:$0xff]  }
 0x1e1   : > { %11560 = vmatprep.subr.bf16.mxu0 %v16119_v50  ;;  %v16179_v50 = vld [vmem:[%s18410_s13 + $0x2ab4] ss:$88 sps:$4 sm:$0xff]  }
 0x1e3   : > { %11397 = vmatpush1.bf16.msra.mxu1 %v16114_v52  ;;  %v16174_v52 = vld [vmem:[%s18410_s13 + $0x35a8] ss:$88 sps:$4 sm:$0xff]  }
 0x1e4   : > { %11561 = vmatpush1.bf16.msra.mxu0 %v16117_v53  ;;  %11398 = vmatprep.subr.bf16.mxu1 %v16122_v55  ;;  %v16177_v53 = vld [vmem:[%s18410_s13 + $0x2ab0] ss:$88 sps:$4 sm:$0xff]   ;;  %v16185_v55 = vld [vmem:[%s18410_s13 + $0x2b64] ss:$88 sps:$4 sm:$0xff]  }
 0x1e5   : > { %11562 = vmatprep.subr.bf16.mxu0 %v16125_v56  ;;  %v16180_v56 = vld [vmem:[%s18410_s13 + $0x3658] ss:$88 sps:$4 sm:$0xff]  }
 0x1e6   : > { %v11217_v1 = vpop.f32.mrb[0].mxu0 }
 0x1e7   : > { %v18910_v3 = vadd.f32 %v15264_v61, %v11217_v1  ;;  %v11219_v4 = vpop.f32.mrb[1].mxu0  ;;  %11399 = vmatpush1.bf16.msra.mxu1 %v16120_v58  ;;  %v16188_v58 = vld [vmem:[%s18410_s13 + $0x2c14] ss:$88 sps:$4 sm:$0xff]   ;;  %v16186_v61 = vld [vmem:[%s18410_s13 + $0x2c10] ss:$88 sps:$4 sm:$0xff]  }
 0x1e8   : > { %v18912_v5 = vadd.f32 %v15266_v0, %v11219_v4  ;;  %v11221_v6 = vpop.f32.mrb[2].mxu0  ;;  %11563 = vmatpush1.bf16.msra.mxu0 %v16123_v59  ;;  %11400 = vmatprep.subr.bf16.mxu1 %v16128_v62  ;;  %v16191_v59 = vld [vmem:[%s18410_s13 + $0x1c] ss:$88 sps:$4 sm:$0xff]   ;;  %v16189_v62 = vld [vmem:[%s18410_s13 + $0x18] ss:$88 sps:$4 sm:$0xff]  }
 0x1e9   : > { %v11222_v8 = vpop.f32.mrb[3].mxu0  ;;  %11564 = vmatprep.subr.bf16.mxu0 %v16131_v63  ;;  %v16194_v63 = vld [vmem:[%s18410_s13 + $0x2cc4] ss:$88 sps:$4 sm:$0xff]   ;;  %v16192_v1 = vld [vmem:[%s18410_s13 + $0x2cc0] ss:$88 sps:$4 sm:$0xff]  }
 0x1ea   : > { %v13296_v10 = vcombine.low %v18910_v3, %v18912_v5  ;;  %v16197_v0 = vld [vmem:[%s18410_s13 + $0xcc] ss:$88 sps:$4 sm:$0xff]   ;;  %v16195_v4 = vld [vmem:[%s18410_s13 + $0xc8] ss:$88 sps:$4 sm:$0xff]   ;;  %v16201_v8 = vld [vmem:[%s18410_s13 + $0x178] ss:$88 sps:$4 sm:$0xff]  }
 0x1eb   : > { %11401 = vmatpush1.bf16.msra.mxu1 %v16126_v39  ;;  %v16200_v6 = vld [vmem:[%s18410_s13 + $0x2d74] ss:$88 sps:$4 sm:$0xff]   ;;  %v16527_v5 = vld [vmem:[%s18410_s13 + $0x1ba4] ss:$88 sps:$4 sm:$0xff]  }
 0x1ec   : > { %11565 = vmatpush1.bf16.msra.mxu0 %v16129_v7  ;;  %11402 = vmatprep.subr.bf16.mxu1 %v16134_v40  ;;  %v16203_v39 = vld [vmem:[%s18410_s13 + $0x17c] ss:$88 sps:$4 sm:$0xff]   ;;  %v16198_v7 = vld [vmem:[%s18410_s13 + $0x2d70] ss:$88 sps:$4 sm:$0xff]  }
 0x1ed   : > { %11566 = vmatprep.subr.bf16.mxu0 %v16137_v9  ;;  %v16206_v40 = vld [vmem:[%s18410_s13 + $0x2e24] ss:$88 sps:$4 sm:$0xff]  }
 0x1ee   : > { %v16209_v9 = vld [vmem:[%s18410_s13 + $0x22c] ss:$88 sps:$4 sm:$0xff]   ;;  %v16524_v3 = vld [vmem:[%s18410_s13 + $0x269c] ss:$88 sps:$4 sm:$0xff]  }
 0x1ef   : > { %11403 = vmatpush1.bf16.msra.mxu1 %v16132_v11  ;;  %v16204_v11 = vld [vmem:[%s18410_s13 + $0x2e20] ss:$88 sps:$4 sm:$0xff]  }
 0x1f0   : > { %11567 = vmatpush1.bf16.msra.mxu0 %v16135_v12  ;;  %11404 = vmatprep.subr.bf16.mxu1 %v16140_v13  ;;  %v16207_v12 = vld [vmem:[%s18410_s13 + $0x228] ss:$88 sps:$4 sm:$0xff]   ;;  %v16212_v13 = vld [vmem:[%s18410_s13 + $0x2ed4] ss:$88 sps:$4 sm:$0xff]  }
 0x1f1   : > { %11568 = vmatprep.subr.bf16.mxu0 %v16143_v14  ;;  %v16215_v14 = vld [vmem:[%s18410_s13 + $0x2dc] ss:$88 sps:$4 sm:$0xff]  }
 0x1f3   : > { %11405 = vmatpush1.bf16.msra.mxu1 %v16138_v15  ;;  %v16210_v15 = vld [vmem:[%s18410_s13 + $0x2ed0] ss:$88 sps:$4 sm:$0xff]  }
 0x1f4   : > { %11569 = vmatpush1.bf16.msra.mxu0 %v16141_v16  ;;  %11406 = vmatprep.subr.bf16.mxu1 %v16146_v17  ;;  %v16213_v16 = vld [vmem:[%s18410_s13 + $0x2d8] ss:$88 sps:$4 sm:$0xff]   ;;  %v16218_v17 = vld [vmem:[%s18410_s13 + $0x2f84] ss:$88 sps:$4 sm:$0xff]  }
 0x1f5   : > { %11570 = vmatprep.subr.bf16.mxu0 %v16149_v20  ;;  %v16221_v20 = vld [vmem:[%s18410_s13 + $0x38c] ss:$88 sps:$4 sm:$0xff]  }
 0x1f7   : > { %11407 = vmatpush1.bf16.msra.mxu1 %v16144_v21  ;;  %v16216_v21 = vld [vmem:[%s18410_s13 + $0x2f80] ss:$88 sps:$4 sm:$0xff]  }
 0x1f8   : > { %11571 = vmatpush1.bf16.msra.mxu0 %v16147_v24  ;;  %11408 = vmatprep.subr.bf16.mxu1 %v16152_v25  ;;  %v16219_v24 = vld [vmem:[%s18410_s13 + $0x388] ss:$88 sps:$4 sm:$0xff]   ;;  %v16224_v25 = vld [vmem:[%s18410_s13 + $0x3034] ss:$88 sps:$4 sm:$0xff]  }
 0x1f9   : > { %11572 = vmatprep.subr.bf16.mxu0 %v16155_v28  ;;  %v16227_v28 = vld [vmem:[%s18410_s13 + $0x43c] ss:$88 sps:$4 sm:$0xff]  }
 0x1fb   : > { %11409 = vmatpush1.bf16.msra.mxu1 %v16150_v29  ;;  %v16222_v29 = vld [vmem:[%s18410_s13 + $0x3030] ss:$88 sps:$4 sm:$0xff]  }
 0x1fc   : > { %11573 = vmatpush1.bf16.msra.mxu0 %v16153_v30  ;;  %11410 = vmatprep.subr.bf16.mxu1 %v16158_v31  ;;  %v16225_v30 = vld [vmem:[%s18410_s13 + $0x438] ss:$88 sps:$4 sm:$0xff]   ;;  %v16230_v31 = vld [vmem:[%s18410_s13 + $0x30e4] ss:$88 sps:$4 sm:$0xff]  }
 0x1fd   : > { %11574 = vmatprep.subr.bf16.mxu0 %v16161_v32  ;;  %v16233_v32 = vld [vmem:[%s18410_s13 + $0x4ec] ss:$88 sps:$4 sm:$0xff]  }
 0x1ff   : > { %11411 = vmatpush1.bf16.msra.mxu1 %v16156_v35  ;;  %v16228_v35 = vld [vmem:[%s18410_s13 + $0x30e0] ss:$88 sps:$4 sm:$0xff]  }
 0x200   : > { %11575 = vmatpush1.bf16.msra.mxu0 %v16159_v36  ;;  %11412 = vmatprep.subr.bf16.mxu1 %v16164_v37  ;;  %v16231_v36 = vld [vmem:[%s18410_s13 + $0x4e8] ss:$88 sps:$4 sm:$0xff]   ;;  %v16236_v37 = vld [vmem:[%s18410_s13 + $0x3194] ss:$88 sps:$4 sm:$0xff]  }
 0x201   : > { %11576 = vmatprep.subr.bf16.mxu0 %v16167_v38  ;;  %v16239_v38 = vld [vmem:[%s18410_s13 + $0x59c] ss:$88 sps:$4 sm:$0xff]  }
 0x203   : > { %11413 = vmatpush1.bf16.msra.mxu1 %v16162_v41  ;;  %v16234_v41 = vld [vmem:[%s18410_s13 + $0x3190] ss:$88 sps:$4 sm:$0xff]  }
 0x204   : > { %11577 = vmatpush1.bf16.msra.mxu0 %v16165_v42  ;;  %11414 = vmatprep.subr.bf16.mxu1 %v16170_v43  ;;  %v16237_v42 = vld [vmem:[%s18410_s13 + $0x598] ss:$88 sps:$4 sm:$0xff]   ;;  %v16242_v43 = vld [vmem:[%s18410_s13 + $0x3244] ss:$88 sps:$4 sm:$0xff]  }
 0x205   : > { %11578 = vmatprep.subr.bf16.mxu0 %v16173_v44  ;;  %v16245_v44 = vld [vmem:[%s18410_s13 + $0x64c] ss:$88 sps:$4 sm:$0xff]  }
 0x207   : > { %11415 = vmatpush1.bf16.msra.mxu1 %v16168_v45  ;;  %v16240_v45 = vld [vmem:[%s18410_s13 + $0x3240] ss:$88 sps:$4 sm:$0xff]  }
 0x208   : > { %11579 = vmatpush1.bf16.msra.mxu0 %v16171_v47  ;;  %11416 = vmatprep.subr.bf16.mxu1 %v16176_v49  ;;  %v16243_v47 = vld [vmem:[%s18410_s13 + $0x648] ss:$88 sps:$4 sm:$0xff]   ;;  %v16248_v49 = vld [vmem:[%s18410_s13 + $0x32f4] ss:$88 sps:$4 sm:$0xff]  }
 0x209   : > { %11580 = vmatprep.subr.bf16.mxu0 %v16179_v50  ;;  %v16251_v50 = vld [vmem:[%s18410_s13 + $0x6fc] ss:$88 sps:$4 sm:$0xff]  }
 0x20b   : > { %11417 = vmatpush1.bf16.msra.mxu1 %v16174_v52  ;;  %v16246_v52 = vld [vmem:[%s18410_s13 + $0x32f0] ss:$88 sps:$4 sm:$0xff]  }
 0x20c   : > { %11581 = vmatpush1.bf16.msra.mxu0 %v16177_v53  ;;  %11418 = vmatprep.subr.bf16.mxu1 %v16182_v54  ;;  %v16249_v53 = vld [vmem:[%s18410_s13 + $0x6f8] ss:$88 sps:$4 sm:$0xff]   ;;  %v16254_v54 = vld [vmem:[%s18410_s13 + $0x33a4] ss:$88 sps:$4 sm:$0xff]  }
 0x20d   : > { %11582 = vmatprep.subr.bf16.mxu0 %v16185_v55  ;;  %v16257_v55 = vld [vmem:[%s18410_s13 + $0x7ac] ss:$88 sps:$4 sm:$0xff]  }
 0x20f   : > { %11419 = vmatpush1.bf16.msra.mxu1 %v16180_v56  ;;  %v16252_v56 = vld [vmem:[%s18410_s13 + $0x33a0] ss:$88 sps:$4 sm:$0xff]  }
 0x210   : > { %11583 = vmatpush1.bf16.msra.mxu0 %v16183_v57  ;;  %11634 = vmatprep.subr.bf16.mxu1 %v16191_v59  ;;  %v16255_v57 = vld [vmem:[%s18410_s13 + $0x7a8] ss:$88 sps:$4 sm:$0xff]   ;;  %v16263_v59 = vld [vmem:[%s18410_s13 + $0x85c] ss:$88 sps:$4 sm:$0xff]  }
 0x211   : > { %11593 = vmatprep.subr.bf16.mxu0 %v16188_v58  ;;  %v16260_v58 = vld [vmem:[%s18410_s13 + $0x3454] ss:$88 sps:$4 sm:$0xff]  }
 0x212   : > { %11421 = vmatmul.mubr.bf16.vlgmr.msra.gmra.mrb[4].mxu1 %v18511_v23 }
 0x213   : > { %11585 = vmatmul.mubr.bf16.vlgmr.msra.gmra.mrb[4].mxu0 %v18593_v34  ;;  %11635 = vmatpush1.bf16.msra.mxu1 %v16189_v62  ;;  %v16261_v62 = vld [vmem:[%s18410_s13 + $0x858] ss:$88 sps:$4 sm:$0xff]  }
 0x214   : > { %11594 = vmatpush1.bf16.msra.mxu0 %v16186_v61  ;;  %11636 = vmatprep.subr.bf16.mxu1 %v16197_v0  ;;  %v16258_v61 = vld [vmem:[%s18410_s13 + $0x3450] ss:$88 sps:$4 sm:$0xff]   ;;  %v16269_v0 = vld [vmem:[%s18410_s13 + $0x90c] ss:$88 sps:$4 sm:$0xff]  }
 0x215   : > { %11595 = vmatprep.subr.bf16.mxu0 %v16194_v63  ;;  %11625 = vmatprep.mubr.bf16.mxu0 %v18509_v22  ;;  %v16266_v63 = vld [vmem:[%s18410_s13 + $0x3504] ss:$88 sps:$4 sm:$0xff]  }
 0x216   : > { %11666 = vmatprep.mubr.bf16.mxu1 %v18481_v60 }
 0x217   : > { %11637 = vmatpush1.bf16.msra.mxu1 %v16195_v4  ;;  %v16267_v4 = vld [vmem:[%s18410_s13 + $0x908] ss:$88 sps:$4 sm:$0xff]  }
 0x218   : > { %11596 = vmatpush1.bf16.msra.mxu0 %v16192_v1  ;;  %11638 = vmatprep.subr.bf16.mxu1 %v16203_v39  ;;  %v16264_v1 = vld [vmem:[%s18410_s13 + $0x3500] ss:$88 sps:$4 sm:$0xff]   ;;  %v16275_v39 = vld [vmem:[%s18410_s13 + $0x9bc] ss:$88 sps:$4 sm:$0xff]  }
 0x219   : > { %11597 = vmatprep.subr.bf16.mxu0 %v16200_v6  ;;  %v16272_v6 = vld [vmem:[%s18410_s13 + $0x35b4] ss:$88 sps:$4 sm:$0xff]  }
 0x21b   : > { %11639 = vmatpush1.bf16.msra.mxu1 %v16201_v8  ;;  %v16273_v8 = vld [vmem:[%s18410_s13 + $0x9b8] ss:$88 sps:$4 sm:$0xff]  }
 0x21c   : > { %11598 = vmatpush1.bf16.msra.mxu0 %v16198_v7  ;;  %11640 = vmatprep.subr.bf16.mxu1 %v16209_v9  ;;  %v16270_v7 = vld [vmem:[%s18410_s13 + $0x35b0] ss:$88 sps:$4 sm:$0xff]   ;;  %v16281_v9 = vld [vmem:[%s18410_s13 + $0xa6c] ss:$88 sps:$4 sm:$0xff]  }
 0x21d   : > { %11599 = vmatprep.subr.bf16.mxu0 %v16206_v40  ;;  %v16278_v40 = vld [vmem:[%s18410_s13 + $0x3664] ss:$88 sps:$4 sm:$0xff]  }
 0x21f   : > { %11641 = vmatpush1.bf16.msra.mxu1 %v16207_v12  ;;  %v16279_v12 = vld [vmem:[%s18410_s13 + $0xa68] ss:$88 sps:$4 sm:$0xff]  }
 0x220   : > { %11600 = vmatpush1.bf16.msra.mxu0 %v16204_v11  ;;  %11642 = vmatprep.subr.bf16.mxu1 %v16215_v14  ;;  %v16276_v11 = vld [vmem:[%s18410_s13 + $0x3660] ss:$88 sps:$4 sm:$0xff]   ;;  %v16287_v14 = vld [vmem:[%s18410_s13 + $0x24] ss:$88 sps:$4 sm:$0xff]  }
 0x221   : > { %11601 = vmatprep.subr.bf16.mxu0 %v16212_v13  ;;  %v16284_v13 = vld [vmem:[%s18410_s13 + $0xb1c] ss:$88 sps:$4 sm:$0xff]  }
 0x223   : > { %11643 = vmatpush1.bf16.msra.mxu1 %v16213_v16  ;;  %v16285_v16 = vld [vmem:[%s18410_s13 + $0x20] ss:$88 sps:$4 sm:$0xff]  }
 0x224   : > { %11602 = vmatpush1.bf16.msra.mxu0 %v16210_v15  ;;  %11644 = vmatprep.subr.bf16.mxu1 %v16221_v20  ;;  %v16282_v15 = vld [vmem:[%s18410_s13 + $0xb18] ss:$88 sps:$4 sm:$0xff]   ;;  %v16293_v20 = vld [vmem:[%s18410_s13 + $0xd4] ss:$88 sps:$4 sm:$0xff]  }
 0x225   : > { %11603 = vmatprep.subr.bf16.mxu0 %v16218_v17  ;;  %v16290_v17 = vld [vmem:[%s18410_s13 + $0xbcc] ss:$88 sps:$4 sm:$0xff]  }
 0x227   : > { %11645 = vmatpush1.bf16.msra.mxu1 %v16219_v24  ;;  %v16291_v24 = vld [vmem:[%s18410_s13 + $0xd0] ss:$88 sps:$4 sm:$0xff]  }
 0x228   : > { %11604 = vmatpush1.bf16.msra.mxu0 %v16216_v21  ;;  %11646 = vmatprep.subr.bf16.mxu1 %v16227_v28  ;;  %v16288_v21 = vld [vmem:[%s18410_s13 + $0xbc8] ss:$88 sps:$4 sm:$0xff]   ;;  %v16299_v28 = vld [vmem:[%s18410_s13 + $0x184] ss:$88 sps:$4 sm:$0xff]  }
 0x229   : > { %11605 = vmatprep.subr.bf16.mxu0 %v16224_v25  ;;  %v16296_v25 = vld [vmem:[%s18410_s13 + $0xc7c] ss:$88 sps:$4 sm:$0xff]  }
 0x22b   : > { %11647 = vmatpush1.bf16.msra.mxu1 %v16225_v30  ;;  %v16297_v30 = vld [vmem:[%s18410_s13 + $0x180] ss:$88 sps:$4 sm:$0xff]  }
 0x22c   : > { %11606 = vmatpush1.bf16.msra.mxu0 %v16222_v29  ;;  %11648 = vmatprep.subr.bf16.mxu1 %v16233_v32  ;;  %v16294_v29 = vld [vmem:[%s18410_s13 + $0xc78] ss:$88 sps:$4 sm:$0xff]   ;;  %v16305_v32 = vld [vmem:[%s18410_s13 + $0x234] ss:$88 sps:$4 sm:$0xff]  }
 0x22d   : > { %11607 = vmatprep.subr.bf16.mxu0 %v16230_v31  ;;  %v16302_v31 = vld [vmem:[%s18410_s13 + $0xd2c] ss:$88 sps:$4 sm:$0xff]  }
 0x22f   : > { %11649 = vmatpush1.bf16.msra.mxu1 %v16231_v36  ;;  %v16303_v36 = vld [vmem:[%s18410_s13 + $0x230] ss:$88 sps:$4 sm:$0xff]  }
 0x230   : > { %11608 = vmatpush1.bf16.msra.mxu0 %v16228_v35  ;;  %11650 = vmatprep.subr.bf16.mxu1 %v16239_v38  ;;  %v16300_v35 = vld [vmem:[%s18410_s13 + $0xd28] ss:$88 sps:$4 sm:$0xff]   ;;  %v16311_v38 = vld [vmem:[%s18410_s13 + $0x2e4] ss:$88 sps:$4 sm:$0xff]  }
 0x231   : > { %11609 = vmatprep.subr.bf16.mxu0 %v16236_v37  ;;  %v16308_v37 = vld [vmem:[%s18410_s13 + $0xddc] ss:$88 sps:$4 sm:$0xff]  }
 0x233   : > { %11651 = vmatpush1.bf16.msra.mxu1 %v16237_v42  ;;  %v16309_v42 = vld [vmem:[%s18410_s13 + $0x2e0] ss:$88 sps:$4 sm:$0xff]  }
 0x234   : > { %11610 = vmatpush1.bf16.msra.mxu0 %v16234_v41  ;;  %11652 = vmatprep.subr.bf16.mxu1 %v16245_v44  ;;  %v16306_v41 = vld [vmem:[%s18410_s13 + $0xdd8] ss:$88 sps:$4 sm:$0xff]   ;;  %v16317_v44 = vld [vmem:[%s18410_s13 + $0x394] ss:$88 sps:$4 sm:$0xff]  }
 0x235   : > { %11611 = vmatprep.subr.bf16.mxu0 %v16242_v43  ;;  %v16314_v43 = vld [vmem:[%s18410_s13 + $0xe8c] ss:$88 sps:$4 sm:$0xff]  }
 0x237   : > { %11653 = vmatpush1.bf16.msra.mxu1 %v16243_v47  ;;  %v16315_v47 = vld [vmem:[%s18410_s13 + $0x390] ss:$88 sps:$4 sm:$0xff]  }
 0x238   : > { %11612 = vmatpush1.bf16.msra.mxu0 %v16240_v45  ;;  %11654 = vmatprep.subr.bf16.mxu1 %v16251_v50  ;;  %v16312_v45 = vld [vmem:[%s18410_s13 + $0xe88] ss:$88 sps:$4 sm:$0xff]   ;;  %v16323_v50 = vld [vmem:[%s18410_s13 + $0x444] ss:$88 sps:$4 sm:$0xff]  }
 0x239   : > { %11613 = vmatprep.subr.bf16.mxu0 %v16248_v49  ;;  %v16320_v49 = vld [vmem:[%s18410_s13 + $0xf3c] ss:$88 sps:$4 sm:$0xff]  }
 0x23b   : > { %11655 = vmatpush1.bf16.msra.mxu1 %v16249_v53  ;;  %v16321_v53 = vld [vmem:[%s18410_s13 + $0x440] ss:$88 sps:$4 sm:$0xff]  }
 0x23c   : > { %11614 = vmatpush1.bf16.msra.mxu0 %v16246_v52  ;;  %11656 = vmatprep.subr.bf16.mxu1 %v16257_v55  ;;  %v16318_v52 = vld [vmem:[%s18410_s13 + $0xf38] ss:$88 sps:$4 sm:$0xff]   ;;  %v16329_v55 = vld [vmem:[%s18410_s13 + $0x4f4] ss:$88 sps:$4 sm:$0xff]  }
 0x23d   : > { %11615 = vmatprep.subr.bf16.mxu0 %v16254_v54  ;;  %v16326_v54 = vld [vmem:[%s18410_s13 + $0xfec] ss:$88 sps:$4 sm:$0xff]  }
 0x23f   : > { %11657 = vmatpush1.bf16.msra.mxu1 %v16255_v57  ;;  %v16327_v57 = vld [vmem:[%s18410_s13 + $0x4f0] ss:$88 sps:$4 sm:$0xff]  }
 0x240   : > { %11616 = vmatpush1.bf16.msra.mxu0 %v16252_v56  ;;  %11658 = vmatprep.subr.bf16.mxu1 %v16263_v59  ;;  %v16324_v56 = vld [vmem:[%s18410_s13 + $0xfe8] ss:$88 sps:$4 sm:$0xff]   ;;  %v16335_v59 = vld [vmem:[%s18410_s13 + $0x5a4] ss:$88 sps:$4 sm:$0xff]  }
 0x241   : > { %11617 = vmatprep.subr.bf16.mxu0 %v16260_v58  ;;  %v16332_v58 = vld [vmem:[%s18410_s13 + $0x109c] ss:$88 sps:$4 sm:$0xff]  }
 0x243   : > { %11659 = vmatpush1.bf16.msra.mxu1 %v16261_v62  ;;  %v16333_v62 = vld [vmem:[%s18410_s13 + $0x5a0] ss:$88 sps:$4 sm:$0xff]  }
 0x244   : > { %11618 = vmatpush1.bf16.msra.mxu0 %v16258_v61  ;;  %11660 = vmatprep.subr.bf16.mxu1 %v16269_v0  ;;  %v16330_v61 = vld [vmem:[%s18410_s13 + $0x1098] ss:$88 sps:$4 sm:$0xff]   ;;  %v16341_v0 = vld [vmem:[%s18410_s13 + $0x654] ss:$88 sps:$4 sm:$0xff]  }
 0x245   : > { %11619 = vmatprep.subr.bf16.mxu0 %v16266_v63  ;;  %v16338_v63 = vld [vmem:[%s18410_s13 + $0x114c] ss:$88 sps:$4 sm:$0xff]  }
 0x247   : > { %11661 = vmatpush1.bf16.msra.mxu1 %v16267_v4  ;;  %v16339_v4 = vld [vmem:[%s18410_s13 + $0x650] ss:$88 sps:$4 sm:$0xff]  }
 0x248   : > { %11620 = vmatpush1.bf16.msra.mxu0 %v16264_v1  ;;  %11662 = vmatprep.subr.bf16.mxu1 %v16275_v39  ;;  %v16336_v1 = vld [vmem:[%s18410_s13 + $0x1148] ss:$88 sps:$4 sm:$0xff]   ;;  %v16347_v39 = vld [vmem:[%s18410_s13 + $0x704] ss:$88 sps:$4 sm:$0xff]  }
 0x249   : > { %11621 = vmatprep.subr.bf16.mxu0 %v16272_v6  ;;  %v16344_v6 = vld [vmem:[%s18410_s13 + $0x11fc] ss:$88 sps:$4 sm:$0xff]  }
 0x24b   : > { %11663 = vmatpush1.bf16.msra.mxu1 %v16273_v8  ;;  %v16345_v8 = vld [vmem:[%s18410_s13 + $0x700] ss:$88 sps:$4 sm:$0xff]  }
 0x24c   : > { %11622 = vmatpush1.bf16.msra.mxu0 %v16270_v7  ;;  %11664 = vmatprep.subr.bf16.mxu1 %v16281_v9  ;;  %v16342_v7 = vld [vmem:[%s18410_s13 + $0x11f8] ss:$88 sps:$4 sm:$0xff]   ;;  %v16353_v9 = vld [vmem:[%s18410_s13 + $0x7b4] ss:$88 sps:$4 sm:$0xff]  }
 0x24d   : > { %11623 = vmatprep.subr.bf16.mxu0 %v16278_v40  ;;  %v16350_v40 = vld [vmem:[%s18410_s13 + $0x12ac] ss:$88 sps:$4 sm:$0xff]  }
 0x24f   : > { %11665 = vmatpush1.bf16.msra.mxu1 %v16279_v12  ;;  %v16351_v12 = vld [vmem:[%s18410_s13 + $0x7b0] ss:$88 sps:$4 sm:$0xff]  }
 0x250   : > { %11624 = vmatpush1.bf16.msra.mxu0 %v16276_v11  ;;  %11675 = vmatprep.subr.bf16.mxu1 %v16284_v13  ;;  %v16348_v11 = vld [vmem:[%s18410_s13 + $0x12a8] ss:$88 sps:$4 sm:$0xff]   ;;  %v16356_v13 = vld [vmem:[%s18410_s13 + $0x135c] ss:$88 sps:$4 sm:$0xff]  }
 0x251   : > { %11839 = vmatprep.subr.bf16.mxu0 %v16287_v14  ;;  %v16359_v14 = vld [vmem:[%s18410_s13 + $0x864] ss:$88 sps:$4 sm:$0xff]  }
 0x252   : > { %11667 = vmatmul.mubr.bf16.vlgmr.msra.gmra.mrb[8].mxu1 %v18503_v18 }
 0x253   : > { %11626 = vmatmul.mubr.bf16.vlgmr.msra.gmra.mrb[4].mxu0 %v18511_v23  ;;  %11676 = vmatpush1.bf16.msra.mxu1 %v16282_v15  ;;  %v16354_v15 = vld [vmem:[%s18410_s13 + $0x1358] ss:$88 sps:$4 sm:$0xff]  }
 0x254   : > { %11840 = vmatpush1.bf16.msra.mxu0 %v16285_v16  ;;  %11677 = vmatprep.subr.bf16.mxu1 %v16290_v17  ;;  %v16357_v16 = vld [vmem:[%s18410_s13 + $0x860] ss:$88 sps:$4 sm:$0xff]   ;;  %v16362_v17 = vld [vmem:[%s18410_s13 + $0x140c] ss:$88 sps:$4 sm:$0xff]  }
 0x255   : > { %11841 = vmatprep.subr.bf16.mxu0 %v16293_v20  ;;  %11707 = vmatprep.mubr.bf16.mxu1 %v18517_v26  ;;  %v16365_v20 = vld [vmem:[%s18410_s13 + $0x914] ss:$88 sps:$4 sm:$0xff]  }
 0x256   : > { %11871 = vmatprep.mubr.bf16.mxu0 %v18481_v60 }
 0x257   : > { %11678 = vmatpush1.bf16.msra.mxu1 %v16288_v21  ;;  %v16360_v21 = vld [vmem:[%s18410_s13 + $0x1408] ss:$88 sps:$4 sm:$0xff]  }
 0x258   : > { %11842 = vmatpush1.bf16.msra.mxu0 %v16291_v24  ;;  %11679 = vmatprep.subr.bf16.mxu1 %v16296_v25  ;;  %v16363_v24 = vld [vmem:[%s18410_s13 + $0x910] ss:$88 sps:$4 sm:$0xff]   ;;  %v16368_v25 = vld [vmem:[%s18410_s13 + $0x14bc] ss:$88 sps:$4 sm:$0xff]  }
 0x259   : > { %11843 = vmatprep.subr.bf16.mxu0 %v16299_v28  ;;  %v16371_v28 = vld [vmem:[%s18410_s13 + $0x9c4] ss:$88 sps:$4 sm:$0xff]  }
 0x25b   : > { %11680 = vmatpush1.bf16.msra.mxu1 %v16294_v29  ;;  %v16366_v29 = vld [vmem:[%s18410_s13 + $0x14b8] ss:$88 sps:$4 sm:$0xff]  }
 0x25c   : > { %11844 = vmatpush1.bf16.msra.mxu0 %v16297_v30  ;;  %11681 = vmatprep.subr.bf16.mxu1 %v16302_v31  ;;  %v16369_v30 = vld [vmem:[%s18410_s13 + $0x9c0] ss:$88 sps:$4 sm:$0xff]   ;;  %v16374_v31 = vld [vmem:[%s18410_s13 + $0x156c] ss:$88 sps:$4 sm:$0xff]  }
 0x25d   : > { %11845 = vmatprep.subr.bf16.mxu0 %v16305_v32  ;;  %v16377_v32 = vld [vmem:[%s18410_s13 + $0xa74] ss:$88 sps:$4 sm:$0xff]  }
 0x25f   : > { %11682 = vmatpush1.bf16.msra.mxu1 %v16300_v35  ;;  %v16372_v35 = vld [vmem:[%s18410_s13 + $0x1568] ss:$88 sps:$4 sm:$0xff]  }
 0x260   : > { %11846 = vmatpush1.bf16.msra.mxu0 %v16303_v36  ;;  %11683 = vmatprep.subr.bf16.mxu1 %v16308_v37  ;;  %v16375_v36 = vld [vmem:[%s18410_s13 + $0xa70] ss:$88 sps:$4 sm:$0xff]   ;;  %v16380_v37 = vld [vmem:[%s18410_s13 + $0x161c] ss:$88 sps:$4 sm:$0xff]  }
 0x261   : > { %11847 = vmatprep.subr.bf16.mxu0 %v16311_v38  ;;  %v16383_v38 = vld [vmem:[%s18410_s13 + $0xb24] ss:$88 sps:$4 sm:$0xff]  }
 0x263   : > { %11684 = vmatpush1.bf16.msra.mxu1 %v16306_v41  ;;  %v16378_v41 = vld [vmem:[%s18410_s13 + $0x1618] ss:$88 sps:$4 sm:$0xff]  }
 0x264   : > { %11848 = vmatpush1.bf16.msra.mxu0 %v16309_v42  ;;  %11685 = vmatprep.subr.bf16.mxu1 %v16314_v43  ;;  %v16381_v42 = vld [vmem:[%s18410_s13 + $0xb20] ss:$88 sps:$4 sm:$0xff]   ;;  %v16386_v43 = vld [vmem:[%s18410_s13 + $0x16cc] ss:$88 sps:$4 sm:$0xff]  }
 0x265   : > { %11849 = vmatprep.subr.bf16.mxu0 %v16317_v44  ;;  %v16389_v44 = vld [vmem:[%s18410_s13 + $0xbd4] ss:$88 sps:$4 sm:$0xff]  }
 0x267   : > { %11686 = vmatpush1.bf16.msra.mxu1 %v16312_v45  ;;  %v16384_v45 = vld [vmem:[%s18410_s13 + $0x16c8] ss:$88 sps:$4 sm:$0xff]  }
 0x268   : > { %11850 = vmatpush1.bf16.msra.mxu0 %v16315_v47  ;;  %11687 = vmatprep.subr.bf16.mxu1 %v16320_v49  ;;  %v16387_v47 = vld [vmem:[%s18410_s13 + $0xbd0] ss:$88 sps:$4 sm:$0xff]   ;;  %v16392_v49 = vld [vmem:[%s18410_s13 + $0x177c] ss:$88 sps:$4 sm:$0xff]  }
 0x269   : > { %11851 = vmatprep.subr.bf16.mxu0 %v16323_v50  ;;  %v16395_v50 = vld [vmem:[%s18410_s13 + $0xc84] ss:$88 sps:$4 sm:$0xff]  }
 0x26b   : > { %11688 = vmatpush1.bf16.msra.mxu1 %v16318_v52  ;;  %v16390_v52 = vld [vmem:[%s18410_s13 + $0x1778] ss:$88 sps:$4 sm:$0xff]  }
 0x26c   : > { %11852 = vmatpush1.bf16.msra.mxu0 %v16321_v53  ;;  %11689 = vmatprep.subr.bf16.mxu1 %v16326_v54  ;;  %v16393_v53 = vld [vmem:[%s18410_s13 + $0xc80] ss:$88 sps:$4 sm:$0xff]   ;;  %v16398_v54 = vld [vmem:[%s18410_s13 + $0x182c] ss:$88 sps:$4 sm:$0xff]  }
 0x26d   : > { %11853 = vmatprep.subr.bf16.mxu0 %v16329_v55  ;;  %v16401_v55 = vld [vmem:[%s18410_s13 + $0xd34] ss:$88 sps:$4 sm:$0xff]  }
 0x26f   : > { %11690 = vmatpush1.bf16.msra.mxu1 %v16324_v56  ;;  %v16396_v56 = vld [vmem:[%s18410_s13 + $0x1828] ss:$88 sps:$4 sm:$0xff]  }
 0x270   : > { %11854 = vmatpush1.bf16.msra.mxu0 %v16327_v57  ;;  %11691 = vmatprep.subr.bf16.mxu1 %v16332_v58  ;;  %v16399_v57 = vld [vmem:[%s18410_s13 + $0xd30] ss:$88 sps:$4 sm:$0xff]   ;;  %v16404_v58 = vld [vmem:[%s18410_s13 + $0x18dc] ss:$88 sps:$4 sm:$0xff]  }
 0x271   : > { %11855 = vmatprep.subr.bf16.mxu0 %v16335_v59  ;;  %v16407_v59 = vld [vmem:[%s18410_s13 + $0xde4] ss:$88 sps:$4 sm:$0xff]  }
 0x273   : > { %11692 = vmatpush1.bf16.msra.mxu1 %v16330_v61  ;;  %v16402_v61 = vld [vmem:[%s18410_s13 + $0x18d8] ss:$88 sps:$4 sm:$0xff]  }
 0x274   : > { %11856 = vmatpush1.bf16.msra.mxu0 %v16333_v62  ;;  %11693 = vmatprep.subr.bf16.mxu1 %v16338_v63  ;;  %v16405_v62 = vld [vmem:[%s18410_s13 + $0xde0] ss:$88 sps:$4 sm:$0xff]   ;;  %v16410_v63 = vld [vmem:[%s18410_s13 + $0x198c] ss:$88 sps:$4 sm:$0xff]  }
 0x275   : > { %11857 = vmatprep.subr.bf16.mxu0 %v16341_v0  ;;  %v16413_v0 = vld [vmem:[%s18410_s13 + $0xe94] ss:$88 sps:$4 sm:$0xff]  }
 0x277   : > { %11694 = vmatpush1.bf16.msra.mxu1 %v16336_v1  ;;  %v16408_v1 = vld [vmem:[%s18410_s13 + $0x1988] ss:$88 sps:$4 sm:$0xff]  }
 0x278   : > { %11858 = vmatpush1.bf16.msra.mxu0 %v16339_v4  ;;  %11695 = vmatprep.subr.bf16.mxu1 %v16344_v6  ;;  %v16411_v4 = vld [vmem:[%s18410_s13 + $0xe90] ss:$88 sps:$4 sm:$0xff]   ;;  %v16416_v6 = vld [vmem:[%s18410_s13 + $0x1a3c] ss:$88 sps:$4 sm:$0xff]  }
 0x279   : > { %11859 = vmatprep.subr.bf16.mxu0 %v16347_v39  ;;  %v16419_v39 = vld [vmem:[%s18410_s13 + $0xf44] ss:$88 sps:$4 sm:$0xff]  }
 0x27b   : > { %11696 = vmatpush1.bf16.msra.mxu1 %v16342_v7  ;;  %v16414_v7 = vld [vmem:[%s18410_s13 + $0x1a38] ss:$88 sps:$4 sm:$0xff]  }
 0x27c   : > { %11860 = vmatpush1.bf16.msra.mxu0 %v16345_v8  ;;  %11697 = vmatprep.subr.bf16.mxu1 %v16350_v40  ;;  %v16417_v8 = vld [vmem:[%s18410_s13 + $0xf40] ss:$88 sps:$4 sm:$0xff]   ;;  %v16422_v40 = vld [vmem:[%s18410_s13 + $0x1aec] ss:$88 sps:$4 sm:$0xff]  }
 0x27d   : > { %11861 = vmatprep.subr.bf16.mxu0 %v16353_v9  ;;  %v16425_v9 = vld [vmem:[%s18410_s13 + $0xff4] ss:$88 sps:$4 sm:$0xff]  }
 0x27f   : > { %11698 = vmatpush1.bf16.msra.mxu1 %v16348_v11  ;;  %v16420_v11 = vld [vmem:[%s18410_s13 + $0x1ae8] ss:$88 sps:$4 sm:$0xff]  }
 0x280   : > { %11862 = vmatpush1.bf16.msra.mxu0 %v16351_v12  ;;  %11699 = vmatprep.subr.bf16.mxu1 %v16356_v13  ;;  %v16423_v12 = vld [vmem:[%s18410_s13 + $0xff0] ss:$88 sps:$4 sm:$0xff]   ;;  %v16428_v13 = vld [vmem:[%s18410_s13 + $0x1b9c] ss:$88 sps:$4 sm:$0xff]  }
 0x281   : > { %11863 = vmatprep.subr.bf16.mxu0 %v16359_v14  ;;  %v16431_v14 = vld [vmem:[%s18410_s13 + $0x10a4] ss:$88 sps:$4 sm:$0xff]  }
 0x283   : > { %11700 = vmatpush1.bf16.msra.mxu1 %v16354_v15  ;;  %v16426_v15 = vld [vmem:[%s18410_s13 + $0x1b98] ss:$88 sps:$4 sm:$0xff]  }
 0x284   : > { %11864 = vmatpush1.bf16.msra.mxu0 %v16357_v16  ;;  %11701 = vmatprep.subr.bf16.mxu1 %v16362_v17  ;;  %v16429_v16 = vld [vmem:[%s18410_s13 + $0x10a0] ss:$88 sps:$4 sm:$0xff]   ;;  %v16434_v17 = vld [vmem:[%s18410_s13 + $0x1c4c] ss:$88 sps:$4 sm:$0xff]  }
 0x285   : > { %11865 = vmatprep.subr.bf16.mxu0 %v16365_v20  ;;  %v16437_v20 = vld [vmem:[%s18410_s13 + $0x1154] ss:$88 sps:$4 sm:$0xff]  }
 0x287   : > { %11702 = vmatpush1.bf16.msra.mxu1 %v16360_v21  ;;  %v16432_v21 = vld [vmem:[%s18410_s13 + $0x1c48] ss:$88 sps:$4 sm:$0xff]  }
 0x288   : > { %11866 = vmatpush1.bf16.msra.mxu0 %v16363_v24  ;;  %11703 = vmatprep.subr.bf16.mxu1 %v16368_v25  ;;  %v16435_v24 = vld [vmem:[%s18410_s13 + $0x1150] ss:$88 sps:$4 sm:$0xff]   ;;  %v16440_v25 = vld [vmem:[%s18410_s13 + $0x1cfc] ss:$88 sps:$4 sm:$0xff]  }
 0x289   : > { %11867 = vmatprep.subr.bf16.mxu0 %v16371_v28  ;;  %v16443_v28 = vld [vmem:[%s18410_s13 + $0x1204] ss:$88 sps:$4 sm:$0xff]  }
 0x28b   : > { %11704 = vmatpush1.bf16.msra.mxu1 %v16366_v29  ;;  %v16438_v29 = vld [vmem:[%s18410_s13 + $0x1cf8] ss:$88 sps:$4 sm:$0xff]  }
 0x28c   : > { %11868 = vmatpush1.bf16.msra.mxu0 %v16369_v30  ;;  %11705 = vmatprep.subr.bf16.mxu1 %v16374_v31  ;;  %v16441_v30 = vld [vmem:[%s18410_s13 + $0x1200] ss:$88 sps:$4 sm:$0xff]   ;;  %v16446_v31 = vld [vmem:[%s18410_s13 + $0x1dac] ss:$88 sps:$4 sm:$0xff]  }
 0x28d   : > { %11869 = vmatprep.subr.bf16.mxu0 %v16377_v32  ;;  %v16449_v32 = vld [vmem:[%s18410_s13 + $0x12b4] ss:$88 sps:$4 sm:$0xff]  }
 0x28f   : > { %11706 = vmatpush1.bf16.msra.mxu1 %v16372_v35  ;;  %v16444_v35 = vld [vmem:[%s18410_s13 + $0x1da8] ss:$88 sps:$4 sm:$0xff]  }
 0x290   : > { %11870 = vmatpush1.bf16.msra.mxu0 %v16375_v36  ;;  %11716 = vmatprep.subr.bf16.mxu1 %v16380_v37  ;;  %v16447_v36 = vld [vmem:[%s18410_s13 + $0x12b0] ss:$88 sps:$4 sm:$0xff]   ;;  %v16452_v37 = vld [vmem:[%s18410_s13 + $0x1e5c] ss:$88 sps:$4 sm:$0xff]  }
 0x291   : > { %11880 = vmatprep.subr.bf16.mxu0 %v16383_v38  ;;  %v16455_v38 = vld [vmem:[%s18410_s13 + $0x1364] ss:$88 sps:$4 sm:$0xff]  }
 0x292   : > { %11708 = vmatmul.mubr.bf16.vlgmr.msra.gmra.mrb[8].mxu1 %v18589_v33 }
 0x293   : > { %11872 = vmatmul.mubr.bf16.vlgmr.msra.gmra.mrb[8].mxu0 %v18503_v18  ;;  %11717 = vmatpush1.bf16.msra.mxu1 %v16378_v41  ;;  %v16450_v41 = vld [vmem:[%s18410_s13 + $0x1e58] ss:$88 sps:$4 sm:$0xff]  }
 0x294   : > { %11881 = vmatpush1.bf16.msra.mxu0 %v16381_v42  ;;  %11718 = vmatprep.subr.bf16.mxu1 %v16386_v43  ;;  %v16453_v42 = vld [vmem:[%s18410_s13 + $0x1360] ss:$88 sps:$4 sm:$0xff]   ;;  %v16458_v43 = vld [vmem:[%s18410_s13 + $0x1f0c] ss:$88 sps:$4 sm:$0xff]  }
 0x295   : > { %11882 = vmatprep.subr.bf16.mxu0 %v16389_v44  ;;  %11748 = vmatprep.mubr.bf16.mxu1 %v18487_v2  ;;  %v16461_v44 = vld [vmem:[%s18410_s13 + $0x1414] ss:$88 sps:$4 sm:$0xff]  }
 0x296   : > { %11912 = vmatprep.mubr.bf16.mxu0 %v18517_v26 }
 0x297   : > { %11719 = vmatpush1.bf16.msra.mxu1 %v16384_v45  ;;  %v16456_v45 = vld [vmem:[%s18410_s13 + $0x1f08] ss:$88 sps:$4 sm:$0xff]  }
 0x298   : > { %11883 = vmatpush1.bf16.msra.mxu0 %v16387_v47  ;;  %11720 = vmatprep.subr.bf16.mxu1 %v16392_v49  ;;  %v16459_v47 = vld [vmem:[%s18410_s13 + $0x1410] ss:$88 sps:$4 sm:$0xff]   ;;  %v16464_v49 = vld [vmem:[%s18410_s13 + $0x1fbc] ss:$88 sps:$4 sm:$0xff]  }
 0x299   : > { %11884 = vmatprep.subr.bf16.mxu0 %v16395_v50  ;;  %v16467_v50 = vld [vmem:[%s18410_s13 + $0x14c4] ss:$88 sps:$4 sm:$0xff]  }
 0x29b   : > { %11721 = vmatpush1.bf16.msra.mxu1 %v16390_v52  ;;  %v16462_v52 = vld [vmem:[%s18410_s13 + $0x1fb8] ss:$88 sps:$4 sm:$0xff]  }
 0x29c   : > { %11885 = vmatpush1.bf16.msra.mxu0 %v16393_v53  ;;  %11722 = vmatprep.subr.bf16.mxu1 %v16398_v54  ;;  %v16465_v53 = vld [vmem:[%s18410_s13 + $0x14c0] ss:$88 sps:$4 sm:$0xff]   ;;  %v16470_v54 = vld [vmem:[%s18410_s13 + $0x206c] ss:$88 sps:$4 sm:$0xff]  }
 0x29d   : > { %11886 = vmatprep.subr.bf16.mxu0 %v16401_v55  ;;  %v16473_v55 = vld [vmem:[%s18410_s13 + $0x1574] ss:$88 sps:$4 sm:$0xff]  }
 0x29f   : > { %11723 = vmatpush1.bf16.msra.mxu1 %v16396_v56  ;;  %v16468_v56 = vld [vmem:[%s18410_s13 + $0x2068] ss:$88 sps:$4 sm:$0xff]  }
 0x2a0   : > { %11887 = vmatpush1.bf16.msra.mxu0 %v16399_v57  ;;  %11724 = vmatprep.subr.bf16.mxu1 %v16404_v58  ;;  %v16471_v57 = vld [vmem:[%s18410_s13 + $0x1570] ss:$88 sps:$4 sm:$0xff]   ;;  %v16476_v58 = vld [vmem:[%s18410_s13 + $0x211c] ss:$88 sps:$4 sm:$0xff]  }
 0x2a1   : > { %11888 = vmatprep.subr.bf16.mxu0 %v16407_v59  ;;  %v16479_v59 = vld [vmem:[%s18410_s13 + $0x1624] ss:$88 sps:$4 sm:$0xff]  }
 0x2a3   : > { %11725 = vmatpush1.bf16.msra.mxu1 %v16402_v61  ;;  %v16474_v61 = vld [vmem:[%s18410_s13 + $0x2118] ss:$88 sps:$4 sm:$0xff]  }
 0x2a4   : > { %11889 = vmatpush1.bf16.msra.mxu0 %v16405_v62  ;;  %11726 = vmatprep.subr.bf16.mxu1 %v16410_v63  ;;  %v16477_v62 = vld [vmem:[%s18410_s13 + $0x1620] ss:$88 sps:$4 sm:$0xff]   ;;  %v16482_v63 = vld [vmem:[%s18410_s13 + $0x21cc] ss:$88 sps:$4 sm:$0xff]  }
 0x2a5   : > { %11890 = vmatprep.subr.bf16.mxu0 %v16413_v0  ;;  %v16485_v0 = vld [vmem:[%s18410_s13 + $0x16d4] ss:$88 sps:$4 sm:$0xff]  }
 0x2a7   : > { %11727 = vmatpush1.bf16.msra.mxu1 %v16408_v1  ;;  %v16480_v1 = vld [vmem:[%s18410_s13 + $0x21c8] ss:$88 sps:$4 sm:$0xff]  }
 0x2a8   : > { %11891 = vmatpush1.bf16.msra.mxu0 %v16411_v4  ;;  %11728 = vmatprep.subr.bf16.mxu1 %v16416_v6  ;;  %v16483_v4 = vld [vmem:[%s18410_s13 + $0x16d0] ss:$88 sps:$4 sm:$0xff]   ;;  %v16488_v6 = vld [vmem:[%s18410_s13 + $0x227c] ss:$88 sps:$4 sm:$0xff]  }
 0x2a9   : > { %11892 = vmatprep.subr.bf16.mxu0 %v16419_v39  ;;  %v16491_v39 = vld [vmem:[%s18410_s13 + $0x1784] ss:$88 sps:$4 sm:$0xff]  }
 0x2ab   : > { %11729 = vmatpush1.bf16.msra.mxu1 %v16414_v7  ;;  %v16486_v7 = vld [vmem:[%s18410_s13 + $0x2278] ss:$88 sps:$4 sm:$0xff]  }
 0x2ac   : > { %11893 = vmatpush1.bf16.msra.mxu0 %v16417_v8  ;;  %11730 = vmatprep.subr.bf16.mxu1 %v16422_v40  ;;  %v16489_v8 = vld [vmem:[%s18410_s13 + $0x1780] ss:$88 sps:$4 sm:$0xff]   ;;  %v16494_v40 = vld [vmem:[%s18410_s13 + $0x232c] ss:$88 sps:$4 sm:$0xff]  }
 0x2ad   : > { %11894 = vmatprep.subr.bf16.mxu0 %v16425_v9  ;;  %v16497_v9 = vld [vmem:[%s18410_s13 + $0x1834] ss:$88 sps:$4 sm:$0xff]  }
 0x2af   : > { %11731 = vmatpush1.bf16.msra.mxu1 %v16420_v11  ;;  %v16492_v11 = vld [vmem:[%s18410_s13 + $0x2328] ss:$88 sps:$4 sm:$0xff]  }
 0x2b0   : > { %11895 = vmatpush1.bf16.msra.mxu0 %v16423_v12  ;;  %11732 = vmatprep.subr.bf16.mxu1 %v16428_v13  ;;  %v16495_v12 = vld [vmem:[%s18410_s13 + $0x1830] ss:$88 sps:$4 sm:$0xff]   ;;  %v16500_v13 = vld [vmem:[%s18410_s13 + $0x23dc] ss:$88 sps:$4 sm:$0xff]  }
 0x2b1   : > { %11896 = vmatprep.subr.bf16.mxu0 %v16431_v14  ;;  %v16503_v14 = vld [vmem:[%s18410_s13 + $0x18e4] ss:$88 sps:$4 sm:$0xff]  }
 0x2b3   : > { %11733 = vmatpush1.bf16.msra.mxu1 %v16426_v15  ;;  %v19183_v15 = vsub.s32 2, %v18464_v46 }
 0x2b4   : > { %11897 = vmatpush1.bf16.msra.mxu0 %v16429_v16  ;;  %11734 = vmatprep.subr.bf16.mxu1 %v16434_v17  ;;  %v18263_v16 = vmov 1983009808  }
 0x2b5   : > { %11898 = vmatprep.subr.bf16.mxu0 %v16437_v20  ;;  %v13299_v17 = vunpack.c.l.s4 %v18263_v16  ;;  %v16498_v20 = vld [vmem:[%s18410_s13 + $0x23d8] ss:$88 sps:$4 sm:$0xff]  }
 0x2b6   : > { %v16546_v16 = vld [vmem:[%s18410_s13 + $0x2958] ss:$88 sps:$4 sm:$0xff]  }
 0x2b7   : > { %11735 = vmatpush1.bf16.msra.mxu1 %v16432_v21  ;;  %v16501_v21 = vld [vmem:[%s18410_s13 + $0x18e0] ss:$88 sps:$4 sm:$0xff]  }
 0x2b8   : > { %11899 = vmatpush1.bf16.msra.mxu0 %v16435_v24  ;;  %11736 = vmatprep.subr.bf16.mxu1 %v16440_v25  ;;  %v19188_v24 = vsub.s32 3, %v18464_v46  ;;  %v16506_v25 = vld [vmem:[%s18410_s13 + $0x248c] ss:$88 sps:$4 sm:$0xff]  }
 0x2b9   : > { %11900 = vmatprep.subr.bf16.mxu0 %v16443_v28  ;;  %v16509_v28 = vld [vmem:[%s18410_s13 + $0x1994] ss:$88 sps:$4 sm:$0xff]  }
 0x2bb   : > { %11737 = vmatpush1.bf16.msra.mxu1 %v16438_v29  ;;  %v19193_v29 = vld [vmem:[%s18416_s8] sm:$0xff] }
 0x2bc   : > { %11901 = vmatpush1.bf16.msra.mxu0 %v16441_v30  ;;  %11738 = vmatprep.subr.bf16.mxu1 %v16446_v31  ;;  %v2120_v30 = vrot.slane %v19193_v29, %v19183_v15  ;;  %v13300_v31 = vunpack.c.0.s8 %v13299_v17  ;;  %v16549_v17 = vld [vmem:[%s18410_s13 + $0x1e60] ss:$88 sps:$4 sm:$0xff]  }
 0x2bd   : > { %11902 = vmatprep.subr.bf16.mxu0 %v16449_v32  ;;  %v2124_v32 = vrot.slane %v19193_v29, %v19188_v24 }
 0x2bf   : > { %11739 = vmatpush1.bf16.msra.mxu1 %v16444_v35  ;;  %v16504_v35 = vld [vmem:[%s18410_s13 + $0x2488] ss:$88 sps:$4 sm:$0xff]  }
 0x2c0   : > { %11903 = vmatpush1.bf16.msra.mxu0 %v16447_v36  ;;  %11740 = vmatprep.subr.bf16.mxu1 %v16452_v37  ;;  %v16507_v36 = vld [vmem:[%s18410_s13 + $0x1990] ss:$88 sps:$4 sm:$0xff]   ;;  %v16512_v37 = vld [vmem:[%s18410_s13 + $0x253c] ss:$88 sps:$4 sm:$0xff]  }
 0x2c1   : > { %11904 = vmatprep.subr.bf16.mxu0 %v16455_v38  ;;  %v16515_v38 = vld [vmem:[%s18410_s13 + $0x1a44] ss:$88 sps:$4 sm:$0xff]  }
 0x2c3   : > { %11741 = vmatpush1.bf16.msra.mxu1 %v16450_v41 }
 0x2c4   : > { %11905 = vmatpush1.bf16.msra.mxu0 %v16453_v42  ;;  %11742 = vmatprep.subr.bf16.mxu1 %v16458_v43 }
 0x2c5   : > { %11906 = vmatprep.subr.bf16.mxu0 %v16461_v44  ;;  %v19205_v44 = vsub.s32 %v13300_v31, %v18464_v46  ;;  %v16563_v31 = vld [vmem:[%s18410_s13 + $0x1fc4] ss:$88 sps:$4 sm:$0xff]  }
 0x2c7   : > { %11743 = vmatpush1.bf16.msra.mxu1 %v16456_v45 }
 0x2c8   : > { %11907 = vmatpush1.bf16.msra.mxu0 %v16459_v47  ;;  %11744 = vmatprep.subr.bf16.mxu1 %v16464_v49  ;;  %v16510_v49 = vld [vmem:[%s18410_s13 + $0x2538] ss:$88 sps:$4 sm:$0xff]  }
 0x2c9   : > { %11908 = vmatprep.subr.bf16.mxu0 %v16467_v50  ;;  %v16513_v50 = vld [vmem:[%s18410_s13 + $0x1a40] ss:$88 sps:$4 sm:$0xff]  }
 0x2cb   : > { %11745 = vmatpush1.bf16.msra.mxu1 %v16462_v52 }
 0x2cc   : > { %11909 = vmatpush1.bf16.msra.mxu0 %v16465_v53  ;;  %11746 = vmatprep.subr.bf16.mxu1 %v16470_v54  ;;  %v16518_v53 = vld [vmem:[%s18410_s13 + $0x25ec] ss:$88 sps:$4 sm:$0xff]  }
 0x2cd   : > { %11910 = vmatprep.subr.bf16.mxu0 %v16473_v55  ;;  %v16521_v54 = vld [vmem:[%s18410_s13 + $0x1af4] ss:$88 sps:$4 sm:$0xff]  }
 0x2cf   : > { %11747 = vmatpush1.bf16.msra.mxu1 %v16468_v56  ;;  %v13304_v56 = vrot.slane %v13296_v10, %v19205_v44 }
 0x2d0   : > { %11911 = vmatpush1.bf16.msra.mxu0 %v16471_v57  ;;  %11757 = vmatprep.subr.bf16.mxu1 %v16476_v58  ;;  %v16516_v58 = vld [vmem:[%s18410_s13 + $0x25e8] ss:$88 sps:$4 sm:$0xff]  }
 0x2d1   : > { %11921 = vmatprep.subr.bf16.mxu0 %v16479_v59  ;;  %v16519_v59 = vld [vmem:[%s18410_s13 + $0x1af0] ss:$88 sps:$4 sm:$0xff]  }
 0x2d2   : > { %11749 = vmatmul.mubr.bf16.vlgmr.msra.gmra.mrb[8].mxu1 %v18505_v19 }
 0x2d3   : > { %11913 = vmatmul.mubr.bf16.vlgmr.msra.gmra.mrb[8].mxu0 %v18589_v33  ;;  %11758 = vmatpush1.bf16.msra.mxu1 %v16474_v61  ;;  %v16522_v61 = vld [vmem:[%s18410_s13 + $0x2698] ss:$88 sps:$4 sm:$0xff]  }
 0x2d4   : > { %11922 = vmatpush1.bf16.msra.mxu0 %v16477_v62  ;;  %11759 = vmatprep.subr.bf16.mxu1 %v16482_v63  ;;  %v16525_v62 = vld [vmem:[%s18410_s13 + $0x1ba0] ss:$88 sps:$4 sm:$0xff]   ;;  %v16530_v63 = vld [vmem:[%s18410_s13 + $0x274c] ss:$88 sps:$4 sm:$0xff]  }
 0x2d5   : > { %11923 = vmatprep.subr.bf16.mxu0 %v16485_v0  ;;  %11789 = vmatprep.mubr.bf16.mxu1 %v18521_v27  ;;  %v16533_v0 = vld [vmem:[%s18410_s13 + $0x1c54] ss:$88 sps:$4 sm:$0xff]  }
 0x2d6   : > { %11953 = vmatprep.mubr.bf16.mxu0 %v18487_v2 }
 0x2d7   : > { %11760 = vmatpush1.bf16.msra.mxu1 %v16480_v1  ;;  %v16528_v1 = vld [vmem:[%s18410_s13 + $0x2748] ss:$88 sps:$4 sm:$0xff]  }
 0x2d8   : > { %11924 = vmatpush1.bf16.msra.mxu0 %v16483_v4  ;;  %11761 = vmatprep.subr.bf16.mxu1 %v16488_v6  ;;  %v16531_v4 = vld [vmem:[%s18410_s13 + $0x1c50] ss:$88 sps:$4 sm:$0xff]   ;;  %v16536_v6 = vld [vmem:[%s18410_s13 + $0x27fc] ss:$88 sps:$4 sm:$0xff]  }
 0x2d9   : > { %11925 = vmatprep.subr.bf16.mxu0 %v16491_v39  ;;  %v16539_v39 = vld [vmem:[%s18410_s13 + $0x1d04] ss:$88 sps:$4 sm:$0xff]  }
 0x2db   : > { %11762 = vmatpush1.bf16.msra.mxu1 %v16486_v7  ;;  %v16534_v7 = vld [vmem:[%s18410_s13 + $0x27f8] ss:$88 sps:$4 sm:$0xff]  }
 0x2dc   : > { %11926 = vmatpush1.bf16.msra.mxu0 %v16489_v8  ;;  %11763 = vmatprep.subr.bf16.mxu1 %v16494_v40  ;;  %v16537_v8 = vld [vmem:[%s18410_s13 + $0x1d00] ss:$88 sps:$4 sm:$0xff]   ;;  %v16542_v40 = vld [vmem:[%s18410_s13 + $0x28ac] ss:$88 sps:$4 sm:$0xff]  }
 0x2dd   : > { %11927 = vmatprep.subr.bf16.mxu0 %v16497_v9  ;;  %v16545_v9 = vld [vmem:[%s18410_s13 + $0x1db4] ss:$88 sps:$4 sm:$0xff]  }
 0x2df   : > { %11764 = vmatpush1.bf16.msra.mxu1 %v16492_v11  ;;  %v16540_v11 = vld [vmem:[%s18410_s13 + $0x28a8] ss:$88 sps:$4 sm:$0xff]  }
 0x2e0   : > { %11928 = vmatpush1.bf16.msra.mxu0 %v16495_v12  ;;  %11765 = vmatprep.subr.bf16.mxu1 %v16500_v13  ;;  %v16543_v12 = vld [vmem:[%s18410_s13 + $0x1db0] ss:$88 sps:$4 sm:$0xff]   ;;  %v16548_v13 = vld [vmem:[%s18410_s13 + $0x295c] ss:$88 sps:$4 sm:$0xff]  }
 0x2e1   : > { %11929 = vmatprep.subr.bf16.mxu0 %v16503_v14  ;;  %v16551_v14 = vld [vmem:[%s18410_s13 + $0x1e64] ss:$88 sps:$4 sm:$0xff]  }
 0x2e3   : > { %11766 = vmatpush1.bf16.msra.mxu1 %v16498_v20  ;;  %v16554_v20 = vld [vmem:[%s18410_s13 + $0x2a0c] ss:$88 sps:$4 sm:$0xff]  }
 0x2e4   : > { %11930 = vmatpush1.bf16.msra.mxu0 %v16501_v21  ;;  %11767 = vmatprep.subr.bf16.mxu1 %v16506_v25  ;;  %v16557_v21 = vld [vmem:[%s18410_s13 + $0x1f14] ss:$88 sps:$4 sm:$0xff]   ;;  %v16552_v25 = vld [vmem:[%s18410_s13 + $0x2a08] ss:$88 sps:$4 sm:$0xff]  }
 0x2e5   : > { %11931 = vmatprep.subr.bf16.mxu0 %v16509_v28  ;;  %v11422_v41 = vpop.f32.mrb[4].mxu1  ;;  %v16555_v28 = vld [vmem:[%s18410_s13 + $0x1f10] ss:$88 sps:$4 sm:$0xff]  }
 0x2e6   : > { %v15268_v42 = vadd.f32 %v11422_v41, %v2120_v30  ;;  %v11424_v43 = vpop.f32.mrb[5].mxu1  ;;  %v16560_v30 = vld [vmem:[%s18410_s13 + $0x2abc] ss:$88 sps:$4 sm:$0xff]   ;;  %v16567_v41 = vld [vmem:[%s18410_s13 + $0x2070] ss:$88 sps:$4 sm:$0xff]  }
 0x2e7   : > { %v15269_v45 = vadd.f32 %v11424_v43, %v2124_v32  ;;  %v11426_v47 = vpop.f32.mrb[6].mxu1  ;;  %11768 = vmatpush1.bf16.msra.mxu1 %v16504_v35  ;;  %v16558_v32 = vld [vmem:[%s18410_s13 + $0x2ab8] ss:$88 sps:$4 sm:$0xff]   ;;  %v16575_v43 = vld [vmem:[%s18410_s13 + $0x2124] ss:$88 sps:$4 sm:$0xff]  }
 0x2e8   : > { %11932 = vmatpush1.bf16.msra.mxu0 %v16507_v36  ;;  %v11427_v52 = vpop.f32.mrb[7].mxu1  ;;  %11769 = vmatprep.subr.bf16.mxu1 %v16512_v37  ;;  %v16561_v35 = vld [vmem:[%s18410_s13 + $0x1fc0] ss:$88 sps:$4 sm:$0xff]   ;;  %v16566_v36 = vld [vmem:[%s18410_s13 + $0x2b6c] ss:$88 sps:$4 sm:$0xff]  }
 0x2e9   : > { %11933 = vmatprep.subr.bf16.mxu0 %v16515_v38  ;;  %v13297_v55 = vcombine.low %v15268_v42, %v15269_v45  ;;  %v16569_v37 = vld [vmem:[%s18410_s13 + $0x2074] ss:$88 sps:$4 sm:$0xff]   ;;  %v16564_v38 = vld [vmem:[%s18410_s13 + $0x2b68] ss:$88 sps:$4 sm:$0xff]   ;;  %v16570_v45 = vld [vmem:[%s18410_s13 + $0x2c18] ss:$88 sps:$4 sm:$0xff]  }
 0x2ea   : > { %v16572_v42 = vld [vmem:[%s18410_s13 + $0x2c1c] ss:$88 sps:$4 sm:$0xff]   ;;  %v16573_v47 = vld [vmem:[%s18410_s13 + $0x2120] ss:$88 sps:$4 sm:$0xff]  }
 0x2eb   : > { %v13311_v57 = vrot.slane %v13297_v55, %v19205_v44  ;;  %11770 = vmatpush1.bf16.msra.mxu1 %v16510_v49  ;;  %v16578_v49 = vld [vmem:[%s18410_s13 + $0x2ccc] ss:$88 sps:$4 sm:$0xff]   ;;  %v16576_v52 = vld [vmem:[%s18410_s13 + $0x2cc8] ss:$88 sps:$4 sm:$0xff]  }
 0x2ec   : > { %11934 = vmatpush1.bf16.msra.mxu0 %v16513_v50  ;;  %11771 = vmatprep.subr.bf16.mxu1 %v16518_v53  ;;  %v16581_v50 = vld [vmem:[%s18410_s13 + $0x21d4] ss:$88 sps:$4 sm:$0xff]   ;;  %v16579_v53 = vld [vmem:[%s18410_s13 + $0x21d0] ss:$88 sps:$4 sm:$0xff]   ;;  %v16587_v55 = vld [vmem:[%s18410_s13 + $0x2284] ss:$88 sps:$4 sm:$0xff]  }
 0x2ed   : > { %11935 = vmatprep.subr.bf16.mxu0 %v16521_v54  ;;  %v13312_v10 = vcombine.low %v13304_v56, %v13311_v57  ;;  %v16584_v54 = vld [vmem:[%s18410_s13 + $0x2d7c] ss:$88 sps:$4 sm:$0xff]   ;;  %v16582_v56 = vld [vmem:[%s18410_s13 + $0x2d78] ss:$88 sps:$4 sm:$0xff]  }
 0x2ee   : > { %v16585_v57 = vld [vmem:[%s18410_s13 + $0x2280] ss:$88 sps:$4 sm:$0xff]  }
 0x2ef   : > { %13395 = vst [vmem:[%s19221_s21] sm:$0xff] %v13312_v10  ;;  %11772 = vmatpush1.bf16.msra.mxu1 %v16516_v58  ;;  %v16590_v58 = vld [vmem:[%s18410_s13 + $0x2e2c] ss:$88 sps:$4 sm:$0xff]   ;;  %v16596_v10 = vld [vmem:[%s18410_s13 + $0x2edc] ss:$88 sps:$4 sm:$0xff]  }
 0x2f0   : > { %11936 = vmatpush1.bf16.msra.mxu0 %v16519_v59  ;;  %11773 = vmatprep.subr.bf16.mxu1 %v16524_v3  ;;  %v16593_v59 = vld [vmem:[%s18410_s13 + $0x2334] ss:$88 sps:$4 sm:$0xff]   ;;  %v16588_v3 = vld [vmem:[%s18410_s13 + $0x2e28] ss:$88 sps:$4 sm:$0xff]  }
 0x2f1   : > { %11937 = vmatprep.subr.bf16.mxu0 %v16527_v5  ;;  %v16591_v5 = vld [vmem:[%s18410_s13 + $0x2330] ss:$88 sps:$4 sm:$0xff]  }
 0x2f3   : > { %11774 = vmatpush1.bf16.msra.mxu1 %v16522_v61  ;;  %v16599_v61 = vld [vmem:[%s18410_s13 + $0x23e4] ss:$88 sps:$4 sm:$0xff]  }
 0x2f4   : > { %11938 = vmatpush1.bf16.msra.mxu0 %v16525_v62  ;;  %11775 = vmatprep.subr.bf16.mxu1 %v16530_v63  ;;  %v19279_v62 = vsub.s32 4, %v18464_v46  ;;  %v16594_v63 = vld [vmem:[%s18410_s13 + $0x2ed8] ss:$88 sps:$4 sm:$0xff]  }
 0x2f5   : > { %11939 = vmatprep.subr.bf16.mxu0 %v16533_v0  ;;  %v16597_v0 = vld [vmem:[%s18410_s13 + $0x23e0] ss:$88 sps:$4 sm:$0xff]  }
 0x2f7   : > { %11776 = vmatpush1.bf16.msra.mxu1 %v16528_v1  ;;  %v19284_v1 = vsub.s32 5, %v18464_v46 }
 0x2f8   : > { %11940 = vmatpush1.bf16.msra.mxu0 %v16531_v4  ;;  %11777 = vmatprep.subr.bf16.mxu1 %v16536_v6  ;;  %v16602_v4 = vld [vmem:[%s18410_s13 + $0x2f8c] ss:$88 sps:$4 sm:$0xff]  }
 0x2f9   : > { %11941 = vmatprep.subr.bf16.mxu0 %v16539_v39  ;;  %v16605_v6 = vld [vmem:[%s18410_s13 + $0x2494] ss:$88 sps:$4 sm:$0xff]   ;;  %v2128_v39 = vrot.slane %v19193_v29, %v19279_v62 }
 0x2fb   : > { %11778 = vmatpush1.bf16.msra.mxu1 %v16534_v7  ;;  %v2132_v7 = vrot.slane %v19193_v29, %v19284_v1  ;;  %v16606_v29 = vld [vmem:[%s18410_s13 + $0x3038] ss:$88 sps:$4 sm:$0xff]  }
 0x2fc   : > { %11942 = vmatpush1.bf16.msra.mxu0 %v16537_v8  ;;  %11779 = vmatprep.subr.bf16.mxu1 %v16542_v40  ;;  %v16600_v8 = vld [vmem:[%s18410_s13 + $0x2f88] ss:$88 sps:$4 sm:$0xff]  }
 0x2fd   : > { %11943 = vmatprep.subr.bf16.mxu0 %v16545_v9  ;;  %v16603_v40 = vld [vmem:[%s18410_s13 + $0x2490] ss:$88 sps:$4 sm:$0xff]   ;;  %v16608_v9 = vld [vmem:[%s18410_s13 + $0x303c] ss:$88 sps:$4 sm:$0xff]  }
 0x2ff   : > { %11780 = vmatpush1.bf16.msra.mxu1 %v16540_v11  ;;  %v16611_v11 = vld [vmem:[%s18410_s13 + $0x2544] ss:$88 sps:$4 sm:$0xff]  }
 0x300   : > { %11944 = vmatpush1.bf16.msra.mxu0 %v16543_v12  ;;  %11781 = vmatprep.subr.bf16.mxu1 %v16548_v13 }
 0x301   : > { %11945 = vmatprep.subr.bf16.mxu0 %v16551_v14 }
 0x303   : > { %11782 = vmatpush1.bf16.msra.mxu1 %v16546_v16 }
 0x304   : > { %11946 = vmatpush1.bf16.msra.mxu0 %v16549_v17  ;;  %11783 = vmatprep.subr.bf16.mxu1 %v16554_v20  ;;  %v16609_v20 = vld [vmem:[%s18410_s13 + $0x2540] ss:$88 sps:$4 sm:$0xff]  }
 0x305   : > { %11947 = vmatprep.subr.bf16.mxu0 %v16557_v21 }
 0x307   : > { %11784 = vmatpush1.bf16.msra.mxu1 %v16552_v25  ;;  %v16614_v25 = vld [vmem:[%s18410_s13 + $0x30ec] ss:$88 sps:$4 sm:$0xff]  }
 0x308   : > { %11948 = vmatpush1.bf16.msra.mxu0 %v16555_v28  ;;  %11785 = vmatprep.subr.bf16.mxu1 %v16560_v30  ;;  %v16617_v28 = vld [vmem:[%s18410_s13 + $0x25f4] ss:$88 sps:$4 sm:$0xff]  }
 0x309   : > { %11949 = vmatprep.subr.bf16.mxu0 %v16563_v31  ;;  %v16612_v31 = vld [vmem:[%s18410_s13 + $0x30e8] ss:$88 sps:$4 sm:$0xff]  }
 0x30b   : > { %11786 = vmatpush1.bf16.msra.mxu1 %v16558_v32  ;;  %v16615_v32 = vld [vmem:[%s18410_s13 + $0x25f0] ss:$88 sps:$4 sm:$0xff]  }
 0x30c   : > { %11950 = vmatpush1.bf16.msra.mxu0 %v16561_v35  ;;  %11787 = vmatprep.subr.bf16.mxu1 %v16566_v36  ;;  %v16620_v35 = vld [vmem:[%s18410_s13 + $0x319c] ss:$88 sps:$4 sm:$0xff]  }
 0x30d   : > { %11951 = vmatprep.subr.bf16.mxu0 %v16569_v37  ;;  %v16623_v36 = vld [vmem:[%s18410_s13 + $0x26a4] ss:$88 sps:$4 sm:$0xff]   ;;  %v16618_v37 = vld [vmem:[%s18410_s13 + $0x3198] ss:$88 sps:$4 sm:$0xff]  }
 0x30f   : > { %11788 = vmatpush1.bf16.msra.mxu1 %v16564_v38  ;;  %v16621_v38 = vld [vmem:[%s18410_s13 + $0x26a0] ss:$88 sps:$4 sm:$0xff]  }
 0x310   : > { %11952 = vmatpush1.bf16.msra.mxu0 %v16567_v41  ;;  %11798 = vmatprep.subr.bf16.mxu1 %v16572_v42  ;;  %v16626_v41 = vld [vmem:[%s18410_s13 + $0x324c] ss:$88 sps:$4 sm:$0xff]  }
 0x311   : > { %11962 = vmatprep.subr.bf16.mxu0 %v16575_v43  ;;  %v16629_v42 = vld [vmem:[%s18410_s13 + $0x2754] ss:$88 sps:$4 sm:$0xff]   ;;  %v16624_v43 = vld [vmem:[%s18410_s13 + $0x3248] ss:$88 sps:$4 sm:$0xff]  }
 0x312   : > { %11790 = vmatmul.mubr.bf16.vlgmr.msra.gmra.mrb[8].mxu1 %v18593_v34 }
 0x313   : > { %11954 = vmatmul.mubr.bf16.vlgmr.msra.gmra.mrb[8].mxu0 %v18505_v19  ;;  %11799 = vmatpush1.bf16.msra.mxu1 %v16570_v45  ;;  %v16627_v45 = vld [vmem:[%s18410_s13 + $0x2750] ss:$88 sps:$4 sm:$0xff]  }
 0x314   : > { %11963 = vmatpush1.bf16.msra.mxu0 %v16573_v47  ;;  %11800 = vmatprep.subr.bf16.mxu1 %v16578_v49  ;;  %v16632_v47 = vld [vmem:[%s18410_s13 + $0x32fc] ss:$88 sps:$4 sm:$0xff]  }
 0x315   : > { %11964 = vmatprep.subr.bf16.mxu0 %v16581_v50  ;;  %11830 = vmatprep.mubr.bf16.mxu1 %v18509_v22  ;;  %v16635_v49 = vld [vmem:[%s18410_s13 + $0x2804] ss:$88 sps:$4 sm:$0xff]   ;;  %v16630_v50 = vld [vmem:[%s18410_s13 + $0x32f8] ss:$88 sps:$4 sm:$0xff]  }
 0x316   : > { %11994 = vmatprep.mubr.bf16.mxu0 %v18521_v27 }
 0x317   : > { %11801 = vmatpush1.bf16.msra.mxu1 %v16576_v52  ;;  %v16633_v52 = vld [vmem:[%s18410_s13 + $0x2800] ss:$88 sps:$4 sm:$0xff]  }
 0x318   : > { %11965 = vmatpush1.bf16.msra.mxu0 %v16579_v53  ;;  %11802 = vmatprep.subr.bf16.mxu1 %v16584_v54  ;;  %v16638_v53 = vld [vmem:[%s18410_s13 + $0x33ac] ss:$88 sps:$4 sm:$0xff]  }
 0x319   : > { %11966 = vmatprep.subr.bf16.mxu0 %v16587_v55  ;;  %v16641_v54 = vld [vmem:[%s18410_s13 + $0x28b4] ss:$88 sps:$4 sm:$0xff]   ;;  %v16636_v55 = vld [vmem:[%s18410_s13 + $0x33a8] ss:$88 sps:$4 sm:$0xff]  }
 0x31b   : > { %11803 = vmatpush1.bf16.msra.mxu1 %v16582_v56  ;;  %v16639_v56 = vld [vmem:[%s18410_s13 + $0x28b0] ss:$88 sps:$4 sm:$0xff]  }
 0x31c   : > { %11967 = vmatpush1.bf16.msra.mxu0 %v16585_v57  ;;  %11804 = vmatprep.subr.bf16.mxu1 %v16590_v58  ;;  %v16644_v57 = vld [vmem:[%s18410_s13 + $0x345c] ss:$88 sps:$4 sm:$0xff]  }
 0x31d   : > { %11968 = vmatprep.subr.bf16.mxu0 %v16593_v59  ;;  %v16647_v58 = vld [vmem:[%s18410_s13 + $0x2964] ss:$88 sps:$4 sm:$0xff]   ;;  %v16642_v59 = vld [vmem:[%s18410_s13 + $0x3458] ss:$88 sps:$4 sm:$0xff]  }
 0x31f   : > { %11805 = vmatpush1.bf16.msra.mxu1 %v16588_v3  ;;  %v16645_v3 = vld [vmem:[%s18410_s13 + $0x2960] ss:$88 sps:$4 sm:$0xff]  }
 0x320   : > { %11969 = vmatpush1.bf16.msra.mxu0 %v16591_v5  ;;  %11806 = vmatprep.subr.bf16.mxu1 %v16596_v10  ;;  %v16650_v5 = vld [vmem:[%s18410_s13 + $0x350c] ss:$88 sps:$4 sm:$0xff]  }
 0x321   : > { %11970 = vmatprep.subr.bf16.mxu0 %v16599_v61  ;;  %v16653_v10 = vld [vmem:[%s18410_s13 + $0x2a14] ss:$88 sps:$4 sm:$0xff]   ;;  %v16648_v61 = vld [vmem:[%s18410_s13 + $0x3508] ss:$88 sps:$4 sm:$0xff]  }
 0x323   : > { %11807 = vmatpush1.bf16.msra.mxu1 %v16594_v63  ;;  %v16651_v63 = vld [vmem:[%s18410_s13 + $0x2a10] ss:$88 sps:$4 sm:$0xff]  }
 0x324   : > { %11971 = vmatpush1.bf16.msra.mxu0 %v16597_v0  ;;  %11808 = vmatprep.subr.bf16.mxu1 %v16602_v4  ;;  %v16656_v0 = vld [vmem:[%s18410_s13 + $0x35bc] ss:$88 sps:$4 sm:$0xff]  }
 0x325   : > { %11972 = vmatprep.subr.bf16.mxu0 %v16605_v6  ;;  %v16659_v4 = vld [vmem:[%s18410_s13 + $0x2ac4] ss:$88 sps:$4 sm:$0xff]   ;;  %v16654_v6 = vld [vmem:[%s18410_s13 + $0x35b8] ss:$88 sps:$4 sm:$0xff]  }
 0x326   : > { %v11627_v12 = vpop.f32.mrb[4].mxu0 }
 0x327   : > { %v19296_v13 = vadd.f32 %v11627_v12, %v2128_v39  ;;  %v11629_v14 = vpop.f32.mrb[5].mxu0  ;;  %11809 = vmatpush1.bf16.msra.mxu1 %v16600_v8  ;;  %v16657_v39 = vld [vmem:[%s18410_s13 + $0x2ac0] ss:$88 sps:$4 sm:$0xff]   ;;  %v16665_v8 = vld [vmem:[%s18410_s13 + $0x2b74] ss:$88 sps:$4 sm:$0xff]  }
 0x328   : > { %v19298_v16 = vadd.f32 %v11629_v14, %v2132_v7  ;;  %v11631_v17 = vpop.f32.mrb[6].mxu0  ;;  %11973 = vmatpush1.bf16.msra.mxu0 %v16603_v40  ;;  %11810 = vmatprep.subr.bf16.mxu1 %v16608_v9  ;;  %v16662_v7 = vld [vmem:[%s18410_s13 + $0x366c] ss:$88 sps:$4 sm:$0xff]   ;;  %v16660_v40 = vld [vmem:[%s18410_s13 + $0x3668] ss:$88 sps:$4 sm:$0xff]  }
 0x329   : > { %v11632_v21 = vpop.f32.mrb[7].mxu0  ;;  %11974 = vmatprep.subr.bf16.mxu0 %v16611_v11  ;;  %v16663_v9 = vld [vmem:[%s18410_s13 + $0x2b70] ss:$88 sps:$4 sm:$0xff]   ;;  %v16668_v11 = vld [vmem:[%s18410_s13 + $0x2c24] ss:$88 sps:$4 sm:$0xff]  }
 0x32a   : > { %v13313_v30 = vcombine.low %v19296_v13, %v19298_v16  ;;  %v16671_v12 = vld [vmem:[%s18410_s13 + $0x2c] ss:$88 sps:$4 sm:$0xff]   ;;  %v16666_v14 = vld [vmem:[%s18410_s13 + $0x2c20] ss:$88 sps:$4 sm:$0xff]   ;;  %v16672_v21 = vld [vmem:[%s18410_s13 + $0x2cd0] ss:$88 sps:$4 sm:$0xff]  }
 0x32b   : > { %11811 = vmatpush1.bf16.msra.mxu1 %v16606_v29  ;;  %v16669_v17 = vld [vmem:[%s18410_s13 + $0x28] ss:$88 sps:$4 sm:$0xff]   ;;  %v16674_v29 = vld [vmem:[%s18410_s13 + $0x2cd4] ss:$88 sps:$4 sm:$0xff]  }
 0x32c   : > { %11975 = vmatpush1.bf16.msra.mxu0 %v16609_v20  ;;  %11812 = vmatprep.subr.bf16.mxu1 %v16614_v25  ;;  %v16677_v20 = vld [vmem:[%s18410_s13 + $0xdc] ss:$88 sps:$4 sm:$0xff]   ;;  %v16675_v25 = vld [vmem:[%s18410_s13 + $0xd8] ss:$88 sps:$4 sm:$0xff]   ;;  %v17002_v13 = vld [vmem:[%s18410_s13 + $0x26a8] ss:$88 sps:$4 sm:$0xff]  }
 0x32d   : > { %11976 = vmatprep.subr.bf16.mxu0 %v16617_v28  ;;  %v16680_v28 = vld [vmem:[%s18410_s13 + $0x2d84] ss:$88 sps:$4 sm:$0xff]   ;;  %v17005_v16 = vld [vmem:[%s18410_s13 + $0x1bb0] ss:$88 sps:$4 sm:$0xff]  }
 0x32f   : > { %11813 = vmatpush1.bf16.msra.mxu1 %v16612_v31  ;;  %v16683_v31 = vld [vmem:[%s18410_s13 + $0x18c] ss:$88 sps:$4 sm:$0xff]  }
 0x330   : > { %11977 = vmatpush1.bf16.msra.mxu0 %v16615_v32  ;;  %11814 = vmatprep.subr.bf16.mxu1 %v16620_v35  ;;  %v16678_v32 = vld [vmem:[%s18410_s13 + $0x2d80] ss:$88 sps:$4 sm:$0xff]  }
 0x331   : > { %11978 = vmatprep.subr.bf16.mxu0 %v16623_v36  ;;  %v16681_v35 = vld [vmem:[%s18410_s13 + $0x188] ss:$88 sps:$4 sm:$0xff]   ;;  %v16686_v36 = vld [vmem:[%s18410_s13 + $0x2e34] ss:$88 sps:$4 sm:$0xff]  }
 0x333   : > { %11815 = vmatpush1.bf16.msra.mxu1 %v16618_v37  ;;  %v16689_v37 = vld [vmem:[%s18410_s13 + $0x23c] ss:$88 sps:$4 sm:$0xff]  }
 0x334   : > { %11979 = vmatpush1.bf16.msra.mxu0 %v16621_v38  ;;  %11816 = vmatprep.subr.bf16.mxu1 %v16626_v41  ;;  %v16684_v38 = vld [vmem:[%s18410_s13 + $0x2e30] ss:$88 sps:$4 sm:$0xff]  }
 0x335   : > { %11980 = vmatprep.subr.bf16.mxu0 %v16629_v42  ;;  %v16687_v41 = vld [vmem:[%s18410_s13 + $0x238] ss:$88 sps:$4 sm:$0xff]   ;;  %v16692_v42 = vld [vmem:[%s18410_s13 + $0x2ee4] ss:$88 sps:$4 sm:$0xff]  }
 0x337   : > { %11817 = vmatpush1.bf16.msra.mxu1 %v16624_v43  ;;  %v16695_v43 = vld [vmem:[%s18410_s13 + $0x2ec] ss:$88 sps:$4 sm:$0xff]  }
 0x338   : > { %11981 = vmatpush1.bf16.msra.mxu0 %v16627_v45  ;;  %11818 = vmatprep.subr.bf16.mxu1 %v16632_v47  ;;  %v16690_v45 = vld [vmem:[%s18410_s13 + $0x2ee0] ss:$88 sps:$4 sm:$0xff]  }
 0x339   : > { %11982 = vmatprep.subr.bf16.mxu0 %v16635_v49  ;;  %v16693_v47 = vld [vmem:[%s18410_s13 + $0x2e8] ss:$88 sps:$4 sm:$0xff]   ;;  %v16698_v49 = vld [vmem:[%s18410_s13 + $0x2f94] ss:$88 sps:$4 sm:$0xff]  }
 0x33b   : > { %11819 = vmatpush1.bf16.msra.mxu1 %v16630_v50  ;;  %v16701_v50 = vld [vmem:[%s18410_s13 + $0x39c] ss:$88 sps:$4 sm:$0xff]  }
 0x33c   : > { %11983 = vmatpush1.bf16.msra.mxu0 %v16633_v52  ;;  %11820 = vmatprep.subr.bf16.mxu1 %v16638_v53  ;;  %v16696_v52 = vld [vmem:[%s18410_s13 + $0x2f90] ss:$88 sps:$4 sm:$0xff]  }
 0x33d   : > { %11984 = vmatprep.subr.bf16.mxu0 %v16641_v54  ;;  %v16699_v53 = vld [vmem:[%s18410_s13 + $0x398] ss:$88 sps:$4 sm:$0xff]   ;;  %v16704_v54 = vld [vmem:[%s18410_s13 + $0x3044] ss:$88 sps:$4 sm:$0xff]  }
 0x33f   : > { %11821 = vmatpush1.bf16.msra.mxu1 %v16636_v55  ;;  %v16707_v55 = vld [vmem:[%s18410_s13 + $0x44c] ss:$88 sps:$4 sm:$0xff]  }
 0x340   : > { %11985 = vmatpush1.bf16.msra.mxu0 %v16639_v56  ;;  %11822 = vmatprep.subr.bf16.mxu1 %v16644_v57  ;;  %v16702_v56 = vld [vmem:[%s18410_s13 + $0x3040] ss:$88 sps:$4 sm:$0xff]  }
 0x341   : > { %11986 = vmatprep.subr.bf16.mxu0 %v16647_v58  ;;  %v16705_v57 = vld [vmem:[%s18410_s13 + $0x448] ss:$88 sps:$4 sm:$0xff]   ;;  %v16710_v58 = vld [vmem:[%s18410_s13 + $0x30f4] ss:$88 sps:$4 sm:$0xff]  }
 0x343   : > { %11823 = vmatpush1.bf16.msra.mxu1 %v16642_v59  ;;  %v16713_v59 = vld [vmem:[%s18410_s13 + $0x4fc] ss:$88 sps:$4 sm:$0xff]  }
 0x344   : > { %11987 = vmatpush1.bf16.msra.mxu0 %v16645_v3  ;;  %11824 = vmatprep.subr.bf16.mxu1 %v16650_v5  ;;  %v16708_v3 = vld [vmem:[%s18410_s13 + $0x30f0] ss:$88 sps:$4 sm:$0xff]  }
 0x345   : > { %11988 = vmatprep.subr.bf16.mxu0 %v16653_v10  ;;  %v16711_v5 = vld [vmem:[%s18410_s13 + $0x4f8] ss:$88 sps:$4 sm:$0xff]   ;;  %v16716_v10 = vld [vmem:[%s18410_s13 + $0x31a4] ss:$88 sps:$4 sm:$0xff]  }
 0x347   : > { %11825 = vmatpush1.bf16.msra.mxu1 %v16648_v61  ;;  %v16719_v61 = vld [vmem:[%s18410_s13 + $0x5ac] ss:$88 sps:$4 sm:$0xff]  }
 0x348   : > { %11989 = vmatpush1.bf16.msra.mxu0 %v16651_v63  ;;  %11826 = vmatprep.subr.bf16.mxu1 %v16656_v0  ;;  %v16714_v63 = vld [vmem:[%s18410_s13 + $0x31a0] ss:$88 sps:$4 sm:$0xff]  }
 0x349   : > { %11990 = vmatprep.subr.bf16.mxu0 %v16659_v4  ;;  %v16717_v0 = vld [vmem:[%s18410_s13 + $0x5a8] ss:$88 sps:$4 sm:$0xff]   ;;  %v16722_v4 = vld [vmem:[%s18410_s13 + $0x3254] ss:$88 sps:$4 sm:$0xff]  }
 0x34b   : > { %11827 = vmatpush1.bf16.msra.mxu1 %v16654_v6  ;;  %v16725_v6 = vld [vmem:[%s18410_s13 + $0x65c] ss:$88 sps:$4 sm:$0xff]  }
 0x34c   : > { %11991 = vmatpush1.bf16.msra.mxu0 %v16657_v39  ;;  %11828 = vmatprep.subr.bf16.mxu1 %v16662_v7  ;;  %v16720_v39 = vld [vmem:[%s18410_s13 + $0x3250] ss:$88 sps:$4 sm:$0xff]  }
 0x34d   : > { %11992 = vmatprep.subr.bf16.mxu0 %v16665_v8  ;;  %v16723_v7 = vld [vmem:[%s18410_s13 + $0x658] ss:$88 sps:$4 sm:$0xff]   ;;  %v16728_v8 = vld [vmem:[%s18410_s13 + $0x3304] ss:$88 sps:$4 sm:$0xff]  }
 0x34f   : > { %11829 = vmatpush1.bf16.msra.mxu1 %v16660_v40  ;;  %v16731_v40 = vld [vmem:[%s18410_s13 + $0x70c] ss:$88 sps:$4 sm:$0xff]  }
 0x350   : > { %11993 = vmatpush1.bf16.msra.mxu0 %v16663_v9  ;;  %12044 = vmatprep.subr.bf16.mxu1 %v16671_v12  ;;  %v16726_v9 = vld [vmem:[%s18410_s13 + $0x3300] ss:$88 sps:$4 sm:$0xff]   ;;  %v16734_v12 = vld [vmem:[%s18410_s13 + $0x33b4] ss:$88 sps:$4 sm:$0xff]  }
 0x351   : > { %12003 = vmatprep.subr.bf16.mxu0 %v16668_v11  ;;  %v16729_v11 = vld [vmem:[%s18410_s13 + $0x708] ss:$88 sps:$4 sm:$0xff]  }
 0x352   : > { %11831 = vmatmul.mubr.bf16.vlgmr.msra.gmra.mrb[8].mxu1 %v18511_v23 }
 0x353   : > { %11995 = vmatmul.mubr.bf16.vlgmr.msra.gmra.mrb[8].mxu0 %v18593_v34  ;;  %12045 = vmatpush1.bf16.msra.mxu1 %v16669_v17  ;;  %v16732_v17 = vld [vmem:[%s18410_s13 + $0x33b0] ss:$88 sps:$4 sm:$0xff]  }
 0x354   : > { %12004 = vmatpush1.bf16.msra.mxu0 %v16666_v14  ;;  %12046 = vmatprep.subr.bf16.mxu1 %v16677_v20  ;;  %v16737_v14 = vld [vmem:[%s18410_s13 + $0x7bc] ss:$88 sps:$4 sm:$0xff]  }
 0x355   : > { %12005 = vmatprep.subr.bf16.mxu0 %v16674_v29  ;;  %12035 = vmatprep.mubr.bf16.mxu0 %v18509_v22  ;;  %v16735_v29 = vld [vmem:[%s18410_s13 + $0x7b8] ss:$88 sps:$4 sm:$0xff]   ;;  %v16740_v20 = vld [vmem:[%s18410_s13 + $0x3464] ss:$88 sps:$4 sm:$0xff]  }
 0x356   : > { %12076 = vmatprep.mubr.bf16.mxu1 %v18481_v60 }
 0x357   : > { %12047 = vmatpush1.bf16.msra.mxu1 %v16675_v25  ;;  %v16738_v25 = vld [vmem:[%s18410_s13 + $0x3460] ss:$88 sps:$4 sm:$0xff]  }
 0x358   : > { %12006 = vmatpush1.bf16.msra.mxu0 %v16672_v21  ;;  %12048 = vmatprep.subr.bf16.mxu1 %v16683_v31  ;;  %v16743_v21 = vld [vmem:[%s18410_s13 + $0x86c] ss:$88 sps:$4 sm:$0xff]  }
 0x359   : > { %12007 = vmatprep.subr.bf16.mxu0 %v16680_v28  ;;  %v16741_v28 = vld [vmem:[%s18410_s13 + $0x868] ss:$88 sps:$4 sm:$0xff]   ;;  %v16746_v31 = vld [vmem:[%s18410_s13 + $0x3514] ss:$88 sps:$4 sm:$0xff]  }
 0x35b   : > { %12049 = vmatpush1.bf16.msra.mxu1 %v16681_v35  ;;  %v16744_v35 = vld [vmem:[%s18410_s13 + $0x3510] ss:$88 sps:$4 sm:$0xff]  }
 0x35c   : > { %12008 = vmatpush1.bf16.msra.mxu0 %v16678_v32  ;;  %12050 = vmatprep.subr.bf16.mxu1 %v16689_v37  ;;  %v16749_v32 = vld [vmem:[%s18410_s13 + $0x91c] ss:$88 sps:$4 sm:$0xff]  }
 0x35d   : > { %12009 = vmatprep.subr.bf16.mxu0 %v16686_v36  ;;  %v16747_v36 = vld [vmem:[%s18410_s13 + $0x918] ss:$88 sps:$4 sm:$0xff]   ;;  %v16752_v37 = vld [vmem:[%s18410_s13 + $0x35c4] ss:$88 sps:$4 sm:$0xff]  }
 0x35f   : > { %12051 = vmatpush1.bf16.msra.mxu1 %v16687_v41  ;;  %v16750_v41 = vld [vmem:[%s18410_s13 + $0x35c0] ss:$88 sps:$4 sm:$0xff]  }
 0x360   : > { %12010 = vmatpush1.bf16.msra.mxu0 %v16684_v38  ;;  %12052 = vmatprep.subr.bf16.mxu1 %v16695_v43  ;;  %v16755_v38 = vld [vmem:[%s18410_s13 + $0x9cc] ss:$88 sps:$4 sm:$0xff]  }
 0x361   : > { %12011 = vmatprep.subr.bf16.mxu0 %v16692_v42  ;;  %v16753_v42 = vld [vmem:[%s18410_s13 + $0x9c8] ss:$88 sps:$4 sm:$0xff]   ;;  %v16758_v43 = vld [vmem:[%s18410_s13 + $0x3674] ss:$88 sps:$4 sm:$0xff]  }
 0x363   : > { %12053 = vmatpush1.bf16.msra.mxu1 %v16693_v47  ;;  %v16756_v47 = vld [vmem:[%s18410_s13 + $0x3670] ss:$88 sps:$4 sm:$0xff]  }
 0x364   : > { %12012 = vmatpush1.bf16.msra.mxu0 %v16690_v45  ;;  %12054 = vmatprep.subr.bf16.mxu1 %v16701_v50  ;;  %v16761_v45 = vld [vmem:[%s18410_s13 + $0xa7c] ss:$88 sps:$4 sm:$0xff]   ;;  %v16764_v50 = vld [vmem:[%s18410_s13 + $0xb2c] ss:$88 sps:$4 sm:$0xff]  }
 0x365   : > { %12013 = vmatprep.subr.bf16.mxu0 %v16698_v49  ;;  %v16759_v49 = vld [vmem:[%s18410_s13 + $0xa78] ss:$88 sps:$4 sm:$0xff]  }
 0x367   : > { %12055 = vmatpush1.bf16.msra.mxu1 %v16699_v53  ;;  %v16762_v53 = vld [vmem:[%s18410_s13 + $0xb28] ss:$88 sps:$4 sm:$0xff]  }
 0x368   : > { %12014 = vmatpush1.bf16.msra.mxu0 %v16696_v52  ;;  %12056 = vmatprep.subr.bf16.mxu1 %v16707_v55  ;;  %v16767_v52 = vld [vmem:[%s18410_s13 + $0x34] ss:$88 sps:$4 sm:$0xff]  }
 0x369   : > { %12015 = vmatprep.subr.bf16.mxu0 %v16704_v54  ;;  %v16765_v54 = vld [vmem:[%s18410_s13 + $0x30] ss:$88 sps:$4 sm:$0xff]   ;;  %v16770_v55 = vld [vmem:[%s18410_s13 + $0xbdc] ss:$88 sps:$4 sm:$0xff]  }
 0x36b   : > { %12057 = vmatpush1.bf16.msra.mxu1 %v16705_v57  ;;  %v16768_v57 = vld [vmem:[%s18410_s13 + $0xbd8] ss:$88 sps:$4 sm:$0xff]  }
 0x36c   : > { %12016 = vmatpush1.bf16.msra.mxu0 %v16702_v56  ;;  %12058 = vmatprep.subr.bf16.mxu1 %v16713_v59  ;;  %v16773_v56 = vld [vmem:[%s18410_s13 + $0xe4] ss:$88 sps:$4 sm:$0xff]  }
 0x36d   : > { %12017 = vmatprep.subr.bf16.mxu0 %v16710_v58  ;;  %v16771_v58 = vld [vmem:[%s18410_s13 + $0xe0] ss:$88 sps:$4 sm:$0xff]   ;;  %v16776_v59 = vld [vmem:[%s18410_s13 + $0xc8c] ss:$88 sps:$4 sm:$0xff]  }
 0x36f   : > { %12059 = vmatpush1.bf16.msra.mxu1 %v16711_v5  ;;  %v16774_v5 = vld [vmem:[%s18410_s13 + $0xc88] ss:$88 sps:$4 sm:$0xff]  }
 0x370   : > { %12018 = vmatpush1.bf16.msra.mxu0 %v16708_v3  ;;  %12060 = vmatprep.subr.bf16.mxu1 %v16719_v61  ;;  %v16779_v3 = vld [vmem:[%s18410_s13 + $0x194] ss:$88 sps:$4 sm:$0xff]  }
 0x371   : > { %12019 = vmatprep.subr.bf16.mxu0 %v16716_v10  ;;  %v16777_v10 = vld [vmem:[%s18410_s13 + $0x190] ss:$88 sps:$4 sm:$0xff]   ;;  %v16782_v61 = vld [vmem:[%s18410_s13 + $0xd3c] ss:$88 sps:$4 sm:$0xff]  }
 0x373   : > { %12061 = vmatpush1.bf16.msra.mxu1 %v16717_v0  ;;  %v16780_v0 = vld [vmem:[%s18410_s13 + $0xd38] ss:$88 sps:$4 sm:$0xff]  }
 0x374   : > { %12020 = vmatpush1.bf16.msra.mxu0 %v16714_v63  ;;  %12062 = vmatprep.subr.bf16.mxu1 %v16725_v6  ;;  %v16785_v63 = vld [vmem:[%s18410_s13 + $0x244] ss:$88 sps:$4 sm:$0xff]  }
 0x375   : > { %12021 = vmatprep.subr.bf16.mxu0 %v16722_v4  ;;  %v16783_v4 = vld [vmem:[%s18410_s13 + $0x240] ss:$88 sps:$4 sm:$0xff]   ;;  %v16788_v6 = vld [vmem:[%s18410_s13 + $0xdec] ss:$88 sps:$4 sm:$0xff]  }
 0x377   : > { %12063 = vmatpush1.bf16.msra.mxu1 %v16723_v7  ;;  %v16786_v7 = vld [vmem:[%s18410_s13 + $0xde8] ss:$88 sps:$4 sm:$0xff]  }
 0x378   : > { %12022 = vmatpush1.bf16.msra.mxu0 %v16720_v39  ;;  %12064 = vmatprep.subr.bf16.mxu1 %v16731_v40  ;;  %v16791_v39 = vld [vmem:[%s18410_s13 + $0x2f4] ss:$88 sps:$4 sm:$0xff]  }
 0x379   : > { %12023 = vmatprep.subr.bf16.mxu0 %v16728_v8  ;;  %v16789_v8 = vld [vmem:[%s18410_s13 + $0x2f0] ss:$88 sps:$4 sm:$0xff]   ;;  %v16794_v40 = vld [vmem:[%s18410_s13 + $0xe9c] ss:$88 sps:$4 sm:$0xff]  }
 0x37b   : > { %12065 = vmatpush1.bf16.msra.mxu1 %v16729_v11  ;;  %v16792_v11 = vld [vmem:[%s18410_s13 + $0xe98] ss:$88 sps:$4 sm:$0xff]  }
 0x37c   : > { %12024 = vmatpush1.bf16.msra.mxu0 %v16726_v9  ;;  %12066 = vmatprep.subr.bf16.mxu1 %v16737_v14  ;;  %v16797_v9 = vld [vmem:[%s18410_s13 + $0x3a4] ss:$88 sps:$4 sm:$0xff]  }
 0x37d   : > { %12025 = vmatprep.subr.bf16.mxu0 %v16734_v12  ;;  %v16795_v12 = vld [vmem:[%s18410_s13 + $0x3a0] ss:$88 sps:$4 sm:$0xff]   ;;  %v16800_v14 = vld [vmem:[%s18410_s13 + $0xf4c] ss:$88 sps:$4 sm:$0xff]  }
 0x37f   : > { %12067 = vmatpush1.bf16.msra.mxu1 %v16735_v29  ;;  %v16798_v29 = vld [vmem:[%s18410_s13 + $0xf48] ss:$88 sps:$4 sm:$0xff]  }
 0x380   : > { %12026 = vmatpush1.bf16.msra.mxu0 %v16732_v17  ;;  %12068 = vmatprep.subr.bf16.mxu1 %v16743_v21  ;;  %v16803_v17 = vld [vmem:[%s18410_s13 + $0x454] ss:$88 sps:$4 sm:$0xff]  }
 0x381   : > { %12027 = vmatprep.subr.bf16.mxu0 %v16740_v20  ;;  %v16801_v20 = vld [vmem:[%s18410_s13 + $0x450] ss:$88 sps:$4 sm:$0xff]   ;;  %v16806_v21 = vld [vmem:[%s18410_s13 + $0xffc] ss:$88 sps:$4 sm:$0xff]  }
 0x383   : > { %12069 = vmatpush1.bf16.msra.mxu1 %v16741_v28  ;;  %v16804_v28 = vld [vmem:[%s18410_s13 + $0xff8] ss:$88 sps:$4 sm:$0xff]  }
 0x384   : > { %12028 = vmatpush1.bf16.msra.mxu0 %v16738_v25  ;;  %12070 = vmatprep.subr.bf16.mxu1 %v16749_v32  ;;  %v16809_v25 = vld [vmem:[%s18410_s13 + $0x504] ss:$88 sps:$4 sm:$0xff]  }
 0x385   : > { %12029 = vmatprep.subr.bf16.mxu0 %v16746_v31  ;;  %v16807_v31 = vld [vmem:[%s18410_s13 + $0x500] ss:$88 sps:$4 sm:$0xff]   ;;  %v16812_v32 = vld [vmem:[%s18410_s13 + $0x10ac] ss:$88 sps:$4 sm:$0xff]  }
 0x387   : > { %12071 = vmatpush1.bf16.msra.mxu1 %v16747_v36  ;;  %v16810_v36 = vld [vmem:[%s18410_s13 + $0x10a8] ss:$88 sps:$4 sm:$0xff]  }
 0x388   : > { %12030 = vmatpush1.bf16.msra.mxu0 %v16744_v35  ;;  %12072 = vmatprep.subr.bf16.mxu1 %v16755_v38  ;;  %v16815_v35 = vld [vmem:[%s18410_s13 + $0x5b4] ss:$88 sps:$4 sm:$0xff]  }
 0x389   : > { %12031 = vmatprep.subr.bf16.mxu0 %v16752_v37  ;;  %v16813_v37 = vld [vmem:[%s18410_s13 + $0x5b0] ss:$88 sps:$4 sm:$0xff]   ;;  %v16818_v38 = vld [vmem:[%s18410_s13 + $0x115c] ss:$88 sps:$4 sm:$0xff]  }
 0x38b   : > { %12073 = vmatpush1.bf16.msra.mxu1 %v16753_v42  ;;  %v16816_v42 = vld [vmem:[%s18410_s13 + $0x1158] ss:$88 sps:$4 sm:$0xff]  }
 0x38c   : > { %12032 = vmatpush1.bf16.msra.mxu0 %v16750_v41  ;;  %12074 = vmatprep.subr.bf16.mxu1 %v16761_v45  ;;  %v16821_v41 = vld [vmem:[%s18410_s13 + $0x664] ss:$88 sps:$4 sm:$0xff]  }
 0x38d   : > { %12033 = vmatprep.subr.bf16.mxu0 %v16758_v43  ;;  %v16819_v43 = vld [vmem:[%s18410_s13 + $0x660] ss:$88 sps:$4 sm:$0xff]   ;;  %v16824_v45 = vld [vmem:[%s18410_s13 + $0x120c] ss:$88 sps:$4 sm:$0xff]  }
 0x38f   : > { %12075 = vmatpush1.bf16.msra.mxu1 %v16759_v49  ;;  %v16822_v49 = vld [vmem:[%s18410_s13 + $0x1208] ss:$88 sps:$4 sm:$0xff]  }
 0x390   : > { %12034 = vmatpush1.bf16.msra.mxu0 %v16756_v47  ;;  %12085 = vmatprep.subr.bf16.mxu1 %v16764_v50  ;;  %v16827_v47 = vld [vmem:[%s18410_s13 + $0x714] ss:$88 sps:$4 sm:$0xff]   ;;  %v16825_v50 = vld [vmem:[%s18410_s13 + $0x710] ss:$88 sps:$4 sm:$0xff]  }
 0x391   : > { %12249 = vmatprep.subr.bf16.mxu0 %v16767_v52  ;;  %v16830_v52 = vld [vmem:[%s18410_s13 + $0x12bc] ss:$88 sps:$4 sm:$0xff]  }
 0x392   : > { %12077 = vmatmul.mubr.bf16.vlgmr.msra.gmra.mrb[12].mxu1 %v18503_v18 }
 0x393   : > { %12036 = vmatmul.mubr.bf16.vlgmr.msra.gmra.mrb[8].mxu0 %v18511_v23  ;;  %12086 = vmatpush1.bf16.msra.mxu1 %v16762_v53  ;;  %v16833_v53 = vld [vmem:[%s18410_s13 + $0x7c4] ss:$88 sps:$4 sm:$0xff]  }
 0x394   : > { %12250 = vmatpush1.bf16.msra.mxu0 %v16765_v54  ;;  %12087 = vmatprep.subr.bf16.mxu1 %v16770_v55  ;;  %v16828_v54 = vld [vmem:[%s18410_s13 + $0x12b8] ss:$88 sps:$4 sm:$0xff]  }
 0x395   : > { %12251 = vmatprep.subr.bf16.mxu0 %v16773_v56  ;;  %12117 = vmatprep.mubr.bf16.mxu1 %v18517_v26  ;;  %v16831_v55 = vld [vmem:[%s18410_s13 + $0x7c0] ss:$88 sps:$4 sm:$0xff]   ;;  %v16836_v56 = vld [vmem:[%s18410_s13 + $0x136c] ss:$88 sps:$4 sm:$0xff]  }
 0x396   : > { %12281 = vmatprep.mubr.bf16.mxu0 %v18481_v60 }
 0x397   : > { %12088 = vmatpush1.bf16.msra.mxu1 %v16768_v57  ;;  %v16839_v57 = vld [vmem:[%s18410_s13 + $0x874] ss:$88 sps:$4 sm:$0xff]  }
 0x398   : > { %12252 = vmatpush1.bf16.msra.mxu0 %v16771_v58  ;;  %12089 = vmatprep.subr.bf16.mxu1 %v16776_v59  ;;  %v16834_v58 = vld [vmem:[%s18410_s13 + $0x1368] ss:$88 sps:$4 sm:$0xff]  }
 0x399   : > { %12253 = vmatprep.subr.bf16.mxu0 %v16779_v3  ;;  %v16837_v59 = vld [vmem:[%s18410_s13 + $0x870] ss:$88 sps:$4 sm:$0xff]   ;;  %v16842_v3 = vld [vmem:[%s18410_s13 + $0x141c] ss:$88 sps:$4 sm:$0xff]  }
 0x39b   : > { %12090 = vmatpush1.bf16.msra.mxu1 %v16774_v5  ;;  %v16845_v5 = vld [vmem:[%s18410_s13 + $0x924] ss:$88 sps:$4 sm:$0xff]  }
 0x39c   : > { %12254 = vmatpush1.bf16.msra.mxu0 %v16777_v10  ;;  %12091 = vmatprep.subr.bf16.mxu1 %v16782_v61  ;;  %v16840_v10 = vld [vmem:[%s18410_s13 + $0x1418] ss:$88 sps:$4 sm:$0xff]  }
 0x39d   : > { %12255 = vmatprep.subr.bf16.mxu0 %v16785_v63  ;;  %v16843_v61 = vld [vmem:[%s18410_s13 + $0x920] ss:$88 sps:$4 sm:$0xff]   ;;  %v16848_v63 = vld [vmem:[%s18410_s13 + $0x14cc] ss:$88 sps:$4 sm:$0xff]  }
 0x39f   : > { %12092 = vmatpush1.bf16.msra.mxu1 %v16780_v0  ;;  %v16851_v0 = vld [vmem:[%s18410_s13 + $0x9d4] ss:$88 sps:$4 sm:$0xff]  }
 0x3a0   : > { %12256 = vmatpush1.bf16.msra.mxu0 %v16783_v4  ;;  %12093 = vmatprep.subr.bf16.mxu1 %v16788_v6  ;;  %v16846_v4 = vld [vmem:[%s18410_s13 + $0x14c8] ss:$88 sps:$4 sm:$0xff]  }
 0x3a1   : > { %12257 = vmatprep.subr.bf16.mxu0 %v16791_v39  ;;  %v16849_v6 = vld [vmem:[%s18410_s13 + $0x9d0] ss:$88 sps:$4 sm:$0xff]   ;;  %v16854_v39 = vld [vmem:[%s18410_s13 + $0x157c] ss:$88 sps:$4 sm:$0xff]  }
 0x3a3   : > { %12094 = vmatpush1.bf16.msra.mxu1 %v16786_v7  ;;  %v16857_v7 = vld [vmem:[%s18410_s13 + $0xa84] ss:$88 sps:$4 sm:$0xff]  }
 0x3a4   : > { %12258 = vmatpush1.bf16.msra.mxu0 %v16789_v8  ;;  %12095 = vmatprep.subr.bf16.mxu1 %v16794_v40  ;;  %v16852_v8 = vld [vmem:[%s18410_s13 + $0x1578] ss:$88 sps:$4 sm:$0xff]  }
 0x3a5   : > { %12259 = vmatprep.subr.bf16.mxu0 %v16797_v9  ;;  %v16855_v40 = vld [vmem:[%s18410_s13 + $0xa80] ss:$88 sps:$4 sm:$0xff]   ;;  %v16860_v9 = vld [vmem:[%s18410_s13 + $0x162c] ss:$88 sps:$4 sm:$0xff]  }
 0x3a7   : > { %12096 = vmatpush1.bf16.msra.mxu1 %v16792_v11  ;;  %v16863_v11 = vld [vmem:[%s18410_s13 + $0xb34] ss:$88 sps:$4 sm:$0xff]  }
 0x3a8   : > { %12260 = vmatpush1.bf16.msra.mxu0 %v16795_v12  ;;  %12097 = vmatprep.subr.bf16.mxu1 %v16800_v14  ;;  %v16858_v12 = vld [vmem:[%s18410_s13 + $0x1628] ss:$88 sps:$4 sm:$0xff]  }
 0x3a9   : > { %12261 = vmatprep.subr.bf16.mxu0 %v16803_v17  ;;  %v16861_v14 = vld [vmem:[%s18410_s13 + $0xb30] ss:$88 sps:$4 sm:$0xff]   ;;  %v16866_v17 = vld [vmem:[%s18410_s13 + $0x16dc] ss:$88 sps:$4 sm:$0xff]  }
 0x3ab   : > { %12098 = vmatpush1.bf16.msra.mxu1 %v16798_v29  ;;  %v16869_v29 = vld [vmem:[%s18410_s13 + $0xbe4] ss:$88 sps:$4 sm:$0xff]  }
 0x3ac   : > { %12262 = vmatpush1.bf16.msra.mxu0 %v16801_v20  ;;  %12099 = vmatprep.subr.bf16.mxu1 %v16806_v21  ;;  %v16864_v20 = vld [vmem:[%s18410_s13 + $0x16d8] ss:$88 sps:$4 sm:$0xff]  }
 0x3ad   : > { %12263 = vmatprep.subr.bf16.mxu0 %v16809_v25  ;;  %v16867_v21 = vld [vmem:[%s18410_s13 + $0xbe0] ss:$88 sps:$4 sm:$0xff]   ;;  %v16872_v25 = vld [vmem:[%s18410_s13 + $0x178c] ss:$88 sps:$4 sm:$0xff]  }
 0x3af   : > { %12100 = vmatpush1.bf16.msra.mxu1 %v16804_v28  ;;  %v16875_v28 = vld [vmem:[%s18410_s13 + $0xc94] ss:$88 sps:$4 sm:$0xff]  }
 0x3b0   : > { %12264 = vmatpush1.bf16.msra.mxu0 %v16807_v31  ;;  %12101 = vmatprep.subr.bf16.mxu1 %v16812_v32  ;;  %v16870_v31 = vld [vmem:[%s18410_s13 + $0x1788] ss:$88 sps:$4 sm:$0xff]  }
 0x3b1   : > { %12265 = vmatprep.subr.bf16.mxu0 %v16815_v35  ;;  %v16873_v32 = vld [vmem:[%s18410_s13 + $0xc90] ss:$88 sps:$4 sm:$0xff]   ;;  %v16878_v35 = vld [vmem:[%s18410_s13 + $0x183c] ss:$88 sps:$4 sm:$0xff]  }
 0x3b3   : > { %12102 = vmatpush1.bf16.msra.mxu1 %v16810_v36  ;;  %v16881_v36 = vld [vmem:[%s18410_s13 + $0xd44] ss:$88 sps:$4 sm:$0xff]  }
 0x3b4   : > { %12266 = vmatpush1.bf16.msra.mxu0 %v16813_v37  ;;  %12103 = vmatprep.subr.bf16.mxu1 %v16818_v38  ;;  %v16876_v37 = vld [vmem:[%s18410_s13 + $0x1838] ss:$88 sps:$4 sm:$0xff]  }
 0x3b5   : > { %12267 = vmatprep.subr.bf16.mxu0 %v16821_v41  ;;  %v16879_v38 = vld [vmem:[%s18410_s13 + $0xd40] ss:$88 sps:$4 sm:$0xff]   ;;  %v16884_v41 = vld [vmem:[%s18410_s13 + $0x18ec] ss:$88 sps:$4 sm:$0xff]  }
 0x3b7   : > { %12104 = vmatpush1.bf16.msra.mxu1 %v16816_v42  ;;  %v16887_v42 = vld [vmem:[%s18410_s13 + $0xdf4] ss:$88 sps:$4 sm:$0xff]  }
 0x3b8   : > { %12268 = vmatpush1.bf16.msra.mxu0 %v16819_v43  ;;  %12105 = vmatprep.subr.bf16.mxu1 %v16824_v45  ;;  %v16882_v43 = vld [vmem:[%s18410_s13 + $0x18e8] ss:$88 sps:$4 sm:$0xff]  }
 0x3b9   : > { %12269 = vmatprep.subr.bf16.mxu0 %v16827_v47  ;;  %v16885_v45 = vld [vmem:[%s18410_s13 + $0xdf0] ss:$88 sps:$4 sm:$0xff]   ;;  %v16890_v47 = vld [vmem:[%s18410_s13 + $0x199c] ss:$88 sps:$4 sm:$0xff]  }
 0x3bb   : > { %12106 = vmatpush1.bf16.msra.mxu1 %v16822_v49  ;;  %v16893_v49 = vld [vmem:[%s18410_s13 + $0xea4] ss:$88 sps:$4 sm:$0xff]  }
 0x3bc   : > { %12270 = vmatpush1.bf16.msra.mxu0 %v16825_v50  ;;  %12107 = vmatprep.subr.bf16.mxu1 %v16830_v52  ;;  %v16888_v50 = vld [vmem:[%s18410_s13 + $0x1998] ss:$88 sps:$4 sm:$0xff]  }
 0x3bd   : > { %12271 = vmatprep.subr.bf16.mxu0 %v16833_v53  ;;  %v16891_v52 = vld [vmem:[%s18410_s13 + $0xea0] ss:$88 sps:$4 sm:$0xff]   ;;  %v16896_v53 = vld [vmem:[%s18410_s13 + $0x1a4c] ss:$88 sps:$4 sm:$0xff]  }
 0x3bf   : > { %12108 = vmatpush1.bf16.msra.mxu1 %v16828_v54  ;;  %v16899_v54 = vld [vmem:[%s18410_s13 + $0xf54] ss:$88 sps:$4 sm:$0xff]  }
 0x3c0   : > { %12272 = vmatpush1.bf16.msra.mxu0 %v16831_v55  ;;  %12109 = vmatprep.subr.bf16.mxu1 %v16836_v56  ;;  %v16894_v55 = vld [vmem:[%s18410_s13 + $0x1a48] ss:$88 sps:$4 sm:$0xff]  }
 0x3c1   : > { %12273 = vmatprep.subr.bf16.mxu0 %v16839_v57  ;;  %v16897_v56 = vld [vmem:[%s18410_s13 + $0xf50] ss:$88 sps:$4 sm:$0xff]   ;;  %v16902_v57 = vld [vmem:[%s18410_s13 + $0x1afc] ss:$88 sps:$4 sm:$0xff]  }
 0x3c3   : > { %12110 = vmatpush1.bf16.msra.mxu1 %v16834_v58  ;;  %v16905_v58 = vld [vmem:[%s18410_s13 + $0x1004] ss:$88 sps:$4 sm:$0xff]  }
 0x3c4   : > { %12274 = vmatpush1.bf16.msra.mxu0 %v16837_v59  ;;  %12111 = vmatprep.subr.bf16.mxu1 %v16842_v3  ;;  %v16900_v59 = vld [vmem:[%s18410_s13 + $0x1af8] ss:$88 sps:$4 sm:$0xff]  }
 0x3c5   : > { %12275 = vmatprep.subr.bf16.mxu0 %v16845_v5  ;;  %v16903_v3 = vld [vmem:[%s18410_s13 + $0x1000] ss:$88 sps:$4 sm:$0xff]   ;;  %v16908_v5 = vld [vmem:[%s18410_s13 + $0x1bac] ss:$88 sps:$4 sm:$0xff]  }
 0x3c7   : > { %12112 = vmatpush1.bf16.msra.mxu1 %v16840_v10  ;;  %v16911_v10 = vld [vmem:[%s18410_s13 + $0x10b4] ss:$88 sps:$4 sm:$0xff]  }
 0x3c8   : > { %12276 = vmatpush1.bf16.msra.mxu0 %v16843_v61  ;;  %12113 = vmatprep.subr.bf16.mxu1 %v16848_v63  ;;  %v16906_v61 = vld [vmem:[%s18410_s13 + $0x1ba8] ss:$88 sps:$4 sm:$0xff]  }
 0x3c9   : > { %12277 = vmatprep.subr.bf16.mxu0 %v16851_v0  ;;  %v16909_v63 = vld [vmem:[%s18410_s13 + $0x10b0] ss:$88 sps:$4 sm:$0xff]   ;;  %v16914_v0 = vld [vmem:[%s18410_s13 + $0x1c5c] ss:$88 sps:$4 sm:$0xff]  }
 0x3cb   : > { %12114 = vmatpush1.bf16.msra.mxu1 %v16846_v4  ;;  %v16917_v4 = vld [vmem:[%s18410_s13 + $0x1164] ss:$88 sps:$4 sm:$0xff]  }
 0x3cc   : > { %12278 = vmatpush1.bf16.msra.mxu0 %v16849_v6  ;;  %12115 = vmatprep.subr.bf16.mxu1 %v16854_v39  ;;  %v16912_v6 = vld [vmem:[%s18410_s13 + $0x1c58] ss:$88 sps:$4 sm:$0xff]  }
 0x3cd   : > { %12279 = vmatprep.subr.bf16.mxu0 %v16857_v7  ;;  %v16915_v39 = vld [vmem:[%s18410_s13 + $0x1160] ss:$88 sps:$4 sm:$0xff]   ;;  %v16920_v7 = vld [vmem:[%s18410_s13 + $0x1d0c] ss:$88 sps:$4 sm:$0xff]  }
 0x3cf   : > { %12116 = vmatpush1.bf16.msra.mxu1 %v16852_v8  ;;  %v16923_v8 = vld [vmem:[%s18410_s13 + $0x1214] ss:$88 sps:$4 sm:$0xff]  }
 0x3d0   : > { %12280 = vmatpush1.bf16.msra.mxu0 %v16855_v40  ;;  %12126 = vmatprep.subr.bf16.mxu1 %v16860_v9  ;;  %v16918_v40 = vld [vmem:[%s18410_s13 + $0x1d08] ss:$88 sps:$4 sm:$0xff]  }
 0x3d1   : > { %12290 = vmatprep.subr.bf16.mxu0 %v16863_v11  ;;  %v16921_v9 = vld [vmem:[%s18410_s13 + $0x1210] ss:$88 sps:$4 sm:$0xff]   ;;  %v16926_v11 = vld [vmem:[%s18410_s13 + $0x1dbc] ss:$88 sps:$4 sm:$0xff]  }
 0x3d2   : > { %12118 = vmatmul.mubr.bf16.vlgmr.msra.gmra.mrb[12].mxu1 %v18589_v33 }
 0x3d3   : > { %12282 = vmatmul.mubr.bf16.vlgmr.msra.gmra.mrb[12].mxu0 %v18503_v18  ;;  %12127 = vmatpush1.bf16.msra.mxu1 %v16858_v12  ;;  %v16929_v12 = vld [vmem:[%s18410_s13 + $0x12c4] ss:$88 sps:$4 sm:$0xff]  }
 0x3d4   : > { %12291 = vmatpush1.bf16.msra.mxu0 %v16861_v14  ;;  %12128 = vmatprep.subr.bf16.mxu1 %v16866_v17  ;;  %v16924_v14 = vld [vmem:[%s18410_s13 + $0x1db8] ss:$88 sps:$4 sm:$0xff]  }
 0x3d5   : > { %12292 = vmatprep.subr.bf16.mxu0 %v16869_v29  ;;  %12158 = vmatprep.mubr.bf16.mxu1 %v18487_v2  ;;  %v16927_v17 = vld [vmem:[%s18410_s13 + $0x12c0] ss:$88 sps:$4 sm:$0xff]   ;;  %v16932_v29 = vld [vmem:[%s18410_s13 + $0x1e6c] ss:$88 sps:$4 sm:$0xff]  }
 0x3d6   : > { %12322 = vmatprep.mubr.bf16.mxu0 %v18517_v26 }
 0x3d7   : > { %12129 = vmatpush1.bf16.msra.mxu1 %v16864_v20  ;;  %v16935_v20 = vld [vmem:[%s18410_s13 + $0x1374] ss:$88 sps:$4 sm:$0xff]  }
 0x3d8   : > { %12293 = vmatpush1.bf16.msra.mxu0 %v16867_v21  ;;  %12130 = vmatprep.subr.bf16.mxu1 %v16872_v25  ;;  %v16930_v21 = vld [vmem:[%s18410_s13 + $0x1e68] ss:$88 sps:$4 sm:$0xff]  }
 0x3d9   : > { %12294 = vmatprep.subr.bf16.mxu0 %v16875_v28  ;;  %v16933_v25 = vld [vmem:[%s18410_s13 + $0x1370] ss:$88 sps:$4 sm:$0xff]   ;;  %v16938_v28 = vld [vmem:[%s18410_s13 + $0x1f1c] ss:$88 sps:$4 sm:$0xff]  }
 0x3db   : > { %12131 = vmatpush1.bf16.msra.mxu1 %v16870_v31  ;;  %v16941_v31 = vld [vmem:[%s18410_s13 + $0x1424] ss:$88 sps:$4 sm:$0xff]  }
 0x3dc   : > { %12295 = vmatpush1.bf16.msra.mxu0 %v16873_v32  ;;  %12132 = vmatprep.subr.bf16.mxu1 %v16878_v35  ;;  %v16936_v32 = vld [vmem:[%s18410_s13 + $0x1f18] ss:$88 sps:$4 sm:$0xff]  }
 0x3dd   : > { %12296 = vmatprep.subr.bf16.mxu0 %v16881_v36  ;;  %v16939_v35 = vld [vmem:[%s18410_s13 + $0x1420] ss:$88 sps:$4 sm:$0xff]   ;;  %v16944_v36 = vld [vmem:[%s18410_s13 + $0x1fcc] ss:$88 sps:$4 sm:$0xff]  }
 0x3df   : > { %12133 = vmatpush1.bf16.msra.mxu1 %v16876_v37  ;;  %v16947_v37 = vld [vmem:[%s18410_s13 + $0x14d4] ss:$88 sps:$4 sm:$0xff]  }
 0x3e0   : > { %12297 = vmatpush1.bf16.msra.mxu0 %v16879_v38  ;;  %12134 = vmatprep.subr.bf16.mxu1 %v16884_v41  ;;  %v16942_v38 = vld [vmem:[%s18410_s13 + $0x1fc8] ss:$88 sps:$4 sm:$0xff]  }
 0x3e1   : > { %12298 = vmatprep.subr.bf16.mxu0 %v16887_v42  ;;  %v16945_v41 = vld [vmem:[%s18410_s13 + $0x14d0] ss:$88 sps:$4 sm:$0xff]   ;;  %v16950_v42 = vld [vmem:[%s18410_s13 + $0x207c] ss:$88 sps:$4 sm:$0xff]  }
 0x3e3   : > { %12135 = vmatpush1.bf16.msra.mxu1 %v16882_v43  ;;  %v16953_v43 = vld [vmem:[%s18410_s13 + $0x1584] ss:$88 sps:$4 sm:$0xff]  }
 0x3e4   : > { %12299 = vmatpush1.bf16.msra.mxu0 %v16885_v45  ;;  %12136 = vmatprep.subr.bf16.mxu1 %v16890_v47  ;;  %v16948_v45 = vld [vmem:[%s18410_s13 + $0x2078] ss:$88 sps:$4 sm:$0xff]  }
 0x3e5   : > { %12300 = vmatprep.subr.bf16.mxu0 %v16893_v49  ;;  %v16951_v47 = vld [vmem:[%s18410_s13 + $0x1580] ss:$88 sps:$4 sm:$0xff]   ;;  %v16956_v49 = vld [vmem:[%s18410_s13 + $0x212c] ss:$88 sps:$4 sm:$0xff]  }
 0x3e7   : > { %12137 = vmatpush1.bf16.msra.mxu1 %v16888_v50  ;;  %v16959_v50 = vld [vmem:[%s18410_s13 + $0x1634] ss:$88 sps:$4 sm:$0xff]  }
 0x3e8   : > { %12301 = vmatpush1.bf16.msra.mxu0 %v16891_v52  ;;  %12138 = vmatprep.subr.bf16.mxu1 %v16896_v53  ;;  %v16954_v52 = vld [vmem:[%s18410_s13 + $0x2128] ss:$88 sps:$4 sm:$0xff]  }
 0x3e9   : > { %12302 = vmatprep.subr.bf16.mxu0 %v16899_v54  ;;  %v16957_v53 = vld [vmem:[%s18410_s13 + $0x1630] ss:$88 sps:$4 sm:$0xff]   ;;  %v16962_v54 = vld [vmem:[%s18410_s13 + $0x21dc] ss:$88 sps:$4 sm:$0xff]  }
 0x3eb   : > { %12139 = vmatpush1.bf16.msra.mxu1 %v16894_v55  ;;  %v16965_v55 = vld [vmem:[%s18410_s13 + $0x16e4] ss:$88 sps:$4 sm:$0xff]  }
 0x3ec   : > { %12303 = vmatpush1.bf16.msra.mxu0 %v16897_v56  ;;  %12140 = vmatprep.subr.bf16.mxu1 %v16902_v57  ;;  %v16960_v56 = vld [vmem:[%s18410_s13 + $0x21d8] ss:$88 sps:$4 sm:$0xff]  }
 0x3ed   : > { %12304 = vmatprep.subr.bf16.mxu0 %v16905_v58  ;;  %v16963_v57 = vld [vmem:[%s18410_s13 + $0x16e0] ss:$88 sps:$4 sm:$0xff]   ;;  %v16968_v58 = vld [vmem:[%s18410_s13 + $0x228c] ss:$88 sps:$4 sm:$0xff]  }
 0x3ef   : > { %12141 = vmatpush1.bf16.msra.mxu1 %v16900_v59  ;;  %v16971_v59 = vld [vmem:[%s18410_s13 + $0x1794] ss:$88 sps:$4 sm:$0xff]  }
 0x3f0   : > { %12305 = vmatpush1.bf16.msra.mxu0 %v16903_v3  ;;  %12142 = vmatprep.subr.bf16.mxu1 %v16908_v5  ;;  %v16966_v3 = vld [vmem:[%s18410_s13 + $0x2288] ss:$88 sps:$4 sm:$0xff]  }
 0x3f1   : > { %12306 = vmatprep.subr.bf16.mxu0 %v16911_v10  ;;  %v16969_v5 = vld [vmem:[%s18410_s13 + $0x1790] ss:$88 sps:$4 sm:$0xff]   ;;  %v16974_v10 = vld [vmem:[%s18410_s13 + $0x233c] ss:$88 sps:$4 sm:$0xff]  }
 0x3f3   : > { %12143 = vmatpush1.bf16.msra.mxu1 %v16906_v61  ;;  %v16977_v61 = vld [vmem:[%s18410_s13 + $0x1844] ss:$88 sps:$4 sm:$0xff]  }
 0x3f4   : > { %12307 = vmatpush1.bf16.msra.mxu0 %v16909_v63  ;;  %12144 = vmatprep.subr.bf16.mxu1 %v16914_v0  ;;  %v16972_v63 = vld [vmem:[%s18410_s13 + $0x2338] ss:$88 sps:$4 sm:$0xff]  }
 0x3f5   : > { %12308 = vmatprep.subr.bf16.mxu0 %v16917_v4  ;;  %v16975_v0 = vld [vmem:[%s18410_s13 + $0x1840] ss:$88 sps:$4 sm:$0xff]   ;;  %v16980_v4 = vld [vmem:[%s18410_s13 + $0x23ec] ss:$88 sps:$4 sm:$0xff]  }
 0x3f7   : > { %12145 = vmatpush1.bf16.msra.mxu1 %v16912_v6  ;;  %v16983_v6 = vld [vmem:[%s18410_s13 + $0x18f4] ss:$88 sps:$4 sm:$0xff]  }
 0x3f8   : > { %12309 = vmatpush1.bf16.msra.mxu0 %v16915_v39  ;;  %12146 = vmatprep.subr.bf16.mxu1 %v16920_v7  ;;  %v2135_v39 = vsub.s32 6, %v18464_v46  ;;  %v16978_v7 = vld [vmem:[%s18410_s13 + $0x23e8] ss:$88 sps:$4 sm:$0xff]  }
 0x3f9   : > { %12310 = vmatprep.subr.bf16.mxu0 %v16923_v8  ;;  %v16981_v8 = vld [vmem:[%s18410_s13 + $0x18f0] ss:$88 sps:$4 sm:$0xff]  }
 0x3fb   : > { %12147 = vmatpush1.bf16.msra.mxu1 %v16918_v40  ;;  %v2139_v40 = vsub.s32 7, %v18464_v46  ;;  %v17950_v46 = vld [vmem:[%s18410_s13 + $0x2568] ss:$88 sps:$4 sm:$0xff]  }
 0x3fc   : > { %12311 = vmatpush1.bf16.msra.mxu0 %v16921_v9  ;;  %12148 = vmatprep.subr.bf16.mxu1 %v16926_v11  ;;  %v16986_v9 = vld [vmem:[%s18410_s13 + $0x249c] ss:$88 sps:$4 sm:$0xff]  }
 0x3fd   : > { %12312 = vmatprep.subr.bf16.mxu0 %v16929_v12  ;;  %v16989_v11 = vld [vmem:[%s18410_s13 + $0x19a4] ss:$88 sps:$4 sm:$0xff]  }
 0x3fe   : > { %v18155_v12 = vld [vmem:[%s18416_s8] sm:$0xff] }
 0x3ff   : > { %12149 = vmatpush1.bf16.msra.mxu1 %v16924_v14  ;;  %v2136_v14 = vrot.slane %v18155_v12, %v2135_v39 }
 0x400   : > { %12313 = vmatpush1.bf16.msra.mxu0 %v16927_v17  ;;  %12150 = vmatprep.subr.bf16.mxu1 %v16932_v29  ;;  %v2140_v17 = vrot.slane %v18155_v12, %v2139_v40  ;;  %v16984_v29 = vld [vmem:[%s18410_s13 + $0x2498] ss:$88 sps:$4 sm:$0xff]   ;;  %v17037_v12 = vld [vmem:[%s18410_s13 + $0x1f24] ss:$88 sps:$4 sm:$0xff]  }
 0x401   : > { %12314 = vmatprep.subr.bf16.mxu0 %v16935_v20  ;;  %v16987_v20 = vld [vmem:[%s18410_s13 + $0x19a0] ss:$88 sps:$4 sm:$0xff]  }
 0x403   : > { %12151 = vmatpush1.bf16.msra.mxu1 %v16930_v21  ;;  %v16992_v21 = vld [vmem:[%s18410_s13 + $0x254c] ss:$88 sps:$4 sm:$0xff]  }
 0x404   : > { %12315 = vmatpush1.bf16.msra.mxu0 %v16933_v25  ;;  %12152 = vmatprep.subr.bf16.mxu1 %v16938_v28  ;;  %v16995_v25 = vld [vmem:[%s18410_s13 + $0x1a54] ss:$88 sps:$4 sm:$0xff]  }
 0x405   : > { %12316 = vmatprep.subr.bf16.mxu0 %v16941_v31 }
 0x407   : > { %12153 = vmatpush1.bf16.msra.mxu1 %v16936_v32 }
 0x408   : > { %12317 = vmatpush1.bf16.msra.mxu0 %v16939_v35  ;;  %12154 = vmatprep.subr.bf16.mxu1 %v16944_v36 }
 0x409   : > { %12318 = vmatprep.subr.bf16.mxu0 %v16947_v37  ;;  %v16990_v37 = vld [vmem:[%s18410_s13 + $0x2548] ss:$88 sps:$4 sm:$0xff]  }
 0x40b   : > { %12155 = vmatpush1.bf16.msra.mxu1 %v16942_v38  ;;  %v16993_v38 = vld [vmem:[%s18410_s13 + $0x1a50] ss:$88 sps:$4 sm:$0xff]  }
 0x40c   : > { %12319 = vmatpush1.bf16.msra.mxu0 %v16945_v41  ;;  %12156 = vmatprep.subr.bf16.mxu1 %v16950_v42  ;;  %v16998_v42 = vld [vmem:[%s18410_s13 + $0x25fc] ss:$88 sps:$4 sm:$0xff]  }
 0x40d   : > { %12320 = vmatprep.subr.bf16.mxu0 %v16953_v43  ;;  %v17001_v43 = vld [vmem:[%s18410_s13 + $0x1b04] ss:$88 sps:$4 sm:$0xff]  }
 0x40f   : > { %12157 = vmatpush1.bf16.msra.mxu1 %v16948_v45 }
 0x410   : > { %12321 = vmatpush1.bf16.msra.mxu0 %v16951_v47  ;;  %12167 = vmatprep.subr.bf16.mxu1 %v16956_v49  ;;  %v13321_v47 = vrot.slane %v13313_v30, %v19205_v44  ;;  %v17010_v30 = vld [vmem:[%s18410_s13 + $0x275c] ss:$88 sps:$4 sm:$0xff]  }
 0x411   : > { %12331 = vmatprep.subr.bf16.mxu0 %v16959_v50  ;;  %v16996_v50 = vld [vmem:[%s18410_s13 + $0x25f8] ss:$88 sps:$4 sm:$0xff]  }
 0x412   : > { %12159 = vmatmul.mubr.bf16.vlgmr.msra.gmra.mrb[12].mxu1 %v18505_v19 }
 0x413   : > { %12323 = vmatmul.mubr.bf16.vlgmr.msra.gmra.mrb[12].mxu0 %v18589_v33  ;;  %12168 = vmatpush1.bf16.msra.mxu1 %v16954_v52  ;;  %v16999_v52 = vld [vmem:[%s18410_s13 + $0x1b00] ss:$88 sps:$4 sm:$0xff]  }
 0x414   : > { %12332 = vmatpush1.bf16.msra.mxu0 %v16957_v53  ;;  %12169 = vmatprep.subr.bf16.mxu1 %v16962_v54  ;;  %v17004_v53 = vld [vmem:[%s18410_s13 + $0x26ac] ss:$88 sps:$4 sm:$0xff]  }
 0x415   : > { %12333 = vmatprep.subr.bf16.mxu0 %v16965_v55  ;;  %12199 = vmatprep.mubr.bf16.mxu1 %v18521_v27  ;;  %v17007_v54 = vld [vmem:[%s18410_s13 + $0x1bb4] ss:$88 sps:$4 sm:$0xff]  }
 0x416   : > { %12363 = vmatprep.mubr.bf16.mxu0 %v18487_v2 }
 0x417   : > { %12170 = vmatpush1.bf16.msra.mxu1 %v16960_v56  ;;  %v17013_v56 = vld [vmem:[%s18410_s13 + $0x1c64] ss:$88 sps:$4 sm:$0xff]  }
 0x418   : > { %12334 = vmatpush1.bf16.msra.mxu0 %v16963_v57  ;;  %12171 = vmatprep.subr.bf16.mxu1 %v16968_v58  ;;  %v17008_v57 = vld [vmem:[%s18410_s13 + $0x2758] ss:$88 sps:$4 sm:$0xff]  }
 0x419   : > { %12335 = vmatprep.subr.bf16.mxu0 %v16971_v59  ;;  %v17011_v58 = vld [vmem:[%s18410_s13 + $0x1c60] ss:$88 sps:$4 sm:$0xff]   ;;  %v17016_v59 = vld [vmem:[%s18410_s13 + $0x280c] ss:$88 sps:$4 sm:$0xff]  }
 0x41b   : > { %12172 = vmatpush1.bf16.msra.mxu1 %v16966_v3  ;;  %v17019_v3 = vld [vmem:[%s18410_s13 + $0x1d14] ss:$88 sps:$4 sm:$0xff]  }
 0x41c   : > { %12336 = vmatpush1.bf16.msra.mxu0 %v16969_v5  ;;  %12173 = vmatprep.subr.bf16.mxu1 %v16974_v10  ;;  %v17014_v5 = vld [vmem:[%s18410_s13 + $0x2808] ss:$88 sps:$4 sm:$0xff]  }
 0x41d   : > { %12337 = vmatprep.subr.bf16.mxu0 %v16977_v61  ;;  %v17017_v10 = vld [vmem:[%s18410_s13 + $0x1d10] ss:$88 sps:$4 sm:$0xff]   ;;  %v17022_v61 = vld [vmem:[%s18410_s13 + $0x28bc] ss:$88 sps:$4 sm:$0xff]  }
 0x41f   : > { %12174 = vmatpush1.bf16.msra.mxu1 %v16972_v63  ;;  %v17025_v63 = vld [vmem:[%s18410_s13 + $0x1dc4] ss:$88 sps:$4 sm:$0xff]  }
 0x420   : > { %12338 = vmatpush1.bf16.msra.mxu0 %v16975_v0  ;;  %12175 = vmatprep.subr.bf16.mxu1 %v16980_v4  ;;  %v17020_v0 = vld [vmem:[%s18410_s13 + $0x28b8] ss:$88 sps:$4 sm:$0xff]  }
 0x421   : > { %12339 = vmatprep.subr.bf16.mxu0 %v16983_v6  ;;  %v17023_v4 = vld [vmem:[%s18410_s13 + $0x1dc0] ss:$88 sps:$4 sm:$0xff]   ;;  %v17028_v6 = vld [vmem:[%s18410_s13 + $0x296c] ss:$88 sps:$4 sm:$0xff]  }
 0x423   : > { %12176 = vmatpush1.bf16.msra.mxu1 %v16978_v7  ;;  %v17031_v7 = vld [vmem:[%s18410_s13 + $0x1e74] ss:$88 sps:$4 sm:$0xff]  }
 0x424   : > { %12340 = vmatpush1.bf16.msra.mxu0 %v16981_v8  ;;  %12177 = vmatprep.subr.bf16.mxu1 %v16986_v9  ;;  %v17026_v8 = vld [vmem:[%s18410_s13 + $0x2968] ss:$88 sps:$4 sm:$0xff]  }
 0x425   : > { %12341 = vmatprep.subr.bf16.mxu0 %v16989_v11  ;;  %v11832_v28 = vpop.f32.mrb[8].mxu1  ;;  %v17029_v9 = vld [vmem:[%s18410_s13 + $0x1e70] ss:$88 sps:$4 sm:$0xff]   ;;  %v17034_v11 = vld [vmem:[%s18410_s13 + $0x2a1c] ss:$88 sps:$4 sm:$0xff]  }
 0x426   : > { %v15272_v31 = vadd.f32 %v11832_v28, %v2136_v14  ;;  %v11834_v32 = vpop.f32.mrb[9].mxu1  ;;  %v17032_v14 = vld [vmem:[%s18410_s13 + $0x2a18] ss:$88 sps:$4 sm:$0xff]   ;;  %v17046_v28 = vld [vmem:[%s18410_s13 + $0x2b7c] ss:$88 sps:$4 sm:$0xff]  }
 0x427   : > { %v15273_v35 = vadd.f32 %v11834_v32, %v2140_v17  ;;  %v11836_v36 = vpop.f32.mrb[10].mxu1  ;;  %12178 = vmatpush1.bf16.msra.mxu1 %v16984_v29  ;;  %v17035_v17 = vld [vmem:[%s18410_s13 + $0x1f20] ss:$88 sps:$4 sm:$0xff]   ;;  %v17040_v29 = vld [vmem:[%s18410_s13 + $0x2acc] ss:$88 sps:$4 sm:$0xff]  }
 0x428   : > { %12342 = vmatpush1.bf16.msra.mxu0 %v16987_v20  ;;  %v11837_v41 = vpop.f32.mrb[11].mxu1  ;;  %12179 = vmatprep.subr.bf16.mxu1 %v16992_v21  ;;  %v17043_v20 = vld [vmem:[%s18410_s13 + $0x1fd4] ss:$88 sps:$4 sm:$0xff]   ;;  %v17038_v21 = vld [vmem:[%s18410_s13 + $0x2ac8] ss:$88 sps:$4 sm:$0xff]  }
 0x429   : > { %12343 = vmatprep.subr.bf16.mxu0 %v16995_v25  ;;  %v13314_v45 = vcombine.low %v15272_v31, %v15273_v35  ;;  %v17041_v25 = vld [vmem:[%s18410_s13 + $0x1fd0] ss:$88 sps:$4 sm:$0xff]   ;;  %v17049_v31 = vld [vmem:[%s18410_s13 + $0x2084] ss:$88 sps:$4 sm:$0xff]   ;;  %v17047_v35 = vld [vmem:[%s18410_s13 + $0x2080] ss:$88 sps:$4 sm:$0xff]  }
 0x42a   : > { %v17044_v32 = vld [vmem:[%s18410_s13 + $0x2b78] ss:$88 sps:$4 sm:$0xff]   ;;  %v17052_v36 = vld [vmem:[%s18410_s13 + $0x2c2c] ss:$88 sps:$4 sm:$0xff]  }
 0x42b   : > { %v13328_v49 = vrot.slane %v13314_v45, %v19205_v44  ;;  %12180 = vmatpush1.bf16.msra.mxu1 %v16990_v37  ;;  %v17055_v37 = vld [vmem:[%s18410_s13 + $0x2134] ss:$88 sps:$4 sm:$0xff]   ;;  %v17053_v41 = vld [vmem:[%s18410_s13 + $0x2130] ss:$88 sps:$4 sm:$0xff]  }
 0x42c   : > { %12344 = vmatpush1.bf16.msra.mxu0 %v16993_v38  ;;  %12181 = vmatprep.subr.bf16.mxu1 %v16998_v42  ;;  %v17050_v38 = vld [vmem:[%s18410_s13 + $0x2c28] ss:$88 sps:$4 sm:$0xff]   ;;  %v17058_v42 = vld [vmem:[%s18410_s13 + $0x2cdc] ss:$88 sps:$4 sm:$0xff]   ;;  %v17056_v45 = vld [vmem:[%s18410_s13 + $0x2cd8] ss:$88 sps:$4 sm:$0xff]  }
 0x42d   : > { %12345 = vmatprep.subr.bf16.mxu0 %v17001_v43  ;;  %v13329_v55 = vcombine.low %v13321_v47, %v13328_v49  ;;  %v17061_v43 = vld [vmem:[%s18410_s13 + $0x21e4] ss:$88 sps:$4 sm:$0xff]   ;;  %v17059_v47 = vld [vmem:[%s18410_s13 + $0x21e0] ss:$88 sps:$4 sm:$0xff]  }
 0x42e   : > { %v17064_v49 = vld [vmem:[%s18410_s13 + $0x2d8c] ss:$88 sps:$4 sm:$0xff]  }
 0x42f   : > { %13396 = vst [vmem:[%s19221_s21 + $0x8] sm:$0xff] %v13329_v55  ;;  %12182 = vmatpush1.bf16.msra.mxu1 %v16996_v50  ;;  %v17067_v50 = vld [vmem:[%s18410_s13 + $0x2294] ss:$88 sps:$4 sm:$0xff]   ;;  %v17073_v55 = vld [vmem:[%s18410_s13 + $0x2344] ss:$88 sps:$4 sm:$0xff]  }
 0x430   : > { %12346 = vmatpush1.bf16.msra.mxu0 %v16999_v52  ;;  %12183 = vmatprep.subr.bf16.mxu1 %v17004_v53  ;;  %v17062_v52 = vld [vmem:[%s18410_s13 + $0x2d88] ss:$88 sps:$4 sm:$0xff]  }
 0x431   : > { %12347 = vmatprep.subr.bf16.mxu0 %v17007_v54  ;;  %v17065_v53 = vld [vmem:[%s18410_s13 + $0x2290] ss:$88 sps:$4 sm:$0xff]   ;;  %v17070_v54 = vld [vmem:[%s18410_s13 + $0x2e3c] ss:$88 sps:$4 sm:$0xff]  }
 0x433   : > { %12184 = vmatpush1.bf16.msra.mxu1 %v17002_v13  ;;  %v17068_v13 = vld [vmem:[%s18410_s13 + $0x2e38] ss:$88 sps:$4 sm:$0xff]  }
 0x434   : > { %12348 = vmatpush1.bf16.msra.mxu0 %v17005_v16  ;;  %12185 = vmatprep.subr.bf16.mxu1 %v17010_v30  ;;  %v17071_v16 = vld [vmem:[%s18410_s13 + $0x2340] ss:$88 sps:$4 sm:$0xff]   ;;  %v17076_v30 = vld [vmem:[%s18410_s13 + $0x2eec] ss:$88 sps:$4 sm:$0xff]  }
 0x435   : > { %12349 = vmatprep.subr.bf16.mxu0 %v17013_v56  ;;  %v17079_v56 = vld [vmem:[%s18410_s13 + $0x23f4] ss:$88 sps:$4 sm:$0xff]  }
 0x437   : > { %12186 = vmatpush1.bf16.msra.mxu1 %v17008_v57  ;;  %v17074_v57 = vld [vmem:[%s18410_s13 + $0x2ee8] ss:$88 sps:$4 sm:$0xff]  }
 0x438   : > { %12350 = vmatpush1.bf16.msra.mxu0 %v17011_v58  ;;  %12187 = vmatprep.subr.bf16.mxu1 %v17016_v59  ;;  %v17077_v58 = vld [vmem:[%s18410_s13 + $0x23f0] ss:$88 sps:$4 sm:$0xff]  }
 0x439   : > { %12351 = vmatprep.subr.bf16.mxu0 %v17019_v3  ;;  %v2104_v59 = vld [vmem:[%s18416_s8 + $0x8] sm:$0xff] }
 0x43a   : > { %v17082_v3 = vld [vmem:[%s18410_s13 + $0x2f9c] ss:$88 sps:$4 sm:$0xff]  }
 0x43b   : > { %12188 = vmatpush1.bf16.msra.mxu1 %v17014_v5  ;;  %v17085_v5 = vld [vmem:[%s18410_s13 + $0x24a4] ss:$88 sps:$4 sm:$0xff]  }
 0x43c   : > { %12352 = vmatpush1.bf16.msra.mxu0 %v17017_v10  ;;  %12189 = vmatprep.subr.bf16.mxu1 %v17022_v61  ;;  %v2144_v10 = vrot.slane %v2104_v59, %v18891_v48  ;;  %v2148_v61 = vrot.slane %v2104_v59, %v18896_v51  ;;  %v17128_v59 = vld [vmem:[%s18410_s13 + $0x3518] ss:$88 sps:$4 sm:$0xff]  }
 0x43d   : > { %12353 = vmatprep.subr.bf16.mxu0 %v17025_v63  ;;  %v17080_v63 = vld [vmem:[%s18410_s13 + $0x2f98] ss:$88 sps:$4 sm:$0xff]  }
 0x43f   : > { %12190 = vmatpush1.bf16.msra.mxu1 %v17020_v0  ;;  %v17083_v0 = vld [vmem:[%s18410_s13 + $0x24a0] ss:$88 sps:$4 sm:$0xff]  }
 0x440   : > { %12354 = vmatpush1.bf16.msra.mxu0 %v17023_v4  ;;  %12191 = vmatprep.subr.bf16.mxu1 %v17028_v6  ;;  %v17088_v4 = vld [vmem:[%s18410_s13 + $0x304c] ss:$88 sps:$4 sm:$0xff]  }
 0x441   : > { %12355 = vmatprep.subr.bf16.mxu0 %v17031_v7  ;;  %v17091_v6 = vld [vmem:[%s18410_s13 + $0x2554] ss:$88 sps:$4 sm:$0xff]  }
 0x443   : > { %12192 = vmatpush1.bf16.msra.mxu1 %v17026_v8 }
 0x444   : > { %12356 = vmatpush1.bf16.msra.mxu0 %v17029_v9  ;;  %12193 = vmatprep.subr.bf16.mxu1 %v17034_v11 }
 0x445   : > { %12357 = vmatprep.subr.bf16.mxu0 %v17037_v12 }
 0x447   : > { %12194 = vmatpush1.bf16.msra.mxu1 %v17032_v14  ;;  %v17086_v14 = vld [vmem:[%s18410_s13 + $0x3048] ss:$88 sps:$4 sm:$0xff]  }
 0x448   : > { %12358 = vmatpush1.bf16.msra.mxu0 %v17035_v17  ;;  %12195 = vmatprep.subr.bf16.mxu1 %v17040_v29  ;;  %v17089_v17 = vld [vmem:[%s18410_s13 + $0x2550] ss:$88 sps:$4 sm:$0xff]  }
 0x449   : > { %12359 = vmatprep.subr.bf16.mxu0 %v17043_v20  ;;  %v17094_v20 = vld [vmem:[%s18410_s13 + $0x30fc] ss:$88 sps:$4 sm:$0xff]  }
 0x44b   : > { %12196 = vmatpush1.bf16.msra.mxu1 %v17038_v21  ;;  %v17097_v21 = vld [vmem:[%s18410_s13 + $0x2604] ss:$88 sps:$4 sm:$0xff]  }
 0x44c   : > { %12360 = vmatpush1.bf16.msra.mxu0 %v17041_v25  ;;  %12197 = vmatprep.subr.bf16.mxu1 %v17046_v28  ;;  %v17092_v28 = vld [vmem:[%s18410_s13 + $0x30f8] ss:$88 sps:$4 sm:$0xff]  }
 0x44d   : > { %12361 = vmatprep.subr.bf16.mxu0 %v17049_v31  ;;  %v17095_v31 = vld [vmem:[%s18410_s13 + $0x2600] ss:$88 sps:$4 sm:$0xff]  }
 0x44f   : > { %12198 = vmatpush1.bf16.msra.mxu1 %v17044_v32  ;;  %v17100_v32 = vld [vmem:[%s18410_s13 + $0x31ac] ss:$88 sps:$4 sm:$0xff]  }
 0x450   : > { %12362 = vmatpush1.bf16.msra.mxu0 %v17047_v35  ;;  %12208 = vmatprep.subr.bf16.mxu1 %v17052_v36  ;;  %v17103_v35 = vld [vmem:[%s18410_s13 + $0x26b4] ss:$88 sps:$4 sm:$0xff]   ;;  %v17098_v36 = vld [vmem:[%s18410_s13 + $0x31a8] ss:$88 sps:$4 sm:$0xff]  }
 0x451   : > { %12372 = vmatprep.subr.bf16.mxu0 %v17055_v37  ;;  %v17101_v37 = vld [vmem:[%s18410_s13 + $0x26b0] ss:$88 sps:$4 sm:$0xff]  }
 0x452   : > { %12200 = vmatmul.mubr.bf16.vlgmr.msra.gmra.mrb[12].mxu1 %v18593_v34 }
 0x453   : > { %12364 = vmatmul.mubr.bf16.vlgmr.msra.gmra.mrb[12].mxu0 %v18505_v19  ;;  %12209 = vmatpush1.bf16.msra.mxu1 %v17050_v38  ;;  %v17106_v38 = vld [vmem:[%s18410_s13 + $0x325c] ss:$88 sps:$4 sm:$0xff]  }
 0x454   : > { %12373 = vmatpush1.bf16.msra.mxu0 %v17053_v41  ;;  %12210 = vmatprep.subr.bf16.mxu1 %v17058_v42  ;;  %v17109_v41 = vld [vmem:[%s18410_s13 + $0x2764] ss:$88 sps:$4 sm:$0xff]   ;;  %v17104_v42 = vld [vmem:[%s18410_s13 + $0x3258] ss:$88 sps:$4 sm:$0xff]  }
 0x455   : > { %12374 = vmatprep.subr.bf16.mxu0 %v17061_v43  ;;  %12240 = vmatprep.mubr.bf16.mxu1 %v18509_v22  ;;  %v17107_v43 = vld [vmem:[%s18410_s13 + $0x2760] ss:$88 sps:$4 sm:$0xff]  }
 0x456   : > { %12404 = vmatprep.mubr.bf16.mxu0 %v18521_v27 }
 0x457   : > { %12211 = vmatpush1.bf16.msra.mxu1 %v17056_v45  ;;  %v17112_v45 = vld [vmem:[%s18410_s13 + $0x330c] ss:$88 sps:$4 sm:$0xff]  }
 0x458   : > { %12375 = vmatpush1.bf16.msra.mxu0 %v17059_v47  ;;  %12212 = vmatprep.subr.bf16.mxu1 %v17064_v49  ;;  %v17115_v47 = vld [vmem:[%s18410_s13 + $0x2814] ss:$88 sps:$4 sm:$0xff]   ;;  %v17110_v49 = vld [vmem:[%s18410_s13 + $0x3308] ss:$88 sps:$4 sm:$0xff]  }
 0x459   : > { %12376 = vmatprep.subr.bf16.mxu0 %v17067_v50  ;;  %v17113_v50 = vld [vmem:[%s18410_s13 + $0x2810] ss:$88 sps:$4 sm:$0xff]  }
 0x45b   : > { %12213 = vmatpush1.bf16.msra.mxu1 %v17062_v52  ;;  %v17118_v52 = vld [vmem:[%s18410_s13 + $0x33bc] ss:$88 sps:$4 sm:$0xff]  }
 0x45c   : > { %12377 = vmatpush1.bf16.msra.mxu0 %v17065_v53  ;;  %12214 = vmatprep.subr.bf16.mxu1 %v17070_v54  ;;  %v17121_v53 = vld [vmem:[%s18410_s13 + $0x28c4] ss:$88 sps:$4 sm:$0xff]   ;;  %v17116_v54 = vld [vmem:[%s18410_s13 + $0x33b8] ss:$88 sps:$4 sm:$0xff]  }
 0x45d   : > { %12378 = vmatprep.subr.bf16.mxu0 %v17073_v55  ;;  %v17119_v55 = vld [vmem:[%s18410_s13 + $0x28c0] ss:$88 sps:$4 sm:$0xff]  }
 0x45f   : > { %12215 = vmatpush1.bf16.msra.mxu1 %v17068_v13  ;;  %v17124_v13 = vld [vmem:[%s18410_s13 + $0x346c] ss:$88 sps:$4 sm:$0xff]  }
 0x460   : > { %12379 = vmatpush1.bf16.msra.mxu0 %v17071_v16  ;;  %12216 = vmatprep.subr.bf16.mxu1 %v17076_v30  ;;  %v17127_v16 = vld [vmem:[%s18410_s13 + $0x2974] ss:$88 sps:$4 sm:$0xff]   ;;  %v17122_v30 = vld [vmem:[%s18410_s13 + $0x3468] ss:$88 sps:$4 sm:$0xff]  }
 0x461   : > { %12380 = vmatprep.subr.bf16.mxu0 %v17079_v56  ;;  %v17125_v56 = vld [vmem:[%s18410_s13 + $0x2970] ss:$88 sps:$4 sm:$0xff]  }
 0x463   : > { %12217 = vmatpush1.bf16.msra.mxu1 %v17074_v57  ;;  %v17130_v57 = vld [vmem:[%s18410_s13 + $0x351c] ss:$88 sps:$4 sm:$0xff]  }
 0x464   : > { %12381 = vmatpush1.bf16.msra.mxu0 %v17077_v58  ;;  %12218 = vmatprep.subr.bf16.mxu1 %v17082_v3  ;;  %v17133_v58 = vld [vmem:[%s18410_s13 + $0x2a24] ss:$88 sps:$4 sm:$0xff]   ;;  %v17131_v3 = vld [vmem:[%s18410_s13 + $0x2a20] ss:$88 sps:$4 sm:$0xff]  }
 0x465   : > { %12382 = vmatprep.subr.bf16.mxu0 %v17085_v5  ;;  %v17136_v5 = vld [vmem:[%s18410_s13 + $0x35cc] ss:$88 sps:$4 sm:$0xff]  }
 0x466   : > { %v12037_v7 = vpop.f32.mrb[8].mxu0 }
 0x467   : > { %v19658_v8 = vadd.f32 %v12037_v7, %v2144_v10  ;;  %v12039_v9 = vpop.f32.mrb[9].mxu0  ;;  %12219 = vmatpush1.bf16.msra.mxu1 %v17080_v63  ;;  %v17139_v10 = vld [vmem:[%s18410_s13 + $0x2ad4] ss:$88 sps:$4 sm:$0xff]   ;;  %v17137_v63 = vld [vmem:[%s18410_s13 + $0x2ad0] ss:$88 sps:$4 sm:$0xff]  }
 0x468   : > { %v19660_v11 = vadd.f32 %v12039_v9, %v2148_v61  ;;  %v12041_v12 = vpop.f32.mrb[10].mxu0  ;;  %12383 = vmatpush1.bf16.msra.mxu0 %v17083_v0  ;;  %12220 = vmatprep.subr.bf16.mxu1 %v17088_v4  ;;  %v17134_v61 = vld [vmem:[%s18410_s13 + $0x35c8] ss:$88 sps:$4 sm:$0xff]   ;;  %v17142_v0 = vld [vmem:[%s18410_s13 + $0x367c] ss:$88 sps:$4 sm:$0xff]  }
 0x469   : > { %v12042_v29 = vpop.f32.mrb[11].mxu0  ;;  %12384 = vmatprep.subr.bf16.mxu0 %v17091_v6  ;;  %v17145_v4 = vld [vmem:[%s18410_s13 + $0x2b84] ss:$88 sps:$4 sm:$0xff]   ;;  %v17140_v6 = vld [vmem:[%s18410_s13 + $0x3678] ss:$88 sps:$4 sm:$0xff]  }
 0x46a   : > { %v13330_v25 = vcombine.low %v19658_v8, %v19660_v11  ;;  %v17143_v7 = vld [vmem:[%s18410_s13 + $0x2b80] ss:$88 sps:$4 sm:$0xff]   ;;  %v17148_v9 = vld [vmem:[%s18410_s13 + $0x2c34] ss:$88 sps:$4 sm:$0xff]   ;;  %v17154_v29 = vld [vmem:[%s18410_s13 + $0x2ce4] ss:$88 sps:$4 sm:$0xff]  }
 0x46b   : > { %12221 = vmatpush1.bf16.msra.mxu1 %v17086_v14  ;;  %v17151_v12 = vld [vmem:[%s18410_s13 + $0x3c] ss:$88 sps:$4 sm:$0xff]   ;;  %v17146_v14 = vld [vmem:[%s18410_s13 + $0x2c30] ss:$88 sps:$4 sm:$0xff]   ;;  %v17485_v11 = vld [vmem:[%s18410_s13 + $0x1bc0] ss:$88 sps:$4 sm:$0xff]  }
 0x46c   : > { %12385 = vmatpush1.bf16.msra.mxu0 %v17089_v17  ;;  %12222 = vmatprep.subr.bf16.mxu1 %v17094_v20  ;;  %v17149_v17 = vld [vmem:[%s18410_s13 + $0x38] ss:$88 sps:$4 sm:$0xff]   ;;  %v17157_v20 = vld [vmem:[%s18410_s13 + $0xec] ss:$88 sps:$4 sm:$0xff]  }
 0x46d   : > { %12386 = vmatprep.subr.bf16.mxu0 %v17097_v21  ;;  %v17152_v21 = vld [vmem:[%s18410_s13 + $0x2ce0] ss:$88 sps:$4 sm:$0xff]  }
 0x46e   : > { %v17482_v8 = vld [vmem:[%s18410_s13 + $0x26b8] ss:$88 sps:$4 sm:$0xff]  }
 0x46f   : > { %12223 = vmatpush1.bf16.msra.mxu1 %v17092_v28  ;;  %v17155_v28 = vld [vmem:[%s18410_s13 + $0xe8] ss:$88 sps:$4 sm:$0xff]  }
 0x470   : > { %12387 = vmatpush1.bf16.msra.mxu0 %v17095_v31  ;;  %12224 = vmatprep.subr.bf16.mxu1 %v17100_v32  ;;  %v17160_v31 = vld [vmem:[%s18410_s13 + $0x2d94] ss:$88 sps:$4 sm:$0xff]  }
 0x471   : > { %12388 = vmatprep.subr.bf16.mxu0 %v17103_v35  ;;  %v17163_v32 = vld [vmem:[%s18410_s13 + $0x19c] ss:$88 sps:$4 sm:$0xff]   ;;  %v17158_v35 = vld [vmem:[%s18410_s13 + $0x2d90] ss:$88 sps:$4 sm:$0xff]  }
 0x473   : > { %12225 = vmatpush1.bf16.msra.mxu1 %v17098_v36  ;;  %v17161_v36 = vld [vmem:[%s18410_s13 + $0x198] ss:$88 sps:$4 sm:$0xff]  }
 0x474   : > { %12389 = vmatpush1.bf16.msra.mxu0 %v17101_v37  ;;  %12226 = vmatprep.subr.bf16.mxu1 %v17106_v38  ;;  %v17166_v37 = vld [vmem:[%s18410_s13 + $0x2e44] ss:$88 sps:$4 sm:$0xff]  }
 0x475   : > { %12390 = vmatprep.subr.bf16.mxu0 %v17109_v41  ;;  %v17169_v38 = vld [vmem:[%s18410_s13 + $0x24c] ss:$88 sps:$4 sm:$0xff]   ;;  %v17164_v41 = vld [vmem:[%s18410_s13 + $0x2e40] ss:$88 sps:$4 sm:$0xff]  }
 0x477   : > { %12227 = vmatpush1.bf16.msra.mxu1 %v17104_v42  ;;  %v17167_v42 = vld [vmem:[%s18410_s13 + $0x248] ss:$88 sps:$4 sm:$0xff]  }
 0x478   : > { %12391 = vmatpush1.bf16.msra.mxu0 %v17107_v43  ;;  %12228 = vmatprep.subr.bf16.mxu1 %v17112_v45  ;;  %v17172_v43 = vld [vmem:[%s18410_s13 + $0x2ef4] ss:$88 sps:$4 sm:$0xff]  }
 0x479   : > { %12392 = vmatprep.subr.bf16.mxu0 %v17115_v47  ;;  %v17175_v45 = vld [vmem:[%s18410_s13 + $0x2fc] ss:$88 sps:$4 sm:$0xff]   ;;  %v17170_v47 = vld [vmem:[%s18410_s13 + $0x2ef0] ss:$88 sps:$4 sm:$0xff]  }
 0x47b   : > { %12229 = vmatpush1.bf16.msra.mxu1 %v17110_v49  ;;  %v17173_v49 = vld [vmem:[%s18410_s13 + $0x2f8] ss:$88 sps:$4 sm:$0xff]  }
 0x47c   : > { %12393 = vmatpush1.bf16.msra.mxu0 %v17113_v50  ;;  %12230 = vmatprep.subr.bf16.mxu1 %v17118_v52  ;;  %v17178_v50 = vld [vmem:[%s18410_s13 + $0x2fa4] ss:$88 sps:$4 sm:$0xff]  }
 0x47d   : > { %12394 = vmatprep.subr.bf16.mxu0 %v17121_v53  ;;  %v17181_v52 = vld [vmem:[%s18410_s13 + $0x3ac] ss:$88 sps:$4 sm:$0xff]   ;;  %v17176_v53 = vld [vmem:[%s18410_s13 + $0x2fa0] ss:$88 sps:$4 sm:$0xff]  }
 0x47f   : > { %12231 = vmatpush1.bf16.msra.mxu1 %v17116_v54  ;;  %v17179_v54 = vld [vmem:[%s18410_s13 + $0x3a8] ss:$88 sps:$4 sm:$0xff]  }
 0x480   : > { %12395 = vmatpush1.bf16.msra.mxu0 %v17119_v55  ;;  %12232 = vmatprep.subr.bf16.mxu1 %v17124_v13  ;;  %v17184_v55 = vld [vmem:[%s18410_s13 + $0x3054] ss:$88 sps:$4 sm:$0xff]  }
 0x481   : > { %12396 = vmatprep.subr.bf16.mxu0 %v17127_v16  ;;  %v17187_v13 = vld [vmem:[%s18410_s13 + $0x45c] ss:$88 sps:$4 sm:$0xff]   ;;  %v17182_v16 = vld [vmem:[%s18410_s13 + $0x3050] ss:$88 sps:$4 sm:$0xff]  }
 0x483   : > { %12233 = vmatpush1.bf16.msra.mxu1 %v17122_v30  ;;  %v17185_v30 = vld [vmem:[%s18410_s13 + $0x458] ss:$88 sps:$4 sm:$0xff]  }
 0x484   : > { %12397 = vmatpush1.bf16.msra.mxu0 %v17125_v56  ;;  %12234 = vmatprep.subr.bf16.mxu1 %v17130_v57  ;;  %v17190_v56 = vld [vmem:[%s18410_s13 + $0x3104] ss:$88 sps:$4 sm:$0xff]  }
 0x485   : > { %12398 = vmatprep.subr.bf16.mxu0 %v17133_v58  ;;  %v17193_v57 = vld [vmem:[%s18410_s13 + $0x50c] ss:$88 sps:$4 sm:$0xff]   ;;  %v17188_v58 = vld [vmem:[%s18410_s13 + $0x3100] ss:$88 sps:$4 sm:$0xff]  }
 0x487   : > { %12235 = vmatpush1.bf16.msra.mxu1 %v17128_v59  ;;  %v17191_v59 = vld [vmem:[%s18410_s13 + $0x508] ss:$88 sps:$4 sm:$0xff]  }
 0x488   : > { %12399 = vmatpush1.bf16.msra.mxu0 %v17131_v3  ;;  %12236 = vmatprep.subr.bf16.mxu1 %v17136_v5  ;;  %v17196_v3 = vld [vmem:[%s18410_s13 + $0x31b4] ss:$88 sps:$4 sm:$0xff]  }
 0x489   : > { %12400 = vmatprep.subr.bf16.mxu0 %v17139_v10  ;;  %v17199_v5 = vld [vmem:[%s18410_s13 + $0x5bc] ss:$88 sps:$4 sm:$0xff]   ;;  %v17194_v10 = vld [vmem:[%s18410_s13 + $0x31b0] ss:$88 sps:$4 sm:$0xff]  }
 0x48b   : > { %12237 = vmatpush1.bf16.msra.mxu1 %v17134_v61  ;;  %v17197_v61 = vld [vmem:[%s18410_s13 + $0x5b8] ss:$88 sps:$4 sm:$0xff]  }
 0x48c   : > { %12401 = vmatpush1.bf16.msra.mxu0 %v17137_v63  ;;  %12238 = vmatprep.subr.bf16.mxu1 %v17142_v0  ;;  %v17202_v63 = vld [vmem:[%s18410_s13 + $0x3264] ss:$88 sps:$4 sm:$0xff]  }
 0x48d   : > { %12402 = vmatprep.subr.bf16.mxu0 %v17145_v4  ;;  %v17205_v0 = vld [vmem:[%s18410_s13 + $0x66c] ss:$88 sps:$4 sm:$0xff]   ;;  %v17200_v4 = vld [vmem:[%s18410_s13 + $0x3260] ss:$88 sps:$4 sm:$0xff]  }
 0x48f   : > { %12239 = vmatpush1.bf16.msra.mxu1 %v17140_v6  ;;  %v17203_v6 = vld [vmem:[%s18410_s13 + $0x668] ss:$88 sps:$4 sm:$0xff]  }
 0x490   : > { %12403 = vmatpush1.bf16.msra.mxu0 %v17143_v7  ;;  %12454 = vmatprep.subr.bf16.mxu1 %v17151_v12  ;;  %v17208_v7 = vld [vmem:[%s18410_s13 + $0x3314] ss:$88 sps:$4 sm:$0xff]   ;;  %v17206_v12 = vld [vmem:[%s18410_s13 + $0x3310] ss:$88 sps:$4 sm:$0xff]  }
 0x491   : > { %12413 = vmatprep.subr.bf16.mxu0 %v17148_v9  ;;  %v17211_v9 = vld [vmem:[%s18410_s13 + $0x71c] ss:$88 sps:$4 sm:$0xff]  }
 0x492   : > { %12241 = vmatmul.mubr.bf16.vlgmr.msra.gmra.mrb[12].mxu1 %v18511_v23 }
 0x493   : > { %12405 = vmatmul.mubr.bf16.vlgmr.msra.gmra.mrb[12].mxu0 %v18593_v34  ;;  %12455 = vmatpush1.bf16.msra.mxu1 %v17149_v17  ;;  %v17214_v17 = vld [vmem:[%s18410_s13 + $0x33c4] ss:$88 sps:$4 sm:$0xff]  }
 0x494   : > { %12414 = vmatpush1.bf16.msra.mxu0 %v17146_v14  ;;  %12456 = vmatprep.subr.bf16.mxu1 %v17157_v20  ;;  %v17209_v14 = vld [vmem:[%s18410_s13 + $0x718] ss:$88 sps:$4 sm:$0xff]  }
 0x495   : > { %12415 = vmatprep.subr.bf16.mxu0 %v17154_v29  ;;  %12445 = vmatprep.mubr.bf16.mxu0 %v18509_v22  ;;  %v17217_v29 = vld [vmem:[%s18410_s13 + $0x7cc] ss:$88 sps:$4 sm:$0xff]   ;;  %v17212_v20 = vld [vmem:[%s18410_s13 + $0x33c0] ss:$88 sps:$4 sm:$0xff]  }
 0x496   : > { %12486 = vmatprep.mubr.bf16.mxu1 %v18481_v60 }
 0x497   : > { %12457 = vmatpush1.bf16.msra.mxu1 %v17155_v28  ;;  %v17220_v28 = vld [vmem:[%s18410_s13 + $0x3474] ss:$88 sps:$4 sm:$0xff]  }
 0x498   : > { %12416 = vmatpush1.bf16.msra.mxu0 %v17152_v21  ;;  %12458 = vmatprep.subr.bf16.mxu1 %v17163_v32  ;;  %v17215_v21 = vld [vmem:[%s18410_s13 + $0x7c8] ss:$88 sps:$4 sm:$0xff]  }
 0x499   : > { %12417 = vmatprep.subr.bf16.mxu0 %v17160_v31  ;;  %v17223_v31 = vld [vmem:[%s18410_s13 + $0x87c] ss:$88 sps:$4 sm:$0xff]   ;;  %v17218_v32 = vld [vmem:[%s18410_s13 + $0x3470] ss:$88 sps:$4 sm:$0xff]  }
 0x49b   : > { %12459 = vmatpush1.bf16.msra.mxu1 %v17161_v36  ;;  %v17226_v36 = vld [vmem:[%s18410_s13 + $0x3524] ss:$88 sps:$4 sm:$0xff]  }
 0x49c   : > { %12418 = vmatpush1.bf16.msra.mxu0 %v17158_v35  ;;  %12460 = vmatprep.subr.bf16.mxu1 %v17169_v38  ;;  %v17221_v35 = vld [vmem:[%s18410_s13 + $0x878] ss:$88 sps:$4 sm:$0xff]  }
 0x49d   : > { %12419 = vmatprep.subr.bf16.mxu0 %v17166_v37  ;;  %v17229_v37 = vld [vmem:[%s18410_s13 + $0x92c] ss:$88 sps:$4 sm:$0xff]   ;;  %v17224_v38 = vld [vmem:[%s18410_s13 + $0x3520] ss:$88 sps:$4 sm:$0xff]  }
 0x49f   : > { %12461 = vmatpush1.bf16.msra.mxu1 %v17167_v42  ;;  %v17232_v42 = vld [vmem:[%s18410_s13 + $0x35d4] ss:$88 sps:$4 sm:$0xff]  }
 0x4a0   : > { %12420 = vmatpush1.bf16.msra.mxu0 %v17164_v41  ;;  %12462 = vmatprep.subr.bf16.mxu1 %v17175_v45  ;;  %v17227_v41 = vld [vmem:[%s18410_s13 + $0x928] ss:$88 sps:$4 sm:$0xff]  }
 0x4a1   : > { %12421 = vmatprep.subr.bf16.mxu0 %v17172_v43  ;;  %v17235_v43 = vld [vmem:[%s18410_s13 + $0x9dc] ss:$88 sps:$4 sm:$0xff]   ;;  %v17230_v45 = vld [vmem:[%s18410_s13 + $0x35d0] ss:$88 sps:$4 sm:$0xff]  }
 0x4a3   : > { %12463 = vmatpush1.bf16.msra.mxu1 %v17173_v49  ;;  %v17238_v49 = vld [vmem:[%s18410_s13 + $0x3684] ss:$88 sps:$4 sm:$0xff]  }
 0x4a4   : > { %12422 = vmatpush1.bf16.msra.mxu0 %v17170_v47  ;;  %12464 = vmatprep.subr.bf16.mxu1 %v17181_v52  ;;  %v17233_v47 = vld [vmem:[%s18410_s13 + $0x9d8] ss:$88 sps:$4 sm:$0xff]  }
 0x4a5   : > { %12423 = vmatprep.subr.bf16.mxu0 %v17178_v50  ;;  %v17241_v50 = vld [vmem:[%s18410_s13 + $0xa8c] ss:$88 sps:$4 sm:$0xff]   ;;  %v17236_v52 = vld [vmem:[%s18410_s13 + $0x3680] ss:$88 sps:$4 sm:$0xff]  }
 0x4a7   : > { %12465 = vmatpush1.bf16.msra.mxu1 %v17179_v54  ;;  %v17244_v54 = vld [vmem:[%s18410_s13 + $0xb3c] ss:$88 sps:$4 sm:$0xff]  }
 0x4a8   : > { %12424 = vmatpush1.bf16.msra.mxu0 %v17176_v53  ;;  %12466 = vmatprep.subr.bf16.mxu1 %v17187_v13  ;;  %v17239_v53 = vld [vmem:[%s18410_s13 + $0xa88] ss:$88 sps:$4 sm:$0xff]   ;;  %v17242_v13 = vld [vmem:[%s18410_s13 + $0xb38] ss:$88 sps:$4 sm:$0xff]  }
 0x4a9   : > { %12425 = vmatprep.subr.bf16.mxu0 %v17184_v55  ;;  %v17247_v55 = vld [vmem:[%s18410_s13 + $0x44] ss:$88 sps:$4 sm:$0xff]  }
 0x4ab   : > { %12467 = vmatpush1.bf16.msra.mxu1 %v17185_v30  ;;  %v17250_v30 = vld [vmem:[%s18410_s13 + $0xbec] ss:$88 sps:$4 sm:$0xff]  }
 0x4ac   : > { %12426 = vmatpush1.bf16.msra.mxu0 %v17182_v16  ;;  %12468 = vmatprep.subr.bf16.mxu1 %v17193_v57  ;;  %v17245_v16 = vld [vmem:[%s18410_s13 + $0x40] ss:$88 sps:$4 sm:$0xff]  }
 0x4ad   : > { %12427 = vmatprep.subr.bf16.mxu0 %v17190_v56  ;;  %v17253_v56 = vld [vmem:[%s18410_s13 + $0xf4] ss:$88 sps:$4 sm:$0xff]   ;;  %v17248_v57 = vld [vmem:[%s18410_s13 + $0xbe8] ss:$88 sps:$4 sm:$0xff]  }
 0x4af   : > { %12469 = vmatpush1.bf16.msra.mxu1 %v17191_v59  ;;  %v17256_v59 = vld [vmem:[%s18410_s13 + $0xc9c] ss:$88 sps:$4 sm:$0xff]  }
 0x4b0   : > { %12428 = vmatpush1.bf16.msra.mxu0 %v17188_v58  ;;  %12470 = vmatprep.subr.bf16.mxu1 %v17199_v5  ;;  %v17251_v58 = vld [vmem:[%s18410_s13 + $0xf0] ss:$88 sps:$4 sm:$0xff]  }
 0x4b1   : > { %12429 = vmatprep.subr.bf16.mxu0 %v17196_v3  ;;  %v17259_v3 = vld [vmem:[%s18410_s13 + $0x1a4] ss:$88 sps:$4 sm:$0xff]   ;;  %v17254_v5 = vld [vmem:[%s18410_s13 + $0xc98] ss:$88 sps:$4 sm:$0xff]  }
 0x4b3   : > { %12471 = vmatpush1.bf16.msra.mxu1 %v17197_v61  ;;  %v17262_v61 = vld [vmem:[%s18410_s13 + $0xd4c] ss:$88 sps:$4 sm:$0xff]  }
 0x4b4   : > { %12430 = vmatpush1.bf16.msra.mxu0 %v17194_v10  ;;  %12472 = vmatprep.subr.bf16.mxu1 %v17205_v0  ;;  %v17257_v10 = vld [vmem:[%s18410_s13 + $0x1a0] ss:$88 sps:$4 sm:$0xff]  }
 0x4b5   : > { %12431 = vmatprep.subr.bf16.mxu0 %v17202_v63  ;;  %v17265_v63 = vld [vmem:[%s18410_s13 + $0x254] ss:$88 sps:$4 sm:$0xff]   ;;  %v17260_v0 = vld [vmem:[%s18410_s13 + $0xd48] ss:$88 sps:$4 sm:$0xff]  }
 0x4b7   : > { %12473 = vmatpush1.bf16.msra.mxu1 %v17203_v6  ;;  %v17268_v6 = vld [vmem:[%s18410_s13 + $0xdfc] ss:$88 sps:$4 sm:$0xff]  }
 0x4b8   : > { %12432 = vmatpush1.bf16.msra.mxu0 %v17200_v4  ;;  %12474 = vmatprep.subr.bf16.mxu1 %v17211_v9  ;;  %v17263_v4 = vld [vmem:[%s18410_s13 + $0x250] ss:$88 sps:$4 sm:$0xff]  }
 0x4b9   : > { %12433 = vmatprep.subr.bf16.mxu0 %v17208_v7  ;;  %v17271_v7 = vld [vmem:[%s18410_s13 + $0x304] ss:$88 sps:$4 sm:$0xff]   ;;  %v17266_v9 = vld [vmem:[%s18410_s13 + $0xdf8] ss:$88 sps:$4 sm:$0xff]  }
 0x4bb   : > { %12475 = vmatpush1.bf16.msra.mxu1 %v17209_v14  ;;  %v17274_v14 = vld [vmem:[%s18410_s13 + $0xeac] ss:$88 sps:$4 sm:$0xff]  }
 0x4bc   : > { %12434 = vmatpush1.bf16.msra.mxu0 %v17206_v12  ;;  %12476 = vmatprep.subr.bf16.mxu1 %v17217_v29  ;;  %v17269_v12 = vld [vmem:[%s18410_s13 + $0x300] ss:$88 sps:$4 sm:$0xff]  }
 0x4bd   : > { %12435 = vmatprep.subr.bf16.mxu0 %v17214_v17  ;;  %v17277_v17 = vld [vmem:[%s18410_s13 + $0x3b4] ss:$88 sps:$4 sm:$0xff]   ;;  %v17272_v29 = vld [vmem:[%s18410_s13 + $0xea8] ss:$88 sps:$4 sm:$0xff]  }
 0x4bf   : > { %12477 = vmatpush1.bf16.msra.mxu1 %v17215_v21  ;;  %v17280_v21 = vld [vmem:[%s18410_s13 + $0xf5c] ss:$88 sps:$4 sm:$0xff]  }
 0x4c0   : > { %12436 = vmatpush1.bf16.msra.mxu0 %v17212_v20  ;;  %12478 = vmatprep.subr.bf16.mxu1 %v17223_v31  ;;  %v17275_v20 = vld [vmem:[%s18410_s13 + $0x3b0] ss:$88 sps:$4 sm:$0xff]  }
 0x4c1   : > { %12437 = vmatprep.subr.bf16.mxu0 %v17220_v28  ;;  %v17283_v28 = vld [vmem:[%s18410_s13 + $0x464] ss:$88 sps:$4 sm:$0xff]   ;;  %v17278_v31 = vld [vmem:[%s18410_s13 + $0xf58] ss:$88 sps:$4 sm:$0xff]  }
 0x4c3   : > { %12479 = vmatpush1.bf16.msra.mxu1 %v17221_v35  ;;  %v17286_v35 = vld [vmem:[%s18410_s13 + $0x100c] ss:$88 sps:$4 sm:$0xff]  }
 0x4c4   : > { %12438 = vmatpush1.bf16.msra.mxu0 %v17218_v32  ;;  %12480 = vmatprep.subr.bf16.mxu1 %v17229_v37  ;;  %v17281_v32 = vld [vmem:[%s18410_s13 + $0x460] ss:$88 sps:$4 sm:$0xff]  }
 0x4c5   : > { %12439 = vmatprep.subr.bf16.mxu0 %v17226_v36  ;;  %v17289_v36 = vld [vmem:[%s18410_s13 + $0x514] ss:$88 sps:$4 sm:$0xff]   ;;  %v17284_v37 = vld [vmem:[%s18410_s13 + $0x1008] ss:$88 sps:$4 sm:$0xff]  }
 0x4c7   : > { %12481 = vmatpush1.bf16.msra.mxu1 %v17227_v41  ;;  %v17292_v41 = vld [vmem:[%s18410_s13 + $0x10bc] ss:$88 sps:$4 sm:$0xff]  }
 0x4c8   : > { %12440 = vmatpush1.bf16.msra.mxu0 %v17224_v38  ;;  %12482 = vmatprep.subr.bf16.mxu1 %v17235_v43  ;;  %v17287_v38 = vld [vmem:[%s18410_s13 + $0x510] ss:$88 sps:$4 sm:$0xff]  }
 0x4c9   : > { %12441 = vmatprep.subr.bf16.mxu0 %v17232_v42  ;;  %v17295_v42 = vld [vmem:[%s18410_s13 + $0x5c4] ss:$88 sps:$4 sm:$0xff]   ;;  %v17290_v43 = vld [vmem:[%s18410_s13 + $0x10b8] ss:$88 sps:$4 sm:$0xff]  }
 0x4cb   : > { %12483 = vmatpush1.bf16.msra.mxu1 %v17233_v47  ;;  %v17298_v47 = vld [vmem:[%s18410_s13 + $0x116c] ss:$88 sps:$4 sm:$0xff]  }
 0x4cc   : > { %12442 = vmatpush1.bf16.msra.mxu0 %v17230_v45  ;;  %12484 = vmatprep.subr.bf16.mxu1 %v17241_v50  ;;  %v17293_v45 = vld [vmem:[%s18410_s13 + $0x5c0] ss:$88 sps:$4 sm:$0xff]  }
 0x4cd   : > { %12443 = vmatprep.subr.bf16.mxu0 %v17238_v49  ;;  %v17301_v49 = vld [vmem:[%s18410_s13 + $0x674] ss:$88 sps:$4 sm:$0xff]   ;;  %v17296_v50 = vld [vmem:[%s18410_s13 + $0x1168] ss:$88 sps:$4 sm:$0xff]  }
 0x4cf   : > { %12485 = vmatpush1.bf16.msra.mxu1 %v17239_v53  ;;  %v17304_v53 = vld [vmem:[%s18410_s13 + $0x121c] ss:$88 sps:$4 sm:$0xff]  }
 0x4d0   : > { %12444 = vmatpush1.bf16.msra.mxu0 %v17236_v52  ;;  %12495 = vmatprep.subr.bf16.mxu1 %v17244_v54  ;;  %v17299_v52 = vld [vmem:[%s18410_s13 + $0x670] ss:$88 sps:$4 sm:$0xff]   ;;  %v17307_v54 = vld [vmem:[%s18410_s13 + $0x724] ss:$88 sps:$4 sm:$0xff]  }
 0x4d1   : > { %12659 = vmatprep.subr.bf16.mxu0 %v17247_v55  ;;  %v17302_v55 = vld [vmem:[%s18410_s13 + $0x1218] ss:$88 sps:$4 sm:$0xff]  }
 0x4d2   : > { %12487 = vmatmul.mubr.bf16.vlgmr.msra.gmra.mrb[16].mxu1 %v18503_v18 }
 0x4d3   : > { %12446 = vmatmul.mubr.bf16.vlgmr.msra.gmra.mrb[12].mxu0 %v18511_v23  ;;  %12496 = vmatpush1.bf16.msra.mxu1 %v17242_v13  ;;  %v17305_v13 = vld [vmem:[%s18410_s13 + $0x720] ss:$88 sps:$4 sm:$0xff]  }
 0x4d4   : > { %12660 = vmatpush1.bf16.msra.mxu0 %v17245_v16  ;;  %12497 = vmatprep.subr.bf16.mxu1 %v17250_v30  ;;  %v17310_v16 = vld [vmem:[%s18410_s13 + $0x12cc] ss:$88 sps:$4 sm:$0xff]  }
 0x4d5   : > { %12661 = vmatprep.subr.bf16.mxu0 %v17253_v56  ;;  %12527 = vmatprep.mubr.bf16.mxu1 %v18517_v26  ;;  %v17313_v30 = vld [vmem:[%s18410_s13 + $0x7d4] ss:$88 sps:$4 sm:$0xff]   ;;  %v17308_v56 = vld [vmem:[%s18410_s13 + $0x12c8] ss:$88 sps:$4 sm:$0xff]  }
 0x4d6   : > { %12691 = vmatprep.mubr.bf16.mxu0 %v18481_v60 }
 0x4d7   : > { %12498 = vmatpush1.bf16.msra.mxu1 %v17248_v57  ;;  %v17311_v57 = vld [vmem:[%s18410_s13 + $0x7d0] ss:$88 sps:$4 sm:$0xff]  }
 0x4d8   : > { %12662 = vmatpush1.bf16.msra.mxu0 %v17251_v58  ;;  %12499 = vmatprep.subr.bf16.mxu1 %v17256_v59  ;;  %v17316_v58 = vld [vmem:[%s18410_s13 + $0x137c] ss:$88 sps:$4 sm:$0xff]  }
 0x4d9   : > { %12663 = vmatprep.subr.bf16.mxu0 %v17259_v3  ;;  %v17319_v59 = vld [vmem:[%s18410_s13 + $0x884] ss:$88 sps:$4 sm:$0xff]   ;;  %v17314_v3 = vld [vmem:[%s18410_s13 + $0x1378] ss:$88 sps:$4 sm:$0xff]  }
 0x4db   : > { %12500 = vmatpush1.bf16.msra.mxu1 %v17254_v5  ;;  %v17317_v5 = vld [vmem:[%s18410_s13 + $0x880] ss:$88 sps:$4 sm:$0xff]  }
 0x4dc   : > { %12664 = vmatpush1.bf16.msra.mxu0 %v17257_v10  ;;  %12501 = vmatprep.subr.bf16.mxu1 %v17262_v61  ;;  %v17322_v10 = vld [vmem:[%s18410_s13 + $0x142c] ss:$88 sps:$4 sm:$0xff]  }
 0x4dd   : > { %12665 = vmatprep.subr.bf16.mxu0 %v17265_v63  ;;  %v17325_v61 = vld [vmem:[%s18410_s13 + $0x934] ss:$88 sps:$4 sm:$0xff]   ;;  %v17320_v63 = vld [vmem:[%s18410_s13 + $0x1428] ss:$88 sps:$4 sm:$0xff]  }
 0x4df   : > { %12502 = vmatpush1.bf16.msra.mxu1 %v17260_v0  ;;  %v17323_v0 = vld [vmem:[%s18410_s13 + $0x930] ss:$88 sps:$4 sm:$0xff]  }
 0x4e0   : > { %12666 = vmatpush1.bf16.msra.mxu0 %v17263_v4  ;;  %12503 = vmatprep.subr.bf16.mxu1 %v17268_v6  ;;  %v17328_v4 = vld [vmem:[%s18410_s13 + $0x14dc] ss:$88 sps:$4 sm:$0xff]  }
 0x4e1   : > { %12667 = vmatprep.subr.bf16.mxu0 %v17271_v7  ;;  %v17331_v6 = vld [vmem:[%s18410_s13 + $0x9e4] ss:$88 sps:$4 sm:$0xff]   ;;  %v17326_v7 = vld [vmem:[%s18410_s13 + $0x14d8] ss:$88 sps:$4 sm:$0xff]  }
 0x4e3   : > { %12504 = vmatpush1.bf16.msra.mxu1 %v17266_v9  ;;  %v17329_v9 = vld [vmem:[%s18410_s13 + $0x9e0] ss:$88 sps:$4 sm:$0xff]  }
 0x4e4   : > { %12668 = vmatpush1.bf16.msra.mxu0 %v17269_v12  ;;  %12505 = vmatprep.subr.bf16.mxu1 %v17274_v14  ;;  %v17334_v12 = vld [vmem:[%s18410_s13 + $0x158c] ss:$88 sps:$4 sm:$0xff]  }
 0x4e5   : > { %12669 = vmatprep.subr.bf16.mxu0 %v17277_v17  ;;  %v17337_v14 = vld [vmem:[%s18410_s13 + $0xa94] ss:$88 sps:$4 sm:$0xff]   ;;  %v17332_v17 = vld [vmem:[%s18410_s13 + $0x1588] ss:$88 sps:$4 sm:$0xff]  }
 0x4e7   : > { %12506 = vmatpush1.bf16.msra.mxu1 %v17272_v29  ;;  %v17335_v29 = vld [vmem:[%s18410_s13 + $0xa90] ss:$88 sps:$4 sm:$0xff]  }
 0x4e8   : > { %12670 = vmatpush1.bf16.msra.mxu0 %v17275_v20  ;;  %12507 = vmatprep.subr.bf16.mxu1 %v17280_v21  ;;  %v17340_v20 = vld [vmem:[%s18410_s13 + $0x163c] ss:$88 sps:$4 sm:$0xff]  }
 0x4e9   : > { %12671 = vmatprep.subr.bf16.mxu0 %v17283_v28  ;;  %v17343_v21 = vld [vmem:[%s18410_s13 + $0xb44] ss:$88 sps:$4 sm:$0xff]   ;;  %v17338_v28 = vld [vmem:[%s18410_s13 + $0x1638] ss:$88 sps:$4 sm:$0xff]  }
 0x4eb   : > { %12508 = vmatpush1.bf16.msra.mxu1 %v17278_v31  ;;  %v17341_v31 = vld [vmem:[%s18410_s13 + $0xb40] ss:$88 sps:$4 sm:$0xff]  }
 0x4ec   : > { %12672 = vmatpush1.bf16.msra.mxu0 %v17281_v32  ;;  %12509 = vmatprep.subr.bf16.mxu1 %v17286_v35  ;;  %v17346_v32 = vld [vmem:[%s18410_s13 + $0x16ec] ss:$88 sps:$4 sm:$0xff]  }
 0x4ed   : > { %12673 = vmatprep.subr.bf16.mxu0 %v17289_v36  ;;  %v17349_v35 = vld [vmem:[%s18410_s13 + $0xbf4] ss:$88 sps:$4 sm:$0xff]   ;;  %v17344_v36 = vld [vmem:[%s18410_s13 + $0x16e8] ss:$88 sps:$4 sm:$0xff]  }
 0x4ef   : > { %12510 = vmatpush1.bf16.msra.mxu1 %v17284_v37  ;;  %v17347_v37 = vld [vmem:[%s18410_s13 + $0xbf0] ss:$88 sps:$4 sm:$0xff]  }
 0x4f0   : > { %12674 = vmatpush1.bf16.msra.mxu0 %v17287_v38  ;;  %12511 = vmatprep.subr.bf16.mxu1 %v17292_v41  ;;  %v17352_v38 = vld [vmem:[%s18410_s13 + $0x179c] ss:$88 sps:$4 sm:$0xff]  }
 0x4f1   : > { %12675 = vmatprep.subr.bf16.mxu0 %v17295_v42  ;;  %v17355_v41 = vld [vmem:[%s18410_s13 + $0xca4] ss:$88 sps:$4 sm:$0xff]   ;;  %v17350_v42 = vld [vmem:[%s18410_s13 + $0x1798] ss:$88 sps:$4 sm:$0xff]  }
 0x4f3   : > { %12512 = vmatpush1.bf16.msra.mxu1 %v17290_v43  ;;  %v17353_v43 = vld [vmem:[%s18410_s13 + $0xca0] ss:$88 sps:$4 sm:$0xff]  }
 0x4f4   : > { %12676 = vmatpush1.bf16.msra.mxu0 %v17293_v45  ;;  %12513 = vmatprep.subr.bf16.mxu1 %v17298_v47  ;;  %v17358_v45 = vld [vmem:[%s18410_s13 + $0x184c] ss:$88 sps:$4 sm:$0xff]  }
 0x4f5   : > { %12677 = vmatprep.subr.bf16.mxu0 %v17301_v49  ;;  %v17361_v47 = vld [vmem:[%s18410_s13 + $0xd54] ss:$88 sps:$4 sm:$0xff]   ;;  %v17356_v49 = vld [vmem:[%s18410_s13 + $0x1848] ss:$88 sps:$4 sm:$0xff]  }
 0x4f7   : > { %12514 = vmatpush1.bf16.msra.mxu1 %v17296_v50  ;;  %v17359_v50 = vld [vmem:[%s18410_s13 + $0xd50] ss:$88 sps:$4 sm:$0xff]  }
 0x4f8   : > { %12678 = vmatpush1.bf16.msra.mxu0 %v17299_v52  ;;  %12515 = vmatprep.subr.bf16.mxu1 %v17304_v53  ;;  %v17364_v52 = vld [vmem:[%s18410_s13 + $0x18fc] ss:$88 sps:$4 sm:$0xff]  }
 0x4f9   : > { %12679 = vmatprep.subr.bf16.mxu0 %v17307_v54  ;;  %v17367_v53 = vld [vmem:[%s18410_s13 + $0xe04] ss:$88 sps:$4 sm:$0xff]   ;;  %v17362_v54 = vld [vmem:[%s18410_s13 + $0x18f8] ss:$88 sps:$4 sm:$0xff]  }
 0x4fb   : > { %12516 = vmatpush1.bf16.msra.mxu1 %v17302_v55  ;;  %v17365_v55 = vld [vmem:[%s18410_s13 + $0xe00] ss:$88 sps:$4 sm:$0xff]  }
 0x4fc   : > { %12680 = vmatpush1.bf16.msra.mxu0 %v17305_v13  ;;  %12517 = vmatprep.subr.bf16.mxu1 %v17310_v16  ;;  %v17370_v13 = vld [vmem:[%s18410_s13 + $0x19ac] ss:$88 sps:$4 sm:$0xff]  }
 0x4fd   : > { %12681 = vmatprep.subr.bf16.mxu0 %v17313_v30  ;;  %v17373_v16 = vld [vmem:[%s18410_s13 + $0xeb4] ss:$88 sps:$4 sm:$0xff]   ;;  %v17368_v30 = vld [vmem:[%s18410_s13 + $0x19a8] ss:$88 sps:$4 sm:$0xff]  }
 0x4ff   : > { %12518 = vmatpush1.bf16.msra.mxu1 %v17308_v56  ;;  %v17371_v56 = vld [vmem:[%s18410_s13 + $0xeb0] ss:$88 sps:$4 sm:$0xff]  }
 0x500   : > { %12682 = vmatpush1.bf16.msra.mxu0 %v17311_v57  ;;  %12519 = vmatprep.subr.bf16.mxu1 %v17316_v58  ;;  %v17376_v57 = vld [vmem:[%s18410_s13 + $0x1a5c] ss:$88 sps:$4 sm:$0xff]  }
 0x501   : > { %12683 = vmatprep.subr.bf16.mxu0 %v17319_v59  ;;  %v17379_v58 = vld [vmem:[%s18410_s13 + $0xf64] ss:$88 sps:$4 sm:$0xff]   ;;  %v17374_v59 = vld [vmem:[%s18410_s13 + $0x1a58] ss:$88 sps:$4 sm:$0xff]  }
 0x503   : > { %12520 = vmatpush1.bf16.msra.mxu1 %v17314_v3  ;;  %v17377_v3 = vld [vmem:[%s18410_s13 + $0xf60] ss:$88 sps:$4 sm:$0xff]  }
 0x504   : > { %12684 = vmatpush1.bf16.msra.mxu0 %v17317_v5  ;;  %12521 = vmatprep.subr.bf16.mxu1 %v17322_v10  ;;  %v17382_v5 = vld [vmem:[%s18410_s13 + $0x1b0c] ss:$88 sps:$4 sm:$0xff]  }
 0x505   : > { %12685 = vmatprep.subr.bf16.mxu0 %v17325_v61  ;;  %v17385_v10 = vld [vmem:[%s18410_s13 + $0x1014] ss:$88 sps:$4 sm:$0xff]   ;;  %v17380_v61 = vld [vmem:[%s18410_s13 + $0x1b08] ss:$88 sps:$4 sm:$0xff]  }
 0x507   : > { %12522 = vmatpush1.bf16.msra.mxu1 %v17320_v63  ;;  %v17383_v63 = vld [vmem:[%s18410_s13 + $0x1010] ss:$88 sps:$4 sm:$0xff]  }
 0x508   : > { %12686 = vmatpush1.bf16.msra.mxu0 %v17323_v0  ;;  %12523 = vmatprep.subr.bf16.mxu1 %v17328_v4  ;;  %v17388_v0 = vld [vmem:[%s18410_s13 + $0x1bbc] ss:$88 sps:$4 sm:$0xff]  }
 0x509   : > { %12687 = vmatprep.subr.bf16.mxu0 %v17331_v6  ;;  %v17391_v4 = vld [vmem:[%s18410_s13 + $0x10c4] ss:$88 sps:$4 sm:$0xff]   ;;  %v17386_v6 = vld [vmem:[%s18410_s13 + $0x1bb8] ss:$88 sps:$4 sm:$0xff]  }
 0x50b   : > { %12524 = vmatpush1.bf16.msra.mxu1 %v17326_v7  ;;  %v17389_v7 = vld [vmem:[%s18410_s13 + $0x10c0] ss:$88 sps:$4 sm:$0xff]  }
 0x50c   : > { %12688 = vmatpush1.bf16.msra.mxu0 %v17329_v9  ;;  %12525 = vmatprep.subr.bf16.mxu1 %v17334_v12  ;;  %v17394_v9 = vld [vmem:[%s18410_s13 + $0x1c6c] ss:$88 sps:$4 sm:$0xff]  }
 0x50d   : > { %12689 = vmatprep.subr.bf16.mxu0 %v17337_v14  ;;  %v17397_v12 = vld [vmem:[%s18410_s13 + $0x1174] ss:$88 sps:$4 sm:$0xff]   ;;  %v17392_v14 = vld [vmem:[%s18410_s13 + $0x1c68] ss:$88 sps:$4 sm:$0xff]  }
 0x50f   : > { %12526 = vmatpush1.bf16.msra.mxu1 %v17332_v17  ;;  %v17395_v17 = vld [vmem:[%s18410_s13 + $0x1170] ss:$88 sps:$4 sm:$0xff]  }
 0x510   : > { %12690 = vmatpush1.bf16.msra.mxu0 %v17335_v29  ;;  %12536 = vmatprep.subr.bf16.mxu1 %v17340_v20  ;;  %v17400_v29 = vld [vmem:[%s18410_s13 + $0x1d1c] ss:$88 sps:$4 sm:$0xff]  }
 0x511   : > { %12700 = vmatprep.subr.bf16.mxu0 %v17343_v21  ;;  %v17403_v20 = vld [vmem:[%s18410_s13 + $0x1224] ss:$88 sps:$4 sm:$0xff]   ;;  %v17398_v21 = vld [vmem:[%s18410_s13 + $0x1d18] ss:$88 sps:$4 sm:$0xff]  }
 0x512   : > { %12528 = vmatmul.mubr.bf16.vlgmr.msra.gmra.mrb[16].mxu1 %v18589_v33 }
 0x513   : > { %12692 = vmatmul.mubr.bf16.vlgmr.msra.gmra.mrb[16].mxu0 %v18503_v18  ;;  %12537 = vmatpush1.bf16.msra.mxu1 %v17338_v28  ;;  %v17401_v28 = vld [vmem:[%s18410_s13 + $0x1220] ss:$88 sps:$4 sm:$0xff]  }
 0x514   : > { %12701 = vmatpush1.bf16.msra.mxu0 %v17341_v31  ;;  %12538 = vmatprep.subr.bf16.mxu1 %v17346_v32  ;;  %v17406_v31 = vld [vmem:[%s18410_s13 + $0x1dcc] ss:$88 sps:$4 sm:$0xff]  }
 0x515   : > { %12702 = vmatprep.subr.bf16.mxu0 %v17349_v35  ;;  %12568 = vmatprep.mubr.bf16.mxu1 %v18487_v2  ;;  %v17409_v32 = vld [vmem:[%s18410_s13 + $0x12d4] ss:$88 sps:$4 sm:$0xff]   ;;  %v17404_v35 = vld [vmem:[%s18410_s13 + $0x1dc8] ss:$88 sps:$4 sm:$0xff]  }
 0x516   : > { %12732 = vmatprep.mubr.bf16.mxu0 %v18517_v26 }
 0x517   : > { %12539 = vmatpush1.bf16.msra.mxu1 %v17344_v36  ;;  %v17407_v36 = vld [vmem:[%s18410_s13 + $0x12d0] ss:$88 sps:$4 sm:$0xff]  }
 0x518   : > { %12703 = vmatpush1.bf16.msra.mxu0 %v17347_v37  ;;  %12540 = vmatprep.subr.bf16.mxu1 %v17352_v38  ;;  %v17412_v37 = vld [vmem:[%s18410_s13 + $0x1e7c] ss:$88 sps:$4 sm:$0xff]  }
 0x519   : > { %12704 = vmatprep.subr.bf16.mxu0 %v17355_v41  ;;  %v17415_v38 = vld [vmem:[%s18410_s13 + $0x1384] ss:$88 sps:$4 sm:$0xff]   ;;  %v17410_v41 = vld [vmem:[%s18410_s13 + $0x1e78] ss:$88 sps:$4 sm:$0xff]  }
 0x51b   : > { %12541 = vmatpush1.bf16.msra.mxu1 %v17350_v42  ;;  %v17413_v42 = vld [vmem:[%s18410_s13 + $0x1380] ss:$88 sps:$4 sm:$0xff]  }
 0x51c   : > { %12705 = vmatpush1.bf16.msra.mxu0 %v17353_v43  ;;  %12542 = vmatprep.subr.bf16.mxu1 %v17358_v45  ;;  %v17418_v43 = vld [vmem:[%s18410_s13 + $0x1f2c] ss:$88 sps:$4 sm:$0xff]  }
 0x51d   : > { %12706 = vmatprep.subr.bf16.mxu0 %v17361_v47  ;;  %v17421_v45 = vld [vmem:[%s18410_s13 + $0x1434] ss:$88 sps:$4 sm:$0xff]   ;;  %v17416_v47 = vld [vmem:[%s18410_s13 + $0x1f28] ss:$88 sps:$4 sm:$0xff]  }
 0x51f   : > { %12543 = vmatpush1.bf16.msra.mxu1 %v17356_v49  ;;  %v17419_v49 = vld [vmem:[%s18410_s13 + $0x1430] ss:$88 sps:$4 sm:$0xff]  }
 0x520   : > { %12707 = vmatpush1.bf16.msra.mxu0 %v17359_v50  ;;  %12544 = vmatprep.subr.bf16.mxu1 %v17364_v52  ;;  %v17424_v50 = vld [vmem:[%s18410_s13 + $0x1fdc] ss:$88 sps:$4 sm:$0xff]  }
 0x521   : > { %12708 = vmatprep.subr.bf16.mxu0 %v17367_v53  ;;  %v17427_v52 = vld [vmem:[%s18410_s13 + $0x14e4] ss:$88 sps:$4 sm:$0xff]   ;;  %v17422_v53 = vld [vmem:[%s18410_s13 + $0x1fd8] ss:$88 sps:$4 sm:$0xff]  }
 0x523   : > { %12545 = vmatpush1.bf16.msra.mxu1 %v17362_v54  ;;  %v17425_v54 = vld [vmem:[%s18410_s13 + $0x14e0] ss:$88 sps:$4 sm:$0xff]  }
 0x524   : > { %12709 = vmatpush1.bf16.msra.mxu0 %v17365_v55  ;;  %12546 = vmatprep.subr.bf16.mxu1 %v17370_v13  ;;  %v17430_v55 = vld [vmem:[%s18410_s13 + $0x208c] ss:$88 sps:$4 sm:$0xff]  }
 0x525   : > { %12710 = vmatprep.subr.bf16.mxu0 %v17373_v16  ;;  %v17433_v13 = vld [vmem:[%s18410_s13 + $0x1594] ss:$88 sps:$4 sm:$0xff]   ;;  %v17428_v16 = vld [vmem:[%s18410_s13 + $0x2088] ss:$88 sps:$4 sm:$0xff]  }
 0x527   : > { %12547 = vmatpush1.bf16.msra.mxu1 %v17368_v30  ;;  %v17431_v30 = vld [vmem:[%s18410_s13 + $0x1590] ss:$88 sps:$4 sm:$0xff]  }
 0x528   : > { %12711 = vmatpush1.bf16.msra.mxu0 %v17371_v56  ;;  %12548 = vmatprep.subr.bf16.mxu1 %v17376_v57  ;;  %v17436_v56 = vld [vmem:[%s18410_s13 + $0x213c] ss:$88 sps:$4 sm:$0xff]  }
 0x529   : > { %12712 = vmatprep.subr.bf16.mxu0 %v17379_v58  ;;  %v17439_v57 = vld [vmem:[%s18410_s13 + $0x1644] ss:$88 sps:$4 sm:$0xff]   ;;  %v17434_v58 = vld [vmem:[%s18410_s13 + $0x2138] ss:$88 sps:$4 sm:$0xff]  }
 0x52b   : > { %12549 = vmatpush1.bf16.msra.mxu1 %v17374_v59  ;;  %v17437_v59 = vld [vmem:[%s18410_s13 + $0x1640] ss:$88 sps:$4 sm:$0xff]  }
 0x52c   : > { %12713 = vmatpush1.bf16.msra.mxu0 %v17377_v3  ;;  %12550 = vmatprep.subr.bf16.mxu1 %v17382_v5  ;;  %v17442_v3 = vld [vmem:[%s18410_s13 + $0x21ec] ss:$88 sps:$4 sm:$0xff]  }
 0x52d   : > { %12714 = vmatprep.subr.bf16.mxu0 %v17385_v10  ;;  %v17445_v5 = vld [vmem:[%s18410_s13 + $0x16f4] ss:$88 sps:$4 sm:$0xff]   ;;  %v17440_v10 = vld [vmem:[%s18410_s13 + $0x21e8] ss:$88 sps:$4 sm:$0xff]  }
 0x52f   : > { %12551 = vmatpush1.bf16.msra.mxu1 %v17380_v61  ;;  %v17443_v61 = vld [vmem:[%s18410_s13 + $0x16f0] ss:$88 sps:$4 sm:$0xff]  }
 0x530   : > { %12715 = vmatpush1.bf16.msra.mxu0 %v17383_v63  ;;  %12552 = vmatprep.subr.bf16.mxu1 %v17388_v0  ;;  %v17448_v63 = vld [vmem:[%s18410_s13 + $0x229c] ss:$88 sps:$4 sm:$0xff]  }
 0x531   : > { %12716 = vmatprep.subr.bf16.mxu0 %v17391_v4  ;;  %v17451_v0 = vld [vmem:[%s18410_s13 + $0x17a4] ss:$88 sps:$4 sm:$0xff]   ;;  %v17446_v4 = vld [vmem:[%s18410_s13 + $0x2298] ss:$88 sps:$4 sm:$0xff]  }
 0x533   : > { %12553 = vmatpush1.bf16.msra.mxu1 %v17386_v6  ;;  %v17449_v6 = vld [vmem:[%s18410_s13 + $0x17a0] ss:$88 sps:$4 sm:$0xff]  }
 0x534   : > { %12717 = vmatpush1.bf16.msra.mxu0 %v17389_v7  ;;  %12554 = vmatprep.subr.bf16.mxu1 %v17394_v9  ;;  %v17454_v7 = vld [vmem:[%s18410_s13 + $0x234c] ss:$88 sps:$4 sm:$0xff]  }
 0x535   : > { %12718 = vmatprep.subr.bf16.mxu0 %v17397_v12  ;;  %v17457_v9 = vld [vmem:[%s18410_s13 + $0x1854] ss:$88 sps:$4 sm:$0xff]   ;;  %v17452_v12 = vld [vmem:[%s18410_s13 + $0x2348] ss:$88 sps:$4 sm:$0xff]  }
 0x537   : > { %12555 = vmatpush1.bf16.msra.mxu1 %v17392_v14  ;;  %v17455_v14 = vld [vmem:[%s18410_s13 + $0x1850] ss:$88 sps:$4 sm:$0xff]  }
 0x538   : > { %12719 = vmatpush1.bf16.msra.mxu0 %v17395_v17  ;;  %12556 = vmatprep.subr.bf16.mxu1 %v17400_v29  ;;  %v17460_v17 = vld [vmem:[%s18410_s13 + $0x23fc] ss:$88 sps:$4 sm:$0xff]  }
 0x539   : > { %12720 = vmatprep.subr.bf16.mxu0 %v17403_v20  ;;  %v17463_v29 = vld [vmem:[%s18410_s13 + $0x1904] ss:$88 sps:$4 sm:$0xff]   ;;  %v17458_v20 = vld [vmem:[%s18410_s13 + $0x23f8] ss:$88 sps:$4 sm:$0xff]  }
 0x53b   : > { %12557 = vmatpush1.bf16.msra.mxu1 %v17398_v21  ;;  %v17461_v21 = vld [vmem:[%s18410_s13 + $0x1900] ss:$88 sps:$4 sm:$0xff]  }
 0x53c   : > { %12721 = vmatpush1.bf16.msra.mxu0 %v17401_v28  ;;  %12558 = vmatprep.subr.bf16.mxu1 %v17406_v31  ;;  %v17466_v28 = vld [vmem:[%s18410_s13 + $0x24ac] ss:$88 sps:$4 sm:$0xff]  }
 0x53d   : > { %12722 = vmatprep.subr.bf16.mxu0 %v17409_v32  ;;  %v17469_v31 = vld [vmem:[%s18410_s13 + $0x19b4] ss:$88 sps:$4 sm:$0xff]  }
 0x53e   : > { %v19933_v32 = vld [vmem:[%s18416_s8 + $0x8] sm:$0xff] }
 0x53f   : > { %12559 = vmatpush1.bf16.msra.mxu1 %v17404_v35  ;;  %v2152_v35 = vrot.slane %v19933_v32, %v19183_v15 }
 0x540   : > { %12723 = vmatpush1.bf16.msra.mxu0 %v17407_v36  ;;  %12560 = vmatprep.subr.bf16.mxu1 %v17412_v37  ;;  %v2156_v36 = vrot.slane %v19933_v32, %v19188_v24  ;;  %v17464_v37 = vld [vmem:[%s18410_s13 + $0x24a8] ss:$88 sps:$4 sm:$0xff]  }
 0x541   : > { %12724 = vmatprep.subr.bf16.mxu0 %v17415_v38  ;;  %v17467_v38 = vld [vmem:[%s18410_s13 + $0x19b0] ss:$88 sps:$4 sm:$0xff]  }
 0x543   : > { %12561 = vmatpush1.bf16.msra.mxu1 %v17410_v41  ;;  %v17472_v41 = vld [vmem:[%s18410_s13 + $0x255c] ss:$88 sps:$4 sm:$0xff]  }
 0x544   : > { %12725 = vmatpush1.bf16.msra.mxu0 %v17413_v42  ;;  %12562 = vmatprep.subr.bf16.mxu1 %v17418_v43  ;;  %v17475_v42 = vld [vmem:[%s18410_s13 + $0x1a64] ss:$88 sps:$4 sm:$0xff]  }
 0x545   : > { %12726 = vmatprep.subr.bf16.mxu0 %v17421_v45 }
 0x547   : > { %12563 = vmatpush1.bf16.msra.mxu1 %v17416_v47 }
 0x548   : > { %12727 = vmatpush1.bf16.msra.mxu0 %v17419_v49  ;;  %12564 = vmatprep.subr.bf16.mxu1 %v17424_v50 }
 0x549   : > { %12728 = vmatprep.subr.bf16.mxu0 %v17427_v52  ;;  %v17470_v52 = vld [vmem:[%s18410_s13 + $0x2558] ss:$88 sps:$4 sm:$0xff]  }
 0x54b   : > { %12565 = vmatpush1.bf16.msra.mxu1 %v17422_v53  ;;  %v17473_v53 = vld [vmem:[%s18410_s13 + $0x1a60] ss:$88 sps:$4 sm:$0xff]  }
 0x54c   : > { %12729 = vmatpush1.bf16.msra.mxu0 %v17425_v54  ;;  %12566 = vmatprep.subr.bf16.mxu1 %v17430_v55  ;;  %v17478_v55 = vld [vmem:[%s18410_s13 + $0x260c] ss:$88 sps:$4 sm:$0xff]  }
 0x54d   : > { %12730 = vmatprep.subr.bf16.mxu0 %v17433_v13  ;;  %v17481_v13 = vld [vmem:[%s18410_s13 + $0x1b14] ss:$88 sps:$4 sm:$0xff]  }
 0x54f   : > { %12567 = vmatpush1.bf16.msra.mxu1 %v17428_v16 }
 0x550   : > { %12731 = vmatpush1.bf16.msra.mxu0 %v17431_v30  ;;  %12577 = vmatprep.subr.bf16.mxu1 %v17436_v56  ;;  %v13338_v30 = vrot.slane %v13330_v25, %v19205_v44  ;;  %v17490_v25 = vld [vmem:[%s18410_s13 + $0x276c] ss:$88 sps:$4 sm:$0xff]  }
 0x551   : > { %12741 = vmatprep.subr.bf16.mxu0 %v17439_v57  ;;  %v17476_v57 = vld [vmem:[%s18410_s13 + $0x2608] ss:$88 sps:$4 sm:$0xff]  }
 0x552   : > { %12569 = vmatmul.mubr.bf16.vlgmr.msra.gmra.mrb[16].mxu1 %v18505_v19 }
 0x553   : > { %12733 = vmatmul.mubr.bf16.vlgmr.msra.gmra.mrb[16].mxu0 %v18589_v33  ;;  %12578 = vmatpush1.bf16.msra.mxu1 %v17434_v58  ;;  %v17479_v58 = vld [vmem:[%s18410_s13 + $0x1b10] ss:$88 sps:$4 sm:$0xff]  }
 0x554   : > { %12742 = vmatpush1.bf16.msra.mxu0 %v17437_v59  ;;  %12579 = vmatprep.subr.bf16.mxu1 %v17442_v3  ;;  %v17484_v59 = vld [vmem:[%s18410_s13 + $0x26bc] ss:$88 sps:$4 sm:$0xff]  }
 0x555   : > { %12743 = vmatprep.subr.bf16.mxu0 %v17445_v5  ;;  %12609 = vmatprep.mubr.bf16.mxu1 %v18521_v27  ;;  %v17487_v3 = vld [vmem:[%s18410_s13 + $0x1bc4] ss:$88 sps:$4 sm:$0xff]  }
 0x556   : > { %12773 = vmatprep.mubr.bf16.mxu0 %v18487_v2 }
 0x557   : > { %12580 = vmatpush1.bf16.msra.mxu1 %v17440_v10  ;;  %v17493_v10 = vld [vmem:[%s18410_s13 + $0x1c74] ss:$88 sps:$4 sm:$0xff]  }
 0x558   : > { %12744 = vmatpush1.bf16.msra.mxu0 %v17443_v61  ;;  %12581 = vmatprep.subr.bf16.mxu1 %v17448_v63  ;;  %v17488_v61 = vld [vmem:[%s18410_s13 + $0x2768] ss:$88 sps:$4 sm:$0xff]  }
 0x559   : > { %12745 = vmatprep.subr.bf16.mxu0 %v17451_v0  ;;  %v17491_v63 = vld [vmem:[%s18410_s13 + $0x1c70] ss:$88 sps:$4 sm:$0xff]   ;;  %v17496_v0 = vld [vmem:[%s18410_s13 + $0x281c] ss:$88 sps:$4 sm:$0xff]  }
 0x55b   : > { %12582 = vmatpush1.bf16.msra.mxu1 %v17446_v4  ;;  %v17499_v4 = vld [vmem:[%s18410_s13 + $0x1d24] ss:$88 sps:$4 sm:$0xff]  }
 0x55c   : > { %12746 = vmatpush1.bf16.msra.mxu0 %v17449_v6  ;;  %12583 = vmatprep.subr.bf16.mxu1 %v17454_v7  ;;  %v17494_v6 = vld [vmem:[%s18410_s13 + $0x2818] ss:$88 sps:$4 sm:$0xff]  }
 0x55d   : > { %12747 = vmatprep.subr.bf16.mxu0 %v17457_v9  ;;  %v17497_v7 = vld [vmem:[%s18410_s13 + $0x1d20] ss:$88 sps:$4 sm:$0xff]   ;;  %v17502_v9 = vld [vmem:[%s18410_s13 + $0x28cc] ss:$88 sps:$4 sm:$0xff]  }
 0x55f   : > { %12584 = vmatpush1.bf16.msra.mxu1 %v17452_v12  ;;  %v17505_v12 = vld [vmem:[%s18410_s13 + $0x1dd4] ss:$88 sps:$4 sm:$0xff]  }
 0x560   : > { %12748 = vmatpush1.bf16.msra.mxu0 %v17455_v14  ;;  %12585 = vmatprep.subr.bf16.mxu1 %v17460_v17  ;;  %v17500_v14 = vld [vmem:[%s18410_s13 + $0x28c8] ss:$88 sps:$4 sm:$0xff]  }
 0x561   : > { %12749 = vmatprep.subr.bf16.mxu0 %v17463_v29  ;;  %v17503_v17 = vld [vmem:[%s18410_s13 + $0x1dd0] ss:$88 sps:$4 sm:$0xff]   ;;  %v17508_v29 = vld [vmem:[%s18410_s13 + $0x297c] ss:$88 sps:$4 sm:$0xff]  }
 0x563   : > { %12586 = vmatpush1.bf16.msra.mxu1 %v17458_v20  ;;  %v17511_v20 = vld [vmem:[%s18410_s13 + $0x1e84] ss:$88 sps:$4 sm:$0xff]  }
 0x564   : > { %12750 = vmatpush1.bf16.msra.mxu0 %v17461_v21  ;;  %12587 = vmatprep.subr.bf16.mxu1 %v17466_v28  ;;  %v17506_v21 = vld [vmem:[%s18410_s13 + $0x2978] ss:$88 sps:$4 sm:$0xff]  }
 0x565   : > { %12751 = vmatprep.subr.bf16.mxu0 %v17469_v31  ;;  %v12242_v43 = vpop.f32.mrb[12].mxu1  ;;  %v17509_v28 = vld [vmem:[%s18410_s13 + $0x1e80] ss:$88 sps:$4 sm:$0xff]   ;;  %v17514_v31 = vld [vmem:[%s18410_s13 + $0x2a2c] ss:$88 sps:$4 sm:$0xff]  }
 0x566   : > { %v15276_v45 = vadd.f32 %v12242_v43, %v2152_v35  ;;  %v12244_v47 = vpop.f32.mrb[13].mxu1  ;;  %v17517_v35 = vld [vmem:[%s18410_s13 + $0x1f34] ss:$88 sps:$4 sm:$0xff]   ;;  %v17521_v43 = vld [vmem:[%s18410_s13 + $0x1fe0] ss:$88 sps:$4 sm:$0xff]  }
 0x567   : > { %v15277_v49 = vadd.f32 %v12244_v47, %v2156_v36  ;;  %v12246_v50 = vpop.f32.mrb[14].mxu1  ;;  %12588 = vmatpush1.bf16.msra.mxu1 %v17464_v37  ;;  %v17512_v36 = vld [vmem:[%s18410_s13 + $0x2a28] ss:$88 sps:$4 sm:$0xff]   ;;  %v17529_v47 = vld [vmem:[%s18410_s13 + $0x2094] ss:$88 sps:$4 sm:$0xff]  }
 0x568   : > { %12752 = vmatpush1.bf16.msra.mxu0 %v17467_v38  ;;  %v12247_v54 = vpop.f32.mrb[15].mxu1  ;;  %12589 = vmatprep.subr.bf16.mxu1 %v17472_v41  ;;  %v17515_v37 = vld [vmem:[%s18410_s13 + $0x1f30] ss:$88 sps:$4 sm:$0xff]   ;;  %v17520_v38 = vld [vmem:[%s18410_s13 + $0x2adc] ss:$88 sps:$4 sm:$0xff]  }
 0x569   : > { %12753 = vmatprep.subr.bf16.mxu0 %v17475_v42  ;;  %v13331_v16 = vcombine.low %v15276_v45, %v15277_v49  ;;  %v17523_v41 = vld [vmem:[%s18410_s13 + $0x1fe4] ss:$88 sps:$4 sm:$0xff]   ;;  %v17518_v42 = vld [vmem:[%s18410_s13 + $0x2ad8] ss:$88 sps:$4 sm:$0xff]   ;;  %v17524_v49 = vld [vmem:[%s18410_s13 + $0x2b88] ss:$88 sps:$4 sm:$0xff]  }
 0x56a   : > { %v17526_v45 = vld [vmem:[%s18410_s13 + $0x2b8c] ss:$88 sps:$4 sm:$0xff]   ;;  %v17527_v50 = vld [vmem:[%s18410_s13 + $0x2090] ss:$88 sps:$4 sm:$0xff]  }
 0x56b   : > { %v13345_v56 = vrot.slane %v13331_v16, %v19205_v44  ;;  %12590 = vmatpush1.bf16.msra.mxu1 %v17470_v52  ;;  %v17532_v52 = vld [vmem:[%s18410_s13 + $0x2c3c] ss:$88 sps:$4 sm:$0xff]   ;;  %v17530_v54 = vld [vmem:[%s18410_s13 + $0x2c38] ss:$88 sps:$4 sm:$0xff]  }
 0x56c   : > { %12754 = vmatpush1.bf16.msra.mxu0 %v17473_v53  ;;  %12591 = vmatprep.subr.bf16.mxu1 %v17478_v55  ;;  %v17535_v53 = vld [vmem:[%s18410_s13 + $0x2144] ss:$88 sps:$4 sm:$0xff]   ;;  %v17533_v55 = vld [vmem:[%s18410_s13 + $0x2140] ss:$88 sps:$4 sm:$0xff]   ;;  %v17541_v16 = vld [vmem:[%s18410_s13 + $0x21f4] ss:$88 sps:$4 sm:$0xff]  }
 0x56d   : > { %12755 = vmatprep.subr.bf16.mxu0 %v17481_v13  ;;  %v13346_v5 = vcombine.low %v13338_v30, %v13345_v56  ;;  %v17538_v13 = vld [vmem:[%s18410_s13 + $0x2cec] ss:$88 sps:$4 sm:$0xff]   ;;  %v17536_v30 = vld [vmem:[%s18410_s13 + $0x2ce8] ss:$88 sps:$4 sm:$0xff]  }
 0x56e   : > { %v17539_v56 = vld [vmem:[%s18410_s13 + $0x21f0] ss:$88 sps:$4 sm:$0xff]  }
 0x56f   : > { %13397 = vst [vmem:[%s19221_s21 + $0x10] sm:$0xff] %v13346_v5  ;;  %12592 = vmatpush1.bf16.msra.mxu1 %v17476_v57  ;;  %v17544_v57 = vld [vmem:[%s18410_s13 + $0x2d9c] ss:$88 sps:$4 sm:$0xff]   ;;  %v17550_v5 = vld [vmem:[%s18410_s13 + $0x2e4c] ss:$88 sps:$4 sm:$0xff]  }
 0x570   : > { %12756 = vmatpush1.bf16.msra.mxu0 %v17479_v58  ;;  %12593 = vmatprep.subr.bf16.mxu1 %v17484_v59  ;;  %v17547_v58 = vld [vmem:[%s18410_s13 + $0x22a4] ss:$88 sps:$4 sm:$0xff]   ;;  %v17542_v59 = vld [vmem:[%s18410_s13 + $0x2d98] ss:$88 sps:$4 sm:$0xff]  }
 0x571   : > { %12757 = vmatprep.subr.bf16.mxu0 %v17487_v3  ;;  %v17545_v3 = vld [vmem:[%s18410_s13 + $0x22a0] ss:$88 sps:$4 sm:$0xff]  }
 0x573   : > { %12594 = vmatpush1.bf16.msra.mxu1 %v17482_v8  ;;  %v17553_v8 = vld [vmem:[%s18410_s13 + $0x2354] ss:$88 sps:$4 sm:$0xff]  }
 0x574   : > { %12758 = vmatpush1.bf16.msra.mxu0 %v17485_v11  ;;  %12595 = vmatprep.subr.bf16.mxu1 %v17490_v25  ;;  %v17548_v11 = vld [vmem:[%s18410_s13 + $0x2e48] ss:$88 sps:$4 sm:$0xff]  }
 0x575   : > { %12759 = vmatprep.subr.bf16.mxu0 %v17493_v10  ;;  %v17551_v25 = vld [vmem:[%s18410_s13 + $0x2350] ss:$88 sps:$4 sm:$0xff]   ;;  %v17556_v10 = vld [vmem:[%s18410_s13 + $0x2efc] ss:$88 sps:$4 sm:$0xff]  }
 0x577   : > { %12596 = vmatpush1.bf16.msra.mxu1 %v17488_v61  ;;  %v17559_v61 = vld [vmem:[%s18410_s13 + $0x2404] ss:$88 sps:$4 sm:$0xff]  }
 0x578   : > { %12760 = vmatpush1.bf16.msra.mxu0 %v17491_v63  ;;  %12597 = vmatprep.subr.bf16.mxu1 %v17496_v0  ;;  %v17554_v63 = vld [vmem:[%s18410_s13 + $0x2ef8] ss:$88 sps:$4 sm:$0xff]  }
 0x579   : > { %12761 = vmatprep.subr.bf16.mxu0 %v17499_v4  ;;  %v17557_v0 = vld [vmem:[%s18410_s13 + $0x2400] ss:$88 sps:$4 sm:$0xff]   ;;  %v17562_v4 = vld [vmem:[%s18410_s13 + $0x2fac] ss:$88 sps:$4 sm:$0xff]  }
 0x57b   : > { %12598 = vmatpush1.bf16.msra.mxu1 %v17494_v6  ;;  %v17565_v6 = vld [vmem:[%s18410_s13 + $0x24b4] ss:$88 sps:$4 sm:$0xff]  }
 0x57c   : > { %12762 = vmatpush1.bf16.msra.mxu0 %v17497_v7  ;;  %12599 = vmatprep.subr.bf16.mxu1 %v17502_v9  ;;  %v2160_v7 = vrot.slane %v19933_v32, %v19279_v62  ;;  %v2164_v9 = vrot.slane %v19933_v32, %v19284_v1  ;;  %v17566_v32 = vld [vmem:[%s18410_s13 + $0x3058] ss:$88 sps:$4 sm:$0xff]  }
 0x57d   : > { %12763 = vmatprep.subr.bf16.mxu0 %v17505_v12  ;;  %v17560_v12 = vld [vmem:[%s18410_s13 + $0x2fa8] ss:$88 sps:$4 sm:$0xff]  }
 0x57f   : > { %12600 = vmatpush1.bf16.msra.mxu1 %v17500_v14  ;;  %v17563_v14 = vld [vmem:[%s18410_s13 + $0x24b0] ss:$88 sps:$4 sm:$0xff]  }
 0x580   : > { %12764 = vmatpush1.bf16.msra.mxu0 %v17503_v17  ;;  %12601 = vmatprep.subr.bf16.mxu1 %v17508_v29  ;;  %v17568_v17 = vld [vmem:[%s18410_s13 + $0x305c] ss:$88 sps:$4 sm:$0xff]  }
 0x581   : > { %12765 = vmatprep.subr.bf16.mxu0 %v17511_v20  ;;  %v17571_v29 = vld [vmem:[%s18410_s13 + $0x2564] ss:$88 sps:$4 sm:$0xff]  }
 0x583   : > { %12602 = vmatpush1.bf16.msra.mxu1 %v17506_v21 }
 0x584   : > { %12766 = vmatpush1.bf16.msra.mxu0 %v17509_v28  ;;  %12603 = vmatprep.subr.bf16.mxu1 %v17514_v31 }
 0x585   : > { %12767 = vmatprep.subr.bf16.mxu0 %v17517_v35 }
 0x587   : > { %12604 = vmatpush1.bf16.msra.mxu1 %v17512_v36  ;;  %v17569_v36 = vld [vmem:[%s18410_s13 + $0x2560] ss:$88 sps:$4 sm:$0xff]  }
 0x588   : > { %12768 = vmatpush1.bf16.msra.mxu0 %v17515_v37  ;;  %12605 = vmatprep.subr.bf16.mxu1 %v17520_v38  ;;  %v17574_v38 = vld [vmem:[%s18410_s13 + $0x310c] ss:$88 sps:$4 sm:$0xff]  }
 0x589   : > { %12769 = vmatprep.subr.bf16.mxu0 %v17523_v41  ;;  %v17577_v41 = vld [vmem:[%s18410_s13 + $0x2614] ss:$88 sps:$4 sm:$0xff]  }
 0x58b   : > { %12606 = vmatpush1.bf16.msra.mxu1 %v17518_v42 }
 0x58c   : > { %12770 = vmatpush1.bf16.msra.mxu0 %v17521_v43  ;;  %12607 = vmatprep.subr.bf16.mxu1 %v17526_v45  ;;  %v17572_v43 = vld [vmem:[%s18410_s13 + $0x3108] ss:$88 sps:$4 sm:$0xff]  }
 0x58d   : > { %12771 = vmatprep.subr.bf16.mxu0 %v17529_v47  ;;  %v17575_v45 = vld [vmem:[%s18410_s13 + $0x2610] ss:$88 sps:$4 sm:$0xff]   ;;  %v17580_v47 = vld [vmem:[%s18410_s13 + $0x31bc] ss:$88 sps:$4 sm:$0xff]  }
 0x58f   : > { %12608 = vmatpush1.bf16.msra.mxu1 %v17524_v49  ;;  %v17583_v49 = vld [vmem:[%s18410_s13 + $0x26c4] ss:$88 sps:$4 sm:$0xff]  }
 0x590   : > { %12772 = vmatpush1.bf16.msra.mxu0 %v17527_v50  ;;  %12618 = vmatprep.subr.bf16.mxu1 %v17532_v52  ;;  %v17578_v50 = vld [vmem:[%s18410_s13 + $0x31b8] ss:$88 sps:$4 sm:$0xff]  }
 0x591   : > { %12782 = vmatprep.subr.bf16.mxu0 %v17535_v53  ;;  %v17581_v52 = vld [vmem:[%s18410_s13 + $0x26c0] ss:$88 sps:$4 sm:$0xff]   ;;  %v17586_v53 = vld [vmem:[%s18410_s13 + $0x326c] ss:$88 sps:$4 sm:$0xff]  }
 0x592   : > { %12610 = vmatmul.mubr.bf16.vlgmr.msra.gmra.mrb[16].mxu1 %v18593_v34 }
 0x593   : > { %12774 = vmatmul.mubr.bf16.vlgmr.msra.gmra.mrb[16].mxu0 %v18505_v19  ;;  %12619 = vmatpush1.bf16.msra.mxu1 %v17530_v54  ;;  %v17589_v54 = vld [vmem:[%s18410_s13 + $0x2774] ss:$88 sps:$4 sm:$0xff]  }
 0x594   : > { %12783 = vmatpush1.bf16.msra.mxu0 %v17533_v55  ;;  %12620 = vmatprep.subr.bf16.mxu1 %v17538_v13  ;;  %v17584_v55 = vld [vmem:[%s18410_s13 + $0x3268] ss:$88 sps:$4 sm:$0xff]  }
 0x595   : > { %12784 = vmatprep.subr.bf16.mxu0 %v17541_v16  ;;  %12650 = vmatprep.mubr.bf16.mxu1 %v18509_v22  ;;  %v17587_v13 = vld [vmem:[%s18410_s13 + $0x2770] ss:$88 sps:$4 sm:$0xff]   ;;  %v17592_v16 = vld [vmem:[%s18410_s13 + $0x331c] ss:$88 sps:$4 sm:$0xff]  }
 0x596   : > { %12814 = vmatprep.mubr.bf16.mxu0 %v18521_v27 }
 0x597   : > { %12621 = vmatpush1.bf16.msra.mxu1 %v17536_v30  ;;  %v17595_v30 = vld [vmem:[%s18410_s13 + $0x2824] ss:$88 sps:$4 sm:$0xff]  }
 0x598   : > { %12785 = vmatpush1.bf16.msra.mxu0 %v17539_v56  ;;  %12622 = vmatprep.subr.bf16.mxu1 %v17544_v57  ;;  %v17590_v56 = vld [vmem:[%s18410_s13 + $0x3318] ss:$88 sps:$4 sm:$0xff]  }
 0x599   : > { %12786 = vmatprep.subr.bf16.mxu0 %v17547_v58  ;;  %v17593_v57 = vld [vmem:[%s18410_s13 + $0x2820] ss:$88 sps:$4 sm:$0xff]   ;;  %v17598_v58 = vld [vmem:[%s18410_s13 + $0x33cc] ss:$88 sps:$4 sm:$0xff]  }
 0x59b   : > { %12623 = vmatpush1.bf16.msra.mxu1 %v17542_v59  ;;  %v17601_v59 = vld [vmem:[%s18410_s13 + $0x28d4] ss:$88 sps:$4 sm:$0xff]  }
 0x59c   : > { %12787 = vmatpush1.bf16.msra.mxu0 %v17545_v3  ;;  %12624 = vmatprep.subr.bf16.mxu1 %v17550_v5  ;;  %v17596_v3 = vld [vmem:[%s18410_s13 + $0x33c8] ss:$88 sps:$4 sm:$0xff]  }
 0x59d   : > { %12788 = vmatprep.subr.bf16.mxu0 %v17553_v8  ;;  %v17599_v5 = vld [vmem:[%s18410_s13 + $0x28d0] ss:$88 sps:$4 sm:$0xff]   ;;  %v17604_v8 = vld [vmem:[%s18410_s13 + $0x347c] ss:$88 sps:$4 sm:$0xff]  }
 0x59f   : > { %12625 = vmatpush1.bf16.msra.mxu1 %v17548_v11  ;;  %v17607_v11 = vld [vmem:[%s18410_s13 + $0x2984] ss:$88 sps:$4 sm:$0xff]  }
 0x5a0   : > { %12789 = vmatpush1.bf16.msra.mxu0 %v17551_v25  ;;  %12626 = vmatprep.subr.bf16.mxu1 %v17556_v10  ;;  %v17602_v25 = vld [vmem:[%s18410_s13 + $0x3478] ss:$88 sps:$4 sm:$0xff]  }
 0x5a1   : > { %12790 = vmatprep.subr.bf16.mxu0 %v17559_v61  ;;  %v17605_v10 = vld [vmem:[%s18410_s13 + $0x2980] ss:$88 sps:$4 sm:$0xff]   ;;  %v17610_v61 = vld [vmem:[%s18410_s13 + $0x352c] ss:$88 sps:$4 sm:$0xff]  }
 0x5a3   : > { %12627 = vmatpush1.bf16.msra.mxu1 %v17554_v63  ;;  %v17613_v63 = vld [vmem:[%s18410_s13 + $0x2a34] ss:$88 sps:$4 sm:$0xff]  }
 0x5a4   : > { %12791 = vmatpush1.bf16.msra.mxu0 %v17557_v0  ;;  %12628 = vmatprep.subr.bf16.mxu1 %v17562_v4  ;;  %v17608_v0 = vld [vmem:[%s18410_s13 + $0x3528] ss:$88 sps:$4 sm:$0xff]  }
 0x5a5   : > { %12792 = vmatprep.subr.bf16.mxu0 %v17565_v6  ;;  %v17611_v4 = vld [vmem:[%s18410_s13 + $0x2a30] ss:$88 sps:$4 sm:$0xff]   ;;  %v17616_v6 = vld [vmem:[%s18410_s13 + $0x35dc] ss:$88 sps:$4 sm:$0xff]  }
 0x5a6   : > { %v12447_v20 = vpop.f32.mrb[12].mxu0 }
 0x5a7   : > { %v20021_v21 = vadd.f32 %v12447_v20, %v2160_v7  ;;  %v12449_v28 = vpop.f32.mrb[13].mxu0  ;;  %12629 = vmatpush1.bf16.msra.mxu1 %v17560_v12  ;;  %v17619_v7 = vld [vmem:[%s18410_s13 + $0x2ae4] ss:$88 sps:$4 sm:$0xff]   ;;  %v17617_v12 = vld [vmem:[%s18410_s13 + $0x2ae0] ss:$88 sps:$4 sm:$0xff]  }
 0x5a8   : > { %v20023_v31 = vadd.f32 %v12449_v28, %v2164_v9  ;;  %v12451_v35 = vpop.f32.mrb[14].mxu0  ;;  %12793 = vmatpush1.bf16.msra.mxu0 %v17563_v14  ;;  %12630 = vmatprep.subr.bf16.mxu1 %v17568_v17  ;;  %v17614_v9 = vld [vmem:[%s18410_s13 + $0x35d8] ss:$88 sps:$4 sm:$0xff]   ;;  %v17622_v14 = vld [vmem:[%s18410_s13 + $0x368c] ss:$88 sps:$4 sm:$0xff]  }
 0x5a9   : > { %v12452_v37 = vpop.f32.mrb[15].mxu0  ;;  %12794 = vmatprep.subr.bf16.mxu0 %v17571_v29  ;;  %v17625_v17 = vld [vmem:[%s18410_s13 + $0x2b94] ss:$88 sps:$4 sm:$0xff]   ;;  %v17620_v29 = vld [vmem:[%s18410_s13 + $0x3688] ss:$88 sps:$4 sm:$0xff]  }
 0x5aa   : > { %v13347_v42 = vcombine.low %v20021_v21, %v20023_v31  ;;  %v17623_v20 = vld [vmem:[%s18410_s13 + $0x2b90] ss:$88 sps:$4 sm:$0xff]   ;;  %v17628_v28 = vld [vmem:[%s18410_s13 + $0x2c44] ss:$88 sps:$4 sm:$0xff]   ;;  %v17634_v37 = vld [vmem:[%s18410_s13 + $0x2cf4] ss:$88 sps:$4 sm:$0xff]  }
 0x5ab   : > { %12631 = vmatpush1.bf16.msra.mxu1 %v17566_v32  ;;  %v17631_v35 = vld [vmem:[%s18410_s13 + $0x4c] ss:$88 sps:$4 sm:$0xff]   ;;  %v17626_v32 = vld [vmem:[%s18410_s13 + $0x2c40] ss:$88 sps:$4 sm:$0xff]   ;;  %v17965_v31 = vld [vmem:[%s18410_s13 + $0x1bd0] ss:$88 sps:$4 sm:$0xff]  }
 0x5ac   : > { %12795 = vmatpush1.bf16.msra.mxu0 %v17569_v36  ;;  %12632 = vmatprep.subr.bf16.mxu1 %v17574_v38  ;;  %v17629_v36 = vld [vmem:[%s18410_s13 + $0x48] ss:$88 sps:$4 sm:$0xff]   ;;  %v17637_v38 = vld [vmem:[%s18410_s13 + $0xfc] ss:$88 sps:$4 sm:$0xff]  }
 0x5ad   : > { %12796 = vmatprep.subr.bf16.mxu0 %v17577_v41  ;;  %v17632_v41 = vld [vmem:[%s18410_s13 + $0x2cf0] ss:$88 sps:$4 sm:$0xff]  }
 0x5ae   : > { %v17962_v21 = vld [vmem:[%s18410_s13 + $0x26c8] ss:$88 sps:$4 sm:$0xff]  }
 0x5af   : > { %12633 = vmatpush1.bf16.msra.mxu1 %v17572_v43  ;;  %v17635_v43 = vld [vmem:[%s18410_s13 + $0xf8] ss:$88 sps:$4 sm:$0xff]  }
 0x5b0   : > { %12797 = vmatpush1.bf16.msra.mxu0 %v17575_v45  ;;  %12634 = vmatprep.subr.bf16.mxu1 %v17580_v47  ;;  %v17640_v45 = vld [vmem:[%s18410_s13 + $0x2da4] ss:$88 sps:$4 sm:$0xff]  }
 0x5b1   : > { %12798 = vmatprep.subr.bf16.mxu0 %v17583_v49  ;;  %v17643_v47 = vld [vmem:[%s18410_s13 + $0x1ac] ss:$88 sps:$4 sm:$0xff]   ;;  %v17638_v49 = vld [vmem:[%s18410_s13 + $0x2da0] ss:$88 sps:$4 sm:$0xff]  }
 0x5b3   : > { %12635 = vmatpush1.bf16.msra.mxu1 %v17578_v50  ;;  %v17641_v50 = vld [vmem:[%s18410_s13 + $0x1a8] ss:$88 sps:$4 sm:$0xff]  }
 0x5b4   : > { %12799 = vmatpush1.bf16.msra.mxu0 %v17581_v52  ;;  %12636 = vmatprep.subr.bf16.mxu1 %v17586_v53  ;;  %v17646_v52 = vld [vmem:[%s18410_s13 + $0x2e54] ss:$88 sps:$4 sm:$0xff]  }
 0x5b5   : > { %12800 = vmatprep.subr.bf16.mxu0 %v17589_v54  ;;  %v17649_v53 = vld [vmem:[%s18410_s13 + $0x25c] ss:$88 sps:$4 sm:$0xff]   ;;  %v17644_v54 = vld [vmem:[%s18410_s13 + $0x2e50] ss:$88 sps:$4 sm:$0xff]  }
 0x5b7   : > { %12637 = vmatpush1.bf16.msra.mxu1 %v17584_v55  ;;  %v17647_v55 = vld [vmem:[%s18410_s13 + $0x258] ss:$88 sps:$4 sm:$0xff]  }
 0x5b8   : > { %12801 = vmatpush1.bf16.msra.mxu0 %v17587_v13  ;;  %12638 = vmatprep.subr.bf16.mxu1 %v17592_v16  ;;  %v17652_v13 = vld [vmem:[%s18410_s13 + $0x2f04] ss:$88 sps:$4 sm:$0xff]  }
 0x5b9   : > { %12802 = vmatprep.subr.bf16.mxu0 %v17595_v30  ;;  %v17655_v16 = vld [vmem:[%s18410_s13 + $0x30c] ss:$88 sps:$4 sm:$0xff]   ;;  %v17650_v30 = vld [vmem:[%s18410_s13 + $0x2f00] ss:$88 sps:$4 sm:$0xff]  }
 0x5bb   : > { %12639 = vmatpush1.bf16.msra.mxu1 %v17590_v56  ;;  %v17653_v56 = vld [vmem:[%s18410_s13 + $0x308] ss:$88 sps:$4 sm:$0xff]  }
 0x5bc   : > { %12803 = vmatpush1.bf16.msra.mxu0 %v17593_v57  ;;  %12640 = vmatprep.subr.bf16.mxu1 %v17598_v58  ;;  %v17658_v57 = vld [vmem:[%s18410_s13 + $0x2fb4] ss:$88 sps:$4 sm:$0xff]  }
 0x5bd   : > { %12804 = vmatprep.subr.bf16.mxu0 %v17601_v59  ;;  %v17661_v58 = vld [vmem:[%s18410_s13 + $0x3bc] ss:$88 sps:$4 sm:$0xff]   ;;  %v17656_v59 = vld [vmem:[%s18410_s13 + $0x2fb0] ss:$88 sps:$4 sm:$0xff]  }
 0x5bf   : > { %12641 = vmatpush1.bf16.msra.mxu1 %v17596_v3  ;;  %v17659_v3 = vld [vmem:[%s18410_s13 + $0x3b8] ss:$88 sps:$4 sm:$0xff]  }
 0x5c0   : > { %12805 = vmatpush1.bf16.msra.mxu0 %v17599_v5  ;;  %12642 = vmatprep.subr.bf16.mxu1 %v17604_v8  ;;  %v17664_v5 = vld [vmem:[%s18410_s13 + $0x3064] ss:$88 sps:$4 sm:$0xff]  }
 0x5c1   : > { %12806 = vmatprep.subr.bf16.mxu0 %v17607_v11  ;;  %v17667_v8 = vld [vmem:[%s18410_s13 + $0x46c] ss:$88 sps:$4 sm:$0xff]   ;;  %v17662_v11 = vld [vmem:[%s18410_s13 + $0x3060] ss:$88 sps:$4 sm:$0xff]  }
 0x5c3   : > { %12643 = vmatpush1.bf16.msra.mxu1 %v17602_v25  ;;  %v17665_v25 = vld [vmem:[%s18410_s13 + $0x468] ss:$88 sps:$4 sm:$0xff]  }
 0x5c4   : > { %12807 = vmatpush1.bf16.msra.mxu0 %v17605_v10  ;;  %12644 = vmatprep.subr.bf16.mxu1 %v17610_v61  ;;  %v17670_v10 = vld [vmem:[%s18410_s13 + $0x3114] ss:$88 sps:$4 sm:$0xff]  }
 0x5c5   : > { %12808 = vmatprep.subr.bf16.mxu0 %v17613_v63  ;;  %v17673_v61 = vld [vmem:[%s18410_s13 + $0x51c] ss:$88 sps:$4 sm:$0xff]   ;;  %v17668_v63 = vld [vmem:[%s18410_s13 + $0x3110] ss:$88 sps:$4 sm:$0xff]  }
 0x5c7   : > { %12645 = vmatpush1.bf16.msra.mxu1 %v17608_v0  ;;  %v17671_v0 = vld [vmem:[%s18410_s13 + $0x518] ss:$88 sps:$4 sm:$0xff]  }
 0x5c8   : > { %12809 = vmatpush1.bf16.msra.mxu0 %v17611_v4  ;;  %12646 = vmatprep.subr.bf16.mxu1 %v17616_v6  ;;  %v17676_v4 = vld [vmem:[%s18410_s13 + $0x31c4] ss:$88 sps:$4 sm:$0xff]  }
 0x5c9   : > { %12810 = vmatprep.subr.bf16.mxu0 %v17619_v7  ;;  %v17679_v6 = vld [vmem:[%s18410_s13 + $0x5cc] ss:$88 sps:$4 sm:$0xff]   ;;  %v17674_v7 = vld [vmem:[%s18410_s13 + $0x31c0] ss:$88 sps:$4 sm:$0xff]  }
 0x5cb   : > { %12647 = vmatpush1.bf16.msra.mxu1 %v17614_v9  ;;  %v17677_v9 = vld [vmem:[%s18410_s13 + $0x5c8] ss:$88 sps:$4 sm:$0xff]  }
 0x5cc   : > { %12811 = vmatpush1.bf16.msra.mxu0 %v17617_v12  ;;  %12648 = vmatprep.subr.bf16.mxu1 %v17622_v14  ;;  %v17682_v12 = vld [vmem:[%s18410_s13 + $0x3274] ss:$88 sps:$4 sm:$0xff]  }
 0x5cd   : > { %12812 = vmatprep.subr.bf16.mxu0 %v17625_v17  ;;  %v17685_v14 = vld [vmem:[%s18410_s13 + $0x67c] ss:$88 sps:$4 sm:$0xff]   ;;  %v17680_v17 = vld [vmem:[%s18410_s13 + $0x3270] ss:$88 sps:$4 sm:$0xff]  }
 0x5cf   : > { %12649 = vmatpush1.bf16.msra.mxu1 %v17620_v29  ;;  %v17683_v29 = vld [vmem:[%s18410_s13 + $0x678] ss:$88 sps:$4 sm:$0xff]  }
 0x5d0   : > { %12813 = vmatpush1.bf16.msra.mxu0 %v17623_v20  ;;  %12864 = vmatprep.subr.bf16.mxu1 %v17631_v35  ;;  %v17688_v20 = vld [vmem:[%s18410_s13 + $0x3324] ss:$88 sps:$4 sm:$0xff]   ;;  %v17686_v35 = vld [vmem:[%s18410_s13 + $0x3320] ss:$88 sps:$4 sm:$0xff]  }
 0x5d1   : > { %12823 = vmatprep.subr.bf16.mxu0 %v17628_v28  ;;  %v17691_v28 = vld [vmem:[%s18410_s13 + $0x72c] ss:$88 sps:$4 sm:$0xff]  }
 0x5d2   : > { %12651 = vmatmul.mubr.bf16.vlgmr.msra.gmra.mrb[16].mxu1 %v18511_v23 }
 0x5d3   : > { %12815 = vmatmul.mubr.bf16.vlgmr.msra.gmra.mrb[16].mxu0 %v18593_v34  ;;  %12865 = vmatpush1.bf16.msra.mxu1 %v17629_v36  ;;  %v17694_v36 = vld [vmem:[%s18410_s13 + $0x33d4] ss:$88 sps:$4 sm:$0xff]  }
 0x5d4   : > { %12824 = vmatpush1.bf16.msra.mxu0 %v17626_v32  ;;  %12866 = vmatprep.subr.bf16.mxu1 %v17637_v38  ;;  %v17689_v32 = vld [vmem:[%s18410_s13 + $0x728] ss:$88 sps:$4 sm:$0xff]  }
 0x5d5   : > { %12825 = vmatprep.subr.bf16.mxu0 %v17634_v37  ;;  %12855 = vmatprep.mubr.bf16.mxu0 %v18509_v22  ;;  %v17697_v37 = vld [vmem:[%s18410_s13 + $0x7dc] ss:$88 sps:$4 sm:$0xff]   ;;  %v17692_v38 = vld [vmem:[%s18410_s13 + $0x33d0] ss:$88 sps:$4 sm:$0xff]  }
 0x5d6   : > { %12896 = vmatprep.mubr.bf16.mxu1 %v18481_v60 }
 0x5d7   : > { %12867 = vmatpush1.bf16.msra.mxu1 %v17635_v43  ;;  %v17700_v43 = vld [vmem:[%s18410_s13 + $0x3484] ss:$88 sps:$4 sm:$0xff]  }
 0x5d8   : > { %12826 = vmatpush1.bf16.msra.mxu0 %v17632_v41  ;;  %12868 = vmatprep.subr.bf16.mxu1 %v17643_v47  ;;  %v17695_v41 = vld [vmem:[%s18410_s13 + $0x7d8] ss:$88 sps:$4 sm:$0xff]  }
 0x5d9   : > { %12827 = vmatprep.subr.bf16.mxu0 %v17640_v45  ;;  %v17703_v45 = vld [vmem:[%s18410_s13 + $0x88c] ss:$88 sps:$4 sm:$0xff]   ;;  %v17698_v47 = vld [vmem:[%s18410_s13 + $0x3480] ss:$88 sps:$4 sm:$0xff]  }
 0x5db   : > { %12869 = vmatpush1.bf16.msra.mxu1 %v17641_v50  ;;  %v17706_v50 = vld [vmem:[%s18410_s13 + $0x3534] ss:$88 sps:$4 sm:$0xff]  }
 0x5dc   : > { %12828 = vmatpush1.bf16.msra.mxu0 %v17638_v49  ;;  %12870 = vmatprep.subr.bf16.mxu1 %v17649_v53  ;;  %v17701_v49 = vld [vmem:[%s18410_s13 + $0x888] ss:$88 sps:$4 sm:$0xff]  }
 0x5dd   : > { %12829 = vmatprep.subr.bf16.mxu0 %v17646_v52  ;;  %v17709_v52 = vld [vmem:[%s18410_s13 + $0x93c] ss:$88 sps:$4 sm:$0xff]   ;;  %v17704_v53 = vld [vmem:[%s18410_s13 + $0x3530] ss:$88 sps:$4 sm:$0xff]  }
 0x5df   : > { %12871 = vmatpush1.bf16.msra.mxu1 %v17647_v55  ;;  %v17712_v55 = vld [vmem:[%s18410_s13 + $0x35e4] ss:$88 sps:$4 sm:$0xff]  }
 0x5e0   : > { %12830 = vmatpush1.bf16.msra.mxu0 %v17644_v54  ;;  %12872 = vmatprep.subr.bf16.mxu1 %v17655_v16  ;;  %v17707_v54 = vld [vmem:[%s18410_s13 + $0x938] ss:$88 sps:$4 sm:$0xff]  }
 0x5e1   : > { %12831 = vmatprep.subr.bf16.mxu0 %v17652_v13  ;;  %v17715_v13 = vld [vmem:[%s18410_s13 + $0x9ec] ss:$88 sps:$4 sm:$0xff]   ;;  %v17710_v16 = vld [vmem:[%s18410_s13 + $0x35e0] ss:$88 sps:$4 sm:$0xff]  }
 0x5e3   : > { %12873 = vmatpush1.bf16.msra.mxu1 %v17653_v56  ;;  %v17718_v56 = vld [vmem:[%s18410_s13 + $0x3694] ss:$88 sps:$4 sm:$0xff]  }
 0x5e4   : > { %12832 = vmatpush1.bf16.msra.mxu0 %v17650_v30  ;;  %12874 = vmatprep.subr.bf16.mxu1 %v17661_v58  ;;  %v17713_v30 = vld [vmem:[%s18410_s13 + $0x9e8] ss:$88 sps:$4 sm:$0xff]  }
 0x5e5   : > { %12833 = vmatprep.subr.bf16.mxu0 %v17658_v57  ;;  %v17721_v57 = vld [vmem:[%s18410_s13 + $0xa9c] ss:$88 sps:$4 sm:$0xff]   ;;  %v17716_v58 = vld [vmem:[%s18410_s13 + $0x3690] ss:$88 sps:$4 sm:$0xff]  }
 0x5e7   : > { %12875 = vmatpush1.bf16.msra.mxu1 %v17659_v3  ;;  %v17724_v3 = vld [vmem:[%s18410_s13 + $0xb4c] ss:$88 sps:$4 sm:$0xff]  }
 0x5e8   : > { %12834 = vmatpush1.bf16.msra.mxu0 %v17656_v59  ;;  %12876 = vmatprep.subr.bf16.mxu1 %v17667_v8  ;;  %v17719_v59 = vld [vmem:[%s18410_s13 + $0xa98] ss:$88 sps:$4 sm:$0xff]   ;;  %v17722_v8 = vld [vmem:[%s18410_s13 + $0xb48] ss:$88 sps:$4 sm:$0xff]  }
 0x5e9   : > { %12835 = vmatprep.subr.bf16.mxu0 %v17664_v5  ;;  %v17727_v5 = vld [vmem:[%s18410_s13 + $0x54] ss:$88 sps:$4 sm:$0xff]  }
 0x5eb   : > { %12877 = vmatpush1.bf16.msra.mxu1 %v17665_v25  ;;  %v17730_v25 = vld [vmem:[%s18410_s13 + $0xbfc] ss:$88 sps:$4 sm:$0xff]  }
 0x5ec   : > { %12836 = vmatpush1.bf16.msra.mxu0 %v17662_v11  ;;  %12878 = vmatprep.subr.bf16.mxu1 %v17673_v61  ;;  %v17725_v11 = vld [vmem:[%s18410_s13 + $0x50] ss:$88 sps:$4 sm:$0xff]  }
 0x5ed   : > { %12837 = vmatprep.subr.bf16.mxu0 %v17670_v10  ;;  %v17733_v10 = vld [vmem:[%s18410_s13 + $0x104] ss:$88 sps:$4 sm:$0xff]   ;;  %v17728_v61 = vld [vmem:[%s18410_s13 + $0xbf8] ss:$88 sps:$4 sm:$0xff]  }
 0x5ef   : > { %12879 = vmatpush1.bf16.msra.mxu1 %v17671_v0  ;;  %v17736_v0 = vld [vmem:[%s18410_s13 + $0xcac] ss:$88 sps:$4 sm:$0xff]  }
 0x5f0   : > { %12838 = vmatpush1.bf16.msra.mxu0 %v17668_v63  ;;  %12880 = vmatprep.subr.bf16.mxu1 %v17679_v6  ;;  %v17731_v63 = vld [vmem:[%s18410_s13 + $0x100] ss:$88 sps:$4 sm:$0xff]  }
 0x5f1   : > { %12839 = vmatprep.subr.bf16.mxu0 %v17676_v4  ;;  %v17739_v4 = vld [vmem:[%s18410_s13 + $0x1b4] ss:$88 sps:$4 sm:$0xff]   ;;  %v17734_v6 = vld [vmem:[%s18410_s13 + $0xca8] ss:$88 sps:$4 sm:$0xff]  }
 0x5f3   : > { %12881 = vmatpush1.bf16.msra.mxu1 %v17677_v9  ;;  %v17742_v9 = vld [vmem:[%s18410_s13 + $0xd5c] ss:$88 sps:$4 sm:$0xff]  }
 0x5f4   : > { %12840 = vmatpush1.bf16.msra.mxu0 %v17674_v7  ;;  %12882 = vmatprep.subr.bf16.mxu1 %v17685_v14  ;;  %v17737_v7 = vld [vmem:[%s18410_s13 + $0x1b0] ss:$88 sps:$4 sm:$0xff]  }
 0x5f5   : > { %12841 = vmatprep.subr.bf16.mxu0 %v17682_v12  ;;  %v17745_v12 = vld [vmem:[%s18410_s13 + $0x264] ss:$88 sps:$4 sm:$0xff]   ;;  %v17740_v14 = vld [vmem:[%s18410_s13 + $0xd58] ss:$88 sps:$4 sm:$0xff]  }
 0x5f7   : > { %12883 = vmatpush1.bf16.msra.mxu1 %v17683_v29  ;;  %v17751_v29 = vld [vmem:[%s18410_s13 + $0x314] ss:$88 sps:$4 sm:$0xff]  }
 0x5f8   : > { %12842 = vmatpush1.bf16.msra.mxu0 %v17680_v17  ;;  %12884 = vmatprep.subr.bf16.mxu1 %v17691_v28  ;;  %v17743_v17 = vld [vmem:[%s18410_s13 + $0x260] ss:$88 sps:$4 sm:$0xff]   ;;  %v17749_v28 = vld [vmem:[%s18410_s13 + $0x310] ss:$88 sps:$4 sm:$0xff]  }
 0x5f9   : > { %12843 = vmatprep.subr.bf16.mxu0 %v17688_v20  ;;  %v17746_v20 = vld [vmem:[%s18410_s13 + $0xe08] ss:$88 sps:$4 sm:$0xff]  }
 0x5fb   : > { %12885 = vmatpush1.bf16.msra.mxu1 %v17689_v32  ;;  %v17757_v32 = vld [vmem:[%s18410_s13 + $0x3c4] ss:$88 sps:$4 sm:$0xff]  }
 0x5fc   : > { %12844 = vmatpush1.bf16.msra.mxu0 %v17686_v35  ;;  %12886 = vmatprep.subr.bf16.mxu1 %v17697_v37  ;;  %v17754_v35 = vld [vmem:[%s18410_s13 + $0xebc] ss:$88 sps:$4 sm:$0xff]   ;;  %v17755_v37 = vld [vmem:[%s18410_s13 + $0x3c0] ss:$88 sps:$4 sm:$0xff]  }
 0x5fd   : > { %12845 = vmatprep.subr.bf16.mxu0 %v17694_v36  ;;  %v17752_v36 = vld [vmem:[%s18410_s13 + $0xeb8] ss:$88 sps:$4 sm:$0xff]  }
 0x5ff   : > { %12887 = vmatpush1.bf16.msra.mxu1 %v17695_v41  ;;  %v17763_v41 = vld [vmem:[%s18410_s13 + $0x474] ss:$88 sps:$4 sm:$0xff]  }
 0x600   : > { %12846 = vmatpush1.bf16.msra.mxu0 %v17692_v38  ;;  %12888 = vmatprep.subr.bf16.mxu1 %v17703_v45  ;;  %v17760_v38 = vld [vmem:[%s18410_s13 + $0xf6c] ss:$88 sps:$4 sm:$0xff]   ;;  %v17761_v45 = vld [vmem:[%s18410_s13 + $0x470] ss:$88 sps:$4 sm:$0xff]  }
 0x601   : > { %12847 = vmatprep.subr.bf16.mxu0 %v17700_v43  ;;  %v17758_v43 = vld [vmem:[%s18410_s13 + $0xf68] ss:$88 sps:$4 sm:$0xff]  }
 0x603   : > { %12889 = vmatpush1.bf16.msra.mxu1 %v17701_v49  ;;  %v17769_v49 = vld [vmem:[%s18410_s13 + $0x524] ss:$88 sps:$4 sm:$0xff]  }
 0x604   : > { %12848 = vmatpush1.bf16.msra.mxu0 %v17698_v47  ;;  %12890 = vmatprep.subr.bf16.mxu1 %v17709_v52  ;;  %v17766_v47 = vld [vmem:[%s18410_s13 + $0x101c] ss:$88 sps:$4 sm:$0xff]   ;;  %v17767_v52 = vld [vmem:[%s18410_s13 + $0x520] ss:$88 sps:$4 sm:$0xff]  }
 0x605   : > { %12849 = vmatprep.subr.bf16.mxu0 %v17706_v50  ;;  %v17764_v50 = vld [vmem:[%s18410_s13 + $0x1018] ss:$88 sps:$4 sm:$0xff]  }
 0x607   : > { %12891 = vmatpush1.bf16.msra.mxu1 %v17707_v54  ;;  %v17775_v54 = vld [vmem:[%s18410_s13 + $0x5d4] ss:$88 sps:$4 sm:$0xff]  }
 0x608   : > { %12850 = vmatpush1.bf16.msra.mxu0 %v17704_v53  ;;  %12892 = vmatprep.subr.bf16.mxu1 %v17715_v13  ;;  %v17772_v53 = vld [vmem:[%s18410_s13 + $0x10cc] ss:$88 sps:$4 sm:$0xff]   ;;  %v17773_v13 = vld [vmem:[%s18410_s13 + $0x5d0] ss:$88 sps:$4 sm:$0xff]  }
 0x609   : > { %12851 = vmatprep.subr.bf16.mxu0 %v17712_v55  ;;  %v17770_v55 = vld [vmem:[%s18410_s13 + $0x10c8] ss:$88 sps:$4 sm:$0xff]  }
 0x60b   : > { %12893 = vmatpush1.bf16.msra.mxu1 %v17713_v30  ;;  %v17781_v30 = vld [vmem:[%s18410_s13 + $0x684] ss:$88 sps:$4 sm:$0xff]  }
 0x60c   : > { %12852 = vmatpush1.bf16.msra.mxu0 %v17710_v16  ;;  %12894 = vmatprep.subr.bf16.mxu1 %v17721_v57  ;;  %v17778_v16 = vld [vmem:[%s18410_s13 + $0x117c] ss:$88 sps:$4 sm:$0xff]   ;;  %v17779_v57 = vld [vmem:[%s18410_s13 + $0x680] ss:$88 sps:$4 sm:$0xff]  }
 0x60d   : > { %12853 = vmatprep.subr.bf16.mxu0 %v17718_v56  ;;  %v17776_v56 = vld [vmem:[%s18410_s13 + $0x1178] ss:$88 sps:$4 sm:$0xff]  }
 0x60f   : > { %12895 = vmatpush1.bf16.msra.mxu1 %v17719_v59  ;;  %v17787_v59 = vld [vmem:[%s18410_s13 + $0x734] ss:$88 sps:$4 sm:$0xff]  }
 0x610   : > { %12854 = vmatpush1.bf16.msra.mxu0 %v17716_v58  ;;  %12905 = vmatprep.subr.bf16.mxu1 %v17724_v3  ;;  %v17784_v58 = vld [vmem:[%s18410_s13 + $0x122c] ss:$88 sps:$4 sm:$0xff]   ;;  %v17782_v3 = vld [vmem:[%s18410_s13 + $0x1228] ss:$88 sps:$4 sm:$0xff]  }
 0x611   : > { %13069 = vmatprep.subr.bf16.mxu0 %v17727_v5  ;;  %v17785_v5 = vld [vmem:[%s18410_s13 + $0x730] ss:$88 sps:$4 sm:$0xff]  }
 0x612   : > { %12897 = vmatmul.mubr.bf16.vlgmr.msra.gmra.mrb[20].mxu1 %v18503_v18 }
 0x613   : > { %12856 = vmatmul.mubr.bf16.vlgmr.msra.gmra.mrb[16].mxu0 %v18511_v23  ;;  %12906 = vmatpush1.bf16.msra.mxu1 %v17722_v8  ;;  %v17790_v8 = vld [vmem:[%s18410_s13 + $0x12dc] ss:$88 sps:$4 sm:$0xff]  }
 0x614   : > { %13070 = vmatpush1.bf16.msra.mxu0 %v17725_v11  ;;  %12907 = vmatprep.subr.bf16.mxu1 %v17730_v25  ;;  %v17793_v11 = vld [vmem:[%s18410_s13 + $0x7e4] ss:$88 sps:$4 sm:$0xff]   ;;  %v17788_v25 = vld [vmem:[%s18410_s13 + $0x12d8] ss:$88 sps:$4 sm:$0xff]  }
 0x615   : > { %13071 = vmatprep.subr.bf16.mxu0 %v17733_v10  ;;  %12937 = vmatprep.mubr.bf16.mxu1 %v18517_v26  ;;  %v17791_v10 = vld [vmem:[%s18410_s13 + $0x7e0] ss:$88 sps:$4 sm:$0xff]  }
 0x616   : > { %13101 = vmatprep.mubr.bf16.mxu0 %v18481_v60  ;;  %v17748_v60 = vld [vmem:[%s18410_s13 + $0xe0c] ss:$88 sps:$4 sm:$0xff]  }
 0x617   : > { %12908 = vmatpush1.bf16.msra.mxu1 %v17728_v61  ;;  %v17796_v61 = vld [vmem:[%s18410_s13 + $0x138c] ss:$88 sps:$4 sm:$0xff]  }
 0x618   : > { %13072 = vmatpush1.bf16.msra.mxu0 %v17731_v63  ;;  %12909 = vmatprep.subr.bf16.mxu1 %v17736_v0  ;;  %v17799_v63 = vld [vmem:[%s18410_s13 + $0x894] ss:$88 sps:$4 sm:$0xff]   ;;  %v17794_v0 = vld [vmem:[%s18410_s13 + $0x1388] ss:$88 sps:$4 sm:$0xff]  }
 0x619   : > { %13073 = vmatprep.subr.bf16.mxu0 %v17739_v4  ;;  %v17797_v4 = vld [vmem:[%s18410_s13 + $0x890] ss:$88 sps:$4 sm:$0xff]  }
 0x61b   : > { %12910 = vmatpush1.bf16.msra.mxu1 %v17734_v6  ;;  %v17802_v6 = vld [vmem:[%s18410_s13 + $0x143c] ss:$88 sps:$4 sm:$0xff]  }
 0x61c   : > { %13074 = vmatpush1.bf16.msra.mxu0 %v17737_v7  ;;  %12911 = vmatprep.subr.bf16.mxu1 %v17742_v9  ;;  %v17805_v7 = vld [vmem:[%s18410_s13 + $0x944] ss:$88 sps:$4 sm:$0xff]   ;;  %v17800_v9 = vld [vmem:[%s18410_s13 + $0x1438] ss:$88 sps:$4 sm:$0xff]  }
 0x61d   : > { %13075 = vmatprep.subr.bf16.mxu0 %v17745_v12  ;;  %v17803_v12 = vld [vmem:[%s18410_s13 + $0x940] ss:$88 sps:$4 sm:$0xff]  }
 0x61f   : > { %12912 = vmatpush1.bf16.msra.mxu1 %v17740_v14  ;;  %v17808_v14 = vld [vmem:[%s18410_s13 + $0x14ec] ss:$88 sps:$4 sm:$0xff]  }
 0x620   : > { %13076 = vmatpush1.bf16.msra.mxu0 %v17743_v17  ;;  %12913 = vmatprep.subr.bf16.mxu1 %v17748_v60  ;;  %v17811_v17 = vld [vmem:[%s18410_s13 + $0x9f4] ss:$88 sps:$4 sm:$0xff]   ;;  %v17806_v60 = vld [vmem:[%s18410_s13 + $0x14e8] ss:$88 sps:$4 sm:$0xff]  }
 0x621   : > { %13077 = vmatprep.subr.bf16.mxu0 %v17751_v29  ;;  %v17809_v29 = vld [vmem:[%s18410_s13 + $0x9f0] ss:$88 sps:$4 sm:$0xff]  }
 0x623   : > { %12914 = vmatpush1.bf16.msra.mxu1 %v17746_v20  ;;  %v17814_v20 = vld [vmem:[%s18410_s13 + $0x159c] ss:$88 sps:$4 sm:$0xff]  }
 0x624   : > { %13078 = vmatpush1.bf16.msra.mxu0 %v17749_v28  ;;  %12915 = vmatprep.subr.bf16.mxu1 %v17754_v35  ;;  %v17817_v28 = vld [vmem:[%s18410_s13 + $0xaa4] ss:$88 sps:$4 sm:$0xff]   ;;  %v17812_v35 = vld [vmem:[%s18410_s13 + $0x1598] ss:$88 sps:$4 sm:$0xff]  }
 0x625   : > { %13079 = vmatprep.subr.bf16.mxu0 %v17757_v32  ;;  %v17815_v32 = vld [vmem:[%s18410_s13 + $0xaa0] ss:$88 sps:$4 sm:$0xff]  }
 0x627   : > { %12916 = vmatpush1.bf16.msra.mxu1 %v17752_v36  ;;  %v17820_v36 = vld [vmem:[%s18410_s13 + $0x164c] ss:$88 sps:$4 sm:$0xff]  }
 0x628   : > { %13080 = vmatpush1.bf16.msra.mxu0 %v17755_v37  ;;  %12917 = vmatprep.subr.bf16.mxu1 %v17760_v38  ;;  %v17823_v37 = vld [vmem:[%s18410_s13 + $0xb54] ss:$88 sps:$4 sm:$0xff]   ;;  %v17818_v38 = vld [vmem:[%s18410_s13 + $0x1648] ss:$88 sps:$4 sm:$0xff]  }
 0x629   : > { %13081 = vmatprep.subr.bf16.mxu0 %v17763_v41  ;;  %v17821_v41 = vld [vmem:[%s18410_s13 + $0xb50] ss:$88 sps:$4 sm:$0xff]  }
 0x62b   : > { %12918 = vmatpush1.bf16.msra.mxu1 %v17758_v43  ;;  %v17826_v43 = vld [vmem:[%s18410_s13 + $0x16fc] ss:$88 sps:$4 sm:$0xff]  }
 0x62c   : > { %13082 = vmatpush1.bf16.msra.mxu0 %v17761_v45  ;;  %12919 = vmatprep.subr.bf16.mxu1 %v17766_v47  ;;  %v17829_v45 = vld [vmem:[%s18410_s13 + $0xc04] ss:$88 sps:$4 sm:$0xff]   ;;  %v17824_v47 = vld [vmem:[%s18410_s13 + $0x16f8] ss:$88 sps:$4 sm:$0xff]  }
 0x62d   : > { %13083 = vmatprep.subr.bf16.mxu0 %v17769_v49  ;;  %v17827_v49 = vld [vmem:[%s18410_s13 + $0xc00] ss:$88 sps:$4 sm:$0xff]  }
 0x62f   : > { %12920 = vmatpush1.bf16.msra.mxu1 %v17764_v50  ;;  %v17832_v50 = vld [vmem:[%s18410_s13 + $0x17ac] ss:$88 sps:$4 sm:$0xff]  }
 0x630   : > { %13084 = vmatpush1.bf16.msra.mxu0 %v17767_v52  ;;  %12921 = vmatprep.subr.bf16.mxu1 %v17772_v53  ;;  %v17835_v52 = vld [vmem:[%s18410_s13 + $0xcb4] ss:$88 sps:$4 sm:$0xff]   ;;  %v17833_v53 = vld [vmem:[%s18410_s13 + $0xcb0] ss:$88 sps:$4 sm:$0xff]  }
 0x631   : > { %13085 = vmatprep.subr.bf16.mxu0 %v17775_v54  ;;  %v17838_v54 = vld [vmem:[%s18410_s13 + $0x185c] ss:$88 sps:$4 sm:$0xff]  }
 0x633   : > { %12922 = vmatpush1.bf16.msra.mxu1 %v17770_v55  ;;  %v17841_v55 = vld [vmem:[%s18410_s13 + $0xd64] ss:$88 sps:$4 sm:$0xff]  }
 0x634   : > { %13086 = vmatpush1.bf16.msra.mxu0 %v17773_v13  ;;  %12923 = vmatprep.subr.bf16.mxu1 %v17778_v16  ;;  %v17836_v13 = vld [vmem:[%s18410_s13 + $0x1858] ss:$88 sps:$4 sm:$0xff]  }
 0x635   : > { %13087 = vmatprep.subr.bf16.mxu0 %v17781_v30  ;;  %v17839_v16 = vld [vmem:[%s18410_s13 + $0xd60] ss:$88 sps:$4 sm:$0xff]   ;;  %v17847_v30 = vld [vmem:[%s18410_s13 + $0xe14] ss:$88 sps:$4 sm:$0xff]  }
 0x637   : > { %12924 = vmatpush1.bf16.msra.mxu1 %v17776_v56  ;;  %v17842_v56 = vld [vmem:[%s18410_s13 + $0x1908] ss:$88 sps:$4 sm:$0xff]  }
 0x638   : > { %13088 = vmatpush1.bf16.msra.mxu0 %v17779_v57  ;;  %12925 = vmatprep.subr.bf16.mxu1 %v17784_v58  ;;  %v17845_v57 = vld [vmem:[%s18410_s13 + $0xe10] ss:$88 sps:$4 sm:$0xff]   ;;  %v17850_v58 = vld [vmem:[%s18410_s13 + $0x19bc] ss:$88 sps:$4 sm:$0xff]  }
 0x639   : > { %13089 = vmatprep.subr.bf16.mxu0 %v17787_v59  ;;  %v17853_v59 = vld [vmem:[%s18410_s13 + $0xec4] ss:$88 sps:$4 sm:$0xff]  }
 0x63b   : > { %12926 = vmatpush1.bf16.msra.mxu1 %v17782_v3  ;;  %v17848_v3 = vld [vmem:[%s18410_s13 + $0x19b8] ss:$88 sps:$4 sm:$0xff]  }
 0x63c   : > { %13090 = vmatpush1.bf16.msra.mxu0 %v17785_v5  ;;  %12927 = vmatprep.subr.bf16.mxu1 %v17790_v8  ;;  %v17851_v5 = vld [vmem:[%s18410_s13 + $0xec0] ss:$88 sps:$4 sm:$0xff]   ;;  %v17856_v8 = vld [vmem:[%s18410_s13 + $0x1a6c] ss:$88 sps:$4 sm:$0xff]  }
 0x63d   : > { %13091 = vmatprep.subr.bf16.mxu0 %v17793_v11  ;;  %v17859_v11 = vld [vmem:[%s18410_s13 + $0xf74] ss:$88 sps:$4 sm:$0xff]  }
 0x63f   : > { %12928 = vmatpush1.bf16.msra.mxu1 %v17788_v25  ;;  %v17854_v25 = vld [vmem:[%s18410_s13 + $0x1a68] ss:$88 sps:$4 sm:$0xff]  }
 0x640   : > { %13092 = vmatpush1.bf16.msra.mxu0 %v17791_v10  ;;  %12929 = vmatprep.subr.bf16.mxu1 %v17796_v61  ;;  %v17857_v10 = vld [vmem:[%s18410_s13 + $0xf70] ss:$88 sps:$4 sm:$0xff]   ;;  %v17862_v61 = vld [vmem:[%s18410_s13 + $0x1b1c] ss:$88 sps:$4 sm:$0xff]  }
 0x641   : > { %13093 = vmatprep.subr.bf16.mxu0 %v17799_v63  ;;  %v17865_v63 = vld [vmem:[%s18410_s13 + $0x1024] ss:$88 sps:$4 sm:$0xff]  }
 0x643   : > { %12930 = vmatpush1.bf16.msra.mxu1 %v17794_v0  ;;  %v17860_v0 = vld [vmem:[%s18410_s13 + $0x1b18] ss:$88 sps:$4 sm:$0xff]  }
 0x644   : > { %13094 = vmatpush1.bf16.msra.mxu0 %v17797_v4  ;;  %12931 = vmatprep.subr.bf16.mxu1 %v17802_v6  ;;  %v17863_v4 = vld [vmem:[%s18410_s13 + $0x1020] ss:$88 sps:$4 sm:$0xff]   ;;  %v17868_v6 = vld [vmem:[%s18410_s13 + $0x1bcc] ss:$88 sps:$4 sm:$0xff]  }
 0x645   : > { %13095 = vmatprep.subr.bf16.mxu0 %v17805_v7  ;;  %v17871_v7 = vld [vmem:[%s18410_s13 + $0x10d4] ss:$88 sps:$4 sm:$0xff]  }
 0x647   : > { %12932 = vmatpush1.bf16.msra.mxu1 %v17800_v9  ;;  %v17866_v9 = vld [vmem:[%s18410_s13 + $0x1bc8] ss:$88 sps:$4 sm:$0xff]  }
 0x648   : > { %13096 = vmatpush1.bf16.msra.mxu0 %v17803_v12  ;;  %12933 = vmatprep.subr.bf16.mxu1 %v17808_v14  ;;  %v17869_v12 = vld [vmem:[%s18410_s13 + $0x10d0] ss:$88 sps:$4 sm:$0xff]   ;;  %v17874_v14 = vld [vmem:[%s18410_s13 + $0x1c7c] ss:$88 sps:$4 sm:$0xff]  }
 0x649   : > { %13097 = vmatprep.subr.bf16.mxu0 %v17811_v17  ;;  %v17877_v17 = vld [vmem:[%s18410_s13 + $0x1184] ss:$88 sps:$4 sm:$0xff]  }
 0x64b   : > { %12934 = vmatpush1.bf16.msra.mxu1 %v17806_v60  ;;  %v17872_v60 = vld [vmem:[%s18410_s13 + $0x1c78] ss:$88 sps:$4 sm:$0xff]  }
 0x64c   : > { %13098 = vmatpush1.bf16.msra.mxu0 %v17809_v29  ;;  %12935 = vmatprep.subr.bf16.mxu1 %v17814_v20  ;;  %v17875_v29 = vld [vmem:[%s18410_s13 + $0x1180] ss:$88 sps:$4 sm:$0xff]   ;;  %v17880_v20 = vld [vmem:[%s18410_s13 + $0x1d2c] ss:$88 sps:$4 sm:$0xff]  }
 0x64d   : > { %13099 = vmatprep.subr.bf16.mxu0 %v17817_v28  ;;  %v17883_v28 = vld [vmem:[%s18410_s13 + $0x1234] ss:$88 sps:$4 sm:$0xff]  }
 0x64f   : > { %12936 = vmatpush1.bf16.msra.mxu1 %v17812_v35  ;;  %v17878_v35 = vld [vmem:[%s18410_s13 + $0x1d28] ss:$88 sps:$4 sm:$0xff]  }
 0x650   : > { %13100 = vmatpush1.bf16.msra.mxu0 %v17815_v32  ;;  %12946 = vmatprep.subr.bf16.mxu1 %v17820_v36  ;;  %v17881_v32 = vld [vmem:[%s18410_s13 + $0x1230] ss:$88 sps:$4 sm:$0xff]   ;;  %v17886_v36 = vld [vmem:[%s18410_s13 + $0x1ddc] ss:$88 sps:$4 sm:$0xff]  }
 0x651   : > { %13110 = vmatprep.subr.bf16.mxu0 %v17823_v37  ;;  %v17889_v37 = vld [vmem:[%s18410_s13 + $0x12e4] ss:$88 sps:$4 sm:$0xff]  }
 0x652   : > { %12938 = vmatmul.mubr.bf16.vlgmr.msra.gmra.mrb[20].mxu1 %v18589_v33 }
 0x653   : > { %13102 = vmatmul.mubr.bf16.vlgmr.msra.gmra.mrb[20].mxu0 %v18503_v18  ;;  %12947 = vmatpush1.bf16.msra.mxu1 %v17818_v38  ;;  %v17830_v18 = vld [vmem:[%s18410_s13 + $0x17a8] ss:$88 sps:$4 sm:$0xff]   ;;  %v17884_v38 = vld [vmem:[%s18410_s13 + $0x1dd8] ss:$88 sps:$4 sm:$0xff]  }
 0x654   : > { %13111 = vmatpush1.bf16.msra.mxu0 %v17821_v41  ;;  %12948 = vmatprep.subr.bf16.mxu1 %v17826_v43  ;;  %v17887_v41 = vld [vmem:[%s18410_s13 + $0x12e0] ss:$88 sps:$4 sm:$0xff]   ;;  %v17892_v43 = vld [vmem:[%s18410_s13 + $0x1e8c] ss:$88 sps:$4 sm:$0xff]  }
 0x655   : > { %13112 = vmatprep.subr.bf16.mxu0 %v17829_v45  ;;  %12978 = vmatprep.mubr.bf16.mxu1 %v18487_v2  ;;  %v17895_v45 = vld [vmem:[%s18410_s13 + $0x1394] ss:$88 sps:$4 sm:$0xff]  }
 0x656   : > { %13142 = vmatprep.mubr.bf16.mxu0 %v18517_v26  ;;  %v17844_v26 = vld [vmem:[%s18410_s13 + $0x190c] ss:$88 sps:$4 sm:$0xff]  }
 0x657   : > { %12949 = vmatpush1.bf16.msra.mxu1 %v17824_v47  ;;  %v17890_v47 = vld [vmem:[%s18410_s13 + $0x1e88] ss:$88 sps:$4 sm:$0xff]  }
 0x658   : > { %13113 = vmatpush1.bf16.msra.mxu0 %v17827_v49  ;;  %12950 = vmatprep.subr.bf16.mxu1 %v17832_v50  ;;  %v17893_v49 = vld [vmem:[%s18410_s13 + $0x1390] ss:$88 sps:$4 sm:$0xff]   ;;  %v17898_v50 = vld [vmem:[%s18410_s13 + $0x1f3c] ss:$88 sps:$4 sm:$0xff]  }
 0x659   : > { %13114 = vmatprep.subr.bf16.mxu0 %v17835_v52  ;;  %v17901_v52 = vld [vmem:[%s18410_s13 + $0x1444] ss:$88 sps:$4 sm:$0xff]  }
 0x65b   : > { %12951 = vmatpush1.bf16.msra.mxu1 %v17830_v18  ;;  %v17896_v18 = vld [vmem:[%s18410_s13 + $0x1f38] ss:$88 sps:$4 sm:$0xff]  }
 0x65c   : > { %13115 = vmatpush1.bf16.msra.mxu0 %v17833_v53  ;;  %12952 = vmatprep.subr.bf16.mxu1 %v17838_v54  ;;  %v17899_v53 = vld [vmem:[%s18410_s13 + $0x1440] ss:$88 sps:$4 sm:$0xff]   ;;  %v17904_v54 = vld [vmem:[%s18410_s13 + $0x1fec] ss:$88 sps:$4 sm:$0xff]  }
 0x65d   : > { %13116 = vmatprep.subr.bf16.mxu0 %v17841_v55  ;;  %v17907_v55 = vld [vmem:[%s18410_s13 + $0x14f4] ss:$88 sps:$4 sm:$0xff]  }
 0x65f   : > { %12953 = vmatpush1.bf16.msra.mxu1 %v17836_v13  ;;  %v17902_v13 = vld [vmem:[%s18410_s13 + $0x1fe8] ss:$88 sps:$4 sm:$0xff]  }
 0x660   : > { %13117 = vmatpush1.bf16.msra.mxu0 %v17839_v16  ;;  %12954 = vmatprep.subr.bf16.mxu1 %v17844_v26  ;;  %v17905_v16 = vld [vmem:[%s18410_s13 + $0x14f0] ss:$88 sps:$4 sm:$0xff]   ;;  %v17910_v26 = vld [vmem:[%s18410_s13 + $0x209c] ss:$88 sps:$4 sm:$0xff]  }
 0x661   : > { %13118 = vmatprep.subr.bf16.mxu0 %v17847_v30  ;;  %v17913_v30 = vld [vmem:[%s18410_s13 + $0x15a4] ss:$88 sps:$4 sm:$0xff]  }
 0x663   : > { %12955 = vmatpush1.bf16.msra.mxu1 %v17842_v56  ;;  %v17908_v56 = vld [vmem:[%s18410_s13 + $0x2098] ss:$88 sps:$4 sm:$0xff]  }
 0x664   : > { %13119 = vmatpush1.bf16.msra.mxu0 %v17845_v57  ;;  %12956 = vmatprep.subr.bf16.mxu1 %v17850_v58  ;;  %v17911_v57 = vld [vmem:[%s18410_s13 + $0x15a0] ss:$88 sps:$4 sm:$0xff]   ;;  %v17916_v58 = vld [vmem:[%s18410_s13 + $0x214c] ss:$88 sps:$4 sm:$0xff]  }
 0x665   : > { %13120 = vmatprep.subr.bf16.mxu0 %v17853_v59  ;;  %v17919_v59 = vld [vmem:[%s18410_s13 + $0x1654] ss:$88 sps:$4 sm:$0xff]  }
 0x667   : > { %12957 = vmatpush1.bf16.msra.mxu1 %v17848_v3  ;;  %v17914_v3 = vld [vmem:[%s18410_s13 + $0x2148] ss:$88 sps:$4 sm:$0xff]  }
 0x668   : > { %13121 = vmatpush1.bf16.msra.mxu0 %v17851_v5  ;;  %12958 = vmatprep.subr.bf16.mxu1 %v17856_v8  ;;  %v17917_v5 = vld [vmem:[%s18410_s13 + $0x1650] ss:$88 sps:$4 sm:$0xff]   ;;  %v17922_v8 = vld [vmem:[%s18410_s13 + $0x21fc] ss:$88 sps:$4 sm:$0xff]  }
 0x669   : > { %13122 = vmatprep.subr.bf16.mxu0 %v17859_v11  ;;  %v17925_v11 = vld [vmem:[%s18410_s13 + $0x1704] ss:$88 sps:$4 sm:$0xff]  }
 0x66b   : > { %12959 = vmatpush1.bf16.msra.mxu1 %v17854_v25  ;;  %v17920_v25 = vld [vmem:[%s18410_s13 + $0x21f8] ss:$88 sps:$4 sm:$0xff]  }
 0x66c   : > { %13123 = vmatpush1.bf16.msra.mxu0 %v17857_v10  ;;  %12960 = vmatprep.subr.bf16.mxu1 %v17862_v61  ;;  %v17923_v10 = vld [vmem:[%s18410_s13 + $0x1700] ss:$88 sps:$4 sm:$0xff]   ;;  %v17928_v61 = vld [vmem:[%s18410_s13 + $0x22ac] ss:$88 sps:$4 sm:$0xff]  }
 0x66d   : > { %13124 = vmatprep.subr.bf16.mxu0 %v17865_v63  ;;  %v17931_v63 = vld [vmem:[%s18410_s13 + $0x17b4] ss:$88 sps:$4 sm:$0xff]  }
 0x66f   : > { %12961 = vmatpush1.bf16.msra.mxu1 %v17860_v0  ;;  %v17929_v0 = vld [vmem:[%s18410_s13 + $0x17b0] ss:$88 sps:$4 sm:$0xff]  }
 0x670   : > { %13125 = vmatpush1.bf16.msra.mxu0 %v17863_v4  ;;  %12962 = vmatprep.subr.bf16.mxu1 %v17868_v6  ;;  %v17934_v4 = vld [vmem:[%s18410_s13 + $0x235c] ss:$88 sps:$4 sm:$0xff]  }
 0x671   : > { %13126 = vmatprep.subr.bf16.mxu0 %v17871_v7  ;;  %v17937_v6 = vld [vmem:[%s18410_s13 + $0x1864] ss:$88 sps:$4 sm:$0xff]   ;;  %v17932_v7 = vld [vmem:[%s18410_s13 + $0x2358] ss:$88 sps:$4 sm:$0xff]  }
 0x673   : > { %12963 = vmatpush1.bf16.msra.mxu1 %v17866_v9  ;;  %v17935_v9 = vld [vmem:[%s18410_s13 + $0x1860] ss:$88 sps:$4 sm:$0xff]  }
 0x674   : > { %13127 = vmatpush1.bf16.msra.mxu0 %v17869_v12  ;;  %12964 = vmatprep.subr.bf16.mxu1 %v17874_v14  ;;  %v17943_v12 = vld [vmem:[%s18410_s13 + $0x1914] ss:$88 sps:$4 sm:$0xff]   ;;  %v17938_v14 = vld [vmem:[%s18410_s13 + $0x2408] ss:$88 sps:$4 sm:$0xff]  }
 0x675   : > { %13128 = vmatprep.subr.bf16.mxu0 %v17877_v17  ;;  %v17941_v17 = vld [vmem:[%s18410_s13 + $0x1910] ss:$88 sps:$4 sm:$0xff]  }
 0x677   : > { %12965 = vmatpush1.bf16.msra.mxu1 %v17872_v60  ;;  %v17946_v60 = vld [vmem:[%s18410_s13 + $0x24bc] ss:$88 sps:$4 sm:$0xff]  }
 0x678   : > { %13129 = vmatpush1.bf16.msra.mxu0 %v17875_v29  ;;  %12966 = vmatprep.subr.bf16.mxu1 %v17880_v20  ;;  %v17949_v29 = vld [vmem:[%s18410_s13 + $0x19c4] ss:$88 sps:$4 sm:$0xff]  }
 0x679   : > { %13130 = vmatprep.subr.bf16.mxu0 %v17883_v28  ;;  %v18157_v20 = vld [vmem:[%s18416_s8 + $0x8] sm:$0xff] }
 0x67a   : > { %v2168_v28 = vrot.slane %v18157_v20, %v2135_v39 }
 0x67b   : > { %12967 = vmatpush1.bf16.msra.mxu1 %v17878_v35  ;;  %v2172_v35 = vrot.slane %v18157_v20, %v2139_v40  ;;  %v17953_v40 = vld [vmem:[%s18410_s13 + $0x1a70] ss:$88 sps:$4 sm:$0xff]   ;;  %v18009_v20 = vld [vmem:[%s18410_s13 + $0x20a4] ss:$88 sps:$4 sm:$0xff]  }
 0x67c   : > { %13131 = vmatpush1.bf16.msra.mxu0 %v17881_v32  ;;  %12968 = vmatprep.subr.bf16.mxu1 %v17886_v36  ;;  %v17944_v32 = vld [vmem:[%s18410_s13 + $0x24b8] ss:$88 sps:$4 sm:$0xff]  }
 0x67d   : > { %13132 = vmatprep.subr.bf16.mxu0 %v17889_v37  ;;  %v17947_v36 = vld [vmem:[%s18410_s13 + $0x19c0] ss:$88 sps:$4 sm:$0xff]   ;;  %v17952_v37 = vld [vmem:[%s18410_s13 + $0x256c] ss:$88 sps:$4 sm:$0xff]  }
 0x67f   : > { %12969 = vmatpush1.bf16.msra.mxu1 %v17884_v38  ;;  %v17955_v38 = vld [vmem:[%s18410_s13 + $0x1a74] ss:$88 sps:$4 sm:$0xff]  }
 0x680   : > { %13133 = vmatpush1.bf16.msra.mxu0 %v17887_v41  ;;  %12970 = vmatprep.subr.bf16.mxu1 %v17892_v43 }
 0x681   : > { %13134 = vmatprep.subr.bf16.mxu0 %v17895_v45 }
 0x683   : > { %12971 = vmatpush1.bf16.msra.mxu1 %v17890_v47 }
 0x684   : > { %13135 = vmatpush1.bf16.msra.mxu0 %v17893_v49  ;;  %12972 = vmatprep.subr.bf16.mxu1 %v17898_v50  ;;  %v17958_v50 = vld [vmem:[%s18410_s13 + $0x261c] ss:$88 sps:$4 sm:$0xff]  }
 0x685   : > { %13136 = vmatprep.subr.bf16.mxu0 %v17901_v52  ;;  %v17961_v52 = vld [vmem:[%s18410_s13 + $0x1b24] ss:$88 sps:$4 sm:$0xff]  }
 0x687   : > { %12973 = vmatpush1.bf16.msra.mxu1 %v17896_v18 }
 0x688   : > { %13137 = vmatpush1.bf16.msra.mxu0 %v17899_v53  ;;  %12974 = vmatprep.subr.bf16.mxu1 %v17904_v54  ;;  %v13355_v53 = vrot.slane %v13347_v42, %v19205_v44  ;;  %v17970_v42 = vld [vmem:[%s18410_s13 + $0x277c] ss:$88 sps:$4 sm:$0xff]  }
 0x689   : > { %13138 = vmatprep.subr.bf16.mxu0 %v17907_v55  ;;  %v17956_v55 = vld [vmem:[%s18410_s13 + $0x2618] ss:$88 sps:$4 sm:$0xff]  }
 0x68b   : > { %12975 = vmatpush1.bf16.msra.mxu1 %v17902_v13  ;;  %v17959_v13 = vld [vmem:[%s18410_s13 + $0x1b20] ss:$88 sps:$4 sm:$0xff]  }
 0x68c   : > { %13139 = vmatpush1.bf16.msra.mxu0 %v17905_v16  ;;  %12976 = vmatprep.subr.bf16.mxu1 %v17910_v26  ;;  %v17964_v16 = vld [vmem:[%s18410_s13 + $0x26cc] ss:$88 sps:$4 sm:$0xff]  }
 0x68d   : > { %13140 = vmatprep.subr.bf16.mxu0 %v17913_v30  ;;  %v17967_v26 = vld [vmem:[%s18410_s13 + $0x1bd4] ss:$88 sps:$4 sm:$0xff]  }
 0x68f   : > { %12977 = vmatpush1.bf16.msra.mxu1 %v17908_v56  ;;  %v17973_v56 = vld [vmem:[%s18410_s13 + $0x1c84] ss:$88 sps:$4 sm:$0xff]  }
 0x690   : > { %13141 = vmatpush1.bf16.msra.mxu0 %v17911_v57  ;;  %12987 = vmatprep.subr.bf16.mxu1 %v17916_v58  ;;  %v17968_v57 = vld [vmem:[%s18410_s13 + $0x2778] ss:$88 sps:$4 sm:$0xff]  }
 0x691   : > { %13151 = vmatprep.subr.bf16.mxu0 %v17919_v59  ;;  %v17971_v58 = vld [vmem:[%s18410_s13 + $0x1c80] ss:$88 sps:$4 sm:$0xff]   ;;  %v17976_v59 = vld [vmem:[%s18410_s13 + $0x282c] ss:$88 sps:$4 sm:$0xff]  }
 0x692   : > { %12979 = vmatmul.mubr.bf16.vlgmr.msra.gmra.mrb[20].mxu1 %v18505_v19 }
 0x693   : > { %13143 = vmatmul.mubr.bf16.vlgmr.msra.gmra.mrb[20].mxu0 %v18589_v33  ;;  %12988 = vmatpush1.bf16.msra.mxu1 %v17914_v3  ;;  %v17926_v33 = vld [vmem:[%s18410_s13 + $0x22a8] ss:$88 sps:$4 sm:$0xff]   ;;  %v17979_v3 = vld [vmem:[%s18410_s13 + $0x1d34] ss:$88 sps:$4 sm:$0xff]  }
 0x694   : > { %13152 = vmatpush1.bf16.msra.mxu0 %v17917_v5  ;;  %12989 = vmatprep.subr.bf16.mxu1 %v17922_v8  ;;  %v17974_v5 = vld [vmem:[%s18410_s13 + $0x2828] ss:$88 sps:$4 sm:$0xff]  }
 0x695   : > { %13153 = vmatprep.subr.bf16.mxu0 %v17925_v11  ;;  %13019 = vmatprep.mubr.bf16.mxu1 %v18521_v27  ;;  %v17977_v8 = vld [vmem:[%s18410_s13 + $0x1d30] ss:$88 sps:$4 sm:$0xff]   ;;  %v17982_v11 = vld [vmem:[%s18410_s13 + $0x28dc] ss:$88 sps:$4 sm:$0xff]  }
 0x696   : > { %13183 = vmatprep.mubr.bf16.mxu0 %v18487_v2  ;;  %v17940_v2 = vld [vmem:[%s18410_s13 + $0x240c] ss:$88 sps:$4 sm:$0xff]  }
 0x697   : > { %12990 = vmatpush1.bf16.msra.mxu1 %v17920_v25  ;;  %v17985_v25 = vld [vmem:[%s18410_s13 + $0x1de4] ss:$88 sps:$4 sm:$0xff]  }
 0x698   : > { %13154 = vmatpush1.bf16.msra.mxu0 %v17923_v10  ;;  %12991 = vmatprep.subr.bf16.mxu1 %v17928_v61  ;;  %v17980_v10 = vld [vmem:[%s18410_s13 + $0x28d8] ss:$88 sps:$4 sm:$0xff]  }
 0x699   : > { %13155 = vmatprep.subr.bf16.mxu0 %v17931_v63  ;;  %v17983_v61 = vld [vmem:[%s18410_s13 + $0x1de0] ss:$88 sps:$4 sm:$0xff]   ;;  %v17988_v63 = vld [vmem:[%s18410_s13 + $0x298c] ss:$88 sps:$4 sm:$0xff]  }
 0x69b   : > { %12992 = vmatpush1.bf16.msra.mxu1 %v17926_v33  ;;  %v17991_v33 = vld [vmem:[%s18410_s13 + $0x1e94] ss:$88 sps:$4 sm:$0xff]  }
 0x69c   : > { %13156 = vmatpush1.bf16.msra.mxu0 %v17929_v0  ;;  %12993 = vmatprep.subr.bf16.mxu1 %v17934_v4  ;;  %v17986_v0 = vld [vmem:[%s18410_s13 + $0x2988] ss:$88 sps:$4 sm:$0xff]  }
 0x69d   : > { %13157 = vmatprep.subr.bf16.mxu0 %v17937_v6  ;;  %v17989_v4 = vld [vmem:[%s18410_s13 + $0x1e90] ss:$88 sps:$4 sm:$0xff]   ;;  %v17994_v6 = vld [vmem:[%s18410_s13 + $0x2a3c] ss:$88 sps:$4 sm:$0xff]  }
 0x69f   : > { %12994 = vmatpush1.bf16.msra.mxu1 %v17932_v7  ;;  %v17997_v7 = vld [vmem:[%s18410_s13 + $0x1f44] ss:$88 sps:$4 sm:$0xff]  }
 0x6a0   : > { %13158 = vmatpush1.bf16.msra.mxu0 %v17935_v9  ;;  %12995 = vmatprep.subr.bf16.mxu1 %v17940_v2  ;;  %v17992_v9 = vld [vmem:[%s18410_s13 + $0x2a38] ss:$88 sps:$4 sm:$0xff]  }
 0x6a1   : > { %13159 = vmatprep.subr.bf16.mxu0 %v17943_v12  ;;  %v17995_v2 = vld [vmem:[%s18410_s13 + $0x1f40] ss:$88 sps:$4 sm:$0xff]   ;;  %v18000_v12 = vld [vmem:[%s18410_s13 + $0x2aec] ss:$88 sps:$4 sm:$0xff]  }
 0x6a3   : > { %12996 = vmatpush1.bf16.msra.mxu1 %v17938_v14  ;;  %v18003_v14 = vld [vmem:[%s18410_s13 + $0x1ff4] ss:$88 sps:$4 sm:$0xff]  }
 0x6a4   : > { %13160 = vmatpush1.bf16.msra.mxu0 %v17941_v17  ;;  %12997 = vmatprep.subr.bf16.mxu1 %v17946_v60  ;;  %v17998_v17 = vld [vmem:[%s18410_s13 + $0x2ae8] ss:$88 sps:$4 sm:$0xff]  }
 0x6a5   : > { %13161 = vmatprep.subr.bf16.mxu0 %v17949_v29  ;;  %v12652_v41 = vpop.f32.mrb[16].mxu1  ;;  %v18001_v60 = vld [vmem:[%s18410_s13 + $0x1ff0] ss:$88 sps:$4 sm:$0xff]   ;;  %v18006_v29 = vld [vmem:[%s18410_s13 + $0x2b9c] ss:$88 sps:$4 sm:$0xff]  }
 0x6a6   : > { %v15280_v43 = vadd.f32 %v12652_v41, %v2168_v28  ;;  %v12654_v45 = vpop.f32.mrb[17].mxu1  ;;  %v18004_v28 = vld [vmem:[%s18410_s13 + $0x2b98] ss:$88 sps:$4 sm:$0xff]   ;;  %v18018_v41 = vld [vmem:[%s18410_s13 + $0x2cfc] ss:$88 sps:$4 sm:$0xff]  }
 0x6a7   : > { %v15281_v47 = vadd.f32 %v12654_v45, %v2172_v35  ;;  %v12656_v39 = vpop.f32.mrb[18].mxu1  ;;  %12998 = vmatpush1.bf16.msra.mxu1 %v17944_v32  ;;  %v18007_v35 = vld [vmem:[%s18410_s13 + $0x20a0] ss:$88 sps:$4 sm:$0xff]   ;;  %v18012_v32 = vld [vmem:[%s18410_s13 + $0x2c4c] ss:$88 sps:$4 sm:$0xff]  }
 0x6a8   : > { %13162 = vmatpush1.bf16.msra.mxu0 %v17947_v36  ;;  %v12657_v49 = vpop.f32.mrb[19].mxu1  ;;  %12999 = vmatprep.subr.bf16.mxu1 %v17952_v37  ;;  %v18015_v36 = vld [vmem:[%s18410_s13 + $0x2154] ss:$88 sps:$4 sm:$0xff]   ;;  %v18010_v37 = vld [vmem:[%s18410_s13 + $0x2c48] ss:$88 sps:$4 sm:$0xff]  }
 0x6a9   : > { %13163 = vmatprep.subr.bf16.mxu0 %v17955_v38  ;;  %v13348_v18 = vcombine.low %v15280_v43, %v15281_v47  ;;  %v18013_v38 = vld [vmem:[%s18410_s13 + $0x2150] ss:$88 sps:$4 sm:$0xff]   ;;  %v18021_v43 = vld [vmem:[%s18410_s13 + $0x2204] ss:$88 sps:$4 sm:$0xff]   ;;  %v18019_v47 = vld [vmem:[%s18410_s13 + $0x2200] ss:$88 sps:$4 sm:$0xff]  }
 0x6aa   : > { %v18016_v45 = vld [vmem:[%s18410_s13 + $0x2cf8] ss:$88 sps:$4 sm:$0xff]   ;;  %v18024_v39 = vld [vmem:[%s18410_s13 + $0x2dac] ss:$88 sps:$4 sm:$0xff]   ;;  %v18030_v49 = vld [vmem:[%s18410_s13 + $0x2e5c] ss:$88 sps:$4 sm:$0xff]  }
 0x6ab   : > { %v13362_v54 = vrot.slane %v13348_v18, %v19205_v44  ;;  %13000 = vmatpush1.bf16.msra.mxu1 %v17950_v46  ;;  %v18027_v46 = vld [vmem:[%s18410_s13 + $0x22b4] ss:$88 sps:$4 sm:$0xff]   ;;  %v18031_v18 = vld [vmem:[%s18410_s13 + $0x2360] ss:$88 sps:$4 sm:$0xff]  }
 0x6ac   : > { %13164 = vmatpush1.bf16.msra.mxu0 %v17953_v40  ;;  %13001 = vmatprep.subr.bf16.mxu1 %v17958_v50  ;;  %v18025_v40 = vld [vmem:[%s18410_s13 + $0x22b0] ss:$88 sps:$4 sm:$0xff]   ;;  %v18033_v50 = vld [vmem:[%s18410_s13 + $0x2364] ss:$88 sps:$4 sm:$0xff]  }
 0x6ad   : > { %13165 = vmatprep.subr.bf16.mxu0 %v17961_v52  ;;  %v13363_v30 = vcombine.low %v13355_v53, %v13362_v54  ;;  %v18028_v52 = vld [vmem:[%s18410_s13 + $0x2e58] ss:$88 sps:$4 sm:$0xff]   ;;  %v18039_v53 = vld [vmem:[%s18410_s13 + $0x2414] ss:$88 sps:$4 sm:$0xff]   ;;  %v18034_v54 = vld [vmem:[%s18410_s13 + $0x2f08] ss:$88 sps:$4 sm:$0xff]  }
 0x6af   : > { %13398 = vst [vmem:[%s19221_s21 + $0x18] sm:$0xff] %v13363_v30  ;;  %13002 = vmatpush1.bf16.msra.mxu1 %v17956_v55  ;;  %v18037_v55 = vld [vmem:[%s18410_s13 + $0x2410] ss:$88 sps:$4 sm:$0xff]  }
 0x6b0   : > { %13166 = vmatpush1.bf16.msra.mxu0 %v17959_v13  ;;  %13003 = vmatprep.subr.bf16.mxu1 %v17964_v16  ;;  %v20373_v13 = vld [vmem:[%s18416_s8 + $0x10] sm:$0x3f] }
 0x6b1   : > { %13167 = vmatprep.subr.bf16.mxu0 %v17967_v26  ;;  %v18042_v16 = vld [vmem:[%s18410_s13 + $0x2fbc] ss:$88 sps:$4 sm:$0xff]   ;;  %v2176_v30 = vrot.slane %v20373_v13, %v18891_v48 }
 0x6b2   : > { %v18045_v26 = vld [vmem:[%s18410_s13 + $0x24c4] ss:$88 sps:$4 sm:$0xff]  }
 0x6b3   : > { %13004 = vmatpush1.bf16.msra.mxu1 %v17962_v21  ;;  %v2180_v21 = vrot.slane %v20373_v13, %v18896_v51  ;;  %v18046_v51 = vld [vmem:[%s18410_s13 + $0x3068] ss:$88 sps:$4 sm:$0xff]  }
 0x6b4   : > { %13168 = vmatpush1.bf16.msra.mxu0 %v17965_v31  ;;  %13005 = vmatprep.subr.bf16.mxu1 %v17970_v42  ;;  %v18040_v31 = vld [vmem:[%s18410_s13 + $0x2fb8] ss:$88 sps:$4 sm:$0xff]  }
 0x6b5   : > { %13169 = vmatprep.subr.bf16.mxu0 %v17973_v56  ;;  %v18043_v42 = vld [vmem:[%s18410_s13 + $0x24c0] ss:$88 sps:$4 sm:$0xff]   ;;  %v18048_v56 = vld [vmem:[%s18410_s13 + $0x306c] ss:$88 sps:$4 sm:$0xff]  }
 0x6b7   : > { %13006 = vmatpush1.bf16.msra.mxu1 %v17968_v57  ;;  %v18051_v57 = vld [vmem:[%s18410_s13 + $0x2574] ss:$88 sps:$4 sm:$0xff]  }
 0x6b8   : > { %13170 = vmatpush1.bf16.msra.mxu0 %v17971_v58  ;;  %13007 = vmatprep.subr.bf16.mxu1 %v17976_v59 }
 0x6b9   : > { %13171 = vmatprep.subr.bf16.mxu0 %v17979_v3 }
 0x6bb   : > { %13008 = vmatpush1.bf16.msra.mxu1 %v17974_v5 }
 0x6bc   : > { %13172 = vmatpush1.bf16.msra.mxu0 %v17977_v8  ;;  %13009 = vmatprep.subr.bf16.mxu1 %v17982_v11  ;;  %v18049_v8 = vld [vmem:[%s18410_s13 + $0x2570] ss:$88 sps:$4 sm:$0xff]  }
 0x6bd   : > { %13173 = vmatprep.subr.bf16.mxu0 %v17985_v25  ;;  %v18054_v25 = vld [vmem:[%s18410_s13 + $0x311c] ss:$88 sps:$4 sm:$0xff]  }
 0x6bf   : > { %13010 = vmatpush1.bf16.msra.mxu1 %v17980_v10  ;;  %v18057_v10 = vld [vmem:[%s18410_s13 + $0x2624] ss:$88 sps:$4 sm:$0xff]  }
 0x6c0   : > { %13174 = vmatpush1.bf16.msra.mxu0 %v17983_v61  ;;  %13011 = vmatprep.subr.bf16.mxu1 %v17988_v63  ;;  %v18052_v63 = vld [vmem:[%s18410_s13 + $0x3118] ss:$88 sps:$4 sm:$0xff]  }
 0x6c1   : > { %13175 = vmatprep.subr.bf16.mxu0 %v17991_v33  ;;  %v18055_v33 = vld [vmem:[%s18410_s13 + $0x2620] ss:$88 sps:$4 sm:$0xff]  }
 0x6c3   : > { %13012 = vmatpush1.bf16.msra.mxu1 %v17986_v0  ;;  %v18060_v0 = vld [vmem:[%s18410_s13 + $0x31cc] ss:$88 sps:$4 sm:$0xff]  }
 0x6c4   : > { %13176 = vmatpush1.bf16.msra.mxu0 %v17989_v4  ;;  %13013 = vmatprep.subr.bf16.mxu1 %v17994_v6  ;;  %v18063_v4 = vld [vmem:[%s18410_s13 + $0x26d4] ss:$88 sps:$4 sm:$0xff]   ;;  %v18058_v6 = vld [vmem:[%s18410_s13 + $0x31c8] ss:$88 sps:$4 sm:$0xff]  }
 0x6c5   : > { %13177 = vmatprep.subr.bf16.mxu0 %v17997_v7  ;;  %v18061_v7 = vld [vmem:[%s18410_s13 + $0x26d0] ss:$88 sps:$4 sm:$0xff]  }
 0x6c7   : > { %13014 = vmatpush1.bf16.msra.mxu1 %v17992_v9  ;;  %v18066_v9 = vld [vmem:[%s18410_s13 + $0x327c] ss:$88 sps:$4 sm:$0xff]  }
 0x6c8   : > { %13178 = vmatpush1.bf16.msra.mxu0 %v17995_v2  ;;  %13015 = vmatprep.subr.bf16.mxu1 %v18000_v12  ;;  %v18069_v2 = vld [vmem:[%s18410_s13 + $0x2784] ss:$88 sps:$4 sm:$0xff]   ;;  %v18064_v12 = vld [vmem:[%s18410_s13 + $0x3278] ss:$88 sps:$4 sm:$0xff]  }
 0x6c9   : > { %13179 = vmatprep.subr.bf16.mxu0 %v18003_v14  ;;  %v18067_v14 = vld [vmem:[%s18410_s13 + $0x2780] ss:$88 sps:$4 sm:$0xff]  }
 0x6cb   : > { %13016 = vmatpush1.bf16.msra.mxu1 %v17998_v17  ;;  %v18072_v17 = vld [vmem:[%s18410_s13 + $0x332c] ss:$88 sps:$4 sm:$0xff]  }
 0x6cc   : > { %13180 = vmatpush1.bf16.msra.mxu0 %v18001_v60  ;;  %13017 = vmatprep.subr.bf16.mxu1 %v18006_v29  ;;  %v18075_v60 = vld [vmem:[%s18410_s13 + $0x2834] ss:$88 sps:$4 sm:$0xff]   ;;  %v18070_v29 = vld [vmem:[%s18410_s13 + $0x3328] ss:$88 sps:$4 sm:$0xff]  }
 0x6cd   : > { %13181 = vmatprep.subr.bf16.mxu0 %v18009_v20  ;;  %v18073_v20 = vld [vmem:[%s18410_s13 + $0x2830] ss:$88 sps:$4 sm:$0xff]  }
 0x6cf   : > { %13018 = vmatpush1.bf16.msra.mxu1 %v18004_v28  ;;  %v18078_v28 = vld [vmem:[%s18410_s13 + $0x33dc] ss:$88 sps:$4 sm:$0xff]  }
 0x6d0   : > { %13182 = vmatpush1.bf16.msra.mxu0 %v18007_v35  ;;  %13028 = vmatprep.subr.bf16.mxu1 %v18012_v32  ;;  %v18081_v35 = vld [vmem:[%s18410_s13 + $0x28e4] ss:$88 sps:$4 sm:$0xff]   ;;  %v18076_v32 = vld [vmem:[%s18410_s13 + $0x33d8] ss:$88 sps:$4 sm:$0xff]  }
 0x6d1   : > { %13192 = vmatprep.subr.bf16.mxu0 %v18015_v36  ;;  %v18079_v36 = vld [vmem:[%s18410_s13 + $0x28e0] ss:$88 sps:$4 sm:$0xff]  }
 0x6d2   : > { %13020 = vmatmul.mubr.bf16.vlgmr.msra.gmra.mrb[20].mxu1 %v18593_v34 }
 0x6d3   : > { %13184 = vmatmul.mubr.bf16.vlgmr.msra.gmra.mrb[20].mxu0 %v18505_v19  ;;  %13029 = vmatpush1.bf16.msra.mxu1 %v18010_v37  ;;  %v18022_v19 = vld [vmem:[%s18410_s13 + $0x2da8] ss:$88 sps:$4 sm:$0xff]   ;;  %v18084_v37 = vld [vmem:[%s18410_s13 + $0x348c] ss:$88 sps:$4 sm:$0xff]  }
 0x6d4   : > { %13193 = vmatpush1.bf16.msra.mxu0 %v18013_v38  ;;  %13030 = vmatprep.subr.bf16.mxu1 %v18018_v41  ;;  %v18087_v38 = vld [vmem:[%s18410_s13 + $0x2994] ss:$88 sps:$4 sm:$0xff]   ;;  %v18082_v41 = vld [vmem:[%s18410_s13 + $0x3488] ss:$88 sps:$4 sm:$0xff]  }
 0x6d5   : > { %13194 = vmatprep.subr.bf16.mxu0 %v18021_v43  ;;  %13060 = vmatprep.mubr.bf16.mxu1 %v18509_v22  ;;  %v18085_v43 = vld [vmem:[%s18410_s13 + $0x2990] ss:$88 sps:$4 sm:$0xff]  }
 0x6d6   : > { %13224 = vmatprep.mubr.bf16.mxu0 %v18521_v27  ;;  %v18036_v27 = vld [vmem:[%s18410_s13 + $0x2f0c] ss:$88 sps:$4 sm:$0xff]  }
 0x6d7   : > { %13031 = vmatpush1.bf16.msra.mxu1 %v18016_v45  ;;  %v18090_v45 = vld [vmem:[%s18410_s13 + $0x353c] ss:$88 sps:$4 sm:$0xff]  }
 0x6d8   : > { %13195 = vmatpush1.bf16.msra.mxu0 %v18019_v47  ;;  %13032 = vmatprep.subr.bf16.mxu1 %v18024_v39  ;;  %v18093_v47 = vld [vmem:[%s18410_s13 + $0x2a44] ss:$88 sps:$4 sm:$0xff]   ;;  %v18088_v39 = vld [vmem:[%s18410_s13 + $0x3538] ss:$88 sps:$4 sm:$0xff]  }
 0x6d9   : > { %13196 = vmatprep.subr.bf16.mxu0 %v18027_v46  ;;  %v18091_v46 = vld [vmem:[%s18410_s13 + $0x2a40] ss:$88 sps:$4 sm:$0xff]  }
 0x6db   : > { %13033 = vmatpush1.bf16.msra.mxu1 %v18022_v19  ;;  %v18096_v19 = vld [vmem:[%s18410_s13 + $0x35ec] ss:$88 sps:$4 sm:$0xff]  }
 0x6dc   : > { %13197 = vmatpush1.bf16.msra.mxu0 %v18025_v40  ;;  %13034 = vmatprep.subr.bf16.mxu1 %v18030_v49  ;;  %v18099_v40 = vld [vmem:[%s18410_s13 + $0x2af4] ss:$88 sps:$4 sm:$0xff]   ;;  %v18094_v49 = vld [vmem:[%s18410_s13 + $0x35e8] ss:$88 sps:$4 sm:$0xff]  }
 0x6dd   : > { %13198 = vmatprep.subr.bf16.mxu0 %v18033_v50  ;;  %v18097_v50 = vld [vmem:[%s18410_s13 + $0x2af0] ss:$88 sps:$4 sm:$0xff]  }
 0x6df   : > { %13035 = vmatpush1.bf16.msra.mxu1 %v18028_v52  ;;  %v18102_v52 = vld [vmem:[%s18410_s13 + $0x369c] ss:$88 sps:$4 sm:$0xff]  }
 0x6e0   : > { %13199 = vmatpush1.bf16.msra.mxu0 %v18031_v18  ;;  %13036 = vmatprep.subr.bf16.mxu1 %v18036_v27  ;;  %v18105_v18 = vld [vmem:[%s18410_s13 + $0x2ba4] ss:$88 sps:$4 sm:$0xff]   ;;  %v18100_v27 = vld [vmem:[%s18410_s13 + $0x3698] ss:$88 sps:$4 sm:$0xff]  }
 0x6e1   : > { %13200 = vmatprep.subr.bf16.mxu0 %v18039_v53  ;;  %v18103_v53 = vld [vmem:[%s18410_s13 + $0x2ba0] ss:$88 sps:$4 sm:$0xff]  }
 0x6e3   : > { %13037 = vmatpush1.bf16.msra.mxu1 %v18034_v54  ;;  %v18108_v54 = vld [vmem:[%s18410_s13 + $0x2c54] ss:$88 sps:$4 sm:$0xff]  }
 0x6e4   : > { %13201 = vmatpush1.bf16.msra.mxu0 %v18037_v55  ;;  %13038 = vmatprep.subr.bf16.mxu1 %v18042_v16  ;;  %v18106_v55 = vld [vmem:[%s18410_s13 + $0x2c50] ss:$88 sps:$4 sm:$0xff]   ;;  %v18111_v16 = vld [vmem:[%s18410_s13 + $0x2d04] ss:$88 sps:$4 sm:$0xff]  }
 0x6e5   : > { %13202 = vmatprep.subr.bf16.mxu0 %v18045_v26  ;;  %v18109_v26 = vld [vmem:[%s18410_s13 + $0x2d00] ss:$88 sps:$4 sm:$0xff]  }
 0x6e6   : > { %v12857_v58 = vpop.f32.mrb[16].mxu0 }
 0x6e7   : > { %v20385_v59 = vadd.f32 %v12857_v58, %v2176_v30  ;;  %v12859_v48 = vpop.f32.mrb[17].mxu0  ;;  %13039 = vmatpush1.bf16.msra.mxu1 %v18040_v31  ;;  %v18114_v30 = vld [vmem:[%s18410_s13 + $0x2db4] ss:$88 sps:$4 sm:$0xff]   ;;  %v18117_v31 = vld [vmem:[%s18410_s13 + $0x2e64] ss:$88 sps:$4 sm:$0xff]  }
 0x6e8   : > { %v20387_v3 = vadd.f32 %v12859_v48, %v2180_v21  ;;  %v12861_v5 = vpop.f32.mrb[18].mxu0  ;;  %13203 = vmatpush1.bf16.msra.mxu0 %v18043_v42  ;;  %13040 = vmatprep.subr.bf16.mxu1 %v18048_v56  ;;  %v18112_v21 = vld [vmem:[%s18410_s13 + $0x2db0] ss:$88 sps:$4 sm:$0xff]   ;;  %v18115_v42 = vld [vmem:[%s18410_s13 + $0x2e60] ss:$88 sps:$4 sm:$0xff]  }
 0x6e9   : > { %v12862_v11 = vpop.f32.mrb[19].mxu0  ;;  %13204 = vmatprep.subr.bf16.mxu0 %v18051_v57  ;;  %v18118_v56 = vld [vmem:[%s18410_s13 + $0x2f10] ss:$88 sps:$4 sm:$0xff]   ;;  %v18121_v57 = vld [vmem:[%s18410_s13 + $0x2fc0] ss:$88 sps:$4 sm:$0xff]  }
 0x6ea   : > { %v13364_v61 = vcombine.low %v20385_v59, %v20387_v3  ;;  %v18126_v58 = vld [vmem:[%s18410_s13 + $0x3074] ss:$88 sps:$4 sm:$0xff]   ;;  %v18124_v48 = vld [vmem:[%s18410_s13 + $0x3070] ss:$88 sps:$4 sm:$0xff]   ;;  %v18129_v5 = vld [vmem:[%s18410_s13 + $0x3124] ss:$88 sps:$4 sm:$0xff]  }
 0x6eb   : > { %13041 = vmatpush1.bf16.msra.mxu1 %v18046_v51  ;;  %v18127_v51 = vld [vmem:[%s18410_s13 + $0x3120] ss:$88 sps:$4 sm:$0xff]   ;;  %v18130_v11 = vld [vmem:[%s18410_s13 + $0x31d0] ss:$88 sps:$4 sm:$0xff]  }
 0x6ec   : > { %13205 = vmatpush1.bf16.msra.mxu0 %v18049_v8  ;;  %13042 = vmatprep.subr.bf16.mxu1 %v18054_v25  ;;  %v18132_v8 = vld [vmem:[%s18410_s13 + $0x31d4] ss:$88 sps:$4 sm:$0xff]   ;;  %v18135_v25 = vld [vmem:[%s18410_s13 + $0x3284] ss:$88 sps:$4 sm:$0xff]  }
 0x6ed   : > { %13206 = vmatprep.subr.bf16.mxu0 %v18057_v10  ;;  %v18133_v10 = vld [vmem:[%s18410_s13 + $0x3280] ss:$88 sps:$4 sm:$0xff]  }
 0x6ef   : > { %13043 = vmatpush1.bf16.msra.mxu1 %v18052_v63  ;;  %v18138_v63 = vld [vmem:[%s18410_s13 + $0x3334] ss:$88 sps:$4 sm:$0xff]  }
 0x6f0   : > { %13207 = vmatpush1.bf16.msra.mxu0 %v18055_v33  ;;  %13044 = vmatprep.subr.bf16.mxu1 %v18060_v0  ;;  %v18136_v33 = vld [vmem:[%s18410_s13 + $0x3330] ss:$88 sps:$4 sm:$0xff]   ;;  %v18141_v0 = vld [vmem:[%s18410_s13 + $0x33e4] ss:$88 sps:$4 sm:$0xff]  }
 0x6f1   : > { %13208 = vmatprep.subr.bf16.mxu0 %v18063_v4  ;;  %v18139_v4 = vld [vmem:[%s18410_s13 + $0x33e0] ss:$88 sps:$4 sm:$0xff]  }
 0x6f3   : > { %13045 = vmatpush1.bf16.msra.mxu1 %v18058_v6  ;;  %v18144_v6 = vld [vmem:[%s18410_s13 + $0x3494] ss:$88 sps:$4 sm:$0xff]  }
 0x6f4   : > { %13209 = vmatpush1.bf16.msra.mxu0 %v18061_v7  ;;  %13046 = vmatprep.subr.bf16.mxu1 %v18066_v9  ;;  %v18142_v7 = vld [vmem:[%s18410_s13 + $0x3490] ss:$88 sps:$4 sm:$0xff]   ;;  %v18147_v9 = vld [vmem:[%s18410_s13 + $0x3544] ss:$88 sps:$4 sm:$0xff]  }
 0x6f5   : > { %13210 = vmatprep.subr.bf16.mxu0 %v18069_v2  ;;  %v18145_v2 = vld [vmem:[%s18410_s13 + $0x3540] ss:$88 sps:$4 sm:$0xff]  }
 0x6f7   : > { %13047 = vmatpush1.bf16.msra.mxu1 %v18064_v12  ;;  %v18150_v12 = vld [vmem:[%s18410_s13 + $0x35f4] ss:$88 sps:$4 sm:$0xff]  }
 0x6f8   : > { %13211 = vmatpush1.bf16.msra.mxu0 %v18067_v14  ;;  %13048 = vmatprep.subr.bf16.mxu1 %v18072_v17  ;;  %v18148_v14 = vld [vmem:[%s18410_s13 + $0x35f0] ss:$88 sps:$4 sm:$0xff]   ;;  %v18153_v17 = vld [vmem:[%s18410_s13 + $0x36a4] ss:$88 sps:$4 sm:$0xff]  }
 0x6f9   : > { %13212 = vmatprep.subr.bf16.mxu0 %v18075_v60  ;;  %v18151_v60 = vld [vmem:[%s18410_s13 + $0x36a0] ss:$88 sps:$4 sm:$0xff]  }
 0x6fb   : > { %13049 = vmatpush1.bf16.msra.mxu1 %v18070_v29  ;;  %v2184_v29 = vrot.slane %v20373_v13, %v19183_v15  ;;  %v2192_v15 = vrot.slane %v20373_v13, %v19279_v62 }
 0x6fc   : > { %13213 = vmatpush1.bf16.msra.mxu0 %v18073_v20  ;;  %13050 = vmatprep.subr.bf16.mxu1 %v18078_v28  ;;  %v2188_v20 = vrot.slane %v20373_v13, %v19188_v24  ;;  %v2196_v24 = vrot.slane %v20373_v13, %v19284_v1 }
 0x6fd   : > { %13214 = vmatprep.subr.bf16.mxu0 %v18081_v35 }
 0x6ff   : > { %13051 = vmatpush1.bf16.msra.mxu1 %v18076_v32 }
 0x700   : > { %13215 = vmatpush1.bf16.msra.mxu0 %v18079_v36  ;;  %13052 = vmatprep.subr.bf16.mxu1 %v18084_v37 }
 0x701   : > { %13216 = vmatprep.subr.bf16.mxu0 %v18087_v38 }
 0x703   : > { %13053 = vmatpush1.bf16.msra.mxu1 %v18082_v41 }
 0x704   : > { %13217 = vmatpush1.bf16.msra.mxu0 %v18085_v43  ;;  %13054 = vmatprep.subr.bf16.mxu1 %v18090_v45  ;;  %v13372_v43 = vrot.slane %v13364_v61, %v19205_v44 }
 0x705   : > { %13218 = vmatprep.subr.bf16.mxu0 %v18093_v47 }
 0x707   : > { %13055 = vmatpush1.bf16.msra.mxu1 %v18088_v39 }
 0x708   : > { %13219 = vmatpush1.bf16.msra.mxu0 %v18091_v46  ;;  %13056 = vmatprep.subr.bf16.mxu1 %v18096_v19 }
 0x709   : > { %13220 = vmatprep.subr.bf16.mxu0 %v18099_v40 }
 0x70b   : > { %13057 = vmatpush1.bf16.msra.mxu1 %v18094_v49 }
 0x70c   : > { %13221 = vmatpush1.bf16.msra.mxu0 %v18097_v50  ;;  %13058 = vmatprep.subr.bf16.mxu1 %v18102_v52 }
 0x70d   : > { %13222 = vmatprep.subr.bf16.mxu0 %v18105_v18 }
 0x70f   : > { %13059 = vmatpush1.bf16.msra.mxu1 %v18100_v27 }
 0x710   : > { %13223 = vmatpush1.bf16.msra.mxu0 %v18103_v53 }
 0x711   : > { %13233 = vmatprep.subr.bf16.mxu0 %v18108_v54 }
 0x712   : > { %13061 = vmatmul.mubr.bf16.vlgmr.msra.gmra.mrb[20].mxu1 %v18511_v23 }
 0x713   : > { %13225 = vmatmul.mubr.bf16.vlgmr.msra.gmra.mrb[20].mxu0 %v18593_v34  ;;  %v18120_v34 = vld [vmem:[%s18410_s13 + $0x2f14] ss:$88 sps:$4 sm:$0xff]  }
 0x714   : > { %13234 = vmatpush1.bf16.msra.mxu0 %v18106_v55  ;;  %13265 = vmatprep.mubr.bf16.mxu0 %v18509_v22  ;;  %v18123_v22 = vld [vmem:[%s18410_s13 + $0x2fc4] ss:$88 sps:$4 sm:$0xff]  }
 0x715   : > { %13235 = vmatprep.subr.bf16.mxu0 %v18111_v16 }
 0x718   : > { %13236 = vmatpush1.bf16.msra.mxu0 %v18109_v26 }
 0x719   : > { %13237 = vmatprep.subr.bf16.mxu0 %v18114_v30 }
 0x71c   : > { %13238 = vmatpush1.bf16.msra.mxu0 %v18112_v21 }
 0x71d   : > { %13239 = vmatprep.subr.bf16.mxu0 %v18117_v31 }
 0x720   : > { %13240 = vmatpush1.bf16.msra.mxu0 %v18115_v42 }
 0x721   : > { %13241 = vmatprep.subr.bf16.mxu0 %v18120_v34 }
 0x724   : > { %13242 = vmatpush1.bf16.msra.mxu0 %v18118_v56 }
 0x725   : > { %13243 = vmatprep.subr.bf16.mxu0 %v18123_v22 }
 0x728   : > { %13244 = vmatpush1.bf16.msra.mxu0 %v18121_v57 }
 0x729   : > { %13245 = vmatprep.subr.bf16.mxu0 %v18126_v58 }
 0x72c   : > { %13246 = vmatpush1.bf16.msra.mxu0 %v18124_v48 }
 0x72d   : > { %13247 = vmatprep.subr.bf16.mxu0 %v18129_v5 }
 0x730   : > { %13248 = vmatpush1.bf16.msra.mxu0 %v18127_v51 }
 0x731   : > { %13249 = vmatprep.subr.bf16.mxu0 %v18132_v8 }
 0x734   : > { %13250 = vmatpush1.bf16.msra.mxu0 %v18130_v11 }
 0x735   : > { %13251 = vmatprep.subr.bf16.mxu0 %v18135_v25 }
 0x738   : > { %13252 = vmatpush1.bf16.msra.mxu0 %v18133_v10 }
 0x739   : > { %13253 = vmatprep.subr.bf16.mxu0 %v18138_v63 }
 0x73c   : > { %13254 = vmatpush1.bf16.msra.mxu0 %v18136_v33 }
 0x73d   : > { %13255 = vmatprep.subr.bf16.mxu0 %v18141_v0 }
 0x740   : > { %13256 = vmatpush1.bf16.msra.mxu0 %v18139_v4 }
 0x741   : > { %13257 = vmatprep.subr.bf16.mxu0 %v18144_v6 }
 0x744   : > { %13258 = vmatpush1.bf16.msra.mxu0 %v18142_v7 }
 0x745   : > { %13259 = vmatprep.subr.bf16.mxu0 %v18147_v9 }
 0x748   : > { %13260 = vmatpush1.bf16.msra.mxu0 %v18145_v2 }
 0x749   : > { %13261 = vmatprep.subr.bf16.mxu0 %v18150_v12 }
 0x74c   : > { %13262 = vmatpush1.bf16.msra.mxu0 %v18148_v14 }
 0x74d   : > { %13263 = vmatprep.subr.bf16.mxu0 %v18153_v17 }
 0x750   : > { %13264 = vmatpush1.bf16.msra.mxu0 %v18151_v60 }
 0x753   : > { %13266 = vmatmul.mubr.bf16.vlgmr.msra.gmra.mrb[20].mxu0 %v18511_v23 }
 0x7e5   : > { %v13062_v28 = vpop.f32.mrb[20].mxu1 }
 0x7e6   : > { %v15284_v35 = vadd.f32 %v13062_v28, %v2184_v29  ;;  %v13064_v32 = vpop.f32.mrb[21].mxu1 }
 0x7e7   : > { %v15285_v36 = vadd.f32 %v13064_v32, %v2188_v20  ;;  %v13066_v37 = vpop.f32.mrb[22].mxu1 }
 0x7e8   : > { %v13067_v38 = vpop.f32.mrb[23].mxu1 }
 0x7e9   : > { %v13365_v41 = vcombine.low %v15284_v35, %v15285_v36 }
 0x7eb   : > { %v13379_v23 = vrot.slane %v13365_v41, %v19205_v44 }
 0x7ed   : > { %v13380_v45 = vcombine.low %v13372_v43, %v13379_v23 }
 0x7ef   : > { %13399 = vst [vmem:[%s19221_s21 + $0x20] sm:$0xff] %v13380_v45 }
 0x826   : > { %v13267_v47 = vpop.f32.mrb[20].mxu0 }
 0x827   : > { %v15286_v39 = vadd.f32 %v13267_v47, %v2192_v15  ;;  %v13269_v46 = vpop.f32.mrb[21].mxu0 }
 0x828   : > { %v15287_v19 = vadd.f32 %v13269_v46, %v2196_v24  ;;  %v13271_v40 = vpop.f32.mrb[22].mxu0 }
 0x829   : > { %v13272_v49 = vpop.f32.mrb[23].mxu0 }
 0x82a   : > { %v13381_v50 = vcombine.low %v15286_v39, %v15287_v19 }
 0x82c   : > { %15260 = vst.sshfl [vmem:[%s19221_s21 + $0x28] sm:$0x33 pattern:$0x76325410] %v13381_v50 }
 0x82d PF: > { %p17_p8 = scmp.ge.s32.totalorder %s18309_s20, 4   ;;  %s20505_s15 = smov %s18248_s16 }
 0x82e   : > { %s20506_s16 = smov %s18252_s17  ;;  %s20507_s17 = smov %s18319_s23 }
 0x82f   : > { %s20508_s18 = smov %s18309_s20  ;;  %19 = sbr.rel (!%p17_p8) target bundleno = 5 (0x5), region = 89 }
 0x836   :  { %13423 = vsyncpa [#allocation3], 1 }
 0x837   :  { %13425 = vsyncpa [#allocation3 + $0x1], 1 }
 0x838   :  { %13426 = vsyncpa [#allocation5], 1 }
 0x839   :  { %13428 = vsyncpa [#allocation5 + $0x1], 1 }

</bundles_post_ra>
